<compile_context>
chip_gen: v5e
topology: v5e:2x2
jax: 0.10.0
libtpu: 0.0.40
codegen_flags: <defaults>
</compile_context>

<pallas_src>
import functools
import math

import jax
import jax.numpy as jnp
from jax.experimental import pallas as pl
from jax.experimental.pallas import tpu as pltpu


# ------------------------------ in-kernel helpers ------------------------------

def _store_reflect_pad1(pad_ref, act):
    """Write `act` (B, H, W, C) into pad_ref (B, H+2, W+2, C) with
    ReflectionPad2d(1) borders (torch semantics; requires H, W >= 2)."""
    B, H, W, C = act.shape
    pad_ref[:, 1:H + 1, 1:W + 1, :] = act
    # mirror rows (padded row 0 == interior row 1 == padded row 2, etc.)
    pad_ref[:, 0:1, 1:W + 1, :] = pad_ref[:, 2:3, 1:W + 1, :]
    pad_ref[:, H + 1:H + 2, 1:W + 1, :] = pad_ref[:, H - 1:H, 1:W + 1, :]
    # mirror cols over the full padded height (fills the corners correctly)
    pad_ref[:, :, 0:1, :] = pad_ref[:, :, 2:3, :]
    pad_ref[:, :, W + 1:W + 2, :] = pad_ref[:, :, W - 1:W, :]


# ---------------------------------- the kernel ----------------------------------

def recon_fuse_kernel(x_ref, w01_ref, b01_ref, w1_ref, b1_ref,
                      w2_ref, b2_ref, w3_ref, b3_ref, o_ref,
                      pad64_ref, pad32_ref, pad16_ref, *, B, H, W):
    """One batch tile (B images) of the whole network.

    x_ref  : (B, H*W, 18) bf16   layer-0 im2col slab (fused FIR||FVIS, built in wrapper)
    w01    : (18, 64)     bf16   block-diagonal fused FIR||FVIS weight
    w1     : (9, 64, 32)  bf16   FF1, per-tap layout (t = dy*3 + dx)
    w2     : (9, 32, 16)  bf16   FF2
    w3     : (9, 16)      f32    FF3 (per-tap VPU weighted reduction)
    b*     : (1, Cout)/(1, 1) f32
    o_ref  : (B, 1, H*W)  f32    lane-dense output block
    pad*   : (B, H+2, W+2, C) f32 scratch for reflection-padded activations
    """
    HW = H * W
    M = B * HW

    # ---- layer 0: fused FIR || FVIS (one MXU matmul, K = 9*2 = 18) ----
    slab0 = x_ref[...].reshape(M, 18)
    a0 = jnp.dot(slab0, w01_ref[...],
                 preferred_element_type=jnp.float32) + b01_ref[...]
    a0 = jnp.maximum(a0, 0.0)
    _store_reflect_pad1(pad64_ref, a0.reshape(B, H, W, 64))

    # ---- FF1 / FF2: 9 accumulating per-tap MXU matmuls (no im2col concat) ----
    def conv_relu(pad_in_ref, cin, w_ref, b_ref, pad_out_ref, cout):
        acc = jnp.broadcast_to(b_ref[...], (M, cout)).astype(jnp.float32)
        for t in range(9):
            dy, dx = divmod(t, 3)
            tap = pad_in_ref[:, dy:dy + H, dx:dx + W, :]
            tap = tap.reshape(M, cin).astype(jnp.bfloat16)
            acc = acc + jnp.dot(tap, w_ref[t],
                                preferred_element_type=jnp.float32)
        act = jnp.maximum(acc, 0.0)
        _store_reflect_pad1(pad_out_ref, act.reshape(B, H, W, cout))

    conv_relu(pad64_ref, 64, w1_ref, b1_ref, pad32_ref, 32)   # FF1: 64 -> 32
    conv_relu(pad32_ref, 32, w2_ref, b2_ref, pad16_ref, 16)   # FF2: 32 -> 16

    # ---- FF3 (Cout = 1): per-tap VPU FMA + one cross-lane reduce; tanh on EUP ----
    w3 = w3_ref[...]                                           # (9, 16)
    acc16 = jnp.zeros((M, 16), jnp.float32)
    for t in range(9):
        dy, dx = divmod(t, 3)
        tap = pad16_ref[:, dy:dy + H, dx:dx + W, :].reshape(M, 16)
        acc16 = acc16 + tap * w3[t]
    z = jnp.sum(acc16, axis=-1, keepdims=True) + b3_ref[...]   # (M, 1)
    y = jnp.tanh(z) * 0.5 + 0.5                                # tanh(x)/2 + 0.5
    o_ref[...] = y.reshape(B, 1, HW)                           # lane-dense store


# ---------------------------------- wrapper ----------------------------------

def _pick_batch_tile(n, max_tile=8):
    """Largest divisor of n (<= max_tile) that still leaves >= 2 grid steps
    (keeps both v7x TensorCores busy); falls back to 1."""
    best = 1
    for bt in range(1, min(n, max_tile) + 1):
        if n % bt == 0 and n // bt >= 2:
            best = bt
    return best


def recon_fuse_net_pallas(slab0, prepped, N, H, W):
    """slab0: (N, H*W, 18) bf16 layer-0 im2col slab. Returns (N, 1, H*W) f32."""
    HW = H * W
    (w01, b01), (w1, b1), (w2, b2), (w3, b3) = prepped
    B_TILE = _pick_batch_tile(N)

    kernel = functools.partial(recon_fuse_kernel, B=B_TILE, H=H, W=W)
    return pl.pallas_call(
        kernel,
        out_shape=jax.ShapeDtypeStruct((N, 1, HW), jnp.float32),
        grid=(N // B_TILE,),
        in_specs=[
            pl.BlockSpec((B_TILE, HW, 18), lambda n: (n, 0, 0)),
            pl.BlockSpec(w01.shape, lambda n: (0, 0)),
            pl.BlockSpec(b01.shape, lambda n: (0, 0)),
            pl.BlockSpec(w1.shape, lambda n: (0, 0, 0)),
            pl.BlockSpec(b1.shape, lambda n: (0, 0)),
            pl.BlockSpec(w2.shape, lambda n: (0, 0, 0)),
            pl.BlockSpec(b2.shape, lambda n: (0, 0)),
            pl.BlockSpec(w3.shape, lambda n: (0, 0)),
            pl.BlockSpec(b3.shape, lambda n: (0, 0)),
        ],
        out_specs=pl.BlockSpec((B_TILE, 1, HW), lambda n: (n, 0, 0)),
        scratch_shapes=[
            pltpu.VMEM((B_TILE, H + 2, W + 2, 64), jnp.float32),
            pltpu.VMEM((B_TILE, H + 2, W + 2, 32), jnp.float32),
            pltpu.VMEM((B_TILE, H + 2, W + 2, 16), jnp.float32),
        ],
        compiler_params=pltpu.CompilerParams(
            dimension_semantics=("parallel",)),
    )(slab0, w01, b01, w1, b1, w2, b2, w3, b3)


# ----------------------------- params & preparation ---------------------------

def init_conv_params(key, cin, cout):
    """PyTorch-default (kaiming-uniform) init; weight layout (3,3,Cin,Cout)."""
    kw, kb = jax.random.split(key)
    fan_in = cin * 3 * 3
    bound = 1.0 / math.sqrt(fan_in)
    w = jax.random.uniform(kw, (3, 3, cin, cout), jnp.float32, -bound, bound)
    b = jax.random.uniform(kb, (cout,), jnp.float32, -bound, bound)
    return w, b


def init_recon_fuse_net_params(seed=42):
    keys = jax.random.split(jax.random.PRNGKey(seed), 5)
    return {
        "FIR":  init_conv_params(keys[0], 1, 32),
        "FVIS": init_conv_params(keys[1], 1, 32),
        "FF1":  init_conv_params(keys[2], 64, 32),
        "FF2":  init_conv_params(keys[3], 32, 16),
        "FF3":  init_conv_params(keys[4], 16, 1),
    }


def prepare_params(params):
    """One-time repack into kernel layouts / dtypes.
    NOTE: real PyTorch checkpoints store weights as (Cout,Cin,3,3); transpose
    with (2,3,1,0) to the (3,3,Cin,Cout) layout expected here first."""
    w_fir, b_fir = params["FIR"]           # (3,3,1,32), (32,)
    w_vis, b_vis = params["FVIS"]
    # Fused block-diagonal layer-0 weight: in-ch 0 (IR) -> out[:32], 1 (VIS) -> out[32:].
    w01 = jnp.zeros((3, 3, 2, 64), jnp.float32)
    w01 = w01.at[:, :, 0, :32].set(w_fir[:, :, 0, :])
    w01 = w01.at[:, :, 1, 32:].set(w_vis[:, :, 0, :])
    w01 = w01.reshape(18, 64).astype(jnp.bfloat16)
    b01 = jnp.concatenate([b_fir, b_vis]).reshape(1, 64).astype(jnp.float32)

    w1, b1 = params["FF1"]                 # (3,3,64,32)
    w1 = w1.reshape(9, 64, 32).astype(jnp.bfloat16)
    b1 = b1.reshape(1, 32).astype(jnp.float32)

    w2, b2 = params["FF2"]                 # (3,3,32,16)
    w2 = w2.reshape(9, 32, 16).astype(jnp.bfloat16)
    b2 = b2.reshape(1, 16).astype(jnp.float32)

    w3, b3 = params["FF3"]                 # (3,3,16,1), (1,)
    w3 = w3.reshape(9, 16).astype(jnp.float32)   # per-tap rows for the VPU reduction
    b3 = b3.reshape(1, 1).astype(jnp.float32)

    return ((w01, b01), (w1, b1), (w2, b2), (w3, b3))


# ----------------------------------- forward ----------------------------------

def _layer0_im2col_slab(ir_nhwc, vis_nhwc):
    """(N,H,W,1) x2 -> (N, H*W, 18) bf16 reflection-padded im2col slab
    (column order dy, dx, cin with cin = [IR, VIS], matching w01)."""
    N, H, W, _ = ir_nhwc.shape
    x = jnp.concatenate([ir_nhwc, vis_nhwc], axis=-1)           # (N,H,W,2)
    xp = jnp.pad(x, ((0, 0), (1, 1), (1, 1), (0, 0)), mode="reflect")
    cols = [xp[:, dy:dy + H, dx:dx + W, :].reshape(N, H * W, 2)
            for dy in range(3) for dx in range(3)]
    return jnp.concatenate(cols, axis=-1).astype(jnp.bfloat16)  # (N, H*W, 18)


@jax.jit
def recon_fuse_net(rec_ir_nchw, rec_vis_nchw, prepped):
    """Forward pass. Inputs NCHW (N,1,H,W) like PyTorch; output (N,1,H,W)."""
    N, _, H, W = rec_ir_nchw.shape
    ir = jnp.transpose(rec_ir_nchw, (0, 2, 3, 1)).astype(jnp.float32)
    vis = jnp.transpose(rec_vis_nchw, (0, 2, 3, 1)).astype(jnp.float32)
    slab0 = _layer0_im2col_slab(ir, vis)                        # (N, H*W, 18) bf16
    out = recon_fuse_net_pallas(slab0, prepped, N, H, W)        # (N, 1, H*W)
    return out.reshape(N, 1, H, W)


# ------------------------ pure-JAX reference (f32) -----------------------------

def _conv_ref(x_nhwc, w, b, act):
    xp = jnp.pad(x_nhwc, ((0, 0), (1, 1), (1, 1), (0, 0)), mode="reflect")
    y = jax.lax.conv_general_dilated(
        xp, w, (1, 1), "VALID",
        dimension_numbers=("NHWC", "HWIO", "NHWC")) + b
    if act == "relu":
        return jnp.maximum(y, 0.0)
    return jnp.tanh(y) * 0.5 + 0.5


def recon_fuse_net_reference(rec_ir_nchw, rec_vis_nchw, params):
    ir = jnp.transpose(rec_ir_nchw, (0, 2, 3, 1)).astype(jnp.float32)
    vis = jnp.transpose(rec_vis_nchw, (0, 2, 3, 1)).astype(jnp.float32)
    a = _conv_ref(ir, *params["FIR"], "relu")
    b = _conv_ref(vis, *params["FVIS"], "relu")
    c = jnp.concatenate([a, b], axis=-1)
    c = _conv_ref(c, *params["FF1"], "relu")
    c = _conv_ref(c, *params["FF2"], "relu")
    o = _conv_ref(c, *params["FF3"], "tanh")
    return jnp.transpose(o, (0, 3, 1, 2))


# ------------------------------------ main -------------------------------------

if __name__ == "__main__":
    key = jax.random.PRNGKey(0)
    k1, k2 = jax.random.split(key)
    N, H, W = 2, 16, 16
    rec_ir = jax.random.uniform(k1, (N, 1, H, W), jnp.float32)
    rec_vis = jax.random.uniform(k2, (N, 1, H, W), jnp.float32)

    params = init_recon_fuse_net_params(seed=42)
    prepped = prepare_params(params)

    out = recon_fuse_net(rec_ir, rec_vis, prepped)
    jax.block_until_ready(out)

    assert out.shape == (N, 1, H, W), out.shape
    assert bool(jnp.all(jnp.isfinite(out)))
    # output of tanh/2 + 0.5 must lie in [0, 1]
    assert bool(jnp.all(out >= 0.0)) and bool(jnp.all(out <= 1.0))

    # numerics vs. pure-JAX f32 reference (kernel matmul inputs are bf16)
    ref = recon_fuse_net_reference(rec_ir, rec_vis, params)
    max_err = float(jnp.max(jnp.abs(out - ref)))
    assert max_err < 3e-2, f"max |out - ref| = {max_err}"

    print("KERNEL_OK")
</pallas_src>

<mosaic_0001>
module attributes {stable_mosaic.version = 11 : i64} {
  func.func @recon_fuse_kernel(%arg0: i32, %arg1: memref<1x256x18xbf16, #tpu.memory_space<vmem>>, %arg2: memref<18x64xbf16, #tpu.memory_space<vmem>>, %arg3: memref<1x64xf32, #tpu.memory_space<vmem>>, %arg4: memref<9x64x32xbf16, #tpu.memory_space<vmem>>, %arg5: memref<1x32xf32, #tpu.memory_space<vmem>>, %arg6: memref<9x32x16xbf16, #tpu.memory_space<vmem>>, %arg7: memref<1x16xf32, #tpu.memory_space<vmem>>, %arg8: memref<9x16xf32, #tpu.memory_space<vmem>>, %arg9: memref<1x1xf32, #tpu.memory_space<vmem>>, %arg10: memref<1x1x256xf32, #tpu.memory_space<vmem>>, %arg11: memref<1x18x18x64xf32, #tpu.memory_space<vmem>>, %arg12: memref<1x18x18x32xf32, #tpu.memory_space<vmem>>, %arg13: memref<1x18x18x16xf32, #tpu.memory_space<vmem>>) attributes {dimension_semantics = [#tpu.dimension_semantics<parallel>], iteration_bounds = array<i64: 2>, scalar_prefetch = 0 : i64, scratch_operands = 3 : i64, tpu.core_type = #tpu.core_type<tc>, window_params = [{transform_indices = @transform_0, window_bounds = array<i64: 1, 256, 18>}, {pipeline_mode = #tpu.pipeline_mode<synchronous>, transform_indices = @transform_1, window_bounds = array<i64: 18, 64>}, {pipeline_mode = #tpu.pipeline_mode<synchronous>, transform_indices = @transform_2, window_bounds = array<i64: 1, 64>}, {pipeline_mode = #tpu.pipeline_mode<synchronous>, transform_indices = @transform_3, window_bounds = array<i64: 9, 64, 32>}, {pipeline_mode = #tpu.pipeline_mode<synchronous>, transform_indices = @transform_4, window_bounds = array<i64: 1, 32>}, {pipeline_mode = #tpu.pipeline_mode<synchronous>, transform_indices = @transform_5, window_bounds = array<i64: 9, 32, 16>}, {pipeline_mode = #tpu.pipeline_mode<synchronous>, transform_indices = @transform_6, window_bounds = array<i64: 1, 16>}, {pipeline_mode = #tpu.pipeline_mode<synchronous>, transform_indices = @transform_7, window_bounds = array<i64: 9, 16>}, {pipeline_mode = #tpu.pipeline_mode<synchronous>, transform_indices = @transform_8, window_bounds = array<i64: 1, 1>}, {transform_indices = @transform_9, window_bounds = array<i64: 1, 1, 256>}]} {
    %c0 = arith.constant 0 : index
    %c0_0 = arith.constant 0 : index
    %c0_1 = arith.constant 0 : index
    %0 = vector.load %arg1[%c0, %c0_0, %c0_1] : memref<1x256x18xbf16, #tpu.memory_space<vmem>>, vector<1x256x18xbf16>
    %1 = vector.shape_cast %0 : vector<1x256x18xbf16> to vector<256x18xbf16>
    %c0_2 = arith.constant 0 : index
    %c0_3 = arith.constant 0 : index
    %2 = vector.load %arg2[%c0_2, %c0_3] : memref<18x64xbf16, #tpu.memory_space<vmem>>, vector<18x64xbf16>
    %cst = arith.constant dense<0.000000e+00> : vector<256x64xf32>
    %3 = tpu.matmul %1, %2, %cst {dimension_numbers = #tpu.dot_dimension_numbers<[1], [0], [0], [1], [0, 0, 1, 1], [], []>} : vector<256x18xbf16>, vector<18x64xbf16>, vector<256x64xf32> -> vector<256x64xf32>
    %c0_4 = arith.constant 0 : index
    %c0_5 = arith.constant 0 : index
    %4 = vector.load %arg3[%c0_4, %c0_5] : memref<1x64xf32, #tpu.memory_space<vmem>>, vector<1x64xf32>
    %5 = vector.broadcast %4 : vector<1x64xf32> to vector<256x64xf32>
    %6 = arith.addf %3, %5 : vector<256x64xf32>
    %cst_6 = arith.constant 0.000000e+00 : f32
    %7 = vector.broadcast %cst_6 : f32 to vector<256x64xf32>
    %8 = arith.maximumf %6, %7 : vector<256x64xf32>
    %9 = vector.shape_cast %8 : vector<256x64xf32> to vector<1x16x16x64xf32>
    %c0_7 = arith.constant 0 : index
    %c1 = arith.constant 1 : index
    %c1_8 = arith.constant 1 : index
    %c0_9 = arith.constant 0 : index
    %10 = vector.load %arg11[%c0_7, %c1, %c1_8, %c0_9] : memref<1x18x18x64xf32, #tpu.memory_space<vmem>>, vector<1x16x16x64xf32>
    tpu.vector_store %arg11[%c0_7, %c1, %c1_8, %c0_9], %9 {strides = array<i32>} : memref<1x18x18x64xf32, #tpu.memory_space<vmem>>, vector<1x16x16x64xf32>,
    %c0_10 = arith.constant 0 : index
    %c2 = arith.constant 2 : index
    %c1_11 = arith.constant 1 : index
    %c0_12 = arith.constant 0 : index
    %11 = vector.load %arg11[%c0_10, %c2, %c1_11, %c0_12] : memref<1x18x18x64xf32, #tpu.memory_space<vmem>>, vector<1x1x16x64xf32>
    %c0_13 = arith.constant 0 : index
    %c0_14 = arith.constant 0 : index
    %c1_15 = arith.constant 1 : index
    %c0_16 = arith.constant 0 : index
    %12 = vector.load %arg11[%c0_13, %c0_14, %c1_15, %c0_16] : memref<1x18x18x64xf32, #tpu.memory_space<vmem>>, vector<1x1x16x64xf32>
    tpu.vector_store %arg11[%c0_13, %c0_14, %c1_15, %c0_16], %11 {strides = array<i32>} : memref<1x18x18x64xf32, #tpu.memory_space<vmem>>, vector<1x1x16x64xf32>,
    %c0_17 = arith.constant 0 : index
    %c15 = arith.constant 15 : index
    %c1_18 = arith.constant 1 : index
    %c0_19 = arith.constant 0 : index
    %13 = vector.load %arg11[%c0_17, %c15, %c1_18, %c0_19] : memref<1x18x18x64xf32, #tpu.memory_space<vmem>>, vector<1x1x16x64xf32>
    %c0_20 = arith.constant 0 : index
    %c17 = arith.constant 17 : index
    %c1_21 = arith.constant 1 : index
    %c0_22 = arith.constant 0 : index
    %14 = vector.load %arg11[%c0_20, %c17, %c1_21, %c0_22] : memref<1x18x18x64xf32, #tpu.memory_space<vmem>>, vector<1x1x16x64xf32>
    tpu.vector_store %arg11[%c0_20, %c17, %c1_21, %c0_22], %13 {strides = array<i32>} : memref<1x18x18x64xf32, #tpu.memory_space<vmem>>, vector<1x1x16x64xf32>,
    %c0_23 = arith.constant 0 : index
    %c0_24 = arith.constant 0 : index
    %c2_25 = arith.constant 2 : index
    %c0_26 = arith.constant 0 : index
    %15 = vector.load %arg11[%c0_23, %c0_24, %c2_25, %c0_26] : memref<1x18x18x64xf32, #tpu.memory_space<vmem>>, vector<1x18x1x64xf32>
    %c0_27 = arith.constant 0 : index
    %c0_28 = arith.constant 0 : index
    %c0_29 = arith.constant 0 : index
    %c0_30 = arith.constant 0 : index
    %16 = vector.load %arg11[%c0_27, %c0_28, %c0_29, %c0_30] : memref<1x18x18x64xf32, #tpu.memory_space<vmem>>, vector<1x18x1x64xf32>
    tpu.vector_store %arg11[%c0_27, %c0_28, %c0_29, %c0_30], %15 {strides = array<i32>} : memref<1x18x18x64xf32, #tpu.memory_space<vmem>>, vector<1x18x1x64xf32>,
    %c0_31 = arith.constant 0 : index
    %c0_32 = arith.constant 0 : index
    %c15_33 = arith.constant 15 : index
    %c0_34 = arith.constant 0 : index
    %17 = vector.load %arg11[%c0_31, %c0_32, %c15_33, %c0_34] : memref<1x18x18x64xf32, #tpu.memory_space<vmem>>, vector<1x18x1x64xf32>
    %c0_35 = arith.constant 0 : index
    %c0_36 = arith.constant 0 : index
    %c17_37 = arith.constant 17 : index
    %c0_38 = arith.constant 0 : index
    %18 = vector.load %arg11[%c0_35, %c0_36, %c17_37, %c0_38] : memref<1x18x18x64xf32, #tpu.memory_space<vmem>>, vector<1x18x1x64xf32>
    tpu.vector_store %arg11[%c0_35, %c0_36, %c17_37, %c0_38], %17 {strides = array<i32>} : memref<1x18x18x64xf32, #tpu.memory_space<vmem>>, vector<1x18x1x64xf32>,
    %c0_39 = arith.constant 0 : index
    %c0_40 = arith.constant 0 : index
    %19 = vector.load %arg5[%c0_39, %c0_40] : memref<1x32xf32, #tpu.memory_space<vmem>>, vector<1x32xf32>
    %20 = vector.shape_cast %19 : vector<1x32xf32> to vector<1x32xf32>
    %21 = vector.broadcast %20 : vector<1x32xf32> to vector<256x32xf32>
    %c0_41 = arith.constant 0 : index
    %c0_42 = arith.constant 0 : index
    %c0_43 = arith.constant 0 : index
    %c0_44 = arith.constant 0 : index
    %22 = vector.load %arg11[%c0_41, %c0_42, %c0_43, %c0_44] : memref<1x18x18x64xf32, #tpu.memory_space<vmem>>, vector<1x16x16x64xf32>
    %23 = vector.shape_cast %22 : vector<1x16x16x64xf32> to vector<256x64xf32>
    %24 = arith.truncf %23 : vector<256x64xf32> to vector<256x64xbf16>
    %c0_45 = arith.constant 0 : index
    %c0_46 = arith.constant 0 : index
    %c0_47 = arith.constant 0 : index
    %25 = vector.load %arg4[%c0_45, %c0_46, %c0_47] : memref<9x64x32xbf16, #tpu.memory_space<vmem>>, vector<1x64x32xbf16>
    %26 = vector.shape_cast %25 : vector<1x64x32xbf16> to vector<64x32xbf16>
    %cst_48 = arith.constant dense<0.000000e+00> : vector<256x32xf32>
    %27 = tpu.matmul %24, %26, %cst_48 {dimension_numbers = #tpu.dot_dimension_numbers<[1], [0], [0], [1], [0, 0, 1, 1], [], []>} : vector<256x64xbf16>, vector<64x32xbf16>, vector<256x32xf32> -> vector<256x32xf32>
    %28 = arith.addf %21, %27 : vector<256x32xf32>
    %c0_49 = arith.constant 0 : index
    %c0_50 = arith.constant 0 : index
    %c1_51 = arith.constant 1 : index
    %c0_52 = arith.constant 0 : index
    %29 = vector.load %arg11[%c0_49, %c0_50, %c1_51, %c0_52] : memref<1x18x18x64xf32, #tpu.memory_space<vmem>>, vector<1x16x16x64xf32>
    %30 = vector.shape_cast %29 : vector<1x16x16x64xf32> to vector<256x64xf32>
    %31 = arith.truncf %30 : vector<256x64xf32> to vector<256x64xbf16>
    %c1_53 = arith.constant 1 : index
    %c0_54 = arith.constant 0 : index
    %c0_55 = arith.constant 0 : index
    %32 = vector.load %arg4[%c1_53, %c0_54, %c0_55] : memref<9x64x32xbf16, #tpu.memory_space<vmem>>, vector<1x64x32xbf16>
    %33 = vector.shape_cast %32 : vector<1x64x32xbf16> to vector<64x32xbf16>
    %cst_56 = arith.constant dense<0.000000e+00> : vector<256x32xf32>
    %34 = tpu.matmul %31, %33, %cst_56 {dimension_numbers = #tpu.dot_dimension_numbers<[1], [0], [0], [1], [0, 0, 1, 1], [], []>} : vector<256x64xbf16>, vector<64x32xbf16>, vector<256x32xf32> -> vector<256x32xf32>
    %35 = arith.addf %28, %34 : vector<256x32xf32>
    %c0_57 = arith.constant 0 : index
    %c0_58 = arith.constant 0 : index
    %c2_59 = arith.constant 2 : index
    %c0_60 = arith.constant 0 : index
    %36 = vector.load %arg11[%c0_57, %c0_58, %c2_59, %c0_60] : memref<1x18x18x64xf32, #tpu.memory_space<vmem>>, vector<1x16x16x64xf32>
    %37 = vector.shape_cast %36 : vector<1x16x16x64xf32> to vector<256x64xf32>
    %38 = arith.truncf %37 : vector<256x64xf32> to vector<256x64xbf16>
    %c2_61 = arith.constant 2 : index
    %c0_62 = arith.constant 0 : index
    %c0_63 = arith.constant 0 : index
    %39 = vector.load %arg4[%c2_61, %c0_62, %c0_63] : memref<9x64x32xbf16, #tpu.memory_space<vmem>>, vector<1x64x32xbf16>
    %40 = vector.shape_cast %39 : vector<1x64x32xbf16> to vector<64x32xbf16>
    %cst_64 = arith.constant dense<0.000000e+00> : vector<256x32xf32>
    %41 = tpu.matmul %38, %40, %cst_64 {dimension_numbers = #tpu.dot_dimension_numbers<[1], [0], [0], [1], [0, 0, 1, 1], [], []>} : vector<256x64xbf16>, vector<64x32xbf16>, vector<256x32xf32> -> vector<256x32xf32>
    %42 = arith.addf %35, %41 : vector<256x32xf32>
    %c0_65 = arith.constant 0 : index
    %c1_66 = arith.constant 1 : index
    %c0_67 = arith.constant 0 : index
    %c0_68 = arith.constant 0 : index
    %43 = vector.load %arg11[%c0_65, %c1_66, %c0_67, %c0_68] : memref<1x18x18x64xf32, #tpu.memory_space<vmem>>, vector<1x16x16x64xf32>
    %44 = vector.shape_cast %43 : vector<1x16x16x64xf32> to vector<256x64xf32>
    %45 = arith.truncf %44 : vector<256x64xf32> to vector<256x64xbf16>
    %c3 = arith.constant 3 : index
    %c0_69 = arith.constant 0 : index
    %c0_70 = arith.constant 0 : index
    %46 = vector.load %arg4[%c3, %c0_69, %c0_70] : memref<9x64x32xbf16, #tpu.memory_space<vmem>>, vector<1x64x32xbf16>
    %47 = vector.shape_cast %46 : vector<1x64x32xbf16> to vector<64x32xbf16>
    %cst_71 = arith.constant dense<0.000000e+00> : vector<256x32xf32>
    %48 = tpu.matmul %45, %47, %cst_71 {dimension_numbers = #tpu.dot_dimension_numbers<[1], [0], [0], [1], [0, 0, 1, 1], [], []>} : vector<256x64xbf16>, vector<64x32xbf16>, vector<256x32xf32> -> vector<256x32xf32>
    %49 = arith.addf %42, %48 : vector<256x32xf32>
    %c0_72 = arith.constant 0 : index
    %c1_73 = arith.constant 1 : index
    %c1_74 = arith.constant 1 : index
    %c0_75 = arith.constant 0 : index
    %50 = vector.load %arg11[%c0_72, %c1_73, %c1_74, %c0_75] : memref<1x18x18x64xf32, #tpu.memory_space<vmem>>, vector<1x16x16x64xf32>
    %51 = vector.shape_cast %50 : vector<1x16x16x64xf32> to vector<256x64xf32>
    %52 = arith.truncf %51 : vector<256x64xf32> to vector<256x64xbf16>
    %c4 = arith.constant 4 : index
    %c0_76 = arith.constant 0 : index
    %c0_77 = arith.constant 0 : index
    %53 = vector.load %arg4[%c4, %c0_76, %c0_77] : memref<9x64x32xbf16, #tpu.memory_space<vmem>>, vector<1x64x32xbf16>
    %54 = vector.shape_cast %53 : vector<1x64x32xbf16> to vector<64x32xbf16>
    %cst_78 = arith.constant dense<0.000000e+00> : vector<256x32xf32>
    %55 = tpu.matmul %52, %54, %cst_78 {dimension_numbers = #tpu.dot_dimension_numbers<[1], [0], [0], [1], [0, 0, 1, 1], [], []>} : vector<256x64xbf16>, vector<64x32xbf16>, vector<256x32xf32> -> vector<256x32xf32>
    %56 = arith.addf %49, %55 : vector<256x32xf32>
    %c0_79 = arith.constant 0 : index
    %c1_80 = arith.constant 1 : index
    %c2_81 = arith.constant 2 : index
    %c0_82 = arith.constant 0 : index
    %57 = vector.load %arg11[%c0_79, %c1_80, %c2_81, %c0_82] : memref<1x18x18x64xf32, #tpu.memory_space<vmem>>, vector<1x16x16x64xf32>
    %58 = vector.shape_cast %57 : vector<1x16x16x64xf32> to vector<256x64xf32>
    %59 = arith.truncf %58 : vector<256x64xf32> to vector<256x64xbf16>
    %c5 = arith.constant 5 : index
    %c0_83 = arith.constant 0 : index
    %c0_84 = arith.constant 0 : index
    %60 = vector.load %arg4[%c5, %c0_83, %c0_84] : memref<9x64x32xbf16, #tpu.memory_space<vmem>>, vector<1x64x32xbf16>
    %61 = vector.shape_cast %60 : vector<1x64x32xbf16> to vector<64x32xbf16>
    %cst_85 = arith.constant dense<0.000000e+00> : vector<256x32xf32>
    %62 = tpu.matmul %59, %61, %cst_85 {dimension_numbers = #tpu.dot_dimension_numbers<[1], [0], [0], [1], [0, 0, 1, 1], [], []>} : vector<256x64xbf16>, vector<64x32xbf16>, vector<256x32xf32> -> vector<256x32xf32>
    %63 = arith.addf %56, %62 : vector<256x32xf32>
    %c0_86 = arith.constant 0 : index
    %c2_87 = arith.constant 2 : index
    %c0_88 = arith.constant 0 : index
    %c0_89 = arith.constant 0 : index
    %64 = vector.load %arg11[%c0_86, %c2_87, %c0_88, %c0_89] : memref<1x18x18x64xf32, #tpu.memory_space<vmem>>, vector<1x16x16x64xf32>
    %65 = vector.shape_cast %64 : vector<1x16x16x64xf32> to vector<256x64xf32>
    %66 = arith.truncf %65 : vector<256x64xf32> to vector<256x64xbf16>
    %c6 = arith.constant 6 : index
    %c0_90 = arith.constant 0 : index
    %c0_91 = arith.constant 0 : index
    %67 = vector.load %arg4[%c6, %c0_90, %c0_91] : memref<9x64x32xbf16, #tpu.memory_space<vmem>>, vector<1x64x32xbf16>
    %68 = vector.shape_cast %67 : vector<1x64x32xbf16> to vector<64x32xbf16>
    %cst_92 = arith.constant dense<0.000000e+00> : vector<256x32xf32>
    %69 = tpu.matmul %66, %68, %cst_92 {dimension_numbers = #tpu.dot_dimension_numbers<[1], [0], [0], [1], [0, 0, 1, 1], [], []>} : vector<256x64xbf16>, vector<64x32xbf16>, vector<256x32xf32> -> vector<256x32xf32>
    %70 = arith.addf %63, %69 : vector<256x32xf32>
    %c0_93 = arith.constant 0 : index
    %c2_94 = arith.constant 2 : index
    %c1_95 = arith.constant 1 : index
    %c0_96 = arith.constant 0 : index
    %71 = vector.load %arg11[%c0_93, %c2_94, %c1_95, %c0_96] : memref<1x18x18x64xf32, #tpu.memory_space<vmem>>, vector<1x16x16x64xf32>
    %72 = vector.shape_cast %71 : vector<1x16x16x64xf32> to vector<256x64xf32>
    %73 = arith.truncf %72 : vector<256x64xf32> to vector<256x64xbf16>
    %c7 = arith.constant 7 : index
    %c0_97 = arith.constant 0 : index
    %c0_98 = arith.constant 0 : index
    %74 = vector.load %arg4[%c7, %c0_97, %c0_98] : memref<9x64x32xbf16, #tpu.memory_space<vmem>>, vector<1x64x32xbf16>
    %75 = vector.shape_cast %74 : vector<1x64x32xbf16> to vector<64x32xbf16>
    %cst_99 = arith.constant dense<0.000000e+00> : vector<256x32xf32>
    %76 = tpu.matmul %73, %75, %cst_99 {dimension_numbers = #tpu.dot_dimension_numbers<[1], [0], [0], [1], [0, 0, 1, 1], [], []>} : vector<256x64xbf16>, vector<64x32xbf16>, vector<256x32xf32> -> vector<256x32xf32>
    %77 = arith.addf %70, %76 : vector<256x32xf32>
    %c0_100 = arith.constant 0 : index
    %c2_101 = arith.constant 2 : index
    %c2_102 = arith.constant 2 : index
    %c0_103 = arith.constant 0 : index
    %78 = vector.load %arg11[%c0_100, %c2_101, %c2_102, %c0_103] : memref<1x18x18x64xf32, #tpu.memory_space<vmem>>, vector<1x16x16x64xf32>
    %79 = vector.shape_cast %78 : vector<1x16x16x64xf32> to vector<256x64xf32>
    %80 = arith.truncf %79 : vector<256x64xf32> to vector<256x64xbf16>
    %c8 = arith.constant 8 : index
    %c0_104 = arith.constant 0 : index
    %c0_105 = arith.constant 0 : index
    %81 = vector.load %arg4[%c8, %c0_104, %c0_105] : memref<9x64x32xbf16, #tpu.memory_space<vmem>>, vector<1x64x32xbf16>
    %82 = vector.shape_cast %81 : vector<1x64x32xbf16> to vector<64x32xbf16>
    %cst_106 = arith.constant dense<0.000000e+00> : vector<256x32xf32>
    %83 = tpu.matmul %80, %82, %cst_106 {dimension_numbers = #tpu.dot_dimension_numbers<[1], [0], [0], [1], [0, 0, 1, 1], [], []>} : vector<256x64xbf16>, vector<64x32xbf16>, vector<256x32xf32> -> vector<256x32xf32>
    %84 = arith.addf %77, %83 : vector<256x32xf32>
    %cst_107 = arith.constant 0.000000e+00 : f32
    %85 = vector.broadcast %cst_107 : f32 to vector<256x32xf32>
    %86 = arith.maximumf %84, %85 : vector<256x32xf32>
    %87 = vector.shape_cast %86 : vector<256x32xf32> to vector<1x16x16x32xf32>
    %c0_108 = arith.constant 0 : index
    %c1_109 = arith.constant 1 : index
    %c1_110 = arith.constant 1 : index
    %c0_111 = arith.constant 0 : index
    %88 = vector.load %arg12[%c0_108, %c1_109, %c1_110, %c0_111] : memref<1x18x18x32xf32, #tpu.memory_space<vmem>>, vector<1x16x16x32xf32>
    tpu.vector_store %arg12[%c0_108, %c1_109, %c1_110, %c0_111], %87 {strides = array<i32>} : memref<1x18x18x32xf32, #tpu.memory_space<vmem>>, vector<1x16x16x32xf32>,
    %c0_112 = arith.constant 0 : index
    %c2_113 = arith.constant 2 : index
    %c1_114 = arith.constant 1 : index
    %c0_115 = arith.constant 0 : index
    %89 = vector.load %arg12[%c0_112, %c2_113, %c1_114, %c0_115] : memref<1x18x18x32xf32, #tpu.memory_space<vmem>>, vector<1x1x16x32xf32>
    %c0_116 = arith.constant 0 : index
    %c0_117 = arith.constant 0 : index
    %c1_118 = arith.constant 1 : index
    %c0_119 = arith.constant 0 : index
    %90 = vector.load %arg12[%c0_116, %c0_117, %c1_118, %c0_119] : memref<1x18x18x32xf32, #tpu.memory_space<vmem>>, vector<1x1x16x32xf32>
    tpu.vector_store %arg12[%c0_116, %c0_117, %c1_118, %c0_119], %89 {strides = array<i32>} : memref<1x18x18x32xf32, #tpu.memory_space<vmem>>, vector<1x1x16x32xf32>,
    %c0_120 = arith.constant 0 : index
    %c15_121 = arith.constant 15 : index
    %c1_122 = arith.constant 1 : index
    %c0_123 = arith.constant 0 : index
    %91 = vector.load %arg12[%c0_120, %c15_121, %c1_122, %c0_123] : memref<1x18x18x32xf32, #tpu.memory_space<vmem>>, vector<1x1x16x32xf32>
    %c0_124 = arith.constant 0 : index
    %c17_125 = arith.constant 17 : index
    %c1_126 = arith.constant 1 : index
    %c0_127 = arith.constant 0 : index
    %92 = vector.load %arg12[%c0_124, %c17_125, %c1_126, %c0_127] : memref<1x18x18x32xf32, #tpu.memory_space<vmem>>, vector<1x1x16x32xf32>
    tpu.vector_store %arg12[%c0_124, %c17_125, %c1_126, %c0_127], %91 {strides = array<i32>} : memref<1x18x18x32xf32, #tpu.memory_space<vmem>>, vector<1x1x16x32xf32>,
    %c0_128 = arith.constant 0 : index
    %c0_129 = arith.constant 0 : index
    %c2_130 = arith.constant 2 : index
    %c0_131 = arith.constant 0 : index
    %93 = vector.load %arg12[%c0_128, %c0_129, %c2_130, %c0_131] : memref<1x18x18x32xf32, #tpu.memory_space<vmem>>, vector<1x18x1x32xf32>
    %c0_132 = arith.constant 0 : index
    %c0_133 = arith.constant 0 : index
    %c0_134 = arith.constant 0 : index
    %c0_135 = arith.constant 0 : index
    %94 = vector.load %arg12[%c0_132, %c0_133, %c0_134, %c0_135] : memref<1x18x18x32xf32, #tpu.memory_space<vmem>>, vector<1x18x1x32xf32>
    tpu.vector_store %arg12[%c0_132, %c0_133, %c0_134, %c0_135], %93 {strides = array<i32>} : memref<1x18x18x32xf32, #tpu.memory_space<vmem>>, vector<1x18x1x32xf32>,
    %c0_136 = arith.constant 0 : index
    %c0_137 = arith.constant 0 : index
    %c15_138 = arith.constant 15 : index
    %c0_139 = arith.constant 0 : index
    %95 = vector.load %arg12[%c0_136, %c0_137, %c15_138, %c0_139] : memref<1x18x18x32xf32, #tpu.memory_space<vmem>>, vector<1x18x1x32xf32>
    %c0_140 = arith.constant 0 : index
    %c0_141 = arith.constant 0 : index
    %c17_142 = arith.constant 17 : index
    %c0_143 = arith.constant 0 : index
    %96 = vector.load %arg12[%c0_140, %c0_141, %c17_142, %c0_143] : memref<1x18x18x32xf32, #tpu.memory_space<vmem>>, vector<1x18x1x32xf32>
    tpu.vector_store %arg12[%c0_140, %c0_141, %c17_142, %c0_143], %95 {strides = array<i32>} : memref<1x18x18x32xf32, #tpu.memory_space<vmem>>, vector<1x18x1x32xf32>,
    %c0_144 = arith.constant 0 : index
    %c0_145 = arith.constant 0 : index
    %97 = vector.load %arg7[%c0_144, %c0_145] : memref<1x16xf32, #tpu.memory_space<vmem>>, vector<1x16xf32>
    %98 = vector.shape_cast %97 : vector<1x16xf32> to vector<1x16xf32>
    %99 = vector.broadcast %98 : vector<1x16xf32> to vector<256x16xf32>
    %c0_146 = arith.constant 0 : index
    %c0_147 = arith.constant 0 : index
    %c0_148 = arith.constant 0 : index
    %c0_149 = arith.constant 0 : index
    %100 = vector.load %arg12[%c0_146, %c0_147, %c0_148, %c0_149] : memref<1x18x18x32xf32, #tpu.memory_space<vmem>>, vector<1x16x16x32xf32>
    %101 = vector.shape_cast %100 : vector<1x16x16x32xf32> to vector<256x32xf32>
    %102 = arith.truncf %101 : vector<256x32xf32> to vector<256x32xbf16>
    %c0_150 = arith.constant 0 : index
    %c0_151 = arith.constant 0 : index
    %c0_152 = arith.constant 0 : index
    %103 = vector.load %arg6[%c0_150, %c0_151, %c0_152] : memref<9x32x16xbf16, #tpu.memory_space<vmem>>, vector<1x32x16xbf16>
    %104 = vector.shape_cast %103 : vector<1x32x16xbf16> to vector<32x16xbf16>
    %cst_153 = arith.constant dense<0.000000e+00> : vector<256x16xf32>
    %105 = tpu.matmul %102, %104, %cst_153 {dimension_numbers = #tpu.dot_dimension_numbers<[1], [0], [0], [1], [0, 0, 1, 1], [], []>} : vector<256x32xbf16>, vector<32x16xbf16>, vector<256x16xf32> -> vector<256x16xf32>
    %106 = arith.addf %99, %105 : vector<256x16xf32>
    %c0_154 = arith.constant 0 : index
    %c0_155 = arith.constant 0 : index
    %c1_156 = arith.constant 1 : index
    %c0_157 = arith.constant 0 : index
    %107 = vector.load %arg12[%c0_154, %c0_155, %c1_156, %c0_157] : memref<1x18x18x32xf32, #tpu.memory_space<vmem>>, vector<1x16x16x32xf32>
    %108 = vector.shape_cast %107 : vector<1x16x16x32xf32> to vector<256x32xf32>
    %109 = arith.truncf %108 : vector<256x32xf32> to vector<256x32xbf16>
    %c1_158 = arith.constant 1 : index
    %c0_159 = arith.constant 0 : index
    %c0_160 = arith.constant 0 : index
    %110 = vector.load %arg6[%c1_158, %c0_159, %c0_160] : memref<9x32x16xbf16, #tpu.memory_space<vmem>>, vector<1x32x16xbf16>
    %111 = vector.shape_cast %110 : vector<1x32x16xbf16> to vector<32x16xbf16>
    %cst_161 = arith.constant dense<0.000000e+00> : vector<256x16xf32>
    %112 = tpu.matmul %109, %111, %cst_161 {dimension_numbers = #tpu.dot_dimension_numbers<[1], [0], [0], [1], [0, 0, 1, 1], [], []>} : vector<256x32xbf16>, vector<32x16xbf16>, vector<256x16xf32> -> vector<256x16xf32>
    %113 = arith.addf %106, %112 : vector<256x16xf32>
    %c0_162 = arith.constant 0 : index
    %c0_163 = arith.constant 0 : index
    %c2_164 = arith.constant 2 : index
    %c0_165 = arith.constant 0 : index
    %114 = vector.load %arg12[%c0_162, %c0_163, %c2_164, %c0_165] : memref<1x18x18x32xf32, #tpu.memory_space<vmem>>, vector<1x16x16x32xf32>
    %115 = vector.shape_cast %114 : vector<1x16x16x32xf32> to vector<256x32xf32>
    %116 = arith.truncf %115 : vector<256x32xf32> to vector<256x32xbf16>
    %c2_166 = arith.constant 2 : index
    %c0_167 = arith.constant 0 : index
    %c0_168 = arith.constant 0 : index
    %117 = vector.load %arg6[%c2_166, %c0_167, %c0_168] : memref<9x32x16xbf16, #tpu.memory_space<vmem>>, vector<1x32x16xbf16>
    %118 = vector.shape_cast %117 : vector<1x32x16xbf16> to vector<32x16xbf16>
    %cst_169 = arith.constant dense<0.000000e+00> : vector<256x16xf32>
    %119 = tpu.matmul %116, %118, %cst_169 {dimension_numbers = #tpu.dot_dimension_numbers<[1], [0], [0], [1], [0, 0, 1, 1], [], []>} : vector<256x32xbf16>, vector<32x16xbf16>, vector<256x16xf32> -> vector<256x16xf32>
    %120 = arith.addf %113, %119 : vector<256x16xf32>
    %c0_170 = arith.constant 0 : index
    %c1_171 = arith.constant 1 : index
    %c0_172 = arith.constant 0 : index
    %c0_173 = arith.constant 0 : index
    %121 = vector.load %arg12[%c0_170, %c1_171, %c0_172, %c0_173] : memref<1x18x18x32xf32, #tpu.memory_space<vmem>>, vector<1x16x16x32xf32>
    %122 = vector.shape_cast %121 : vector<1x16x16x32xf32> to vector<256x32xf32>
    %123 = arith.truncf %122 : vector<256x32xf32> to vector<256x32xbf16>
    %c3_174 = arith.constant 3 : index
    %c0_175 = arith.constant 0 : index
    %c0_176 = arith.constant 0 : index
    %124 = vector.load %arg6[%c3_174, %c0_175, %c0_176] : memref<9x32x16xbf16, #tpu.memory_space<vmem>>, vector<1x32x16xbf16>
    %125 = vector.shape_cast %124 : vector<1x32x16xbf16> to vector<32x16xbf16>
    %cst_177 = arith.constant dense<0.000000e+00> : vector<256x16xf32>
    %126 = tpu.matmul %123, %125, %cst_177 {dimension_numbers = #tpu.dot_dimension_numbers<[1], [0], [0], [1], [0, 0, 1, 1], [], []>} : vector<256x32xbf16>, vector<32x16xbf16>, vector<256x16xf32> -> vector<256x16xf32>
    %127 = arith.addf %120, %126 : vector<256x16xf32>
    %c0_178 = arith.constant 0 : index
    %c1_179 = arith.constant 1 : index
    %c1_180 = arith.constant 1 : index
    %c0_181 = arith.constant 0 : index
    %128 = vector.load %arg12[%c0_178, %c1_179, %c1_180, %c0_181] : memref<1x18x18x32xf32, #tpu.memory_space<vmem>>, vector<1x16x16x32xf32>
    %129 = vector.shape_cast %128 : vector<1x16x16x32xf32> to vector<256x32xf32>
    %130 = arith.truncf %129 : vector<256x32xf32> to vector<256x32xbf16>
    %c4_182 = arith.constant 4 : index
    %c0_183 = arith.constant 0 : index
    %c0_184 = arith.constant 0 : index
    %131 = vector.load %arg6[%c4_182, %c0_183, %c0_184] : memref<9x32x16xbf16, #tpu.memory_space<vmem>>, vector<1x32x16xbf16>
    %132 = vector.shape_cast %131 : vector<1x32x16xbf16> to vector<32x16xbf16>
    %cst_185 = arith.constant dense<0.000000e+00> : vector<256x16xf32>
    %133 = tpu.matmul %130, %132, %cst_185 {dimension_numbers = #tpu.dot_dimension_numbers<[1], [0], [0], [1], [0, 0, 1, 1], [], []>} : vector<256x32xbf16>, vector<32x16xbf16>, vector<256x16xf32> -> vector<256x16xf32>
    %134 = arith.addf %127, %133 : vector<256x16xf32>
    %c0_186 = arith.constant 0 : index
    %c1_187 = arith.constant 1 : index
    %c2_188 = arith.constant 2 : index
    %c0_189 = arith.constant 0 : index
    %135 = vector.load %arg12[%c0_186, %c1_187, %c2_188, %c0_189] : memref<1x18x18x32xf32, #tpu.memory_space<vmem>>, vector<1x16x16x32xf32>
    %136 = vector.shape_cast %135 : vector<1x16x16x32xf32> to vector<256x32xf32>
    %137 = arith.truncf %136 : vector<256x32xf32> to vector<256x32xbf16>
    %c5_190 = arith.constant 5 : index
    %c0_191 = arith.constant 0 : index
    %c0_192 = arith.constant 0 : index
    %138 = vector.load %arg6[%c5_190, %c0_191, %c0_192] : memref<9x32x16xbf16, #tpu.memory_space<vmem>>, vector<1x32x16xbf16>
    %139 = vector.shape_cast %138 : vector<1x32x16xbf16> to vector<32x16xbf16>
    %cst_193 = arith.constant dense<0.000000e+00> : vector<256x16xf32>
    %140 = tpu.matmul %137, %139, %cst_193 {dimension_numbers = #tpu.dot_dimension_numbers<[1], [0], [0], [1], [0, 0, 1, 1], [], []>} : vector<256x32xbf16>, vector<32x16xbf16>, vector<256x16xf32> -> vector<256x16xf32>
    %141 = arith.addf %134, %140 : vector<256x16xf32>
    %c0_194 = arith.constant 0 : index
    %c2_195 = arith.constant 2 : index
    %c0_196 = arith.constant 0 : index
    %c0_197 = arith.constant 0 : index
    %142 = vector.load %arg12[%c0_194, %c2_195, %c0_196, %c0_197] : memref<1x18x18x32xf32, #tpu.memory_space<vmem>>, vector<1x16x16x32xf32>
    %143 = vector.shape_cast %142 : vector<1x16x16x32xf32> to vector<256x32xf32>
    %144 = arith.truncf %143 : vector<256x32xf32> to vector<256x32xbf16>
    %c6_198 = arith.constant 6 : index
    %c0_199 = arith.constant 0 : index
    %c0_200 = arith.constant 0 : index
    %145 = vector.load %arg6[%c6_198, %c0_199, %c0_200] : memref<9x32x16xbf16, #tpu.memory_space<vmem>>, vector<1x32x16xbf16>
    %146 = vector.shape_cast %145 : vector<1x32x16xbf16> to vector<32x16xbf16>
    %cst_201 = arith.constant dense<0.000000e+00> : vector<256x16xf32>
    %147 = tpu.matmul %144, %146, %cst_201 {dimension_numbers = #tpu.dot_dimension_numbers<[1], [0], [0], [1], [0, 0, 1, 1], [], []>} : vector<256x32xbf16>, vector<32x16xbf16>, vector<256x16xf32> -> vector<256x16xf32>
    %148 = arith.addf %141, %147 : vector<256x16xf32>
    %c0_202 = arith.constant 0 : index
    %c2_203 = arith.constant 2 : index
    %c1_204 = arith.constant 1 : index
    %c0_205 = arith.constant 0 : index
    %149 = vector.load %arg12[%c0_202, %c2_203, %c1_204, %c0_205] : memref<1x18x18x32xf32, #tpu.memory_space<vmem>>, vector<1x16x16x32xf32>
    %150 = vector.shape_cast %149 : vector<1x16x16x32xf32> to vector<256x32xf32>
    %151 = arith.truncf %150 : vector<256x32xf32> to vector<256x32xbf16>
    %c7_206 = arith.constant 7 : index
    %c0_207 = arith.constant 0 : index
    %c0_208 = arith.constant 0 : index
    %152 = vector.load %arg6[%c7_206, %c0_207, %c0_208] : memref<9x32x16xbf16, #tpu.memory_space<vmem>>, vector<1x32x16xbf16>
    %153 = vector.shape_cast %152 : vector<1x32x16xbf16> to vector<32x16xbf16>
    %cst_209 = arith.constant dense<0.000000e+00> : vector<256x16xf32>
    %154 = tpu.matmul %151, %153, %cst_209 {dimension_numbers = #tpu.dot_dimension_numbers<[1], [0], [0], [1], [0, 0, 1, 1], [], []>} : vector<256x32xbf16>, vector<32x16xbf16>, vector<256x16xf32> -> vector<256x16xf32>
    %155 = arith.addf %148, %154 : vector<256x16xf32>
    %c0_210 = arith.constant 0 : index
    %c2_211 = arith.constant 2 : index
    %c2_212 = arith.constant 2 : index
    %c0_213 = arith.constant 0 : index
    %156 = vector.load %arg12[%c0_210, %c2_211, %c2_212, %c0_213] : memref<1x18x18x32xf32, #tpu.memory_space<vmem>>, vector<1x16x16x32xf32>
    %157 = vector.shape_cast %156 : vector<1x16x16x32xf32> to vector<256x32xf32>
    %158 = arith.truncf %157 : vector<256x32xf32> to vector<256x32xbf16>
    %c8_214 = arith.constant 8 : index
    %c0_215 = arith.constant 0 : index
    %c0_216 = arith.constant 0 : index
    %159 = vector.load %arg6[%c8_214, %c0_215, %c0_216] : memref<9x32x16xbf16, #tpu.memory_space<vmem>>, vector<1x32x16xbf16>
    %160 = vector.shape_cast %159 : vector<1x32x16xbf16> to vector<32x16xbf16>
    %cst_217 = arith.constant dense<0.000000e+00> : vector<256x16xf32>
    %161 = tpu.matmul %158, %160, %cst_217 {dimension_numbers = #tpu.dot_dimension_numbers<[1], [0], [0], [1], [0, 0, 1, 1], [], []>} : vector<256x32xbf16>, vector<32x16xbf16>, vector<256x16xf32> -> vector<256x16xf32>
    %162 = arith.addf %155, %161 : vector<256x16xf32>
    %cst_218 = arith.constant 0.000000e+00 : f32
    %163 = vector.broadcast %cst_218 : f32 to vector<256x16xf32>
    %164 = arith.maximumf %162, %163 : vector<256x16xf32>
    %165 = vector.shape_cast %164 : vector<256x16xf32> to vector<1x16x16x16xf32>
    %c0_219 = arith.constant 0 : index
    %c1_220 = arith.constant 1 : index
    %c1_221 = arith.constant 1 : index
    %c0_222 = arith.constant 0 : index
    %166 = vector.load %arg13[%c0_219, %c1_220, %c1_221, %c0_222] : memref<1x18x18x16xf32, #tpu.memory_space<vmem>>, vector<1x16x16x16xf32>
    tpu.vector_store %arg13[%c0_219, %c1_220, %c1_221, %c0_222], %165 {strides = array<i32>} : memref<1x18x18x16xf32, #tpu.memory_space<vmem>>, vector<1x16x16x16xf32>,
    %c0_223 = arith.constant 0 : index
    %c2_224 = arith.constant 2 : index
    %c1_225 = arith.constant 1 : index
    %c0_226 = arith.constant 0 : index
    %167 = vector.load %arg13[%c0_223, %c2_224, %c1_225, %c0_226] : memref<1x18x18x16xf32, #tpu.memory_space<vmem>>, vector<1x1x16x16xf32>
    %c0_227 = arith.constant 0 : index
    %c0_228 = arith.constant 0 : index
    %c1_229 = arith.constant 1 : index
    %c0_230 = arith.constant 0 : index
    %168 = vector.load %arg13[%c0_227, %c0_228, %c1_229, %c0_230] : memref<1x18x18x16xf32, #tpu.memory_space<vmem>>, vector<1x1x16x16xf32>
    tpu.vector_store %arg13[%c0_227, %c0_228, %c1_229, %c0_230], %167 {strides = array<i32>} : memref<1x18x18x16xf32, #tpu.memory_space<vmem>>, vector<1x1x16x16xf32>,
    %c0_231 = arith.constant 0 : index
    %c15_232 = arith.constant 15 : index
    %c1_233 = arith.constant 1 : index
    %c0_234 = arith.constant 0 : index
    %169 = vector.load %arg13[%c0_231, %c15_232, %c1_233, %c0_234] : memref<1x18x18x16xf32, #tpu.memory_space<vmem>>, vector<1x1x16x16xf32>
    %c0_235 = arith.constant 0 : index
    %c17_236 = arith.constant 17 : index
    %c1_237 = arith.constant 1 : index
    %c0_238 = arith.constant 0 : index
    %170 = vector.load %arg13[%c0_235, %c17_236, %c1_237, %c0_238] : memref<1x18x18x16xf32, #tpu.memory_space<vmem>>, vector<1x1x16x16xf32>
    tpu.vector_store %arg13[%c0_235, %c17_236, %c1_237, %c0_238], %169 {strides = array<i32>} : memref<1x18x18x16xf32, #tpu.memory_space<vmem>>, vector<1x1x16x16xf32>,
    %c0_239 = arith.constant 0 : index
    %c0_240 = arith.constant 0 : index
    %c2_241 = arith.constant 2 : index
    %c0_242 = arith.constant 0 : index
    %171 = vector.load %arg13[%c0_239, %c0_240, %c2_241, %c0_242] : memref<1x18x18x16xf32, #tpu.memory_space<vmem>>, vector<1x18x1x16xf32>
    %c0_243 = arith.constant 0 : index
    %c0_244 = arith.constant 0 : index
    %c0_245 = arith.constant 0 : index
    %c0_246 = arith.constant 0 : index
    %172 = vector.load %arg13[%c0_243, %c0_244, %c0_245, %c0_246] : memref<1x18x18x16xf32, #tpu.memory_space<vmem>>, vector<1x18x1x16xf32>
    tpu.vector_store %arg13[%c0_243, %c0_244, %c0_245, %c0_246], %171 {strides = array<i32>} : memref<1x18x18x16xf32, #tpu.memory_space<vmem>>, vector<1x18x1x16xf32>,
    %c0_247 = arith.constant 0 : index
    %c0_248 = arith.constant 0 : index
    %c15_249 = arith.constant 15 : index
    %c0_250 = arith.constant 0 : index
    %173 = vector.load %arg13[%c0_247, %c0_248, %c15_249, %c0_250] : memref<1x18x18x16xf32, #tpu.memory_space<vmem>>, vector<1x18x1x16xf32>
    %c0_251 = arith.constant 0 : index
    %c0_252 = arith.constant 0 : index
    %c17_253 = arith.constant 17 : index
    %c0_254 = arith.constant 0 : index
    %174 = vector.load %arg13[%c0_251, %c0_252, %c17_253, %c0_254] : memref<1x18x18x16xf32, #tpu.memory_space<vmem>>, vector<1x18x1x16xf32>
    tpu.vector_store %arg13[%c0_251, %c0_252, %c17_253, %c0_254], %173 {strides = array<i32>} : memref<1x18x18x16xf32, #tpu.memory_space<vmem>>, vector<1x18x1x16xf32>,
    %c0_255 = arith.constant 0 : index
    %c0_256 = arith.constant 0 : index
    %175 = vector.load %arg8[%c0_255, %c0_256] : memref<9x16xf32, #tpu.memory_space<vmem>>, vector<9x16xf32>
    %cst_257 = arith.constant 0.000000e+00 : f32
    %176 = vector.broadcast %cst_257 : f32 to vector<256x16xf32>
    %c0_258 = arith.constant 0 : index
    %c0_259 = arith.constant 0 : index
    %c0_260 = arith.constant 0 : index
    %c0_261 = arith.constant 0 : index
    %177 = vector.load %arg13[%c0_258, %c0_259, %c0_260, %c0_261] : memref<1x18x18x16xf32, #tpu.memory_space<vmem>>, vector<1x16x16x16xf32>
    %178 = vector.shape_cast %177 : vector<1x16x16x16xf32> to vector<256x16xf32>
    %179 = vector.extract_strided_slice %175 {offsets = [0, 0], sizes = [1, 16], strides = [1, 1]} : vector<9x16xf32> to vector<1x16xf32>
    %180 = vector.shape_cast %179 : vector<1x16xf32> to vector<16xf32>
    %181 = vector.shape_cast %180 : vector<16xf32> to vector<1x16xf32>
    %182 = vector.broadcast %181 : vector<1x16xf32> to vector<256x16xf32>
    %183 = arith.mulf %178, %182 : vector<256x16xf32>
    %184 = arith.addf %176, %183 : vector<256x16xf32>
    %c0_262 = arith.constant 0 : index
    %c0_263 = arith.constant 0 : index
    %c1_264 = arith.constant 1 : index
    %c0_265 = arith.constant 0 : index
    %185 = vector.load %arg13[%c0_262, %c0_263, %c1_264, %c0_265] : memref<1x18x18x16xf32, #tpu.memory_space<vmem>>, vector<1x16x16x16xf32>
    %186 = vector.shape_cast %185 : vector<1x16x16x16xf32> to vector<256x16xf32>
    %187 = vector.extract_strided_slice %175 {offsets = [1, 0], sizes = [1, 16], strides = [1, 1]} : vector<9x16xf32> to vector<1x16xf32>
    %188 = vector.shape_cast %187 : vector<1x16xf32> to vector<16xf32>
    %189 = vector.shape_cast %188 : vector<16xf32> to vector<1x16xf32>
    %190 = vector.broadcast %189 : vector<1x16xf32> to vector<256x16xf32>
    %191 = arith.mulf %186, %190 : vector<256x16xf32>
    %192 = arith.addf %184, %191 : vector<256x16xf32>
    %c0_266 = arith.constant 0 : index
    %c0_267 = arith.constant 0 : index
    %c2_268 = arith.constant 2 : index
    %c0_269 = arith.constant 0 : index
    %193 = vector.load %arg13[%c0_266, %c0_267, %c2_268, %c0_269] : memref<1x18x18x16xf32, #tpu.memory_space<vmem>>, vector<1x16x16x16xf32>
    %194 = vector.shape_cast %193 : vector<1x16x16x16xf32> to vector<256x16xf32>
    %195 = vector.extract_strided_slice %175 {offsets = [2, 0], sizes = [1, 16], strides = [1, 1]} : vector<9x16xf32> to vector<1x16xf32>
    %196 = vector.shape_cast %195 : vector<1x16xf32> to vector<16xf32>
    %197 = vector.shape_cast %196 : vector<16xf32> to vector<1x16xf32>
    %198 = vector.broadcast %197 : vector<1x16xf32> to vector<256x16xf32>
    %199 = arith.mulf %194, %198 : vector<256x16xf32>
    %200 = arith.addf %192, %199 : vector<256x16xf32>
    %c0_270 = arith.constant 0 : index
    %c1_271 = arith.constant 1 : index
    %c0_272 = arith.constant 0 : index
    %c0_273 = arith.constant 0 : index
    %201 = vector.load %arg13[%c0_270, %c1_271, %c0_272, %c0_273] : memref<1x18x18x16xf32, #tpu.memory_space<vmem>>, vector<1x16x16x16xf32>
    %202 = vector.shape_cast %201 : vector<1x16x16x16xf32> to vector<256x16xf32>
    %203 = vector.extract_strided_slice %175 {offsets = [3, 0], sizes = [1, 16], strides = [1, 1]} : vector<9x16xf32> to vector<1x16xf32>
    %204 = vector.shape_cast %203 : vector<1x16xf32> to vector<16xf32>
    %205 = vector.shape_cast %204 : vector<16xf32> to vector<1x16xf32>
    %206 = vector.broadcast %205 : vector<1x16xf32> to vector<256x16xf32>
    %207 = arith.mulf %202, %206 : vector<256x16xf32>
    %208 = arith.addf %200, %207 : vector<256x16xf32>
    %c0_274 = arith.constant 0 : index
    %c1_275 = arith.constant 1 : index
    %c1_276 = arith.constant 1 : index
    %c0_277 = arith.constant 0 : index
    %209 = vector.load %arg13[%c0_274, %c1_275, %c1_276, %c0_277] : memref<1x18x18x16xf32, #tpu.memory_space<vmem>>, vector<1x16x16x16xf32>
    %210 = vector.shape_cast %209 : vector<1x16x16x16xf32> to vector<256x16xf32>
    %211 = vector.extract_strided_slice %175 {offsets = [4, 0], sizes = [1, 16], strides = [1, 1]} : vector<9x16xf32> to vector<1x16xf32>
    %212 = vector.shape_cast %211 : vector<1x16xf32> to vector<16xf32>
    %213 = vector.shape_cast %212 : vector<16xf32> to vector<1x16xf32>
    %214 = vector.broadcast %213 : vector<1x16xf32> to vector<256x16xf32>
    %215 = arith.mulf %210, %214 : vector<256x16xf32>
    %216 = arith.addf %208, %215 : vector<256x16xf32>
    %c0_278 = arith.constant 0 : index
    %c1_279 = arith.constant 1 : index
    %c2_280 = arith.constant 2 : index
    %c0_281 = arith.constant 0 : index
    %217 = vector.load %arg13[%c0_278, %c1_279, %c2_280, %c0_281] : memref<1x18x18x16xf32, #tpu.memory_space<vmem>>, vector<1x16x16x16xf32>
    %218 = vector.shape_cast %217 : vector<1x16x16x16xf32> to vector<256x16xf32>
    %219 = vector.extract_strided_slice %175 {offsets = [5, 0], sizes = [1, 16], strides = [1, 1]} : vector<9x16xf32> to vector<1x16xf32>
    %220 = vector.shape_cast %219 : vector<1x16xf32> to vector<16xf32>
    %221 = vector.shape_cast %220 : vector<16xf32> to vector<1x16xf32>
    %222 = vector.broadcast %221 : vector<1x16xf32> to vector<256x16xf32>
    %223 = arith.mulf %218, %222 : vector<256x16xf32>
    %224 = arith.addf %216, %223 : vector<256x16xf32>
    %c0_282 = arith.constant 0 : index
    %c2_283 = arith.constant 2 : index
    %c0_284 = arith.constant 0 : index
    %c0_285 = arith.constant 0 : index
    %225 = vector.load %arg13[%c0_282, %c2_283, %c0_284, %c0_285] : memref<1x18x18x16xf32, #tpu.memory_space<vmem>>, vector<1x16x16x16xf32>
    %226 = vector.shape_cast %225 : vector<1x16x16x16xf32> to vector<256x16xf32>
    %227 = vector.extract_strided_slice %175 {offsets = [6, 0], sizes = [1, 16], strides = [1, 1]} : vector<9x16xf32> to vector<1x16xf32>
    %228 = vector.shape_cast %227 : vector<1x16xf32> to vector<16xf32>
    %229 = vector.shape_cast %228 : vector<16xf32> to vector<1x16xf32>
    %230 = vector.broadcast %229 : vector<1x16xf32> to vector<256x16xf32>
    %231 = arith.mulf %226, %230 : vector<256x16xf32>
    %232 = arith.addf %224, %231 : vector<256x16xf32>
    %c0_286 = arith.constant 0 : index
    %c2_287 = arith.constant 2 : index
    %c1_288 = arith.constant 1 : index
    %c0_289 = arith.constant 0 : index
    %233 = vector.load %arg13[%c0_286, %c2_287, %c1_288, %c0_289] : memref<1x18x18x16xf32, #tpu.memory_space<vmem>>, vector<1x16x16x16xf32>
    %234 = vector.shape_cast %233 : vector<1x16x16x16xf32> to vector<256x16xf32>
    %235 = vector.extract_strided_slice %175 {offsets = [7, 0], sizes = [1, 16], strides = [1, 1]} : vector<9x16xf32> to vector<1x16xf32>
    %236 = vector.shape_cast %235 : vector<1x16xf32> to vector<16xf32>
    %237 = vector.shape_cast %236 : vector<16xf32> to vector<1x16xf32>
    %238 = vector.broadcast %237 : vector<1x16xf32> to vector<256x16xf32>
    %239 = arith.mulf %234, %238 : vector<256x16xf32>
    %240 = arith.addf %232, %239 : vector<256x16xf32>
    %c0_290 = arith.constant 0 : index
    %c2_291 = arith.constant 2 : index
    %c2_292 = arith.constant 2 : index
    %c0_293 = arith.constant 0 : index
    %241 = vector.load %arg13[%c0_290, %c2_291, %c2_292, %c0_293] : memref<1x18x18x16xf32, #tpu.memory_space<vmem>>, vector<1x16x16x16xf32>
    %242 = vector.shape_cast %241 : vector<1x16x16x16xf32> to vector<256x16xf32>
    %243 = vector.extract_strided_slice %175 {offsets = [8, 0], sizes = [1, 16], strides = [1, 1]} : vector<9x16xf32> to vector<1x16xf32>
    %244 = vector.shape_cast %243 : vector<1x16xf32> to vector<16xf32>
    %245 = vector.shape_cast %244 : vector<16xf32> to vector<1x16xf32>
    %246 = vector.broadcast %245 : vector<1x16xf32> to vector<256x16xf32>
    %247 = arith.mulf %242, %246 : vector<256x16xf32>
    %248 = arith.addf %240, %247 : vector<256x16xf32>
    %cst_294 = arith.constant dense<0.000000e+00> : vector<256xf32>
    %249 = vector.multi_reduction <add>, %248, %cst_294 [1] : vector<256x16xf32> to vector<256xf32>
    %250 = vector.shape_cast %249 : vector<256xf32> to vector<256x1xf32>
    %c0_295 = arith.constant 0 : index
    %c0_296 = arith.constant 0 : index
    %251 = vector.load %arg9[%c0_295, %c0_296] : memref<1x1xf32, #tpu.memory_space<vmem>>, vector<1x1xf32>
    %252 = vector.broadcast %251 : vector<1x1xf32> to vector<256x1xf32>
    %253 = arith.addf %250, %252 : vector<256x1xf32>
    %254 = math.tanh %253 : vector<256x1xf32>
    %cst_297 = arith.constant 5.000000e-01 : f32
    %255 = vector.broadcast %cst_297 : f32 to vector<256x1xf32>
    %256 = arith.mulf %254, %255 : vector<256x1xf32>
    %cst_298 = arith.constant 5.000000e-01 : f32
    %257 = vector.broadcast %cst_298 : f32 to vector<256x1xf32>
    %258 = arith.addf %256, %257 : vector<256x1xf32>
    %259 = vector.shape_cast %258 : vector<256x1xf32> to vector<1x1x256xf32>
    %c0_299 = arith.constant 0 : index
    %c0_300 = arith.constant 0 : index
    %c0_301 = arith.constant 0 : index
    %260 = vector.load %arg10[%c0_299, %c0_300, %c0_301] : memref<1x1x256xf32, #tpu.memory_space<vmem>>, vector<1x1x256xf32>
    tpu.vector_store %arg10[%c0_299, %c0_300, %c0_301], %259 {strides = array<i32>} : memref<1x1x256xf32, #tpu.memory_space<vmem>>, vector<1x1x256xf32>,
    return
  }
  func.func @transform_0(%arg0: i32) -> (i32, i32, i32) {
    %c0_i32 = arith.constant 0 : i32
    %c0_i32_0 = arith.constant 0 : i32
    %c0_i32_1 = arith.constant 0 : i32
    return %arg0, %c0_i32, %c0_i32_0 : i32, i32, i32
  }
  func.func @transform_1(%arg0: i32) -> (i32, i32) {
    %c0_i32 = arith.constant 0 : i32
    %c0_i32_0 = arith.constant 0 : i32
    %c0_i32_1 = arith.constant 0 : i32
    return %c0_i32, %c0_i32_0 : i32, i32
  }
  func.func @transform_2(%arg0: i32) -> (i32, i32) {
    %c0_i32 = arith.constant 0 : i32
    %c0_i32_0 = arith.constant 0 : i32
    %c0_i32_1 = arith.constant 0 : i32
    return %c0_i32, %c0_i32_0 : i32, i32
  }
  func.func @transform_3(%arg0: i32) -> (i32, i32, i32) {
    %c0_i32 = arith.constant 0 : i32
    %c0_i32_0 = arith.constant 0 : i32
    %c0_i32_1 = arith.constant 0 : i32
    %c0_i32_2 = arith.constant 0 : i32
    return %c0_i32, %c0_i32_0, %c0_i32_1 : i32, i32, i32
  }
  func.func @transform_4(%arg0: i32) -> (i32, i32) {
    %c0_i32 = arith.constant 0 : i32
    %c0_i32_0 = arith.constant 0 : i32
    %c0_i32_1 = arith.constant 0 : i32
    return %c0_i32, %c0_i32_0 : i32, i32
  }
  func.func @transform_5(%arg0: i32) -> (i32, i32, i32) {
    %c0_i32 = arith.constant 0 : i32
    %c0_i32_0 = arith.constant 0 : i32
    %c0_i32_1 = arith.constant 0 : i32
    %c0_i32_2 = arith.constant 0 : i32
    return %c0_i32, %c0_i32_0, %c0_i32_1 : i32, i32, i32
  }
  func.func @transform_6(%arg0: i32) -> (i32, i32) {
    %c0_i32 = arith.constant 0 : i32
    %c0_i32_0 = arith.constant 0 : i32
    %c0_i32_1 = arith.constant 0 : i32
    return %c0_i32, %c0_i32_0 : i32, i32
  }
  func.func @transform_7(%arg0: i32) -> (i32, i32) {
    %c0_i32 = arith.constant 0 : i32
    %c0_i32_0 = arith.constant 0 : i32
    %c0_i32_1 = arith.constant 0 : i32
    return %c0_i32, %c0_i32_0 : i32, i32
  }
  func.func @transform_8(%arg0: i32) -> (i32, i32) {
    %c0_i32 = arith.constant 0 : i32
    %c0_i32_0 = arith.constant 0 : i32
    %c0_i32_1 = arith.constant 0 : i32
    return %c0_i32, %c0_i32_0 : i32, i32
  }
  func.func @transform_9(%arg0: i32) -> (i32, i32, i32) {
    %c0_i32 = arith.constant 0 : i32
    %c0_i32_0 = arith.constant 0 : i32
    %c0_i32_1 = arith.constant 0 : i32
    return %arg0, %c0_i32, %c0_i32_0 : i32, i32, i32
  }
}

</mosaic_0001>

<bundles_post_ra>
// kernel: recon_fuse_net.1
= control target key start
LH: loop header
LB: loop body
LE: loop exit
PB: predicated region body
PF: predicated region fallthrough
CT: control target
= control target key end

     0   :  { %s8244_s11 = smov 0   ;;  %s11674_s0 = inlined_call_operand.vmem [shape: bf16[2,256,18], index: 0, kind: input, shape index: {}]   ;;  %s11675_s1 = inlined_call_operand.vmem [shape: bf16[18,64], index: 1, kind: input, shape index: {}]   ;;  %s11676_s2 = inlined_call_operand.vmem [shape: f32[1,64], index: 2, kind: input, shape index: {}]   ;;  %s11677_s3 = inlined_call_operand.vmem [shape: bf16[9,64,32], index: 3, kind: input, shape index: {}]   ;;  %s11678_s4 = inlined_call_operand.vmem [shape: f32[1,32], index: 4, kind: input, shape index: {}]   ;;  %s11679_s5 = inlined_call_operand.vmem [shape: bf16[9,32,16], index: 5, kind: input, shape index: {}]   ;;  %s11680_s6 = inlined_call_operand.vmem [shape: f32[1,16], index: 6, kind: input, shape index: {}]   ;;  %s11681_s7 = inlined_call_operand.vmem [shape: f32[9,16], index: 7, kind: input, shape index: {}]   ;;  %s11682_s8 = inlined_call_operand.<no memory space> [shape: f32[1,1], index: 8, kind: input, shape index: {}]   ;;  %s11683_s9 = inlined_call_operand.vmem [shape: f32[2,1,256], index: 9, kind: output, shape index: {}]  }
   0x1   :  { %v14_v0 = vstv %s11682_s8 }
   0x2   :  { %15 = vst [vmem:[#allocation5] sm:$0x1] %v14_v0 }
   0x3 LB: > { %s7321_s12 = sadd.s32 4294967295, %s8188_s11   ;;  %p7325_p0 = scmp.ge.s32.totalorder %s8188_s11, 1  ;;  %s8188_s11 = sphi %s8244_s11, %s21_s11  }
   0x4   : > { %p289_p1 = scmp.lt.s32.totalorder %s8188_s11, 3 }
   0x6   : > { %p290_p2 = pnand %p7325_p0, %p289_p1 }
   0x8   : > { %293 = sbr.rel (%p290_p2) target bundleno = 2360 (0x938), region = 56 }
   0xd   : > { %v368_v1 = vld [vmem:[%s11675_s1 + $0x8] sm:$0x1]  ;;  %p324_p3 = scmp.lt.s32.totalorder %s7321_s12, 1  ;;  %vm511_vm0 = vcmask 1040384   ;;  %v8032_v5 = vld [vmem:[%s11675_s1] sm:$0xff]  ;;  %vm462_vm1 = vcmask 146432  }
   0xe   : > { %v458_v2 = vunpack.c.l.b16 %v368_v1  ;;  %v8286_v14 = vld [vmem:[%s11676_s2] ss:$0 sm:$0xff]  ;;  %v8036_v18 = vld [vmem:[%s11677_s3 + $0x18] sm:$0xff]  ;;  %vm637_vm2 = vcmask 523264   ;;  %v8035_v21 = vld [vmem:[%s11677_s3 + $0x10] sm:$0xff]  ;;  %vm699_vm3 = vcmask 516096  }
   0xf   : > { %s11964_s12 = smov (!%p324_p3, %s7321_s12), 1  ;;  %v8040_v19 = vld [vmem:[%s11677_s3 + $0x38] sm:$0xff]  ;;  %890 = vmatpush.bf16.msra.mxu1 %v8036_v18  ;;  %v8039_v22 = vld [vmem:[%s11677_s3 + $0x30] sm:$0xff]  ;;  %v8034_v25 = vld [vmem:[%s11677_s3 + $0x8] sm:$0xff]  ;;  %vm3040_vm4 = vcmask 261120   ;;  %vm3102_vm5 = vcmask 253952  }
  0x10   : > { %v460_v3 = vpack.c.b16 %v458_v2, %v458_v2  ;;  %s8015_s8 = sshll.u32 %s11964_s12, 7  ;;  %1140 = vmatpush.bf16.msra.mxu2 %v8040_v19  ;;  %v8038_v26 = vld [vmem:[%s11677_s3 + $0x28] sm:$0xff]  ;;  %v8033_v29 = vld [vmem:[%s11677_s3] sm:$0xff]  ;;  %v8048_v47 = vld [vmem:[%s11677_s3 + $0x78] sm:$0xff]  ;;  %vm5299_vm6 = vcmask 130048   ;;  %vm5361_vm7 = vcmask 122880  }
  0x11   : > { %s8265_s19 = scalar_lea.vmem %s11674_s0, %s8015_s8  ;;  %v8037_v30 = vld [vmem:[%s11677_s3 + $0x20] sm:$0xff]  ;;  %v8047_v52 = vld [vmem:[%s11677_s3 + $0x70] sm:$0xff]  ;;  %v8046_v56 = vld [vmem:[%s11677_s3 + $0x68] sm:$0xff]  ;;  %vm7171_vm8 = vcmask 130112   ;;  %vm7175_vm9 = vcmask 195712   ;;  %vm7179_vm10 = vcmask 261312  }
  0x12   : > { %v513_v4 = vsel %vm511_vm0, %v460_v3, 0  ;;  %v8016_v6 = vld [vmem:[%s8265_s19] sm:$0xff]  ;;  %v8017_v7 = vld [vmem:[%s8265_s19 + $0x8] sm:$0xff]  ;;  %v8018_v8 = vld [vmem:[%s8265_s19 + $0x10] sm:$0xff]  ;;  %vm7183_vm11 = vcmask 326912   ;;  %vm7187_vm12 = vcmask 392512  }
  0x13   : > { %521 = vmatpush.bf16.msra.mxu0 %v513_v4  ;;  %8087 = vmatpush.bf16.msra.mxu3 %v513_v4  ;;  %v8019_v9 = vld [vmem:[%s8265_s19 + $0x18] sm:$0xff]  ;;  %v8020_v10 = vld [vmem:[%s8265_s19 + $0x20] sm:$0xff]  ;;  %v8021_v11 = vld [vmem:[%s8265_s19 + $0x28] sm:$0xff]  ;;  %vm7191_vm13 = vcmask 458112   ;;  %vm7195_vm14 = vcmask 523712   ;;  %vm7199_vm15 = vcmask 589312  }
  0x14   : > { %v8022_v12 = vld [vmem:[%s8265_s19 + $0x30] sm:$0xff]  ;;  %v8023_v13 = vld [vmem:[%s8265_s19 + $0x38] sm:$0xff]  ;;  %v8024_v15 = vld [vmem:[%s8265_s19 + $0x40] sm:$0xff]  ;;  %891 = vmatpush.bf16.msra.mxu1 %v8035_v21  ;;  %1141 = vmatpush.bf16.msra.mxu2 %v8039_v22  ;;  %s7328_s23 = sshll.u32 %s11964_s12, 1 }
  0x15   : > { %v8025_v31 = vld [vmem:[%s8265_s19 + $0x48] sm:$0xff]  ;;  %v8026_v42 = vld [vmem:[%s8265_s19 + $0x50] sm:$0xff]  ;;  %v8027_v58 = vld [vmem:[%s8265_s19 + $0x58] sm:$0xff]  ;;  %s332_s26 = scalar_lea.vmem %s11683_s9, %s7328_s23 }
  0x16   : > { %v8029_v41 = vld [vmem:[%s8265_s19 + $0x68] sm:$0xff]  ;;  %v8030_v59 = vld [vmem:[%s8265_s19 + $0x70] sm:$0xff]  ;;  %v8045_v3 = vld [vmem:[%s11677_s3 + $0x60] sm:$0xff] }
  0x17   : > { %522 = vmatpush.bf16.msra.mxu0 %v8032_v5  ;;  %8088 = vmatpush.bf16.msra.mxu3 %v8032_v5 }
  0x18   : > { %892 = vmatpush.bf16.msra.mxu1 %v8034_v25  ;;  %1142 = vmatpush.bf16.msra.mxu2 %v8038_v26 }
  0x1a   : > { %7397 = vmatmul.msk.bf16.vlgmr.msra.gmra.mxu0 %vm462_vm1, %v8016_v6  ;;  %7410 = vmatmul.msk.bf16.vlgmr.msra.gmra.mxu3 %vm462_vm1, %v8029_v41 }
  0x1b   : > { %8089 = vmatpush.bf16.msrb.mxu3 %v8036_v18  ;;  %1640 = vmatpush.bf16.msrb.mxu0 %v8048_v47 }
  0x1c   : > { %893 = vmatpush.bf16.msra.mxu1 %v8033_v29  ;;  %1143 = vmatpush.bf16.msra.mxu2 %v8037_v30 }
  0x1f   : > { %8090 = vmatpush.bf16.msrb.mxu3 %v8035_v21  ;;  %1641 = vmatpush.bf16.msrb.mxu0 %v8047_v52 }
  0x23   : > { %8091 = vmatpush.bf16.msrb.mxu3 %v8034_v25  ;;  %1642 = vmatpush.bf16.msrb.mxu0 %v8046_v56 }
  0x27   : > { %8092 = vmatpush.bf16.msrb.mxu3 %v8033_v29  ;;  %1643 = vmatpush.bf16.msrb.mxu0 %v8045_v3 }
  0x2a   : > { %7398 = vmatmul.msk.bf16.gmra.mxu0 %vm462_vm1, %v8017_v7  ;;  %7411 = vmatmul.msk.bf16.gmra.mxu3 %vm462_vm1, %v8030_v59 }
  0x2b   : > { %8093 = vmatpush.bf16.msra.mxu3 %v8040_v19 }
  0x2f   : > { %8094 = vmatpush.bf16.msra.mxu3 %v8039_v22 }
  0x33   : > { %8095 = vmatpush.bf16.msra.mxu3 %v8038_v26 }
  0x37   : > { %8096 = vmatpush.bf16.msra.mxu3 %v8037_v30 }
  0x3a   : > { %7399 = vmatmul.msk.bf16.gmra.mxu0 %vm462_vm1, %v8018_v8 }
  0x4a   : > { %7400 = vmatmul.msk.bf16.gmra.mxu0 %vm462_vm1, %v8019_v9 }
  0x5a   : > { %7401 = vmatmul.msk.bf16.gmra.mxu0 %vm462_vm1, %v8020_v10 }
  0x6a   : > { %7402 = vmatmul.msk.bf16.gmra.mxu0 %vm462_vm1, %v8021_v11 }
  0x7a   : > { %7403 = vmatmul.msk.bf16.gmra.mxu0 %vm462_vm1, %v8022_v12 }
  0x8a   : > { %7404 = vmatmul.msk.bf16.gmra.mxu0 %vm462_vm1, %v8023_v13 }
  0x97   : > { %v524_v16 = vpop.f32.mrf.mxu0 }
  0x98   : > { %v525_v17 = vadd.f32 %v8286_v14, %v524_v16 }
  0x9a   : > { %v604_v20 = vmax.f32 %v525_v17, 0.0  ;;  %7405 = vmatmul.msk.bf16.gmra.mxu0 %vm462_vm1, %v8024_v15  ;;  %v8028_v15 = vld [vmem:[%s8265_s19 + $0x60] sm:$0xff] }
  0x9c   : > { %638 = vst.msk [vmem:[#allocation2 + $0x19] sm:$0xff] %vm637_vm2, %v604_v20 }
  0x9f   : > { %v526_v23 = vpop.f32.mrf.mxu0 }
  0xa0   : > { %v527_v24 = vadd.f32 %v8286_v14, %v526_v23 }
  0xa2   : > { %v605_v27 = vmax.f32 %v527_v24, 0.0 }
  0xa3   : > { %v682_v28 = vld [vmem:[#allocation2 + $0x1a] sm:$0x1] }
  0xa4   : > { %701 = vst.msk [vmem:[#allocation2 + $0x18] sm:$0x1] %vm699_vm3, %v682_v28  ;;  %v1009_v13 = vld [vmem:[#allocation2 + $0x19] sm:$0xff] }
  0xa5   : > { %639 = vst.msk [vmem:[#allocation2 + $0x21] sm:$0xff] %vm637_vm2, %v605_v27 }
  0xa7   : > { %v529_v32 = vpop.f32.mrf.mxu0 }
  0xa8   : > { %v530_v33 = vadd.f32 %v8286_v14, %v529_v32 }
  0xaa   : > { %v606_v34 = vmax.f32 %v530_v33, 0.0  ;;  %7406 = vmatmul.msk.bf16.gmra.mxu0 %vm462_vm1, %v8025_v31 }
  0xab   : > { %v760_v10 = vld [vmem:[#allocation2 + $0x18] sm:$0xff] }
  0xac   : > { %v719_v35 = vld [vmem:[#allocation2 + $0x27] sm:$0x1]  ;;  %640 = vst.msk [vmem:[#allocation2 + $0x31] sm:$0xff] %vm637_vm2, %v606_v34 }
  0xad   : > { %737 = vst.msk [vmem:[#allocation2 + $0x29] sm:$0x1] %vm699_vm3, %v719_v35  ;;  %v761_v11 = vld [vmem:[#allocation2 + $0x20] sm:$0xff] }
  0xae   : > { %v1010_v12 = vld [vmem:[#allocation2 + $0x21] sm:$0xff]  ;;  %v791_v16 = vpack.c.bf16 %v761_v11, %v760_v10 }
  0xaf   : > { %v531_v36 = vpop.f32.mrf.mxu0  ;;  %v8372_v17 = vpack.c.bf16 %v1010_v12, %v1009_v13 }
  0xb0   : > { %v532_v37 = vadd.f32 %v8286_v14, %v531_v36 }
  0xb2   : > { %v607_v38 = vmax.f32 %v532_v37, 0.0 }
  0xb3   : > { %v8325_v39 = vld [vmem:[#allocation2 + $0x31] sm:$0xff] }
  0xb4   : > { %v683_v40 = vld [vmem:[#allocation2 + $0x32] sm:$0x1]  ;;  %673 = vst.msk [vmem:[#allocation2 + $0x1] sm:$0xff] %vm637_vm2, %v8325_v39 }
  0xb5   : > { %702 = vst.msk [vmem:[#allocation2 + $0x30] sm:$0x1] %vm699_vm3, %v683_v40 }
  0xb6   : > { %641 = vst.msk [vmem:[#allocation2 + $0x39] sm:$0xff] %vm637_vm2, %v607_v38 }
  0xb7   : > { %v534_v43 = vpop.f32.mrf.mxu0 }
  0xb8   : > { %v535_v44 = vadd.f32 %v8286_v14, %v534_v43 }
  0xba   : > { %v608_v45 = vmax.f32 %v535_v44, 0.0  ;;  %7407 = vmatmul.msk.bf16.gmra.mxu0 %vm462_vm1, %v8026_v42 }
  0xbb   : > { %v681_v46 = vld [vmem:[#allocation2 + $0x2] sm:$0x1] }
  0xbc   : > { %642 = vst.msk [vmem:[#allocation2 + $0x49] sm:$0xff] %vm637_vm2, %v608_v45  ;;  %v1007_v57 = vld [vmem:[#allocation2 + $0x1] sm:$0xff]  ;;  %v762_v26 = vld [vmem:[#allocation2 + $0x30] sm:$0xff] }
  0xbd   : > { %v8340_v48 = vld [vmem:[#allocation2 + $0x39] sm:$0xff]  ;;  %700 = vst.msk [vmem:[#allocation2] sm:$0x1] %vm699_vm3, %v681_v46 }
  0xbe   : > { %v720_v49 = vld [vmem:[#allocation2 + $0x3f] sm:$0x1]  ;;  %674 = vst.msk [vmem:[#allocation2 + $0x9] sm:$0xff] %vm637_vm2, %v8340_v48  ;;  %v8386_v29 = vpack.c.bf16 %v8340_v48, %v8325_v39 }
  0xbf   : > { %738 = vst.msk [vmem:[#allocation2 + $0x41] sm:$0x1] %vm699_vm3, %v720_v49  ;;  %v536_v50 = vpop.f32.mrf.mxu0  ;;  %v763_v27 = vld [vmem:[#allocation2 + $0x38] sm:$0xff] }
  0xc0   : > { %v537_v51 = vadd.f32 %v8286_v14, %v536_v50  ;;  %v792_v28 = vpack.c.bf16 %v763_v27, %v762_v26 }
  0xc2   : > { %v609_v53 = vmax.f32 %v537_v51, 0.0 }
  0xc3   : > { %v684_v54 = vld [vmem:[#allocation2 + $0x4a] sm:$0x1] }
  0xc4   : > { %703 = vst.msk [vmem:[#allocation2 + $0x48] sm:$0x1] %vm699_vm3, %v684_v54  ;;  %v758_v55 = vld [vmem:[#allocation2] sm:$0xff]  ;;  %v1013_v41 = vld [vmem:[#allocation2 + $0x49] sm:$0xff] }
  0xc5   : > { %643 = vst.msk [vmem:[#allocation2 + $0x51] sm:$0xff] %vm637_vm2, %v609_v53  ;;  %v759_v60 = vld [vmem:[#allocation2 + $0x8] sm:$0xff] }
  0xc6   : > { %v1008_v61 = vld [vmem:[#allocation2 + $0x9] sm:$0xff]  ;;  %v790_v63 = vpack.c.bf16 %v759_v60, %v758_v55 }
  0xc7   : > { %v718_v62 = vld [vmem:[#allocation2 + $0xf] sm:$0x1]  ;;  %v1039_v0 = vpack.c.bf16 %v1008_v61, %v1007_v57  ;;  %v539_v1 = vpop.f32.mrf.mxu0 }
  0xc8   : > { %736 = vst.msk [vmem:[#allocation2 + $0x11] sm:$0x1] %vm699_vm3, %v718_v62  ;;  %v540_v2 = vadd.f32 %v8286_v14, %v539_v1  ;;  %7429 = vmatmul.msk.bf16.vlgmr.msra.gmra.mxu1 %vm637_vm2, %v790_v63 }
  0xc9   : > { %7469 = vmatmul.msk.bf16.vlgmr.msra.gmra.mxu2 %vm637_vm2, %v1039_v0 }
  0xca   : > { %v610_v4 = vmax.f32 %v540_v2, 0.0  ;;  %7408 = vmatmul.msk.bf16.gmra.mxu0 %vm462_vm1, %v8027_v58 }
  0xcb   : > { %v764_v38 = vld [vmem:[#allocation2 + $0x48] sm:$0xff] }
  0xcc   : > { %v721_v5 = vld [vmem:[#allocation2 + $0x57] sm:$0x1]  ;;  %644 = vst.msk [vmem:[#allocation2 + $0x61] sm:$0xff] %vm637_vm2, %v610_v4 }
  0xcd   : > { %739 = vst.msk [vmem:[#allocation2 + $0x59] sm:$0x1] %vm699_vm3, %v721_v5  ;;  %v765_v39 = vld [vmem:[#allocation2 + $0x50] sm:$0xff] }
  0xce   : > { %v1014_v40 = vld [vmem:[#allocation2 + $0x51] sm:$0xff]  ;;  %v793_v42 = vpack.c.bf16 %v765_v39, %v764_v38 }
  0xcf   : > { %v541_v6 = vpop.f32.mrf.mxu0  ;;  %v8398_v43 = vpack.c.bf16 %v1014_v40, %v1013_v41  ;;  %v8052_v5 = vld [vmem:[%s11677_s3 + $0x98] sm:$0xff] }
  0xd0   : > { %v542_v7 = vadd.f32 %v8286_v14, %v541_v6  ;;  %1890 = vmatpush.bf16.msrb.mxu1 %v8052_v5 }
  0xd2   : > { %v611_v8 = vmax.f32 %v542_v7, 0.0 }
  0xd3   : > { %v685_v9 = vld [vmem:[#allocation2 + $0x62] sm:$0x1] }
  0xd4   : > { %704 = vst.msk [vmem:[#allocation2 + $0x60] sm:$0x1] %vm699_vm3, %v685_v9  ;;  %v1015_v55 = vld [vmem:[#allocation2 + $0x61] sm:$0xff] }
  0xd5   : > { %645 = vst.msk [vmem:[#allocation2 + $0x69] sm:$0xff] %vm637_vm2, %v611_v8 }
  0xd7   : > { %v544_v18 = vpop.f32.mrf.mxu0 }
  0xd8   : > { %v545_v19 = vadd.f32 %v8286_v14, %v544_v18  ;;  %7430 = vmatmul.msk.bf16.gmra.mxu1 %vm637_vm2, %v791_v16 }
  0xd9   : > { %7470 = vmatmul.msk.bf16.gmra.mxu2 %vm637_vm2, %v8372_v17 }
  0xda   : > { %v612_v20 = vmax.f32 %v545_v19, 0.0  ;;  %7409 = vmatmul.msk.bf16.gmra.mxu0 %vm462_vm1, %v8028_v15  ;;  %v8031_v15 = vld [vmem:[%s8265_s19 + $0x78] sm:$0xff] }
  0xdb   : > { %v766_v52 = vld [vmem:[#allocation2 + $0x60] sm:$0xff]  ;;  %7412 = vmatmul.msk.bf16.gmra.mxu3 %vm462_vm1, %v8031_v15  ;;  %vm7203_vm1 = vcmask 654912  }
  0xdc   : > { %v722_v21 = vld [vmem:[#allocation2 + $0x6f] sm:$0x1]  ;;  %646 = vst.msk [vmem:[#allocation2 + $0x79] sm:$0xff] %vm637_vm2, %v612_v20 }
  0xdd   : > { %740 = vst.msk [vmem:[#allocation2 + $0x71] sm:$0x1] %vm699_vm3, %v722_v21  ;;  %v767_v53 = vld [vmem:[#allocation2 + $0x68] sm:$0xff] }
  0xde   : > { %v1016_v54 = vld [vmem:[#allocation2 + $0x69] sm:$0xff]  ;;  %v794_v56 = vpack.c.bf16 %v767_v53, %v766_v52 }
  0xdf   : > { %v546_v22 = vpop.f32.mrf.mxu0  ;;  %v8410_v57 = vpack.c.bf16 %v1016_v54, %v1015_v55 }
  0xe0   : > { %v547_v23 = vadd.f32 %v8286_v14, %v546_v22 }
  0xe2   : > { %v613_v24 = vmax.f32 %v547_v23, 0.0 }
  0xe3   : > { %v686_v25 = vld [vmem:[#allocation2 + $0x7a] sm:$0x1] }
  0xe4   : > { %705 = vst.msk [vmem:[#allocation2 + $0x78] sm:$0x1] %vm699_vm3, %v686_v25  ;;  %v1017_v6 = vld [vmem:[#allocation2 + $0x79] sm:$0xff] }
  0xe5   : > { %647 = vst.msk [vmem:[#allocation2 + $0x81] sm:$0xff] %vm637_vm2, %v613_v24 }
  0xe7   : > { %v549_v30 = vpop.f32.mrf.mxu0 }
  0xe8   : > { %v550_v31 = vadd.f32 %v8286_v14, %v549_v30  ;;  %7431 = vmatmul.msk.bf16.gmra.mxu1 %vm637_vm2, %v792_v28 }
  0xe9   : > { %7471 = vmatmul.msk.bf16.gmra.mxu2 %vm637_vm2, %v8386_v29 }
  0xea   : > { %v614_v32 = vmax.f32 %v550_v31, 0.0  ;;  %7549 = vmatmul.msk.bf16.vlgmr.msrb.gmra.mxu0 %vm637_vm2, %v791_v16 }
  0xeb   : > { %v768_v2 = vld [vmem:[#allocation2 + $0x78] sm:$0xff] }
  0xec   : > { %v723_v33 = vld [vmem:[#allocation2 + $0x87] sm:$0x1]  ;;  %648 = vst.msk [vmem:[#allocation2 + $0x91] sm:$0xff] %vm637_vm2, %v614_v32 }
  0xed   : > { %741 = vst.msk [vmem:[#allocation2 + $0x89] sm:$0x1] %vm699_vm3, %v723_v33  ;;  %v769_v3 = vld [vmem:[#allocation2 + $0x80] sm:$0xff] }
  0xee   : > { %v1018_v4 = vld [vmem:[#allocation2 + $0x81] sm:$0xff]  ;;  %v795_v7 = vpack.c.bf16 %v769_v3, %v768_v2 }
  0xef   : > { %v551_v34 = vpop.f32.mrf.mxu0  ;;  %v8425_v8 = vpack.c.bf16 %v1018_v4, %v1017_v6 }
  0xf0   : > { %v552_v35 = vadd.f32 %v8286_v14, %v551_v34 }
  0xf2   : > { %v615_v36 = vmax.f32 %v552_v35, 0.0 }
  0xf3   : > { %v687_v37 = vld [vmem:[#allocation2 + $0x92] sm:$0x1] }
  0xf4   : > { %706 = vst.msk [vmem:[#allocation2 + $0x90] sm:$0x1] %vm699_vm3, %v687_v37  ;;  %v1019_v23 = vld [vmem:[#allocation2 + $0x91] sm:$0xff] }
  0xf5   : > { %649 = vst.msk [vmem:[#allocation2 + $0x99] sm:$0xff] %vm637_vm2, %v615_v36 }
  0xf7   : > { %v554_v44 = vpop.f32.mrf.mxu0 }
  0xf8   : > { %v555_v45 = vadd.f32 %v8286_v14, %v554_v44  ;;  %7432 = vmatmul.msk.bf16.gmra.mxu1 %vm637_vm2, %v793_v42 }
  0xf9   : > { %7472 = vmatmul.msk.bf16.gmra.mxu2 %vm637_vm2, %v8398_v43 }
  0xfa   : > { %v616_v46 = vmax.f32 %v555_v45, 0.0  ;;  %7550 = vmatmul.msk.bf16.gmra.mxu0 %vm637_vm2, %v792_v28  ;;  %v589_v45 = vpop.f32.mrf.mxu3 }
  0xfb   : > { %v770_v20 = vld [vmem:[#allocation2 + $0x90] sm:$0xff]  ;;  %v590_v53 = vadd.f32 %v8286_v14, %v589_v45 }
  0xfc   : > { %v724_v47 = vld [vmem:[#allocation2 + $0x9f] sm:$0x1]  ;;  %650 = vst.msk [vmem:[#allocation2 + $0xa9] sm:$0xff] %vm637_vm2, %v616_v46 }
  0xfd   : > { %742 = vst.msk [vmem:[#allocation2 + $0xa1] sm:$0x1] %vm699_vm3, %v724_v47  ;;  %v771_v21 = vld [vmem:[#allocation2 + $0x98] sm:$0xff] }
  0xfe   : > { %v1020_v22 = vld [vmem:[#allocation2 + $0x99] sm:$0xff]  ;;  %v796_v24 = vpack.c.bf16 %v771_v21, %v770_v20 }
  0xff   : > { %v556_v48 = vpop.f32.mrf.mxu0  ;;  %v8439_v25 = vpack.c.bf16 %v1020_v22, %v1019_v23 }
 0x100   : > { %v557_v49 = vadd.f32 %v8286_v14, %v556_v48 }
 0x102   : > { %v617_v50 = vmax.f32 %v557_v49, 0.0 }
 0x103   : > { %v688_v51 = vld [vmem:[#allocation2 + $0xaa] sm:$0x1] }
 0x104   : > { %707 = vst.msk [vmem:[#allocation2 + $0xa8] sm:$0x1] %vm699_vm3, %v688_v51  ;;  %v1021_v38 = vld [vmem:[#allocation2 + $0xa9] sm:$0xff] }
 0x105   : > { %651 = vst.msk [vmem:[#allocation2 + $0xb1] sm:$0xff] %vm637_vm2, %v617_v50  ;;  %v591_v50 = vpop.f32.mrf.mxu3 }
 0x106   : > { %v592_v54 = vadd.f32 %v8286_v14, %v591_v50  ;;  %v8055_v50 = vld [vmem:[%s11677_s3 + $0xb0] sm:$0xff] }
 0x107   : > { %v559_v58 = vpop.f32.mrf.mxu0 }
 0x108   : > { %v560_v59 = vadd.f32 %v8286_v14, %v559_v58  ;;  %7433 = vmatmul.msk.bf16.gmra.mxu1 %vm637_vm2, %v794_v56  ;;  %v8051_v58 = vld [vmem:[%s11677_s3 + $0x90] sm:$0xff] }
 0x109   : > { %7473 = vmatmul.msk.bf16.gmra.mxu2 %vm637_vm2, %v8410_v57  ;;  %1891 = vmatpush.bf16.msrb.mxu1 %v8051_v58  ;;  %v8050_v58 = vld [vmem:[%s11677_s3 + $0x88] sm:$0xff] }
 0x10a   : > { %v618_v60 = vmax.f32 %v560_v59, 0.0  ;;  %7551 = vmatmul.msk.bf16.gmra.mxu0 %vm637_vm2, %v793_v42  ;;  %v630_v59 = vmax.f32 %v590_v53, 0.0 }
 0x10b   : > { %v772_v35 = vld [vmem:[#allocation2 + $0xa8] sm:$0xff] }
 0x10c   : > { %v725_v61 = vld [vmem:[#allocation2 + $0xb7] sm:$0x1]  ;;  %652 = vst.msk [vmem:[#allocation2 + $0xc1] sm:$0xff] %vm637_vm2, %v618_v60  ;;  %v631_v60 = vmax.f32 %v592_v54, 0.0 }
 0x10d   : > { %743 = vst.msk [vmem:[#allocation2 + $0xb9] sm:$0x1] %vm699_vm3, %v725_v61  ;;  %v773_v36 = vld [vmem:[#allocation2 + $0xb0] sm:$0xff]  ;;  %v594_v5 = vpop.f32.mrf.mxu3  ;;  %1892 = vmatpush.bf16.msrb.mxu1 %v8050_v58 }
 0x10e   : > { %v1022_v37 = vld [vmem:[#allocation2 + $0xb1] sm:$0xff]  ;;  %v797_v39 = vpack.c.bf16 %v773_v36, %v772_v35  ;;  %664 = vst.msk [vmem:[#allocation2 + $0x151] sm:$0xff] %vm637_vm2, %v630_v59  ;;  %v8054_v59 = vld [vmem:[%s11677_s3 + $0xa8] sm:$0xff] }
 0x10f   : > { %v561_v62 = vpop.f32.mrf.mxu0  ;;  %v8451_v40 = vpack.c.bf16 %v1022_v37, %v1021_v38  ;;  %665 = vst.msk [vmem:[#allocation2 + $0x159] sm:$0xff] %vm637_vm2, %v631_v60 }
 0x110   : > { %v562_v63 = vadd.f32 %v8286_v14, %v561_v62 }
 0x112   : > { %v619_v0 = vmax.f32 %v562_v63, 0.0  ;;  %v8471_v63 = vld [vmem:[%s11678_s4] ss:$0 sm:$0xff] }
 0x113   : > { %v689_v1 = vld [vmem:[#allocation2 + $0xc2] sm:$0x1] }
 0x114   : > { %708 = vst.msk [vmem:[#allocation2 + $0xc0] sm:$0x1] %vm699_vm3, %v689_v1  ;;  %v1023_v62 = vld [vmem:[#allocation2 + $0xc1] sm:$0xff] }
 0x115   : > { %653 = vst.msk [vmem:[#allocation2 + $0xc9] sm:$0xff] %vm637_vm2, %v619_v0  ;;  %v596_v21 = vpop.f32.mrf.mxu3 }
 0x117   : > { %v564_v9 = vpop.f32.mrf.mxu0 }
 0x118   : > { %v565_v10 = vadd.f32 %v8286_v14, %v564_v9  ;;  %7434 = vmatmul.msk.bf16.gmra.mxu1 %vm637_vm2, %v795_v7 }
 0x119   : > { %7474 = vmatmul.msk.bf16.gmra.mxu2 %vm637_vm2, %v8425_v8 }
 0x11a   : > { %v620_v11 = vmax.f32 %v565_v10, 0.0  ;;  %7552 = vmatmul.msk.bf16.gmra.mxu0 %vm637_vm2, %v794_v56 }
 0x11b   : > { %v774_v52 = vld [vmem:[#allocation2 + $0xc0] sm:$0xff] }
 0x11c   : > { %v726_v12 = vld [vmem:[#allocation2 + $0xcf] sm:$0x1]  ;;  %654 = vst.msk [vmem:[#allocation2 + $0xd9] sm:$0xff] %vm637_vm2, %v620_v11  ;;  %v595_v11 = vadd.f32 %v8286_v14, %v594_v5 }
 0x11d   : > { %744 = vst.msk [vmem:[#allocation2 + $0xd1] sm:$0x1] %vm699_vm3, %v726_v12  ;;  %v775_v55 = vld [vmem:[#allocation2 + $0xc8] sm:$0xff] }
 0x11e   : > { %v1024_v56 = vld [vmem:[#allocation2 + $0xc9] sm:$0xff]  ;;  %v798_v0 = vpack.c.bf16 %v775_v55, %v774_v52 }
 0x11f   : > { %v566_v13 = vpop.f32.mrf.mxu0  ;;  %v8473_v1 = vpack.c.bf16 %v1024_v56, %v1023_v62 }
 0x120   : > { %v567_v16 = vadd.f32 %v8286_v14, %v566_v13  ;;  %v695_v13 = vld [vmem:[#allocation2 + $0x152] sm:$0x1] }
 0x121   : > { %714 = vst.msk [vmem:[#allocation2 + $0x150] sm:$0x1] %vm699_vm3, %v695_v13 }
 0x122   : > { %v621_v18 = vmax.f32 %v567_v16, 0.0  ;;  %v732_v16 = vld [vmem:[#allocation2 + $0x15f] sm:$0x1] }
 0x123   : > { %v690_v19 = vld [vmem:[#allocation2 + $0xda] sm:$0x1]  ;;  %750 = vst.msk [vmem:[#allocation2 + $0x161] sm:$0x1] %vm699_vm3, %v732_v16 }
 0x124   : > { %709 = vst.msk [vmem:[#allocation2 + $0xd8] sm:$0x1] %vm699_vm3, %v690_v19 }
 0x125   : > { %655 = vst.msk [vmem:[#allocation2 + $0xe1] sm:$0xff] %vm637_vm2, %v621_v18  ;;  %v632_v18 = vmax.f32 %v595_v11, 0.0 }
 0x127   : > { %v569_v26 = vpop.f32.mrf.mxu0  ;;  %666 = vst.msk [vmem:[#allocation2 + $0x169] sm:$0xff] %vm637_vm2, %v632_v18 }
 0x128   : > { %v570_v27 = vadd.f32 %v8286_v14, %v569_v26  ;;  %7435 = vmatmul.msk.bf16.gmra.mxu1 %vm637_vm2, %v796_v24 }
 0x129   : > { %7475 = vmatmul.msk.bf16.gmra.mxu2 %vm637_vm2, %v8439_v25 }
 0x12a   : > { %v622_v28 = vmax.f32 %v570_v27, 0.0  ;;  %7553 = vmatmul.msk.bf16.gmra.mxu0 %vm637_vm2, %v795_v7 }
 0x12b   : > { %v776_v27 = vld [vmem:[#allocation2 + $0xd8] sm:$0xff] }
 0x12c   : > { %v727_v30 = vld [vmem:[#allocation2 + $0xe7] sm:$0x1]  ;;  %656 = vst.msk [vmem:[#allocation2 + $0xf1] sm:$0xff] %vm637_vm2, %v622_v28 }
 0x12d   : > { %745 = vst.msk [vmem:[#allocation2 + $0xe9] sm:$0x1] %vm699_vm3, %v727_v30  ;;  %v777_v28 = vld [vmem:[#allocation2 + $0xe0] sm:$0xff] }
 0x12e   : > { %v1026_v30 = vld [vmem:[#allocation2 + $0xe1] sm:$0xff]  ;;  %v8498_v35 = vpack.c.bf16 %v777_v28, %v776_v27 }
 0x12f   : > { %v571_v31 = vpop.f32.mrf.mxu0 }
 0x130   : > { %v572_v32 = vadd.f32 %v8286_v14, %v571_v31 }
 0x132   : > { %v623_v33 = vmax.f32 %v572_v32, 0.0 }
 0x133   : > { %v691_v34 = vld [vmem:[#allocation2 + $0xf2] sm:$0x1] }
 0x134   : > { %710 = vst.msk [vmem:[#allocation2 + $0xf0] sm:$0x1] %vm699_vm3, %v691_v34  ;;  %v1025_v34 = vld [vmem:[#allocation2 + $0xd9] sm:$0xff] }
 0x135   : > { %657 = vst.msk [vmem:[#allocation2 + $0xf9] sm:$0xff] %vm637_vm2, %v623_v33  ;;  %v8500_v36 = vpack.c.bf16 %v1026_v30, %v1025_v34 }
 0x137   : > { %v574_v41 = vpop.f32.mrf.mxu0 }
 0x138   : > { %v575_v42 = vadd.f32 %v8286_v14, %v574_v41  ;;  %7436 = vmatmul.msk.bf16.gmra.mxu1 %vm637_vm2, %v797_v39  ;;  %v696_v41 = vld [vmem:[#allocation2 + $0x16a] sm:$0x1] }
 0x139   : > { %7476 = vmatmul.msk.bf16.gmra.mxu2 %vm637_vm2, %v8451_v40  ;;  %715 = vst.msk [vmem:[#allocation2 + $0x168] sm:$0x1] %vm699_vm3, %v696_v41 }
 0x13a   : > { %v624_v44 = vmax.f32 %v575_v42, 0.0  ;;  %7554 = vmatmul.msk.bf16.gmra.mxu0 %vm637_vm2, %v796_v24  ;;  %v597_v24 = vadd.f32 %v8286_v14, %v596_v21  ;;  %v8056_v42 = vld [vmem:[%s11677_s3 + $0xb8] sm:$0xff] }
 0x13b   : > { %2140 = vmatpush.bf16.msrb.mxu2 %v8056_v42 }
 0x13c   : > { %v728_v46 = vld [vmem:[#allocation2 + $0xff] sm:$0x1]  ;;  %658 = vst.msk [vmem:[#allocation2 + $0x109] sm:$0xff] %vm637_vm2, %v624_v44  ;;  %v633_v32 = vmax.f32 %v597_v24, 0.0 }
 0x13d   : > { %746 = vst.msk [vmem:[#allocation2 + $0x101] sm:$0x1] %vm699_vm3, %v728_v46  ;;  %v1028_v5 = vld [vmem:[#allocation2 + $0xf9] sm:$0xff] }
 0x13e   : > { %667 = vst.msk [vmem:[#allocation2 + $0x171] sm:$0xff] %vm637_vm2, %v633_v32 }
 0x13f   : > { %v576_v47 = vpop.f32.mrf.mxu0  ;;  %2141 = vmatpush.bf16.msrb.mxu2 %v8055_v50 }
 0x140   : > { %v577_v48 = vadd.f32 %v8286_v14, %v576_v47 }
 0x142   : > { %v625_v49 = vmax.f32 %v577_v48, 0.0 }
 0x143   : > { %v692_v51 = vld [vmem:[#allocation2 + $0x10a] sm:$0x1]  ;;  %2142 = vmatpush.bf16.msrb.mxu2 %v8054_v59 }
 0x144   : > { %711 = vst.msk [vmem:[#allocation2 + $0x108] sm:$0x1] %vm699_vm3, %v692_v51 }
 0x145   : > { %659 = vst.msk [vmem:[#allocation2 + $0x111] sm:$0xff] %vm637_vm2, %v625_v49  ;;  %v895_v61 = vpop.f32.mrf.mxu1  ;;  %v8527_v54 = vld [vmem:[#allocation2 + $0x171] sm:$0xff] }
 0x146   : > { %v975_v6 = vadd.f32 %v8471_v63, %v895_v61  ;;  %v733_v55 = vld [vmem:[#allocation2 + $0x177] sm:$0x1]  ;;  %680 = vst.msk [vmem:[#allocation2 + $0x1a1] sm:$0xff] %vm637_vm2, %v8527_v54 }
 0x147   : > { %v579_v2 = vpop.f32.mrf.mxu0  ;;  %751 = vst.msk [vmem:[#allocation2 + $0x179] sm:$0x1] %vm699_vm3, %v733_v55 }
 0x148   : > { %v580_v3 = vadd.f32 %v8286_v14, %v579_v2  ;;  %7437 = vmatmul.msk.bf16.gmra.mxu1 %vm637_vm2, %v798_v0  ;;  %v778_v2 = vld [vmem:[#allocation2 + $0xf0] sm:$0xff] }
 0x149   : > { %7477 = vmatmul.msk.bf16.gmra.mxu2 %vm637_vm2, %v8473_v1 }
 0x14a   : > { %v626_v4 = vmax.f32 %v580_v3, 0.0  ;;  %7555 = vmatmul.msk.bf16.gmra.mxu0 %vm637_vm2, %v797_v39  ;;  %v8504_v39 = vld [vmem:[#allocation2 + $0x169] sm:$0xff]  ;;  %v779_v3 = vld [vmem:[#allocation2 + $0xf8] sm:$0xff] }
 0x14b   : > { %679 = vst.msk [vmem:[#allocation2 + $0x199] sm:$0xff] %vm637_vm2, %v8504_v39  ;;  %v800_v13 = vpack.c.bf16 %v779_v3, %v778_v2  ;;  %v1054_v18 = vpack.c.bf16 %v8527_v54, %v8504_v39  ;;  %v1258_v39 = vld [vmem:[#allocation2 + $0xa] sm:$0xff] }
 0x14c   : > { %v729_v7 = vld [vmem:[#allocation2 + $0x117] sm:$0x1]  ;;  %660 = vst.msk [vmem:[#allocation2 + $0x121] sm:$0xff] %vm637_vm2, %v626_v4  ;;  %v1145_v9 = vpop.f32.mrf.mxu2 }
 0x14d   : > { %747 = vst.msk [vmem:[#allocation2 + $0x119] sm:$0x1] %vm699_vm3, %v729_v7  ;;  %v8485_v10 = vadd.f32 %v1145_v9, %v975_v6  ;;  %v897_v12 = vpop.f32.mrf.mxu1  ;;  %v8049_v6 = vld [vmem:[%s11677_s3 + $0x80] sm:$0xff] }
 0x14e   : > { %v976_v23 = vadd.f32 %v8471_v63, %v897_v12  ;;  %v8053_v7 = vld [vmem:[%s11677_s3 + $0xa0] sm:$0xff]  ;;  %1893 = vmatpush.bf16.msrb.mxu1 %v8049_v6 }
 0x14f   : > { %v581_v15 = vpop.f32.mrf.mxu0  ;;  %v1027_v12 = vld [vmem:[#allocation2 + $0xf1] sm:$0xff]  ;;  %2143 = vmatpush.bf16.msrb.mxu2 %v8053_v7  ;;  %v788_v7 = vld [vmem:[#allocation2 + $0x168] sm:$0xff] }
 0x150   : > { %v582_v19 = vadd.f32 %v8286_v14, %v581_v15  ;;  %v8552_v15 = vpack.c.bf16 %v1028_v5, %v1027_v12 }
 0x152   : > { %v627_v20 = vmax.f32 %v582_v19, 0.0  ;;  %v735_v19 = vld [vmem:[#allocation2 + $0x1a7] sm:$0x1] }
 0x153   : > { %v693_v22 = vld [vmem:[#allocation2 + $0x122] sm:$0x1]  ;;  %753 = vst.msk [vmem:[#allocation2 + $0x1a9] sm:$0x1] %vm699_vm3, %v735_v19 }
 0x154   : > { %712 = vst.msk [vmem:[#allocation2 + $0x120] sm:$0x1] %vm699_vm3, %v693_v22  ;;  %v1147_v26 = vpop.f32.mrf.mxu2 }
 0x155   : > { %661 = vst.msk [vmem:[#allocation2 + $0x129] sm:$0xff] %vm637_vm2, %v627_v20  ;;  %v8496_v31 = vadd.f32 %v1147_v26, %v976_v23  ;;  %v900_v33 = vpop.f32.mrf.mxu1  ;;  %v698_v20 = vld [vmem:[#allocation2 + $0x19a] sm:$0x1] }
 0x156   : > { %v977_v45 = vadd.f32 %v8471_v63, %v900_v33  ;;  %717 = vst.msk [vmem:[#allocation2 + $0x198] sm:$0x1] %vm699_vm3, %v698_v20 }
 0x157   : > { %v584_v37 = vpop.f32.mrf.mxu0 }
 0x158   : > { %v585_v38 = vadd.f32 %v8286_v14, %v584_v37  ;;  %7438 = vmatmul.msk.bf16.gmra.mxu1 %vm637_vm2, %v8498_v35  ;;  %v781_v37 = vld [vmem:[#allocation2 + $0x110] sm:$0xff] }
 0x159   : > { %7478 = vmatmul.msk.bf16.gmra.mxu2 %vm637_vm2, %v8500_v36 }
 0x15a   : > { %v628_v44 = vmax.f32 %v585_v38, 0.0  ;;  %7556 = vmatmul.msk.bf16.gmra.mxu0 %vm637_vm2, %v798_v0  ;;  %v1030_v38 = vld [vmem:[#allocation2 + $0x111] sm:$0xff] }
 0x15b   : > { %v782_v46 = vld [vmem:[#allocation2 + $0x120] sm:$0xff] }
 0x15c   : > { %v730_v47 = vld [vmem:[#allocation2 + $0x12f] sm:$0x1]  ;;  %662 = vst.msk [vmem:[#allocation2 + $0x139] sm:$0xff] %vm637_vm2, %v628_v44  ;;  %v1150_v48 = vpop.f32.mrf.mxu2 }
 0x15d   : > { %v783_v49 = vld [vmem:[#allocation2 + $0x128] sm:$0xff]  ;;  %748 = vst.msk [vmem:[#allocation2 + $0x131] sm:$0x1] %vm699_vm3, %v730_v47  ;;  %v8523_v51 = vadd.f32 %v1150_v48, %v977_v45  ;;  %v902_v53 = vpop.f32.mrf.mxu1  ;;  %v786_v48 = vld [vmem:[#allocation2 + $0x150] sm:$0xff] }
 0x15e   : > { %v8525_v52 = vpack.c.bf16 %v783_v49, %v782_v46  ;;  %v978_v0 = vadd.f32 %v8471_v63, %v902_v53  ;;  %v1029_v44 = vld [vmem:[#allocation2 + $0x109] sm:$0xff]  ;;  %v787_v49 = vld [vmem:[#allocation2 + $0x158] sm:$0xff] }
 0x15f   : > { %v586_v56 = vpop.f32.mrf.mxu0  ;;  %v8578_v46 = vpack.c.bf16 %v1030_v38, %v1029_v44  ;;  %v1032_v38 = vld [vmem:[#allocation2 + $0x129] sm:$0xff] }
 0x160   : > { %7441 = vmatmul.msk.bf16.vlgmr.msrb.gmra.mxu3 %vm637_vm2, %v8525_v52  ;;  %v587_v60 = vadd.f32 %v8286_v14, %v586_v56  ;;  %v8589_v56 = vpack.c.bf16 %v787_v49, %v786_v48 }
 0x162   : > { %v629_v61 = vmax.f32 %v587_v60, 0.0  ;;  %v8044_v60 = vld [vmem:[%s11677_s3 + $0x58] sm:$0xff] }
 0x163   : > { %v694_v62 = vld [vmem:[#allocation2 + $0x13a] sm:$0x1]  ;;  %1390 = vmatpush.bf16.msrb.mxu3 %v8044_v60  ;;  %v2012_v60 = vld [vmem:[#allocation2 + $0x52] sm:$0xff] }
 0x164   : > { %713 = vst.msk [vmem:[#allocation2 + $0x138] sm:$0x1] %vm699_vm3, %v694_v62  ;;  %v1152_v4 = vpop.f32.mrf.mxu2 }
 0x165   : > { %663 = vst.msk [vmem:[#allocation2 + $0x141] sm:$0xff] %vm637_vm2, %v629_v61  ;;  %v8550_v9 = vadd.f32 %v1152_v4, %v978_v0  ;;  %v905_v11 = vpop.f32.mrf.mxu1  ;;  %v2008_v0 = vld [vmem:[#allocation2 + $0x22] sm:$0xff]  ;;  %v2007_v4 = vld [vmem:[#allocation2 + $0x1a] sm:$0xff] }
 0x166   : > { %v979_v21 = vadd.f32 %v8471_v63, %v905_v11  ;;  %v8601_v5 = vpack.c.bf16 %v2008_v0, %v2007_v4  ;;  %v789_v11 = vld [vmem:[#allocation2 + $0x170] sm:$0xff] }
 0x167   : > { %v8554_v16 = vpop.f32.mrf.mxu0  ;;  %v8613_v20 = vpack.c.bf16 %v789_v11, %v788_v7  ;;  %v2011_v4 = vld [vmem:[#allocation2 + $0x4a] sm:$0xff] }
 0x168   : > { %11685 = vst [vmem:[#allocation6_spill] sm:$0xff] %v8554_v16  ;;  %7439 = vmatmul.msk.bf16.gmra.mxu1 %vm637_vm2, %v800_v13  ;;  %v8651_v7 = vpack.c.bf16 %v2012_v60, %v2011_v4  ;;  %v1036_v4 = vld [vmem:[#allocation2 + $0x159] sm:$0xff]  ;;  %v2511_v16 = vld [vmem:[#allocation2 + $0x61] sm:$0xff] }
 0x169   : > { %7479 = vmatmul.msk.bf16.gmra.mxu2 %vm637_vm2, %v8552_v15 }
 0x16a   : > { %7557 = vmatmul.msk.bf16.gmra.mxu0 %vm637_vm2, %v8498_v35  ;;  %v780_v35 = vld [vmem:[#allocation2 + $0x108] sm:$0xff] }
 0x16b   : > { %v784_v22 = vld [vmem:[#allocation2 + $0x138] sm:$0xff]  ;;  %v801_v45 = vpack.c.bf16 %v781_v37, %v780_v35 }
 0x16c   : > { %v731_v23 = vld [vmem:[#allocation2 + $0x147] sm:$0x1]  ;;  %v1155_v24 = vpop.f32.mrf.mxu2 }
 0x16d   : > { %v785_v26 = vld [vmem:[#allocation2 + $0x140] sm:$0xff]  ;;  %749 = vst.msk [vmem:[#allocation2 + $0x149] sm:$0x1] %vm699_vm3, %v731_v23  ;;  %v8567_v27 = vadd.f32 %v1155_v24, %v979_v21  ;;  %v907_v30 = vpop.f32.mrf.mxu1 }
 0x16e   : > { %v8569_v28 = vpack.c.bf16 %v785_v26, %v784_v22  ;;  %v980_v33 = vadd.f32 %v8471_v63, %v907_v30  ;;  %v2010_v26 = vld [vmem:[#allocation2 + $0x3a] sm:$0xff] }
 0x16f   : > { %v8573_v32 = vpop.f32.mrf.mxu0 }
 0x170   : > { %7442 = vmatmul.msk.bf16.gmra.mxu3 %vm637_vm2, %v8569_v28  ;;  %11686 = vst [vmem:[#allocation7_spill] sm:$0xff] %v8573_v32 }
 0x174   : > { %v1157_v34 = vpop.f32.mrf.mxu2 }
 0x175   : > { %v8576_v41 = vadd.f32 %v1157_v34, %v980_v33  ;;  %v910_v42 = vpop.f32.mrf.mxu1  ;;  %v2009_v34 = vld [vmem:[#allocation2 + $0x32] sm:$0xff] }
 0x176   : > { %v981_v50 = vadd.f32 %v8471_v63, %v910_v42  ;;  %v8625_v35 = vpack.c.bf16 %v2010_v26, %v2009_v34 }
 0x177   : > { %v8580_v47 = vpop.f32.mrf.mxu0 }
 0x178   : > { %11687 = vst [vmem:[#allocation8_spill] sm:$0xff] %v8580_v47  ;;  %7440 = vmatmul.msk.bf16.gmra.mxu1 %vm637_vm2, %v801_v45  ;;  %v2023_v47 = vld [vmem:[#allocation2 + $0xda] sm:$0xff] }
 0x179   : > { %7480 = vmatmul.msk.bf16.gmra.mxu2 %vm637_vm2, %v8578_v46 }
 0x17a   : > { %7558 = vmatmul.msk.bf16.gmra.mxu0 %vm637_vm2, %v800_v13 }
 0x17c   : > { %v1160_v53 = vpop.f32.mrf.mxu2 }
 0x17d   : > { %v8587_v55 = vadd.f32 %v1160_v53, %v981_v50  ;;  %v912_v58 = vpop.f32.mrf.mxu1  ;;  %v8042_v53 = vld [vmem:[%s11677_s3 + $0x48] sm:$0xff] }
 0x17e   : > { %v982_v61 = vadd.f32 %v8471_v63, %v912_v58 }
 0x17f   : > { %v8593_v59 = vpop.f32.mrf.mxu0 }
 0x180   : > { %7443 = vmatmul.msk.bf16.gmra.mxu3 %vm637_vm2, %v8589_v56  ;;  %11688 = vst [vmem:[#allocation9_spill] sm:$0xff] %v8593_v59 }
 0x184   : > { %v1162_v62 = vpop.f32.mrf.mxu2 }
 0x185   : > { %v8599_v2 = vadd.f32 %v1162_v62, %v982_v61  ;;  %v915_v3 = vpop.f32.mrf.mxu1  ;;  %v599_v61 = vpop.f32.mrf.mxu3 }
 0x186   : > { %v983_v12 = vadd.f32 %v8471_v63, %v915_v3  ;;  %v600_v0 = vadd.f32 %v8286_v14, %v599_v61 }
 0x187   : > { %v8603_v6 = vpop.f32.mrf.mxu0 }
 0x188   : > { %11689 = vst [vmem:[#allocation10_spill] sm:$0xff] %v8603_v6  ;;  %7589 = vmatmul.msk.bf16.vlgmr.msrb.gmra.mxu1 %vm637_vm2, %v8372_v17  ;;  %v8043_v17 = vld [vmem:[%s11677_s3 + $0x50] sm:$0xff] }
 0x189   : > { %7629 = vmatmul.msk.bf16.vlgmr.msrb.gmra.mxu2 %vm637_vm2, %v8601_v5  ;;  %1391 = vmatpush.bf16.msrb.mxu3 %v8043_v17 }
 0x18a   : > { %7559 = vmatmul.msk.bf16.gmra.mxu0 %vm637_vm2, %v801_v45  ;;  %v1031_v45 = vld [vmem:[#allocation2 + $0x121] sm:$0xff] }
 0x18b   : > { %v8638_v49 = vpack.c.bf16 %v1032_v38, %v1031_v45 }
 0x18c   : > { %v1165_v13 = vpop.f32.mrf.mxu2 }
 0x18d   : > { %v8611_v19 = vadd.f32 %v1165_v13, %v983_v12  ;;  %v917_v21 = vpop.f32.mrf.mxu1  ;;  %1392 = vmatpush.bf16.msrb.mxu3 %v8042_v53  ;;  %v634_v12 = vmax.f32 %v600_v0, 0.0  ;;  %v1034_v13 = vld [vmem:[#allocation2 + $0x141] sm:$0xff] }
 0x18e   : > { %v984_v23 = vadd.f32 %v8471_v63, %v917_v21 }
 0x18f   : > { %v8617_v22 = vpop.f32.mrf.mxu0  ;;  %668 = vst.msk [vmem:[#allocation2 + $0x181] sm:$0xff] %vm637_vm2, %v634_v12 }
 0x190   : > { %7444 = vmatmul.msk.bf16.gmra.mxu3 %vm637_vm2, %v8613_v20  ;;  %11690 = vst [vmem:[#allocation11_spill] sm:$0xff] %v8617_v22 }
 0x194   : > { %v1167_v24 = vpop.f32.mrf.mxu2 }
 0x195   : > { %v8623_v30 = vadd.f32 %v1167_v24, %v984_v23  ;;  %v920_v33 = vpop.f32.mrf.mxu1  ;;  %v1033_v23 = vld [vmem:[#allocation2 + $0x139] sm:$0xff]  ;;  %v601_v24 = vpop.f32.mrf.mxu3 }
 0x196   : > { %v985_v42 = vadd.f32 %v8471_v63, %v920_v33  ;;  %v8665_v33 = vpack.c.bf16 %v1034_v13, %v1033_v23 }
 0x197   : > { %v8627_v37 = vpop.f32.mrf.mxu0 }
 0x198   : > { %11691 = vst [vmem:[#allocation12_spill] sm:$0xff] %v8627_v37  ;;  %7590 = vmatmul.msk.bf16.gmra.mxu1 %vm637_vm2, %v8386_v29 }
 0x199   : > { %7630 = vmatmul.msk.bf16.gmra.mxu2 %vm637_vm2, %v8625_v35 }
 0x19a   : > { %7560 = vmatmul.msk.bf16.gmra.mxu0 %vm637_vm2, %v8525_v52 }
 0x19c   : > { %v1170_v44 = vpop.f32.mrf.mxu2 }
 0x19d   : > { %v8636_v48 = vadd.f32 %v1170_v44, %v985_v42  ;;  %v922_v50 = vpop.f32.mrf.mxu1  ;;  %v697_v44 = vld [vmem:[#allocation2 + $0x182] sm:$0x1] }
 0x19e   : > { %v986_v52 = vadd.f32 %v8471_v63, %v922_v50  ;;  %716 = vst.msk [vmem:[#allocation2 + $0x180] sm:$0x1] %vm699_vm3, %v697_v44  ;;  %v2014_v50 = vld [vmem:[#allocation2 + $0x6a] sm:$0xff] }
 0x19f   : > { %v8642_v29 = vpop.f32.mrf.mxu0 }
 0x1a0   : > { %7481 = vmatmul.msk.bf16.vlgmr.msra.gmra.mxu3 %vm637_vm2, %v8638_v49  ;;  %11692 = vst [vmem:[#allocation13_spill] sm:$0xff] %v8642_v29 }
 0x1a4   : > { %v1172_v58 = vpop.f32.mrf.mxu2 }
 0x1a5   : > { %v8648_v62 = vadd.f32 %v1172_v58, %v986_v52  ;;  %v925_v3 = vpop.f32.mrf.mxu1  ;;  %v2013_v58 = vld [vmem:[#allocation2 + $0x62] sm:$0xff] }
 0x1a6   : > { %v987_v21 = vadd.f32 %v8471_v63, %v925_v3  ;;  %v8680_v60 = vpack.c.bf16 %v2014_v50, %v2013_v58  ;;  %v1035_v3 = vld [vmem:[#allocation2 + $0x151] sm:$0xff]  ;;  %v2015_v50 = vld [vmem:[#allocation2 + $0x7a] sm:$0xff] }
 0x1a7   : > { %v8653_v11 = vpop.f32.mrf.mxu0  ;;  %v8061_v58 = vld [vmem:[%s11677_s3 + $0xe0] sm:$0xff] }
 0x1a8   : > { %7591 = vmatmul.msk.bf16.gmra.mxu1 %vm637_vm2, %v8398_v43  ;;  %v602_v43 = vadd.f32 %v8286_v14, %v601_v24  ;;  %v8063_v24 = vld [vmem:[%s11677_s3 + $0xf0] sm:$0xff] }
 0x1a9   : > { %7631 = vmatmul.msk.bf16.gmra.mxu2 %vm637_vm2, %v8651_v7 }
 0x1aa   : > { %7561 = vmatmul.msk.bf16.gmra.mxu0 %vm637_vm2, %v8569_v28  ;;  %v635_v42 = vmax.f32 %v602_v43, 0.0  ;;  %v8041_v28 = vld [vmem:[%s11677_s3 + $0x40] sm:$0xff] }
 0x1ab   : > { %1393 = vmatpush.bf16.msrb.mxu3 %v8041_v28  ;;  %v2016_v28 = vld [vmem:[#allocation2 + $0x82] sm:$0xff] }
 0x1ac   : > { %v1175_v17 = vpop.f32.mrf.mxu2  ;;  %669 = vst.msk [vmem:[#allocation2 + $0x189] sm:$0xff] %vm637_vm2, %v635_v42 }
 0x1ad   : > { %v8663_v26 = vadd.f32 %v1175_v17, %v987_v21  ;;  %v927_v34 = vpop.f32.mrf.mxu1  ;;  %v8064_v21 = vld [vmem:[%s11677_s3 + $0xf8] sm:$0xff] }
 0x1ae   : > { %v988_v45 = vadd.f32 %v8471_v63, %v927_v34  ;;  %2640 = vmatpush.bf16.msra.mxu0 %v8064_v21 }
 0x1af   : > { %v8670_v38 = vpop.f32.mrf.mxu0 }
 0x1b0   : > { %7482 = vmatmul.msk.bf16.gmra.mxu3 %vm637_vm2, %v8665_v33 }
 0x1b2   : > { %2641 = vmatpush.bf16.msra.mxu0 %v8063_v24  ;;  %v2018_v24 = vld [vmem:[#allocation2 + $0x9a] sm:$0xff] }
 0x1b3   : > { %v734_v0 = vld [vmem:[#allocation2 + $0x18f] sm:$0x1] }
 0x1b4   : > { %v1177_v14 = vpop.f32.mrf.mxu2  ;;  %752 = vst.msk [vmem:[#allocation2 + $0x191] sm:$0x1] %vm699_vm3, %v734_v0  ;;  %v8068_v0 = vld [vmem:[%s11677_s3 + $0x118] sm:$0xff]  ;;  %vm7211_vm3 = vcmask 786112  }
 0x1b5   : > { %v8678_v53 = vadd.f32 %v1177_v14, %v988_v45  ;;  %v930_v52 = vpop.f32.mrf.mxu1  ;;  %v8062_v45 = vld [vmem:[%s11677_s3 + $0xe8] sm:$0xff]  ;;  %2890 = vmatpush.bf16.msra.mxu1 %v8068_v0 }
 0x1b6   : > { %v989_v12 = vadd.f32 %v8471_v63, %v930_v52  ;;  %v8715_v52 = vpack.c.bf16 %v2016_v28, %v2015_v50  ;;  %2642 = vmatpush.bf16.msra.mxu0 %v8062_v45  ;;  %v2017_v45 = vld [vmem:[#allocation2 + $0x92] sm:$0xff]  ;;  %v1257_v0 = vld [vmem:[#allocation2 + $0x2] sm:$0xff] }
 0x1b7   : > { %v8682_v61 = vpop.f32.mrf.mxu0  ;;  %v8743_v50 = vpack.c.bf16 %v2018_v24, %v2017_v45  ;;  %v2508_v45 = vld [vmem:[#allocation2 + $0x39] sm:$0xff] }
 0x1b8   : > { %7592 = vmatmul.msk.bf16.gmra.mxu1 %vm637_vm2, %v8410_v57  ;;  %v8697_v57 = vpack.c.bf16 %v1036_v4, %v1035_v3 }
 0x1b9   : > { %7632 = vmatmul.msk.bf16.gmra.mxu2 %vm637_vm2, %v8680_v60 }
 0x1ba   : > { %7562 = vmatmul.msk.bf16.gmra.mxu0 %vm637_vm2, %v8589_v56  ;;  %v8060_v56 = vld [vmem:[%s11677_s3 + $0xd8] sm:$0xff] }
 0x1bb   : > { %2390 = vmatpush.bf16.msra.mxu3 %v8060_v56  ;;  %2643 = vmatpush.bf16.msra.mxu0 %v8061_v58  ;;  %v1538_v56 = vld [vmem:[#allocation2 + $0x188] sm:$0xff] }
 0x1bc   : > { %v1180_v13 = vpop.f32.mrf.mxu2 }
 0x1bd   : > { %v8695_v17 = vadd.f32 %v1180_v13, %v989_v12  ;;  %v932_v23 = vpop.f32.mrf.mxu1 }
 0x1be   : > { %v990_v34 = vadd.f32 %v8471_v63, %v932_v23  ;;  %v1537_v23 = vld [vmem:[#allocation2 + $0x180] sm:$0xff] }
 0x1bf   : > { %v8707_v43 = vpop.f32.mrf.mxu0 }
 0x1c0   : > { %7483 = vmatmul.msk.bf16.gmra.mxu3 %vm637_vm2, %v8697_v57 }
 0x1c4   : > { %v1182_v42 = vpop.f32.mrf.mxu2 }
 0x1c5   : > { %v8710_v44 = vadd.f32 %v1182_v42, %v990_v34  ;;  %v935_v14 = vpop.f32.mrf.mxu1 }
 0x1c6   : > { %v991_v3 = vadd.f32 %v8471_v63, %v935_v14  ;;  %v1554_v14 = vpack.c.bf16 %v1538_v56, %v1537_v23 }
 0x1c7   : > { %v8730_v4 = vpop.f32.mrf.mxu0 }
 0x1c8   : > { %7593 = vmatmul.msk.bf16.gmra.mxu1 %vm637_vm2, %v8425_v8 }
 0x1c9   : > { %7633 = vmatmul.msk.bf16.gmra.mxu2 %vm637_vm2, %v8715_v52 }
 0x1ca   : > { %7563 = vmatmul.msk.bf16.gmra.mxu0 %vm637_vm2, %v8613_v20 }
 0x1cc   : > { %v1185_v8 = vpop.f32.mrf.mxu2 }
 0x1cd   : > { %v8732_v12 = vadd.f32 %v1185_v8, %v991_v3  ;;  %v937_v13 = vpop.f32.mrf.mxu1  ;;  %v1289_v8 = vpack.c.bf16 %v1258_v39, %v1257_v0 }
 0x1ce   : > { %v992_v21 = vadd.f32 %v8471_v63, %v937_v13 }
 0x1cf   : > { %v8741_v42 = vpop.f32.mrf.mxu0 }
 0x1d0   : > { %7484 = vmatmul.msk.bf16.gmra.mxu3 %vm637_vm2, %v1054_v18 }
 0x1d4   : > { %v1187_v20 = vpop.f32.mrf.mxu2 }
 0x1d5   : > { %v8739_v34 = vadd.f32 %v1187_v20, %v992_v21  ;;  %v940_v28 = vpop.f32.mrf.mxu1  ;;  %v2020_v20 = vld [vmem:[#allocation2 + $0xb2] sm:$0xff] }
 0x1d6   : > { %v993_v18 = vadd.f32 %v8471_v63, %v940_v28 }
 0x1d7   : > { %v8754_v21 = vpop.f32.mrf.mxu0 }
 0x1d8   : > { %7594 = vmatmul.msk.bf16.gmra.mxu1 %vm637_vm2, %v8439_v25 }
 0x1d9   : > { %7634 = vmatmul.msk.bf16.gmra.mxu2 %vm637_vm2, %v8743_v50 }
 0x1da   : > { %7564 = vmatmul.msk.bf16.gmra.mxu0 %vm637_vm2, %v1554_v14  ;;  %v2019_v14 = vld [vmem:[#allocation2 + $0xaa] sm:$0xff] }
 0x1db   : > { %v8761_v29 = vpack.c.bf16 %v2020_v20, %v2019_v14 }
 0x1dc   : > { %v1190_v58 = vpop.f32.mrf.mxu2 }
 0x1dd   : > { %v8751_v3 = vadd.f32 %v1190_v58, %v993_v18  ;;  %v942_v13 = vpop.f32.mrf.mxu1  ;;  %v2507_v18 = vld [vmem:[#allocation2 + $0x31] sm:$0xff] }
 0x1de   : > { %v994_v25 = vadd.f32 %v8471_v63, %v942_v13  ;;  %v2539_v39 = vpack.c.bf16 %v2508_v45, %v2507_v18  ;;  %v2022_v18 = vld [vmem:[#allocation2 + $0xca] sm:$0xff] }
 0x1df   : > { %v8767_v58 = vpop.f32.mrf.mxu0 }
 0x1e0   : > { %7509 = vmatmul.msk.bf16.vlgmr.msrb.gmra.mxu3 %vm637_vm2, %v1289_v8 }
 0x1e3   : > { %v8756_v23 = vpop.f32.mrf.mxu3 }
 0x1e4   : > { %v1192_v56 = vpop.f32.mrf.mxu2 }
 0x1e5   : > { %v8759_v24 = vadd.f32 %v1192_v56, %v994_v25  ;;  %v945_v28 = vpop.f32.mrf.mxu1 }
 0x1e6   : > { %v995_v8 = vadd.f32 %v8471_v63, %v945_v28  ;;  %v2021_v28 = vld [vmem:[#allocation2 + $0xc2] sm:$0xff] }
 0x1e7   : > { %11693 = vst [vmem:[#allocation14_spill] sm:$0xff] %v8759_v24  ;;  %v8780_v45 = vpop.f32.mrf.mxu0  ;;  %v8784_v6 = vpack.c.bf16 %v2022_v18, %v2021_v28 }
 0x1e8   : > { %7595 = vmatmul.msk.bf16.gmra.mxu1 %vm637_vm2, %v8451_v40 }
 0x1e9   : > { %7635 = vmatmul.msk.bf16.gmra.mxu2 %vm637_vm2, %v8761_v29 }
 0x1ea   : > { %7709 = vmatmul.msk.bf16.vlgmr.msra.gmra.mxu0 %vm637_vm2, %v2539_v39  ;;  %v2510_v39 = vld [vmem:[#allocation2 + $0x51] sm:$0xff] }
 0x1eb   : > { %v8769_v0 = vpop.f32.mrf.mxu3 }
 0x1ec   : > { %v1195_v13 = vpop.f32.mrf.mxu2 }
 0x1ed   : > { %v8773_v25 = vadd.f32 %v1195_v13, %v995_v8  ;;  %v947_v56 = vpop.f32.mrf.mxu1  ;;  %v2509_v8 = vld [vmem:[#allocation2 + $0x49] sm:$0xff] }
 0x1ee   : > { %v996_v40 = vadd.f32 %v8471_v63, %v947_v56  ;;  %v2540_v13 = vpack.c.bf16 %v2510_v39, %v2509_v8 }
 0x1ef   : > { %11694 = vst [vmem:[#allocation15_spill] sm:$0xff] %v8773_v25  ;;  %v8796_v59 = vpop.f32.mrf.mxu0 }
 0x1f0   : > { %7510 = vmatmul.msk.bf16.gmra.mxu3 %vm637_vm2, %v8601_v5 }
 0x1f3   : > { %v8777_v20 = vpop.f32.mrf.mxu3 }
 0x1f4   : > { %v1197_v14 = vpop.f32.mrf.mxu2 }
 0x1f5   : > { %v8782_v37 = vadd.f32 %v1197_v14, %v996_v40  ;;  %v950_v22 = vpop.f32.mrf.mxu1 }
 0x1f6   : > { %v997_v56 = vadd.f32 %v8471_v63, %v950_v22  ;;  %v2024_v22 = vld [vmem:[#allocation2 + $0xe2] sm:$0xff] }
 0x1f7   : > { %11695 = vst [vmem:[#allocation16_spill] sm:$0xff] %v8782_v37  ;;  %v8810_v32 = vpack.c.bf16 %v2024_v22, %v2023_v47 }
 0x1f8   : > { %7596 = vmatmul.msk.bf16.gmra.mxu1 %vm637_vm2, %v8473_v1  ;;  %v8059_v1 = vld [vmem:[%s11677_s3 + $0xd0] sm:$0xff] }
 0x1f9   : > { %7636 = vmatmul.msk.bf16.gmra.mxu2 %vm637_vm2, %v8784_v6  ;;  %2391 = vmatpush.bf16.msra.mxu3 %v8059_v1 }
 0x1fa   : > { %7710 = vmatmul.msk.bf16.gmra.mxu0 %vm637_vm2, %v2540_v13 }
 0x1fb   : > { %v8790_v5 = vpop.f32.mrf.mxu3 }
 0x1fc   : > { %v1200_v40 = vpop.f32.mrf.mxu2 }
 0x1fd   : > { %v8794_v14 = vadd.f32 %v1200_v40, %v997_v56  ;;  %v952_v18 = vpop.f32.mrf.mxu1  ;;  %v2512_v56 = vld [vmem:[#allocation2 + $0x69] sm:$0xff] }
 0x1fe   : > { %v998_v28 = vadd.f32 %v8471_v63, %v952_v18  ;;  %v2541_v37 = vpack.c.bf16 %v2512_v56, %v2511_v16  ;;  %v8067_v18 = vld [vmem:[%s11677_s3 + $0x110] sm:$0xff]  ;;  %v2025_v56 = vld [vmem:[#allocation2 + $0xf2] sm:$0xff] }
 0x1ff   : > { %11696 = vst [vmem:[#allocation17_spill] sm:$0xff] %v8794_v14  ;;  %v8812_v14 = vpop.f32.mrf.mxu0  ;;  %2891 = vmatpush.bf16.msra.mxu1 %v8067_v18 }
 0x200   : > { %7511 = vmatmul.msk.bf16.gmra.mxu3 %vm637_vm2, %v8625_v35  ;;  %11699 = vst [vmem:[#allocation20_spill] sm:$0xff] %v8812_v14  ;;  %v1000_v14 = vadd.f32 %v8471_v63, %v8769_v0 }
 0x203   : > { %v8803_v39 = vpop.f32.mrf.mxu3 }
 0x204   : > { %v1202_v8 = vpop.f32.mrf.mxu2 }
 0x205   : > { %v8806_v13 = vadd.f32 %v1202_v8, %v998_v28  ;;  %v8808_v40 = vpop.f32.mrf.mxu1  ;;  %v2026_v28 = vld [vmem:[#allocation2 + $0xfa] sm:$0xff] }
 0x206   : > { %11698 = vst [vmem:[#allocation19_spill] sm:$0xff] %v8808_v40  ;;  %v2514_v8 = vld [vmem:[#allocation2 + $0x81] sm:$0xff]  ;;  %v8834_v40 = vpack.c.bf16 %v2026_v28, %v2025_v56  ;;  %v2516_v56 = vld [vmem:[#allocation2 + $0x99] sm:$0xff] }
 0x207   : > { %11697 = vst [vmem:[#allocation18_spill] sm:$0xff] %v8806_v13  ;;  %v8828_v16 = vpop.f32.mrf.mxu0  ;;  %v2513_v13 = vld [vmem:[#allocation2 + $0x79] sm:$0xff] }
 0x208   : > { %7597 = vmatmul.msk.bf16.gmra.mxu1 %vm637_vm2, %v8500_v36  ;;  %11701 = vst [vmem:[#allocation22_spill] sm:$0xff] %v8828_v16  ;;  %v2542_v25 = vpack.c.bf16 %v2514_v8, %v2513_v13  ;;  %v999_v13 = vadd.f32 %v8471_v63, %v8756_v23 }
 0x209   : > { %7637 = vmatmul.msk.bf16.gmra.mxu2 %vm637_vm2, %v8810_v32 }
 0x20a   : > { %7711 = vmatmul.msk.bf16.gmra.mxu0 %vm637_vm2, %v2541_v37 }
 0x20b   : > { %v8821_v1 = vpop.f32.mrf.mxu3 }
 0x20c   : > { %v8865_v23 = vpop.f32.mrf.mxu2 }
 0x20d   : > { %v8824_v47 = vpop.f32.mrf.mxu1  ;;  %11708 = vst [vmem:[#allocation29_spill] sm:$0xff] %v8865_v23  ;;  %v2518_v23 = vld [vmem:[#allocation2 + $0xb1] sm:$0xff] }
 0x20e   : > { %11700 = vst [vmem:[#allocation21_spill] sm:$0xff] %v8824_v47 }
 0x20f   : > { %v8843_v18 = vpop.f32.mrf.mxu0 }
 0x210   : > { %7512 = vmatmul.msk.bf16.gmra.mxu3 %vm637_vm2, %v8651_v7  ;;  %11703 = vst [vmem:[#allocation24_spill] sm:$0xff] %v8843_v18  ;;  %v2515_v18 = vld [vmem:[#allocation2 + $0x91] sm:$0xff] }
 0x213   : > { %v8830_v36 = vpop.f32.mrf.mxu3 }
 0x215   : > { %v8832_v22 = vpop.f32.mrf.mxu1 }
 0x216   : > { %11702 = vst [vmem:[#allocation23_spill] sm:$0xff] %v8832_v22 }
 0x217   : > { %v8853_v22 = vpop.f32.mrf.mxu0 }
 0x218   : > { %7598 = vmatmul.msk.bf16.gmra.mxu1 %vm637_vm2, %v8552_v15  ;;  %v2028_v15 = vld [vmem:[#allocation2 + $0x112] sm:$0xff]  ;;  %11706 = vst [vmem:[#allocation27_spill] sm:$0xff] %v8853_v22  ;;  %v2525_v22 = vld [vmem:[#allocation2 + $0x109] sm:$0xff] }
 0x219   : > { %7638 = vmatmul.msk.bf16.gmra.mxu2 %vm637_vm2, %v8834_v40 }
 0x21a   : > { %7712 = vmatmul.msk.bf16.gmra.mxu0 %vm637_vm2, %v2542_v25  ;;  %v2027_v25 = vld [vmem:[#allocation2 + $0x10a] sm:$0xff] }
 0x21b   : > { %v8840_v37 = vpop.f32.mrf.mxu3  ;;  %v8857_v24 = vpack.c.bf16 %v2028_v15, %v2027_v25  ;;  %v8880_v25 = vpop.f32.mrf.mxu2 }
 0x21c   : > { %11713 = vst [vmem:[#allocation34_spill] sm:$0xff] %v8880_v25 }
 0x21d   : > { %v8845_v47 = vpop.f32.mrf.mxu1 }
 0x21e   : > { %11704 = vst [vmem:[#allocation25_spill] sm:$0xff] %v8845_v47  ;;  %v2543_v47 = vpack.c.bf16 %v2516_v56, %v2515_v18 }
 0x21f   : > { %v8874_v18 = vpop.f32.mrf.mxu0 }
 0x220   : > { %7513 = vmatmul.msk.bf16.gmra.mxu3 %vm637_vm2, %v8680_v60  ;;  %11711 = vst [vmem:[#allocation32_spill] sm:$0xff] %v8874_v18  ;;  %v1006_v18 = vadd.f32 %v8471_v63, %v8840_v37 }
 0x223   : > { %v1205_v28 = vpop.f32.mrf.mxu3 }
 0x224   : > { %v8851_v8 = vadd.f32 %v1205_v28, %v999_v13 }
 0x225   : > { %v8855_v16 = vpop.f32.mrf.mxu1 }
 0x226   : > { %11705 = vst [vmem:[#allocation26_spill] sm:$0xff] %v8851_v8  ;;  %v1002_v8 = vadd.f32 %v8471_v63, %v8790_v5  ;;  %v8058_v5 = vld [vmem:[%s11677_s3 + $0xc8] sm:$0xff] }
 0x227   : > { %11707 = vst [vmem:[#allocation28_spill] sm:$0xff] %v8855_v16  ;;  %v2030_v16 = vld [vmem:[#allocation2 + $0x12a] sm:$0xff]  ;;  %2392 = vmatpush.bf16.msra.mxu3 %v8058_v5  ;;  %v8066_v5 = vld [vmem:[%s11677_s3 + $0x108] sm:$0xff] }
 0x228   : > { %7599 = vmatmul.msk.bf16.gmra.mxu1 %vm637_vm2, %v8578_v46  ;;  %v1001_v46 = vadd.f32 %v8471_v63, %v8777_v20  ;;  %v8892_v20 = vpop.f32.mrf.mxu0 }
 0x229   : > { %7639 = vmatmul.msk.bf16.gmra.mxu2 %vm637_vm2, %v8857_v24  ;;  %11715 = vst [vmem:[#allocation36_spill] sm:$0xff] %v8892_v20  ;;  %2892 = vmatpush.bf16.msra.mxu1 %v8066_v5 }
 0x22a   : > { %7713 = vmatmul.msk.bf16.gmra.mxu0 %vm637_vm2, %v2543_v47 }
 0x22b   : > { %v1207_v13 = vpop.f32.mrf.mxu3 }
 0x22c   : > { %v8868_v28 = vadd.f32 %v1207_v13, %v1000_v14  ;;  %v2029_v14 = vld [vmem:[#allocation2 + $0x122] sm:$0xff] }
 0x22d   : > { %v8870_v15 = vpop.f32.mrf.mxu1  ;;  %v8884_v13 = vpack.c.bf16 %v2030_v16, %v2029_v14  ;;  %v8897_v16 = vpop.f32.mrf.mxu2 }
 0x22e   : > { %11709 = vst [vmem:[#allocation30_spill] sm:$0xff] %v8868_v28 }
 0x22f   : > { %11710 = vst [vmem:[#allocation31_spill] sm:$0xff] %v8870_v15  ;;  %v2517_v15 = vld [vmem:[#allocation2 + $0xa9] sm:$0xff] }
 0x230   : > { %7514 = vmatmul.msk.bf16.gmra.mxu3 %vm637_vm2, %v8715_v52  ;;  %v2544_v28 = vpack.c.bf16 %v2518_v23, %v2517_v15  ;;  %11717 = vst [vmem:[#allocation38_spill] sm:$0xff] %v8897_v16  ;;  %v1003_v23 = vadd.f32 %v8471_v63, %v8803_v39  ;;  %v1004_v39 = vadd.f32 %v8471_v63, %v8821_v1 }
 0x231   : > { %v1005_v1 = vadd.f32 %v8471_v63, %v8830_v36 }
 0x233   : > { %v1210_v0 = vpop.f32.mrf.mxu3 }
 0x234   : > { %v8878_v56 = vadd.f32 %v1210_v0, %v1001_v46 }
 0x235   : > { %v8882_v47 = vpop.f32.mrf.mxu1 }
 0x236   : > { %11712 = vst [vmem:[#allocation33_spill] sm:$0xff] %v8878_v56  ;;  %v8916_v56 = vpop.f32.mrf.mxu2 }
 0x237   : > { %11714 = vst [vmem:[#allocation35_spill] sm:$0xff] %v8882_v47 }
 0x238   : > { %7600 = vmatmul.msk.bf16.gmra.mxu1 %vm637_vm2, %v8638_v49  ;;  %11721 = vst [vmem:[#allocation42_spill] sm:$0xff] %v8916_v56 }
 0x239   : > { %7640 = vmatmul.msk.bf16.gmra.mxu2 %vm637_vm2, %v8884_v13 }
 0x23a   : > { %7714 = vmatmul.msk.bf16.gmra.mxu0 %vm637_vm2, %v2544_v28  ;;  %v2032_v28 = vld [vmem:[#allocation2 + $0x142] sm:$0xff] }
 0x23b   : > { %v1212_v46 = vpop.f32.mrf.mxu3 }
 0x23c   : > { %v8895_v0 = vadd.f32 %v1212_v46, %v1002_v8  ;;  %v8910_v8 = vpop.f32.mrf.mxu0  ;;  %v2520_v46 = vld [vmem:[#allocation2 + $0xc9] sm:$0xff] }
 0x23d   : > { %v8899_v14 = vpop.f32.mrf.mxu1  ;;  %11720 = vst [vmem:[#allocation41_spill] sm:$0xff] %v8910_v8 }
 0x23e   : > { %11716 = vst [vmem:[#allocation37_spill] sm:$0xff] %v8895_v0  ;;  %v2519_v0 = vld [vmem:[#allocation2 + $0xc1] sm:$0xff] }
 0x23f   : > { %11718 = vst [vmem:[#allocation39_spill] sm:$0xff] %v8899_v14  ;;  %v2031_v14 = vld [vmem:[#allocation2 + $0x13a] sm:$0xff]  ;;  %v2545_v20 = vpack.c.bf16 %v2520_v46, %v2519_v0 }
 0x240   : > { %7515 = vmatmul.msk.bf16.gmra.mxu3 %vm637_vm2, %v8743_v50  ;;  %v8914_v25 = vpack.c.bf16 %v2032_v28, %v2031_v14  ;;  %v8938_v28 = vpop.f32.mrf.mxu2 }
 0x241   : > { %11724 = vst [vmem:[#allocation45_spill] sm:$0xff] %v8938_v28  ;;  %v2036_v28 = vld [vmem:[#allocation2 + $0x172] sm:$0xff] }
 0x243   : > { %v1215_v15 = vpop.f32.mrf.mxu3 }
 0x244   : > { %v8908_v47 = vadd.f32 %v1215_v15, %v1003_v23  ;;  %v8930_v0 = vpop.f32.mrf.mxu0 }
 0x245   : > { %v8912_v16 = vpop.f32.mrf.mxu1  ;;  %11723 = vst [vmem:[#allocation44_spill] sm:$0xff] %v8930_v0 }
 0x246   : > { %11719 = vst [vmem:[#allocation40_spill] sm:$0xff] %v8908_v47  ;;  %v2033_v47 = vld [vmem:[#allocation2 + $0x152] sm:$0xff] }
 0x248   : > { %7601 = vmatmul.msk.bf16.gmra.mxu1 %vm637_vm2, %v8665_v33 }
 0x249   : > { %7641 = vmatmul.msk.bf16.gmra.mxu2 %vm637_vm2, %v8914_v25 }
 0x24a   : > { %7715 = vmatmul.msk.bf16.gmra.mxu0 %vm637_vm2, %v2545_v20  ;;  %v2034_v20 = vld [vmem:[#allocation2 + $0x15a] sm:$0xff] }
 0x24b   : > { %v1217_v23 = vpop.f32.mrf.mxu3  ;;  %v8944_v5 = vpack.c.bf16 %v2034_v20, %v2033_v47  ;;  %v8957_v47 = vpop.f32.mrf.mxu2  ;;  %v8968_v20 = vld [vmem:[#allocation2 + $0x169] sm:$0xff] }
 0x24c   : > { %v8928_v14 = vadd.f32 %v1217_v23, %v1004_v39  ;;  %v2522_v39 = vld [vmem:[#allocation2 + $0xe1] sm:$0xff]  ;;  %v8946_v0 = vpop.f32.mrf.mxu0  ;;  %11728 = vst [vmem:[#allocation49_spill] sm:$0xff] %v8957_v47 }
 0x24d   : > { %v8932_v15 = vpop.f32.mrf.mxu1  ;;  %11726 = vst [vmem:[#allocation47_spill] sm:$0xff] %v8946_v0 }
 0x24e   : > { %11722 = vst [vmem:[#allocation43_spill] sm:$0xff] %v8928_v14  ;;  %v2521_v14 = vld [vmem:[#allocation2 + $0xd9] sm:$0xff] }
 0x24f   : > { %v2546_v8 = vpack.c.bf16 %v2522_v39, %v2521_v14  ;;  %v2035_v39 = vld [vmem:[#allocation2 + $0x16a] sm:$0xff] }
 0x250   : > { %7516 = vmatmul.msk.bf16.gmra.mxu3 %vm637_vm2, %v8761_v29 }
 0x253   : > { %v1220_v46 = vpop.f32.mrf.mxu3 }
 0x254   : > { %v8940_v56 = vadd.f32 %v1220_v46, %v1005_v1  ;;  %v8963_v14 = vpop.f32.mrf.mxu0 }
 0x255   : > { %v8942_v23 = vpop.f32.mrf.mxu1  ;;  %11729 = vst [vmem:[#allocation50_spill] sm:$0xff] %v8963_v14 }
 0x256   : > { %11725 = vst [vmem:[#allocation46_spill] sm:$0xff] %v8940_v56  ;;  %v8979_v56 = vpack.c.bf16 %v2036_v28, %v2035_v39  ;;  %v1787_v39 = vld [vmem:[#allocation2 + $0x181] sm:$0xff] }
 0x258   : > { %7602 = vmatmul.msk.bf16.gmra.mxu1 %vm637_vm2, %v8697_v57 }
 0x259   : > { %7642 = vmatmul.msk.bf16.gmra.mxu2 %vm637_vm2, %v8944_v5 }
 0x25a   : > { %7716 = vmatmul.msk.bf16.gmra.mxu0 %vm637_vm2, %v2546_v8  ;;  %v2524_v8 = vld [vmem:[#allocation2 + $0xf9] sm:$0xff] }
 0x25b   : > { %v1222_v36 = vpop.f32.mrf.mxu3 }
 0x25c   : > { %v8955_v1 = vadd.f32 %v1222_v36, %v1006_v18  ;;  %v8065_v18 = vld [vmem:[%s11677_s3 + $0x100] sm:$0xff]  ;;  %v8973_v36 = vpop.f32.mrf.mxu2  ;;  %v8988_v14 = vpop.f32.mrf.mxu0 }
 0x25d   : > { %v8959_v46 = vpop.f32.mrf.mxu1  ;;  %11731 = vst [vmem:[#allocation52_spill] sm:$0xff] %v8973_v36  ;;  %2893 = vmatpush.bf16.msra.mxu1 %v8065_v18  ;;  %v2037_v18 = vld [vmem:[#allocation2 + $0x182] sm:$0xff] }
 0x25e   : > { %11727 = vst [vmem:[#allocation48_spill] sm:$0xff] %v8955_v1  ;;  %v1803_v1 = vpack.c.bf16 %v8527_v54, %v8968_v20 }
 0x25f   : > { %11733 = vst [vmem:[#allocation54_spill] sm:$0xff] %v8988_v14 }
 0x260   : > { %7517 = vmatmul.msk.bf16.gmra.mxu3 %vm637_vm2, %v8784_v6 }
 0x263   : > { %v1395_v63 = vpop.f32.mrf.mxu3 }
 0x264   : > { %v8966_v37 = vadd.f32 %v1395_v63, %v8485_v10  ;;  %v2523_v10 = vld [vmem:[#allocation2 + $0xf1] sm:$0xff]  ;;  %v8994_v54 = vpop.f32.mrf.mxu2 }
 0x265   : > { %v8975_v47 = vpop.f32.mrf.mxu1  ;;  %v2547_v63 = vpack.c.bf16 %v2524_v8, %v2523_v10  ;;  %11734 = vst [vmem:[#allocation55_spill] sm:$0xff] %v8994_v54  ;;  %v1788_v8 = vld [vmem:[#allocation2 + $0x189] sm:$0xff] }
 0x266   : > { %11730 = vst [vmem:[#allocation51_spill] sm:$0xff] %v8966_v37  ;;  %v2038_v10 = vld [vmem:[#allocation2 + $0x18a] sm:$0xff]  ;;  %v9006_v14 = vpack.c.bf16 %v1788_v8, %v1787_v39 }
 0x267   : > { %v9008_v54 = vpack.c.bf16 %v2038_v10, %v2037_v18 }
 0x268   : > { %7603 = vmatmul.msk.bf16.gmra.mxu1 %vm637_vm2, %v1803_v1 }
 0x269   : > { %7643 = vmatmul.msk.bf16.gmra.mxu2 %vm637_vm2, %v8979_v56  ;;  %11737 = vst [vmem:[#allocation58_spill] sm:$0xff] %v9008_v54 }
 0x26a   : > { %7717 = vmatmul.msk.bf16.gmra.mxu0 %vm637_vm2, %v2547_v63  ;;  %v2526_v63 = vld [vmem:[#allocation2 + $0x111] sm:$0xff] }
 0x26b   : > { %v1397_v37 = vpop.f32.mrf.mxu3 }
 0x26c   : > { %v8986_v36 = vadd.f32 %v1397_v37, %v8496_v31  ;;  %v8999_v31 = vpop.f32.mrf.mxu0 }
 0x26d   : > { %v8990_v0 = vpop.f32.mrf.mxu1  ;;  %11736 = vst [vmem:[#allocation57_spill] sm:$0xff] %v8999_v31 }
 0x26e   : > { %11732 = vst [vmem:[#allocation53_spill] sm:$0xff] %v8986_v36  ;;  %v8070_v36 = vld [vmem:[%s11679_s5 + $0x8] sm:$0xff] }
 0x26f   : > { %3279 = vmatpush.bf16.msra.mxu2 %v8070_v36 }
 0x270   : > { %7518 = vmatmul.msk.bf16.gmra.mxu3 %vm637_vm2, %v8810_v32 }
 0x273   : > { %v1400_v28 = vpop.f32.mrf.mxu3 }
 0x274   : > { %v8997_v1 = vadd.f32 %v1400_v28, %v8523_v51  ;;  %v2548_v51 = vpack.c.bf16 %v2526_v63, %v2525_v22  ;;  %v2165_v28 = vpop.f32.mrf.mxu2  ;;  %v8057_v22 = vld [vmem:[%s11677_s3 + $0xc0] sm:$0xff]  ;;  %v9025_v36 = vpop.f32.mrf.mxu0 }
 0x275   : > { %v9001_v37 = vpop.f32.mrf.mxu1  ;;  %2393 = vmatpush.bf16.msra.mxu3 %v8057_v22 }
 0x276   : > { %11735 = vst [vmem:[#allocation56_spill] sm:$0xff] %v8997_v1 }
 0x278   : > { %7604 = vmatmul.msk.bf16.gmra.mxu1 %vm637_vm2, %v9006_v14 }
 0x279   : > { %7644 = vmatmul.msk.bf16.gmra.mxu2 %vm637_vm2, %v9008_v54 }
 0x27a   : > { %7718 = vmatmul.msk.bf16.gmra.mxu0 %vm637_vm2, %v2548_v51 }
 0x27b   : > { %v1402_v31 = vpop.f32.mrf.mxu3 }
 0x27c   : > { %v9016_v1 = vadd.f32 %v1402_v31, %v8550_v9  ;;  %v2167_v10 = vpop.f32.mrf.mxu2  ;;  %v9034_v9 = vpop.f32.mrf.mxu0 }
 0x27d   : > { %v9018_v39 = vpop.f32.mrf.mxu1  ;;  %11740 = vst [vmem:[#allocation61_spill] sm:$0xff] %v9034_v9 }
 0x27e   : > { %11738 = vst [vmem:[#allocation59_spill] sm:$0xff] %v9016_v1 }
 0x280   : > { %7519 = vmatmul.msk.bf16.gmra.mxu3 %vm637_vm2, %v8834_v40 }
 0x283   : > { %v1405_v8 = vpop.f32.mrf.mxu3 }
 0x284   : > { %v9028_v18 = vadd.f32 %v1405_v8, %v8567_v27  ;;  %v2170_v22 = vpop.f32.mrf.mxu2 }
 0x285   : > { %v9030_v63 = vpop.f32.mrf.mxu1 }
 0x286   : > { %11739 = vst [vmem:[#allocation60_spill] sm:$0xff] %v9028_v18 }
 0x288   : > { %7749 = vmatmul.msk.bf16.vlgmr.msra.gmra.mxu1 %vm637_vm2, %v8625_v35  ;;  %v9048_v35 = vpop.f32.mrf.mxu0 }
 0x289   : > { %11743 = vst [vmem:[#allocation64_spill] sm:$0xff] %v9048_v35 }
 0x28a   : > { %7719 = vmatmul.msk.bf16.gmra.mxu0 %vm637_vm2, %v8638_v49 }
 0x28b   : > { %v1407_v31 = vpop.f32.mrf.mxu3 }
 0x28c   : > { %v9039_v51 = vadd.f32 %v1407_v31, %v8576_v41  ;;  %v2172_v54 = vpop.f32.mrf.mxu2 }
 0x28d   : > { %v9041_v1 = vpop.f32.mrf.mxu1 }
 0x28e   : > { %11741 = vst [vmem:[#allocation62_spill] sm:$0xff] %v9039_v51 }
 0x290   : > { %7520 = vmatmul.msk.bf16.gmra.mxu3 %vm637_vm2, %v8857_v24  ;;  %v9059_v31 = vpop.f32.mrf.mxu0 }
 0x293   : > { %v1410_v27 = vpop.f32.mrf.mxu3 }
 0x294   : > { %v9046_v8 = vadd.f32 %v1410_v27, %v8587_v55  ;;  %v2175_v55 = vpop.f32.mrf.mxu2 }
 0x295   : > { %v9050_v18 = vpop.f32.mrf.mxu1 }
 0x296   : > { %11742 = vst [vmem:[#allocation63_spill] sm:$0xff] %v9046_v8 }
 0x298   : > { %7750 = vmatmul.msk.bf16.gmra.mxu1 %vm637_vm2, %v8651_v7  ;;  %v9070_v9 = vpop.f32.mrf.mxu0 }
 0x29a   : > { %7720 = vmatmul.msk.bf16.gmra.mxu0 %vm637_vm2, %v8665_v33 }
 0x29b   : > { %v1412_v41 = vpop.f32.mrf.mxu3 }
 0x29c   : > { %v9057_v49 = vadd.f32 %v1412_v41, %v8599_v2 }
 0x29d   : > { %v9061_v51 = vpop.f32.mrf.mxu1 }
 0x29e   : > { %11744 = vst [vmem:[#allocation65_spill] sm:$0xff] %v9057_v49 }
 0x2a0   : > { %7521 = vmatmul.msk.bf16.gmra.mxu3 %vm637_vm2, %v8884_v13 }
 0x2a3   : > { %v1415_v27 = vpop.f32.mrf.mxu3 }
 0x2a4   : > { %v1483_v8 = vadd.f32 %v1415_v27, %v8611_v19  ;;  %v2177_v19 = vpop.f32.mrf.mxu2 }
 0x2a5   : > { %v9067_v35 = vpop.f32.mrf.mxu1 }
 0x2a6   : > { %v1733_v7 = vadd.f32 %v8653_v11, %v1483_v8 }
 0x2a8   : > { %v1983_v33 = vadd.f32 %v8912_v16, %v1733_v7  ;;  %7751 = vmatmul.msk.bf16.gmra.mxu1 %vm637_vm2, %v8680_v60  ;;  %v9087_v60 = vpop.f32.mrf.mxu0 }
 0x2aa   : > { %v9074_v2 = vadd.f32 %v2165_v28, %v1983_v33  ;;  %7721 = vmatmul.msk.bf16.gmra.mxu0 %vm637_vm2, %v8697_v57 }
 0x2ab   : > { %v1417_v41 = vpop.f32.mrf.mxu3 }
 0x2ac   : > { %v1484_v49 = vadd.f32 %v1417_v41, %v8623_v30  ;;  %v2534_v30 = vld [vmem:[#allocation2 + $0x171] sm:$0xff]  ;;  %v2180_v33 = vpop.f32.mrf.mxu2 }
 0x2ad   : > { %v9080_v8 = vpop.f32.mrf.mxu1 }
 0x2ae   : > { %v1734_v11 = vadd.f32 %v8670_v38, %v1484_v49  ;;  %v2552_v49 = vpack.c.bf16 %v2534_v30, %v8968_v20 }
 0x2b0   : > { %7522 = vmatmul.msk.bf16.gmra.mxu3 %vm637_vm2, %v8914_v25  ;;  %v1984_v16 = vadd.f32 %v8932_v15, %v1734_v11  ;;  %v9101_v11 = vpop.f32.mrf.mxu0 }
 0x2b2   : > { %v9085_v27 = vadd.f32 %v2167_v10, %v1984_v16 }
 0x2b3   : > { %v1420_v28 = vpop.f32.mrf.mxu3 }
 0x2b4   : > { %v1485_v7 = vadd.f32 %v1420_v28, %v8636_v48  ;;  %v2182_v20 = vpop.f32.mrf.mxu2 }
 0x2b5   : > { %v9091_v41 = vpop.f32.mrf.mxu1 }
 0x2b6   : > { %v1735_v57 = vadd.f32 %v8682_v61, %v1485_v7 }
 0x2b8   : > { %v1985_v38 = vadd.f32 %v8942_v23, %v1735_v57  ;;  %7752 = vmatmul.msk.bf16.gmra.mxu1 %vm637_vm2, %v8715_v52 }
 0x2ba   : > { %v9097_v15 = vadd.f32 %v2170_v22, %v1985_v38  ;;  %7722 = vmatmul.msk.bf16.gmra.mxu0 %vm637_vm2, %v2552_v49 }
 0x2bb   : > { %v1422_v10 = vpop.f32.mrf.mxu3 }
 0x2bc   : > { %v1486_v48 = vadd.f32 %v1422_v10, %v8648_v62  ;;  %v9113_v62 = vpop.f32.mrf.mxu0 }
 0x2bd   : > { %v9104_v16 = vpop.f32.mrf.mxu1 }
 0x2be   : > { %v1736_v61 = vadd.f32 %v8707_v43, %v1486_v48 }
 0x2c0   : > { %7523 = vmatmul.msk.bf16.gmra.mxu3 %vm637_vm2, %v8944_v5  ;;  %v1986_v23 = vadd.f32 %v8959_v46, %v1736_v61  ;;  %v2185_v46 = vpop.f32.mrf.mxu2  ;;  %v2538_v61 = vld [vmem:[#allocation2 + $0x1a1] sm:$0xff] }
 0x2c2   : > { %v9109_v52 = vadd.f32 %v2172_v54, %v1986_v23 }
 0x2c3   : > { %v1425_v22 = vpop.f32.mrf.mxu3 }
 0x2c4   : > { %v1487_v28 = vadd.f32 %v1425_v22, %v8663_v26  ;;  %v9131_v49 = vpop.f32.mrf.mxu0 }
 0x2c5   : > { %v9115_v57 = vpop.f32.mrf.mxu1 }
 0x2c6   : > { %v1737_v7 = vadd.f32 %v8730_v4, %v1487_v28 }
 0x2c8   : > { %v1987_v43 = vadd.f32 %v8975_v47, %v1737_v7  ;;  %7753 = vmatmul.msk.bf16.gmra.mxu1 %vm637_vm2, %v8743_v50  ;;  %v2187_v48 = vpop.f32.mrf.mxu2  ;;  %v2258_v7 = vld [vmem:[#allocation2 + $0x38] sm:$0xff] }
 0x2ca   : > { %v9120_v30 = vadd.f32 %v2175_v55, %v1987_v43  ;;  %7723 = vmatmul.msk.bf16.gmra.mxu0 %vm637_vm2, %v9006_v14 }
 0x2cb   : > { %v1427_v38 = vpop.f32.mrf.mxu3 }
 0x2cc   : > { %v1488_v26 = vadd.f32 %v1427_v38, %v8678_v53  ;;  %v2537_v53 = vld [vmem:[#allocation2 + $0x199] sm:$0xff] }
 0x2cd   : > { %v9126_v54 = vpop.f32.mrf.mxu1  ;;  %v2554_v22 = vpack.c.bf16 %v2538_v61, %v2537_v53  ;;  %v2259_v61 = vld [vmem:[#allocation2 + $0x48] sm:$0xff] }
 0x2ce   : > { %v1738_v4 = vadd.f32 %v8741_v42, %v1488_v26 }
 0x2d0   : > { %7524 = vmatmul.msk.bf16.gmra.mxu3 %vm637_vm2, %v8979_v56  ;;  %v1988_v47 = vadd.f32 %v8990_v0, %v1738_v4  ;;  %v2190_v26 = vpop.f32.mrf.mxu2 }
 0x2d2   : > { %v9133_v50 = vadd.f32 %v2177_v19, %v1988_v47  ;;  %v9144_v19 = vpop.f32.mrf.mxu0 }
 0x2d3   : > { %v1430_v55 = vpop.f32.mrf.mxu3 }
 0x2d4   : > { %v1489_v10 = vadd.f32 %v1430_v55, %v8695_v17  ;;  %v2257_v17 = vld [vmem:[#allocation2 + $0x30] sm:$0xff] }
 0x2d5   : > { %v9137_v42 = vpop.f32.mrf.mxu1  ;;  %v2289_v38 = vpack.c.bf16 %v2258_v7, %v2257_v17  ;;  %v11746_v17 = vld [vmem:[#allocation20_spill] sm:$0xff] }
 0x2d6   : > { %v1739_v14 = vadd.f32 %v8754_v21, %v1489_v10 }
 0x2d8   : > { %v1989_v23 = vadd.f32 %v9001_v37, %v1739_v14  ;;  %7754 = vmatmul.msk.bf16.gmra.mxu1 %vm637_vm2, %v8761_v29 }
 0x2da   : > { %v9142_v0 = vadd.f32 %v2180_v33, %v1989_v23  ;;  %7724 = vmatmul.msk.bf16.gmra.mxu0 %vm637_vm2, %v2554_v22 }
 0x2db   : > { %v1432_v28 = vpop.f32.mrf.mxu3 }
 0x2dc   : > { %v1490_v21 = vadd.f32 %v1432_v28, %v8710_v44 }
 0x2dd   : > { %v9149_v37 = vpop.f32.mrf.mxu1 }
 0x2de   : > { %v1740_v43 = vadd.f32 %v8767_v58, %v1490_v21  ;;  %v2192_v58 = vpop.f32.mrf.mxu2 }
 0x2e0   : > { %7669 = vmatmul.msk.bf16.vlgmr.msra.gmra.mxu3 %vm637_vm2, %v2289_v38  ;;  %v1990_v29 = vadd.f32 %v9018_v39, %v1740_v43  ;;  %v2260_v39 = vld [vmem:[#allocation2 + $0x50] sm:$0xff]  ;;  %v2261_v43 = vld [vmem:[#allocation2 + $0x60] sm:$0xff]  ;;  %v2262_v38 = vld [vmem:[#allocation2 + $0x68] sm:$0xff] }
 0x2e2   : > { %v9153_v33 = vadd.f32 %v2182_v20, %v1990_v29 }
 0x2e3   : > { %v1435_v4 = vpop.f32.mrf.mxu3 }
 0x2e4   : > { %v1491_v47 = vadd.f32 %v1435_v4, %v8732_v12  ;;  %v2290_v12 = vpack.c.bf16 %v2260_v39, %v2259_v61 }
 0x2e5   : > { %v9157_v10 = vpop.f32.mrf.mxu1 }
 0x2e6   : > { %v1741_v55 = vadd.f32 %v8780_v45, %v1491_v47  ;;  %v2195_v28 = vpop.f32.mrf.mxu2  ;;  %v11748_v47 = vld [vmem:[#allocation22_spill] sm:$0xff] }
 0x2e8   : > { %v1991_v44 = vadd.f32 %v9030_v63, %v1741_v55  ;;  %7755 = vmatmul.msk.bf16.gmra.mxu1 %vm637_vm2, %v8784_v6 }
 0x2ea   : > { %v9162_v14 = vadd.f32 %v2185_v46, %v1991_v44  ;;  %v2291_v44 = vpack.c.bf16 %v2262_v38, %v2261_v43 }
 0x2eb   : > { %v1437_v53 = vpop.f32.mrf.mxu3 }
 0x2ec   : > { %v1492_v20 = vadd.f32 %v1437_v53, %v8739_v34 }
 0x2ed   : > { %v9166_v22 = vpop.f32.mrf.mxu1 }
 0x2ee   : > { %v1742_v23 = vadd.f32 %v8796_v59, %v1492_v20  ;;  %11745 = vst [vmem:[#allocation66_spill] sm:$0xff] %v9166_v22  ;;  %v8069_v59 = vld [vmem:[%s11679_s5] sm:$0xff]  ;;  %v2197_v4 = vpop.f32.mrf.mxu2  ;;  %v11750_v20 = vld [vmem:[#allocation24_spill] sm:$0xff] }
 0x2ef   : > { %3280 = vmatpush.bf16.msra.mxu2 %v8069_v59  ;;  %v11778_v22 = vld [vmem:[#allocation19_spill] sm:$0xff] }
 0x2f0   : > { %7670 = vmatmul.msk.bf16.gmra.mxu3 %vm637_vm2, %v2290_v12  ;;  %v1992_v45 = vadd.f32 %v9041_v1, %v1742_v23 }
 0x2f2   : > { %v9170_v63 = vadd.f32 %v2187_v48, %v1992_v45 }
 0x2f3   : > { %v1440_v6 = vpop.f32.mrf.mxu3 }
 0x2f4   : > { %v1493_v46 = vadd.f32 %v1440_v6, %v8751_v3  ;;  %v11747_v3 = vld [vmem:[#allocation14_spill] sm:$0xff] }
 0x2f5   : > { %v9174_v21 = vpop.f32.mrf.mxu1 }
 0x2f6   : > { %v1743_v7 = vadd.f32 %v11746_v17, %v1493_v46  ;;  %v2200_v12 = vpop.f32.mrf.mxu2 }
 0x2f8   : > { %v1993_v34 = vadd.f32 %v9050_v18, %v1743_v7  ;;  %7756 = vmatmul.msk.bf16.gmra.mxu1 %vm637_vm2, %v8810_v32  ;;  %v2263_v7 = vld [vmem:[#allocation2 + $0x78] sm:$0xff] }
 0x2fa   : > { %v9182_v1 = vadd.f32 %v2190_v26, %v1993_v34  ;;  %v11749_v26 = vld [vmem:[#allocation15_spill] sm:$0xff] }
 0x2fb   : > { %v1442_v48 = vpop.f32.mrf.mxu3  ;;  %v11752_v34 = vld [vmem:[#allocation27_spill] sm:$0xff] }
 0x2fc   : > { %v1494_v29 = vadd.f32 %v1442_v48, %v11747_v3 }
 0x2fd   : > { %v9186_v53 = vpop.f32.mrf.mxu1 }
 0x2fe   : > { %v1744_v55 = vadd.f32 %v11748_v47, %v1494_v29 }
 0x300   : > { %7671 = vmatmul.msk.bf16.gmra.mxu3 %vm637_vm2, %v2291_v44  ;;  %v1994_v18 = vadd.f32 %v9061_v51, %v1744_v55  ;;  %v2264_v51 = vld [vmem:[#allocation2 + $0x80] sm:$0xff] }
 0x301   : > { %v2292_v43 = vpack.c.bf16 %v2264_v51, %v2263_v7  ;;  %v11754_v55 = vld [vmem:[#allocation32_spill] sm:$0xff] }
 0x302   : > { %v9190_v61 = vadd.f32 %v2192_v58, %v1994_v18  ;;  %v11751_v58 = vld [vmem:[#allocation16_spill] sm:$0xff] }
 0x303   : > { %v1445_v32 = vpop.f32.mrf.mxu3 }
 0x304   : > { %v1495_v39 = vadd.f32 %v1445_v32, %v11749_v26 }
 0x305   : > { %v9194_v45 = vpop.f32.mrf.mxu1 }
 0x306   : > { %v1745_v23 = vadd.f32 %v11750_v20, %v1495_v39 }
 0x308   : > { %v1995_v6 = vadd.f32 %v9067_v35, %v1745_v23  ;;  %7757 = vmatmul.msk.bf16.gmra.mxu1 %vm637_vm2, %v8834_v40  ;;  %v2202_v35 = vpop.f32.mrf.mxu2  ;;  %v2266_v23 = vld [vmem:[#allocation2 + $0x98] sm:$0xff] }
 0x30a   : > { %v9199_v46 = vadd.f32 %v2195_v28, %v1995_v6  ;;  %v11753_v28 = vld [vmem:[#allocation17_spill] sm:$0xff] }
 0x30b   : > { %v1447_v17 = vpop.f32.mrf.mxu3 }
 0x30c   : > { %v1496_v59 = vadd.f32 %v1447_v17, %v11751_v58  ;;  %v11756_v17 = vld [vmem:[#allocation36_spill] sm:$0xff] }
 0x30d   : > { %v9203_v38 = vpop.f32.mrf.mxu1 }
 0x30e   : > { %v1746_v48 = vadd.f32 %v11752_v34, %v1496_v59 }
 0x310   : > { %7672 = vmatmul.msk.bf16.gmra.mxu3 %vm637_vm2, %v2292_v43  ;;  %v1996_v3 = vadd.f32 %v9080_v8, %v1746_v48  ;;  %v2205_v39 = vpop.f32.mrf.mxu2  ;;  %v2265_v8 = vld [vmem:[#allocation2 + $0x90] sm:$0xff] }
 0x311   : > { %v2293_v51 = vpack.c.bf16 %v2266_v23, %v2265_v8  ;;  %v11758_v43 = vld [vmem:[#allocation41_spill] sm:$0xff]  ;;  %v11760_v8 = vld [vmem:[#allocation44_spill] sm:$0xff] }
 0x312   : > { %v9207_v29 = vadd.f32 %v2197_v4, %v1996_v3  ;;  %v11755_v4 = vld [vmem:[#allocation18_spill] sm:$0xff] }
 0x313   : > { %v1450_v40 = vpop.f32.mrf.mxu3 }
 0x314   : > { %v1497_v47 = vadd.f32 %v1450_v40, %v11753_v28 }
 0x315   : > { %v9211_v18 = vpop.f32.mrf.mxu1 }
 0x316   : > { %v1747_v44 = vadd.f32 %v11754_v55, %v1497_v47 }
 0x318   : > { %v1997_v32 = vadd.f32 %v9091_v41, %v1747_v44  ;;  %7758 = vmatmul.msk.bf16.gmra.mxu1 %vm637_vm2, %v8857_v24  ;;  %v2207_v48 = vpop.f32.mrf.mxu2  ;;  %v2267_v44 = vld [vmem:[#allocation2 + $0xa8] sm:$0xff] }
 0x31a   : > { %v9216_v26 = vadd.f32 %v2200_v12, %v1997_v32  ;;  %v11757_v12 = vld [vmem:[#allocation26_spill] sm:$0xff] }
 0x31b   : > { %v1452_v20 = vpop.f32.mrf.mxu3 }
 0x31c   : > { %v1498_v6 = vadd.f32 %v1452_v20, %v11755_v4  ;;  %v9236_v20 = vpop.f32.mrf.mxu0 }
 0x31d   : > { %v9220_v58 = vpop.f32.mrf.mxu1 }
 0x31e   : > { %v1748_v7 = vadd.f32 %v11756_v17, %v1498_v6 }
 0x320   : > { %7673 = vmatmul.msk.bf16.gmra.mxu3 %vm637_vm2, %v2293_v51  ;;  %v1998_v41 = vadd.f32 %v9104_v16, %v1748_v7  ;;  %v2268_v16 = vld [vmem:[#allocation2 + $0xb0] sm:$0xff]  ;;  %v2210_v6 = vpop.f32.mrf.mxu2 }
 0x321   : > { %v2294_v4 = vpack.c.bf16 %v2268_v16, %v2267_v44  ;;  %v11761_v7 = vld [vmem:[#allocation33_spill] sm:$0xff] }
 0x322   : > { %v9224_v59 = vadd.f32 %v2202_v35, %v1998_v41  ;;  %v11759_v35 = vld [vmem:[#allocation30_spill] sm:$0xff]  ;;  %v11762_v41 = vld [vmem:[#allocation47_spill] sm:$0xff]  ;;  %v11763_v44 = vld [vmem:[#allocation37_spill] sm:$0xff] }
 0x323   : > { %v1455_v24 = vpop.f32.mrf.mxu3 }
 0x324   : > { %v1499_v34 = vadd.f32 %v1455_v24, %v11757_v12 }
 0x325   : > { %v9228_v40 = vpop.f32.mrf.mxu1 }
 0x326   : > { %v1749_v3 = vadd.f32 %v11758_v43, %v1499_v34  ;;  %v9249_v34 = vpop.f32.mrf.mxu0 }
 0x328   : > { %v1999_v28 = vadd.f32 %v9115_v57, %v1749_v3  ;;  %7759 = vmatmul.msk.bf16.gmra.mxu1 %vm637_vm2, %v8884_v13  ;;  %v2212_v3 = vpop.f32.mrf.mxu2 }
 0x32a   : > { %v9233_v47 = vadd.f32 %v2205_v39, %v1999_v28 }
 0x32b   : > { %v1457_v55 = vpop.f32.mrf.mxu3 }
 0x32c   : > { %v1500_v32 = vadd.f32 %v1457_v55, %v11759_v35  ;;  %v2270_v55 = vld [vmem:[#allocation2 + $0xc8] sm:$0xff]  ;;  %v11764_v35 = vld [vmem:[#allocation50_spill] sm:$0xff] }
 0x32d   : > { %v9239_v17 = vpop.f32.mrf.mxu1 }
 0x32e   : > { %v1750_v23 = vadd.f32 %v11760_v8, %v1500_v32 }
 0x330   : > { %7674 = vmatmul.msk.bf16.gmra.mxu3 %vm637_vm2, %v2294_v4  ;;  %v2000_v57 = vadd.f32 %v9126_v54, %v1750_v23  ;;  %v9262_v4 = vpop.f32.mrf.mxu0 }
 0x332   : > { %v9243_v13 = vadd.f32 %v2207_v48, %v2000_v57  ;;  %v2269_v48 = vld [vmem:[#allocation2 + $0xc0] sm:$0xff] }
 0x333   : > { %v1460_v39 = vpop.f32.mrf.mxu3  ;;  %v2295_v8 = vpack.c.bf16 %v2270_v55, %v2269_v48  ;;  %v2271_v48 = vld [vmem:[#allocation2 + $0xd8] sm:$0xff]  ;;  %v2272_v55 = vld [vmem:[#allocation2 + $0xe0] sm:$0xff] }
 0x334   : > { %v1501_v51 = vadd.f32 %v1460_v39, %v11761_v7  ;;  %v11766_v39 = vld [vmem:[#allocation40_spill] sm:$0xff] }
 0x335   : > { %v9247_v12 = vpop.f32.mrf.mxu1 }
 0x336   : > { %v1751_v24 = vadd.f32 %v11762_v41, %v1501_v51  ;;  %v11767_v51 = vld [vmem:[#allocation54_spill] sm:$0xff] }
 0x338   : > { %v2001_v43 = vadd.f32 %v9137_v42, %v1751_v24  ;;  %7760 = vmatmul.msk.bf16.gmra.mxu1 %vm637_vm2, %v8914_v25  ;;  %v2215_v25 = vpop.f32.mrf.mxu2 }
 0x33a   : > { %v9254_v28 = vadd.f32 %v2210_v6, %v2001_v43 }
 0x33b   : > { %v1462_v54 = vpop.f32.mrf.mxu3 }
 0x33c   : > { %v1502_v16 = vadd.f32 %v1462_v54, %v11763_v44  ;;  %v11769_v44 = vld [vmem:[#allocation43_spill] sm:$0xff] }
 0x33d   : > { %v9258_v23 = vpop.f32.mrf.mxu1 }
 0x33e   : > { %v1752_v32 = vadd.f32 %v11764_v35, %v1502_v16 }
 0x340   : > { %7675 = vmatmul.msk.bf16.gmra.mxu3 %vm637_vm2, %v2295_v8  ;;  %v2002_v42 = vadd.f32 %v9149_v37, %v1752_v32  ;;  %v9280_v35 = vpop.f32.mrf.mxu2  ;;  %v2296_v32 = vpack.c.bf16 %v2272_v55, %v2271_v48 }
 0x341   : > { %11771 = vst [vmem:[#allocation15_spill] sm:$0xff] %v9280_v35  ;;  %v11777_v35 = vld [vmem:[#allocation61_spill] sm:$0xff] }
 0x342   : > { %v9264_v57 = vadd.f32 %v2212_v3, %v2002_v42  ;;  %v9275_v3 = vpop.f32.mrf.mxu0  ;;  %v11772_v42 = vld [vmem:[#allocation46_spill] sm:$0xff] }
 0x343   : > { %v1465_v6 = vpop.f32.mrf.mxu3 }
 0x344   : > { %11765 = vst [vmem:[#allocation20_spill] sm:$0xff] %v9264_v57  ;;  %v1503_v7 = vadd.f32 %v1465_v6, %v11766_v39 }
 0x345   : > { %v9268_v24 = vpop.f32.mrf.mxu1 }
 0x346   : > { %v1753_v41 = vadd.f32 %v11767_v51, %v1503_v7 }
 0x348   : > { %v2003_v43 = vadd.f32 %v9157_v10, %v1753_v41  ;;  %7761 = vmatmul.msk.bf16.gmra.mxu1 %vm637_vm2, %v8944_v5  ;;  %v2220_v39 = vpop.f32.mrf.mxu2  ;;  %v11773_v41 = vld [vmem:[#allocation51_spill] sm:$0xff] }
 0x34a   : > { %v9273_v54 = vadd.f32 %v2215_v25, %v2003_v43  ;;  %v9286_v25 = vpop.f32.mrf.mxu0  ;;  %v11774_v43 = vld [vmem:[#allocation6_spill] sm:$0xff] }
 0x34b   : > { %v1467_v37 = vpop.f32.mrf.mxu3 }
 0x34c   : > { %11768 = vst [vmem:[#allocation14_spill] sm:$0xff] %v9273_v54  ;;  %v9278_v16 = vadd.f32 %v1467_v37, %v11769_v44  ;;  %v1725_v37 = vadd.f32 %v11774_v43, %v11773_v41  ;;  %v2273_v44 = vld [vmem:[#allocation2 + $0xf0] sm:$0xff] }
 0x34d   : > { %v9282_v8 = vpop.f32.mrf.mxu1  ;;  %v11781_v43 = vld [vmem:[#allocation29_spill] sm:$0xff] }
 0x34e   : > { %11770 = vst [vmem:[#allocation22_spill] sm:$0xff] %v9278_v16  ;;  %v1975_v54 = vadd.f32 %v11778_v22, %v1725_v37 }
 0x350   : > { %7676 = vmatmul.msk.bf16.gmra.mxu3 %vm637_vm2, %v2296_v32  ;;  %v2274_v32 = vld [vmem:[#allocation2 + $0xf8] sm:$0xff] }
 0x353   : > { %v1470_v10 = vpop.f32.mrf.mxu3 }
 0x354   : > { %v1505_v5 = vadd.f32 %v1470_v10, %v11772_v42  ;;  %v11776_v10 = vld [vmem:[#allocation48_spill] sm:$0xff] }
 0x355   : > { %v9289_v7 = vpop.f32.mrf.mxu1 }
 0x356   : > { %v1755_v6 = vadd.f32 %v9025_v36, %v1505_v5  ;;  %v2297_v5 = vpack.c.bf16 %v2274_v32, %v2273_v44  ;;  %v11783_v44 = vld [vmem:[#allocation64_spill] sm:$0xff] }
 0x358   : > { %v2005_v51 = vadd.f32 %v9174_v21, %v1755_v6  ;;  %7762 = vmatmul.msk.bf16.gmra.mxu1 %vm637_vm2, %v8979_v56  ;;  %v9305_v6 = vpop.f32.mrf.mxu0  ;;  %v2222_v56 = vpop.f32.mrf.mxu2 }
 0x35a   : > { %v9296_v48 = vadd.f32 %v2220_v39, %v2005_v51  ;;  %v11779_v39 = vld [vmem:[#allocation53_spill] sm:$0xff]  ;;  %v11780_v51 = vld [vmem:[#allocation7_spill] sm:$0xff] }
 0x35b   : > { %v1472_v55 = vpop.f32.mrf.mxu3  ;;  %v1726_v41 = vadd.f32 %v11780_v51, %v11779_v39  ;;  %v11788_v51 = vld [vmem:[#allocation34_spill] sm:$0xff] }
 0x35c   : > { %11775 = vst [vmem:[#allocation24_spill] sm:$0xff] %v9296_v48  ;;  %v1506_v42 = vadd.f32 %v1472_v55, %v11776_v10  ;;  %v2225_v48 = vadd.f32 %v11781_v43, %v1975_v54 }
 0x35d   : > { %v9301_v16 = vpop.f32.mrf.mxu1 }
 0x35e   : > { %v1756_v36 = vadd.f32 %v11777_v35, %v1506_v42  ;;  %v8076_v35 = vld [vmem:[%s11679_s5 + $0x38] sm:$0xff]  ;;  %v8075_v42 = vld [vmem:[%s11679_s5 + $0x30] sm:$0xff] }
 0x35f   : > { %3981 = vmatpush.bf16.msrb.mxu1 %v8076_v35 }
 0x360   : > { %7677 = vmatmul.msk.bf16.gmra.mxu3 %vm637_vm2, %v2297_v5  ;;  %v2006_v21 = vadd.f32 %v9186_v53, %v1756_v36  ;;  %v11784_v53 = vld [vmem:[#allocation21_spill] sm:$0xff]  ;;  %v11785_v5 = vld [vmem:[#allocation56_spill] sm:$0xff] }
 0x361   : > { %v1976_v10 = vadd.f32 %v11784_v53, %v1726_v41  ;;  %v9328_v41 = vpop.f32.mrf.mxu0  ;;  %v11789_v53 = vld [vmem:[#allocation23_spill] sm:$0xff] }
 0x362   : > { %v9313_v55 = vadd.f32 %v2222_v56, %v2006_v21  ;;  %v11786_v21 = vld [vmem:[#allocation8_spill] sm:$0xff] }
 0x363   : > { %v2395_v22 = vpop.f32.mrf.mxu3  ;;  %3982 = vmatpush.bf16.msrb.mxu1 %v8075_v42  ;;  %v1727_v56 = vadd.f32 %v11786_v21, %v11785_v5  ;;  %v2226_v43 = vadd.f32 %v11788_v51, %v1976_v10  ;;  %v11790_v10 = vld [vmem:[#allocation59_spill] sm:$0xff]  ;;  %v11791_v21 = vld [vmem:[#allocation9_spill] sm:$0xff] }
 0x364   : > { %11782 = vst [vmem:[#allocation16_spill] sm:$0xff] %v9313_v55  ;;  %v2475_v37 = vadd.f32 %v2395_v22, %v2225_v48  ;;  %v11787_v48 = vld [vmem:[#allocation58_spill] sm:$0xff]  ;;  %v2275_v22 = vld [vmem:[#allocation2 + $0x108] sm:$0xff] }
 0x365   : > { %v9320_v36 = vpop.f32.mrf.mxu1  ;;  %v1977_v42 = vadd.f32 %v11789_v53, %v1727_v56  ;;  %v11792_v55 = vld [vmem:[#allocation38_spill] sm:$0xff]  ;;  %v2787_v56 = vld [vmem:[#allocation2 + $0x19a] sm:$0xff] }
 0x366   : > { %v2725_v32 = vadd.f32 %v11783_v44, %v2475_v37  ;;  %v2276_v37 = vld [vmem:[#allocation2 + $0x110] sm:$0xff]  ;;  %v8074_v53 = vld [vmem:[%s11679_s5 + $0x28] sm:$0xff] }
 0x367   : > { %v2227_v57 = vadd.f32 %v11792_v55, %v1977_v42  ;;  %v11795_v42 = vld [vmem:[#allocation10_spill] sm:$0xff]  ;;  %3747 = vmatpush.bf16.msrb.mxu0 %v8074_v53 }
 0x368   : > { %v2975_v54 = vadd.f32 %v9194_v45, %v2725_v32  ;;  %7763 = vmatmul.msk.bf16.gmra.mxu1 %vm637_vm2, %v11787_v48  ;;  %v2298_v32 = vpack.c.bf16 %v2276_v37, %v2275_v22  ;;  %v1728_v48 = vadd.f32 %v11791_v21, %v11790_v10  ;;  %v11793_v37 = vld [vmem:[#allocation25_spill] sm:$0xff]  ;;  %v11796_v21 = vld [vmem:[#allocation42_spill] sm:$0xff] }
 0x36a   : > { %v3007_v39 = vmax.f32 %v2975_v54, 0.0 }
 0x36b   : > { %v2397_v35 = vpop.f32.mrf.mxu3 }
 0x36c   : > { %3041 = vst.msk [vmem:[#allocation3 + $0x19] sm:$0xff] %vm3040_vm4, %v3007_v39  ;;  %v2476_v44 = vadd.f32 %v2397_v35, %v2226_v43  ;;  %v9341_v35 = vpop.f32.mrf.mxu0 }
 0x36d   : > { %v9333_v5 = vpop.f32.mrf.mxu1 }
 0x36e   : > { %v2726_v45 = vadd.f32 %v9059_v31, %v2476_v44  ;;  %v1978_v44 = vadd.f32 %v11793_v37, %v1728_v48  ;;  %v2277_v48 = vld [vmem:[#allocation2 + $0x120] sm:$0xff] }
 0x36f   : > { %v11797_v37 = vld [vmem:[#allocation28_spill] sm:$0xff] }
 0x370   : > { %v2976_v54 = vadd.f32 %v9203_v38, %v2726_v45  ;;  %7678 = vmatmul.msk.bf16.gmra.mxu3 %vm637_vm2, %v2298_v32  ;;  %v2788_v38 = vld [vmem:[#allocation2 + $0x1a2] sm:$0xff] }
 0x371   : > { %v2804_v55 = vpack.c.bf16 %v2788_v38, %v2787_v56  ;;  %v8072_v56 = vld [vmem:[%s11679_s5 + $0x18] sm:$0xff] }
 0x372   : > { %v3008_v51 = vmax.f32 %v2976_v54, 0.0  ;;  %3513 = vmatpush.bf16.msrb.mxu3 %v8072_v56  ;;  %v11801_v56 = vld [vmem:[#allocation31_spill] sm:$0xff] }
 0x373   : > { %v3085_v39 = vld [vmem:[#allocation3 + $0x1a] sm:$0x1]  ;;  %v2400_v43 = vpop.f32.mrf.mxu3 }
 0x374   : > { %3104 = vst.msk [vmem:[#allocation3 + $0x18] sm:$0x1] %vm3102_vm5, %v3085_v39  ;;  %v2477_v31 = vadd.f32 %v2400_v43, %v2227_v57  ;;  %v11794_v57 = vld [vmem:[#allocation60_spill] sm:$0xff] }
 0x375   : > { %3042 = vst.msk [vmem:[#allocation3 + $0x21] sm:$0xff] %vm3040_vm4, %v3008_v51  ;;  %v9346_v45 = vpop.f32.mrf.mxu1  ;;  %v1729_v54 = vadd.f32 %v11795_v42, %v11794_v57  ;;  %v2228_v51 = vadd.f32 %v11796_v21, %v1978_v44  ;;  %v2278_v39 = vld [vmem:[#allocation2 + $0x128] sm:$0xff]  ;;  %v11798_v57 = vld [vmem:[#allocation62_spill] sm:$0xff]  ;;  %v11799_v42 = vld [vmem:[#allocation11_spill] sm:$0xff] }
 0x376   : > { %v2727_v22 = vadd.f32 %v9070_v9, %v2477_v31  ;;  %v8073_v31 = vld [vmem:[%s11679_s5 + $0x20] sm:$0xff] }
 0x377   : > { %v1979_v44 = vadd.f32 %v11797_v37, %v1729_v54  ;;  %3748 = vmatpush.bf16.msrb.mxu0 %v8073_v31 }
 0x378   : > { %v2977_v32 = vadd.f32 %v9211_v18, %v2727_v22  ;;  %7764 = vmatmul.msk.bf16.gmra.mxu1 %vm637_vm2, %v2804_v55  ;;  %v2299_v22 = vpack.c.bf16 %v2278_v39, %v2277_v48 }
 0x37a   : > { %v3009_v10 = vmax.f32 %v2977_v32, 0.0  ;;  %v9366_v32 = vpop.f32.mrf.mxu0 }
 0x37b   : > { %v2402_v9 = vpop.f32.mrf.mxu3 }
 0x37c   : > { %v3122_v43 = vld [vmem:[#allocation3 + $0x27] sm:$0x1]  ;;  %3043 = vst.msk [vmem:[#allocation3 + $0x31] sm:$0xff] %vm3040_vm4, %v3009_v10  ;;  %v2478_v18 = vadd.f32 %v2402_v9, %v2228_v51  ;;  %v1730_v10 = vadd.f32 %v11799_v42, %v11798_v57  ;;  %v11800_v51 = vld [vmem:[#allocation45_spill] sm:$0xff]  ;;  %v11802_v57 = vld [vmem:[#allocation63_spill] sm:$0xff] }
 0x37d   : > { %3140 = vst.msk [vmem:[#allocation3 + $0x29] sm:$0x1] %vm3102_vm5, %v3122_v43  ;;  %v9368_v55 = vpop.f32.mrf.mxu1  ;;  %v2229_v9 = vadd.f32 %v11800_v51, %v1979_v44  ;;  %v3862_v43 = vld [vmem:[#allocation3 + $0x18] sm:$0xff] }
 0x37e   : > { %v2728_v38 = vadd.f32 %v9087_v60, %v2478_v18  ;;  %v3863_v18 = vld [vmem:[#allocation3 + $0x20] sm:$0xff]  ;;  %v11803_v42 = vld [vmem:[#allocation12_spill] sm:$0xff] }
 0x37f   : > { %v9389_v44 = vpack.c.bf16 %v3863_v18, %v3862_v43  ;;  %v1731_v51 = vadd.f32 %v11803_v42, %v11802_v57 }
 0x380   : > { %v2978_v53 = vadd.f32 %v9220_v58, %v2728_v38  ;;  %7679 = vmatmul.msk.bf16.gmra.mxu3 %vm637_vm2, %v2299_v22  ;;  %v8078_v58 = vld [vmem:[%s11679_s5 + $0x48] sm:$0xff]  ;;  %v1980_v38 = vadd.f32 %v11801_v56, %v1730_v10  ;;  %v2279_v10 = vld [vmem:[#allocation2 + $0x138] sm:$0xff] }
 0x381   : > { %4215 = vmatpush.bf16.msrb.mxu2 %v8078_v58  ;;  %v11805_v56 = vld [vmem:[#allocation35_spill] sm:$0xff] }
 0x382   : > { %v3010_v21 = vmax.f32 %v2978_v53, 0.0  ;;  %v9391_v53 = vpop.f32.mrf.mxu0 }
 0x383   : > { %v9375_v60 = vld [vmem:[#allocation3 + $0x31] sm:$0xff]  ;;  %v2405_v54 = vpop.f32.mrf.mxu3 }
 0x384   : > { %v3086_v48 = vld [vmem:[#allocation3 + $0x32] sm:$0x1]  ;;  %3076 = vst.msk [vmem:[#allocation3 + $0x1] sm:$0xff] %vm3040_vm4, %v9375_v60  ;;  %v2479_v39 = vadd.f32 %v2405_v54, %v2229_v9 }
 0x385   : > { %3105 = vst.msk [vmem:[#allocation3 + $0x30] sm:$0x1] %vm3102_vm5, %v3086_v48  ;;  %v9386_v22 = vpop.f32.mrf.mxu1  ;;  %v2280_v54 = vld [vmem:[#allocation2 + $0x140] sm:$0xff] }
 0x386   : > { %3044 = vst.msk [vmem:[#allocation3 + $0x39] sm:$0xff] %vm3040_vm4, %v3010_v21  ;;  %v2729_v31 = vadd.f32 %v9101_v11, %v2479_v39  ;;  %v11804_v21 = vld [vmem:[#allocation49_spill] sm:$0xff] }
 0x387   : > { %v2230_v11 = vadd.f32 %v11804_v21, %v1980_v38  ;;  %v1981_v38 = vadd.f32 %v11805_v56, %v1731_v51  ;;  %v11807_v21 = vld [vmem:[#allocation13_spill] sm:$0xff] }
 0x388   : > { %v2979_v37 = vadd.f32 %v9228_v40, %v2729_v31  ;;  %7857 = vmatmul.msk.bf16.vlgmr.msrb.gmra.mxu1 %vm3040_vm4, %v9389_v44  ;;  %v2300_v31 = vpack.c.bf16 %v2280_v54, %v2279_v10 }
 0x38a   : > { %v3011_v9 = vmax.f32 %v2979_v37, 0.0  ;;  %v9416_v10 = vpop.f32.mrf.mxu0 }
 0x38b   : > { %v2407_v48 = vpop.f32.mrf.mxu3  ;;  %v3084_v39 = vld [vmem:[#allocation3 + $0x2] sm:$0x1] }
 0x38c   : > { %3045 = vst.msk [vmem:[#allocation3 + $0x49] sm:$0xff] %vm3040_vm4, %v3011_v9  ;;  %v2480_v40 = vadd.f32 %v2407_v48, %v2230_v11  ;;  %v11806_v9 = vld [vmem:[#allocation65_spill] sm:$0xff]  ;;  %v3864_v56 = vld [vmem:[#allocation3 + $0x30] sm:$0xff] }
 0x38d   : > { %v9399_v58 = vld [vmem:[#allocation3 + $0x39] sm:$0xff]  ;;  %3103 = vst.msk [vmem:[#allocation3] sm:$0x1] %vm3102_vm5, %v3084_v39  ;;  %v9409_v57 = vpop.f32.mrf.mxu1  ;;  %v1732_v11 = vadd.f32 %v11807_v21, %v11806_v9  ;;  %v11808_v39 = vld [vmem:[#allocation52_spill] sm:$0xff] }
 0x38e   : > { %v3123_v43 = vld [vmem:[#allocation3 + $0x3f] sm:$0x1]  ;;  %3077 = vst.msk [vmem:[#allocation3 + $0x9] sm:$0xff] %vm3040_vm4, %v9399_v58  ;;  %v2730_v18 = vadd.f32 %v9113_v62, %v2480_v40  ;;  %v2231_v62 = vadd.f32 %v11808_v39, %v1981_v38 }
 0x38f   : > { %3141 = vst.msk [vmem:[#allocation3 + $0x41] sm:$0x1] %vm3102_vm5, %v3123_v43 }
 0x390   : > { %v2980_v42 = vadd.f32 %v9239_v17, %v2730_v18  ;;  %7680 = vmatmul.msk.bf16.gmra.mxu3 %vm637_vm2, %v2300_v31  ;;  %v3865_v18 = vld [vmem:[#allocation3 + $0x38] sm:$0xff] }
 0x392   : > { %v3012_v48 = vmax.f32 %v2980_v42, 0.0  ;;  %v11809_v42 = vld [vmem:[#allocation39_spill] sm:$0xff] }
 0x393   : > { %v3087_v51 = vld [vmem:[#allocation3 + $0x4a] sm:$0x1]  ;;  %v2410_v54 = vpop.f32.mrf.mxu3  ;;  %v1982_v21 = vadd.f32 %v11809_v42, %v1732_v11 }
 0x394   : > { %3106 = vst.msk [vmem:[#allocation3 + $0x48] sm:$0x1] %vm3102_vm5, %v3087_v51  ;;  %v2481_v40 = vadd.f32 %v2410_v54, %v2231_v62  ;;  %v3161_v43 = vld [vmem:[#allocation3] sm:$0xff]  ;;  %v9427_v62 = vpack.c.bf16 %v3865_v18, %v3864_v56 }
 0x395   : > { %3046 = vst.msk [vmem:[#allocation3 + $0x51] sm:$0xff] %vm3040_vm4, %v3012_v48  ;;  %v3162_v17 = vld [vmem:[#allocation3 + $0x8] sm:$0xff]  ;;  %v9423_v38 = vpop.f32.mrf.mxu1 }
 0x396   : > { %v3121_v31 = vld [vmem:[#allocation3 + $0xf] sm:$0x1]  ;;  %v2731_v37 = vadd.f32 %v9131_v49, %v2481_v40  ;;  %v3193_v9 = vpack.c.bf16 %v3162_v17, %v3161_v43  ;;  %v2281_v40 = vld [vmem:[#allocation2 + $0x150] sm:$0xff] }
 0x397   : > { %3139 = vst.msk [vmem:[#allocation3 + $0x11] sm:$0x1] %vm3102_vm5, %v3121_v31  ;;  %v11810_v48 = vld [vmem:[#allocation55_spill] sm:$0xff]  ;;  %v9433_v31 = vpop.f32.mrf.mxu0 }
 0x398   : > { %v2981_v39 = vadd.f32 %v9247_v12, %v2731_v37  ;;  %7773 = vmatmul.msk.bf16.vlgmr.msra.gmra.mxu2 %vm3040_vm4, %v3193_v9  ;;  %7858 = vmatmul.msk.bf16.gmra.mxu1 %vm3040_vm4, %v9427_v62  ;;  %v2232_v54 = vadd.f32 %v11810_v48, %v1982_v21  ;;  %v2282_v43 = vld [vmem:[#allocation2 + $0x158] sm:$0xff] }
 0x399   : > { %v3628_v12 = vld [vmem:[#allocation3 + $0x2] sm:$0xff]  ;;  %v2301_v9 = vpack.c.bf16 %v2282_v43, %v2281_v40 }
 0x39a   : > { %v3013_v51 = vmax.f32 %v2981_v39, 0.0 }
 0x39b   : > { %v2412_v49 = vpop.f32.mrf.mxu3 }
 0x39c   : > { %v3124_v11 = vld [vmem:[#allocation3 + $0x57] sm:$0x1]  ;;  %3047 = vst.msk [vmem:[#allocation3 + $0x61] sm:$0xff] %vm3040_vm4, %v3013_v51  ;;  %v2482_v17 = vadd.f32 %v2412_v49, %v2232_v54 }
 0x39d   : > { %3142 = vst.msk [vmem:[#allocation3 + $0x59] sm:$0x1] %vm3102_vm5, %v3124_v11  ;;  %v9437_v42 = vpop.f32.mrf.mxu1  ;;  %v3867_v49 = vld [vmem:[#allocation3 + $0x50] sm:$0xff] }
 0x39e   : > { %v3629_v37 = vld [vmem:[#allocation3 + $0xa] sm:$0xff]  ;;  %v2732_v56 = vadd.f32 %v9144_v19, %v2482_v17 }
 0x39f   : > { %v3660_v18 = vpack.c.bf16 %v3629_v37, %v3628_v12  ;;  %v3866_v19 = vld [vmem:[#allocation3 + $0x48] sm:$0xff]  ;;  %v9446_v43 = vpop.f32.mrf.mxu0 }
 0x3a0   : > { %v2982_v21 = vadd.f32 %v9258_v23, %v2732_v56  ;;  %7681 = vmatmul.msk.bf16.gmra.mxu3 %vm637_vm2, %v2301_v9  ;;  %v9453_v17 = vpack.c.bf16 %v3867_v49, %v3866_v19  ;;  %v3631_v37 = vld [vmem:[#allocation3 + $0x22] sm:$0xff]  ;;  %v2283_v56 = vld [vmem:[#allocation2 + $0x168] sm:$0xff] }
 0x3a1   : > { %7829 = vmatmul.msk.bf16.vlgmr.msrb.gmra.mxu0 %vm3040_vm4, %v3660_v18  ;;  %v2284_v18 = vld [vmem:[#allocation2 + $0x170] sm:$0xff] }
 0x3a2   : > { %v3014_v39 = vmax.f32 %v2982_v21, 0.0 }
 0x3a3   : > { %v3088_v51 = vld [vmem:[#allocation3 + $0x62] sm:$0x1]  ;;  %v2415_v48 = vpop.f32.mrf.mxu3 }
 0x3a4   : > { %3107 = vst.msk [vmem:[#allocation3 + $0x60] sm:$0x1] %vm3102_vm5, %v3088_v51  ;;  %v2483_v54 = vadd.f32 %v2415_v48, %v9074_v2 }
 0x3a5   : > { %3048 = vst.msk [vmem:[#allocation3 + $0x69] sm:$0xff] %vm3040_vm4, %v3014_v39  ;;  %v9448_v23 = vpop.f32.mrf.mxu1  ;;  %v2302_v39 = vpack.c.bf16 %v2284_v18, %v2283_v56 }
 0x3a6   : > { %v2733_v40 = vadd.f32 %v9236_v20, %v2483_v54 }
 0x3a7   : > { %v9466_v54 = vpop.f32.mrf.mxu0 }
 0x3a8   : > { %v2983_v11 = vadd.f32 %v9268_v24, %v2733_v40  ;;  %7774 = vmatmul.msk.bf16.gmra.mxu2 %vm3040_vm4, %v9389_v44  ;;  %7859 = vmatmul.msk.bf16.gmra.mxu1 %vm3040_vm4, %v9453_v17  ;;  %v3630_v24 = vld [vmem:[#allocation3 + $0x1a] sm:$0xff] }
 0x3a9   : > { %v3661_v21 = vpack.c.bf16 %v3631_v37, %v3630_v24  ;;  %v2286_v24 = vld [vmem:[#allocation2 + $0x188] sm:$0xff] }
 0x3aa   : > { %v3015_v12 = vmax.f32 %v2983_v11, 0.0 }
 0x3ab   : > { %v2417_v2 = vpop.f32.mrf.mxu3 }
 0x3ac   : > { %v3125_v20 = vld [vmem:[#allocation3 + $0x6f] sm:$0x1]  ;;  %3049 = vst.msk [vmem:[#allocation3 + $0x79] sm:$0xff] %vm3040_vm4, %v3015_v12  ;;  %v2484_v9 = vadd.f32 %v2417_v2, %v9085_v27 }
 0x3ad   : > { %3143 = vst.msk [vmem:[#allocation3 + $0x71] sm:$0x1] %vm3102_vm5, %v3125_v20  ;;  %v9461_v51 = vpop.f32.mrf.mxu1  ;;  %v3869_v11 = vld [vmem:[#allocation3 + $0x68] sm:$0xff]  ;;  %v3633_v20 = vld [vmem:[#allocation3 + $0x3a] sm:$0xff] }
 0x3ae   : > { %v2734_v44 = vadd.f32 %v9249_v34, %v2484_v9  ;;  %v3868_v34 = vld [vmem:[#allocation3 + $0x60] sm:$0xff]  ;;  %v2285_v9 = vld [vmem:[#allocation2 + $0x180] sm:$0xff] }
 0x3af   : > { %v9477_v37 = vpack.c.bf16 %v3869_v11, %v3868_v34 }
 0x3b0   : > { %v2984_v48 = vadd.f32 %v9282_v8, %v2734_v44  ;;  %7682 = vmatmul.msk.bf16.gmra.mxu3 %vm637_vm2, %v2302_v39  ;;  %v2303_v39 = vpack.c.bf16 %v2286_v24, %v2285_v9  ;;  %v3635_v9 = vld [vmem:[#allocation3 + $0x52] sm:$0xff]  ;;  %v2287_v24 = vld [vmem:[#allocation2 + $0x198] sm:$0xff] }
 0x3b1   : > { %7830 = vmatmul.msk.bf16.gmra.mxu0 %vm3040_vm4, %v3661_v21 }
 0x3b2   : > { %v3016_v19 = vmax.f32 %v2984_v48, 0.0  ;;  %v8071_v48 = vld [vmem:[%s11679_s5 + $0x10] sm:$0xff] }
 0x3b3   : > { %v3089_v49 = vld [vmem:[#allocation3 + $0x7a] sm:$0x1]  ;;  %v2420_v27 = vpop.f32.mrf.mxu3  ;;  %3514 = vmatpush.bf16.msrb.mxu3 %v8071_v48 }
 0x3b4   : > { %3108 = vst.msk [vmem:[#allocation3 + $0x78] sm:$0x1] %vm3102_vm5, %v3089_v49  ;;  %v2485_v40 = vadd.f32 %v2420_v27, %v9097_v15  ;;  %v9481_v15 = vpop.f32.mrf.mxu0 }
 0x3b5   : > { %3050 = vst.msk [vmem:[#allocation3 + $0x81] sm:$0xff] %vm3040_vm4, %v3016_v19  ;;  %v9472_v8 = vpop.f32.mrf.mxu1 }
 0x3b6   : > { %v2735_v12 = vadd.f32 %v9262_v4, %v2485_v40 }
 0x3b8   : > { %v2985_v2 = vadd.f32 %v9289_v7, %v2735_v12  ;;  %7775 = vmatmul.msk.bf16.gmra.mxu2 %vm3040_vm4, %v9427_v62  ;;  %7860 = vmatmul.msk.bf16.gmra.mxu1 %vm3040_vm4, %v9477_v37  ;;  %v3632_v62 = vld [vmem:[#allocation3 + $0x32] sm:$0xff] }
 0x3b9   : > { %v3662_v21 = vpack.c.bf16 %v3633_v20, %v3632_v62 }
 0x3ba   : > { %v3017_v56 = vmax.f32 %v2985_v2, 0.0 }
 0x3bb   : > { %v2422_v18 = vpop.f32.mrf.mxu3  ;;  %v3870_v11 = vld [vmem:[#allocation3 + $0x78] sm:$0xff] }
 0x3bc   : > { %v3126_v4 = vld [vmem:[#allocation3 + $0x87] sm:$0x1]  ;;  %3051 = vst.msk [vmem:[#allocation3 + $0x91] sm:$0xff] %vm3040_vm4, %v3017_v56  ;;  %v2486_v7 = vadd.f32 %v2422_v18, %v9109_v52  ;;  %v9497_v34 = vpop.f32.mrf.mxu0 }
 0x3bd   : > { %3144 = vst.msk [vmem:[#allocation3 + $0x89] sm:$0x1] %vm3102_vm5, %v3126_v4  ;;  %v9490_v19 = vpop.f32.mrf.mxu1  ;;  %v3871_v12 = vld [vmem:[#allocation3 + $0x80] sm:$0xff]  ;;  %v2288_v4 = vld [vmem:[#allocation2 + $0x1a0] sm:$0xff] }
 0x3be   : > { %v2736_v44 = vadd.f32 %v9275_v3, %v2486_v7  ;;  %v9506_v18 = vpack.c.bf16 %v3871_v12, %v3870_v11 }
 0x3c0   : > { %v2986_v49 = vadd.f32 %v9301_v16, %v2736_v44  ;;  %7683 = vmatmul.msk.bf16.gmra.mxu3 %vm637_vm2, %v2303_v39  ;;  %v2304_v44 = vpack.c.bf16 %v2288_v4, %v2287_v24 }
 0x3c1   : > { %7831 = vmatmul.msk.bf16.gmra.mxu0 %vm3040_vm4, %v3662_v21 }
 0x3c2   : > { %v3018_v52 = vmax.f32 %v2986_v49, 0.0 }
 0x3c3   : > { %v3090_v27 = vld [vmem:[#allocation3 + $0x92] sm:$0x1]  ;;  %v2425_v40 = vpop.f32.mrf.mxu3 }
 0x3c4   : > { %3109 = vst.msk [vmem:[#allocation3 + $0x90] sm:$0x1] %vm3102_vm5, %v3090_v27  ;;  %v2487_v3 = vadd.f32 %v2425_v40, %v9120_v30  ;;  %v9514_v21 = vpop.f32.mrf.mxu0 }
 0x3c5   : > { %3052 = vst.msk [vmem:[#allocation3 + $0x99] sm:$0xff] %vm3040_vm4, %v3018_v52  ;;  %v9501_v2 = vpop.f32.mrf.mxu1 }
 0x3c6   : > { %v2737_v16 = vadd.f32 %v9286_v25, %v2487_v3 }
 0x3c8   : > { %v2987_v56 = vadd.f32 %v9320_v36, %v2737_v16  ;;  %7776 = vmatmul.msk.bf16.gmra.mxu2 %vm3040_vm4, %v9453_v17  ;;  %7861 = vmatmul.msk.bf16.gmra.mxu1 %vm3040_vm4, %v9506_v18  ;;  %v3634_v36 = vld [vmem:[#allocation3 + $0x4a] sm:$0xff] }
 0x3c9   : > { %v3663_v62 = vpack.c.bf16 %v3635_v9, %v3634_v36 }
 0x3ca   : > { %v3019_v20 = vmax.f32 %v2987_v56, 0.0 }
 0x3cb   : > { %v2427_v30 = vpop.f32.mrf.mxu3 }
 0x3cc   : > { %v3127_v7 = vld [vmem:[#allocation3 + $0x9f] sm:$0x1]  ;;  %3053 = vst.msk [vmem:[#allocation3 + $0xa9] sm:$0xff] %vm3040_vm4, %v3019_v20  ;;  %v2488_v25 = vadd.f32 %v2427_v30, %v9133_v50  ;;  %v9532_v16 = vpop.f32.mrf.mxu0  ;;  %v3637_v20 = vld [vmem:[#allocation3 + $0x6a] sm:$0xff] }
 0x3cd   : > { %3145 = vst.msk [vmem:[#allocation3 + $0xa1] sm:$0x1] %vm3102_vm5, %v3127_v7  ;;  %v9516_v39 = vpop.f32.mrf.mxu1  ;;  %v3873_v40 = vld [vmem:[#allocation3 + $0x98] sm:$0xff]  ;;  %v3395_v30 = vld [vmem:[#allocation3 + $0x9] sm:$0xff] }
 0x3ce   : > { %v2738_v17 = vadd.f32 %v9305_v6, %v2488_v25  ;;  %v3872_v6 = vld [vmem:[#allocation3 + $0x90] sm:$0xff] }
 0x3cf   : > { %v9530_v12 = vpack.c.bf16 %v3873_v40, %v3872_v6  ;;  %v3639_v40 = vld [vmem:[#allocation3 + $0x82] sm:$0xff] }
 0x3d0   : > { %v2988_v48 = vadd.f32 %v9333_v5, %v2738_v17  ;;  %7684 = vmatmul.msk.bf16.gmra.mxu3 %vm637_vm2, %v2304_v44  ;;  %vm7207_vm2 = vcmask 720512  }
 0x3d1   : > { %7832 = vmatmul.msk.bf16.gmra.mxu0 %vm3040_vm4, %v3663_v62 }
 0x3d2   : > { %v3020_v49 = vmax.f32 %v2988_v48, 0.0 }
 0x3d3   : > { %v3091_v52 = vld [vmem:[#allocation3 + $0xaa] sm:$0x1]  ;;  %v2430_v50 = vpop.f32.mrf.mxu3 }
 0x3d4   : > { %3110 = vst.msk [vmem:[#allocation3 + $0xa8] sm:$0x1] %vm3102_vm5, %v3091_v52  ;;  %v2489_v27 = vadd.f32 %v2430_v50, %v9142_v0  ;;  %v9545_v62 = vpop.f32.mrf.mxu0 }
 0x3d5   : > { %3054 = vst.msk [vmem:[#allocation3 + $0xb1] sm:$0xff] %vm3040_vm4, %v3020_v49  ;;  %v9525_v11 = vpop.f32.mrf.mxu1 }
 0x3d6   : > { %v2739_v3 = vadd.f32 %v9328_v41, %v2489_v27 }
 0x3d8   : > { %v2989_v5 = vadd.f32 %v9346_v45, %v2739_v3  ;;  %7777 = vmatmul.msk.bf16.gmra.mxu2 %vm3040_vm4, %v9477_v37  ;;  %7862 = vmatmul.msk.bf16.gmra.mxu1 %vm3040_vm4, %v9530_v12  ;;  %v3636_v45 = vld [vmem:[#allocation3 + $0x62] sm:$0xff] }
 0x3d9   : > { %v3394_v37 = vld [vmem:[#allocation3 + $0x1] sm:$0xff]  ;;  %v3664_v4 = vpack.c.bf16 %v3637_v20, %v3636_v45 }
 0x3da   : > { %v3021_v56 = vmax.f32 %v2989_v5, 0.0  ;;  %v3426_v7 = vpack.c.bf16 %v3395_v30, %v3394_v37  ;;  %v3397_v3 = vld [vmem:[#allocation3 + $0x21] sm:$0xff] }
 0x3db   : > { %v2432_v0 = vpop.f32.mrf.mxu3 }
 0x3dc   : > { %v3128_v9 = vld [vmem:[#allocation3 + $0xb7] sm:$0x1]  ;;  %3055 = vst.msk [vmem:[#allocation3 + $0xc1] sm:$0xff] %vm3040_vm4, %v3021_v56  ;;  %v2490_v41 = vadd.f32 %v2432_v0, %v9153_v33  ;;  %v9562_v56 = vpop.f32.mrf.mxu0 }
 0x3dd   : > { %3146 = vst.msk [vmem:[#allocation3 + $0xb9] sm:$0x1] %vm3102_vm5, %v3128_v9  ;;  %v9540_v25 = vpop.f32.mrf.mxu1  ;;  %v3875_v49 = vld [vmem:[#allocation3 + $0xb0] sm:$0xff] }
 0x3de   : > { %v2740_v24 = vadd.f32 %v9341_v35, %v2490_v41  ;;  %v3874_v35 = vld [vmem:[#allocation3 + $0xa8] sm:$0xff] }
 0x3df   : > { %v9556_v27 = vpack.c.bf16 %v3875_v49, %v3874_v35  ;;  %v3640_v49 = vld [vmem:[#allocation3 + $0x92] sm:$0xff] }
 0x3e0   : > { %v2990_v36 = vadd.f32 %v9368_v55, %v2740_v24  ;;  %7801 = vmatmul.msk.bf16.vlgmr.msrb.gmra.mxu3 %vm3040_vm4, %v3426_v7 }
 0x3e1   : > { %7833 = vmatmul.msk.bf16.gmra.mxu0 %vm3040_vm4, %v3664_v4 }
 0x3e2   : > { %v3022_v17 = vmax.f32 %v2990_v36, 0.0 }
 0x3e3   : > { %v3092_v33 = vld [vmem:[#allocation3 + $0xc2] sm:$0x1]  ;;  %v2435_v44 = vpop.f32.mrf.mxu3 }
 0x3e4   : > { %3111 = vst.msk [vmem:[#allocation3 + $0xc0] sm:$0x1] %vm3102_vm5, %v3092_v33  ;;  %v2491_v48 = vadd.f32 %v2435_v44, %v9162_v14  ;;  %v9578_v36 = vpop.f32.mrf.mxu0 }
 0x3e5   : > { %3056 = vst.msk [vmem:[#allocation3 + $0xc9] sm:$0xff] %vm3040_vm4, %v3022_v17  ;;  %v9551_v55 = vpop.f32.mrf.mxu1 }
 0x3e6   : > { %v2741_v52 = vadd.f32 %v9366_v32, %v2491_v48  ;;  %v3641_v48 = vld [vmem:[#allocation3 + $0x9a] sm:$0xff] }
 0x3e8   : > { %v2991_v50 = vadd.f32 %v9386_v22, %v2741_v52  ;;  %7778 = vmatmul.msk.bf16.gmra.mxu2 %vm3040_vm4, %v9506_v18  ;;  %7863 = vmatmul.msk.bf16.gmra.mxu1 %vm3040_vm4, %v9556_v27  ;;  %v3638_v22 = vld [vmem:[#allocation3 + $0x7a] sm:$0xff]  ;;  %v3666_v52 = vpack.c.bf16 %v3641_v48, %v3640_v49 }
 0x3e9   : > { %v3396_v18 = vld [vmem:[#allocation3 + $0x19] sm:$0xff]  ;;  %v3665_v20 = vpack.c.bf16 %v3639_v40, %v3638_v22 }
 0x3ea   : > { %v3023_v6 = vmax.f32 %v2991_v50, 0.0  ;;  %v9566_v30 = vpack.c.bf16 %v3397_v3, %v3396_v18 }
 0x3eb   : > { %v2437_v14 = vpop.f32.mrf.mxu3 }
 0x3ec   : > { %v3129_v5 = vld [vmem:[#allocation3 + $0xcf] sm:$0x1]  ;;  %3057 = vst.msk [vmem:[#allocation3 + $0xd9] sm:$0xff] %vm3040_vm4, %v3023_v6  ;;  %v2492_v32 = vadd.f32 %v2437_v14, %v9170_v63  ;;  %v11811_v6 = vpack.c.bf16 %v9399_v58, %v9375_v60  ;;  %v9601_v14 = vpop.f32.mrf.mxu0 }
 0x3ed   : > { %3147 = vst.msk [vmem:[#allocation3 + $0xd1] sm:$0x1] %vm3102_vm5, %v3129_v5  ;;  %v9568_v9 = vpop.f32.mrf.mxu1  ;;  %v3877_v4 = vld [vmem:[#allocation3 + $0xc8] sm:$0xff] }
 0x3ee   : > { %v2742_v0 = vadd.f32 %v9391_v53, %v2492_v32  ;;  %v3876_v53 = vld [vmem:[#allocation3 + $0xc0] sm:$0xff] }
 0x3ef   : > { %v9585_v33 = vpack.c.bf16 %v3877_v4, %v3876_v53 }
 0x3f0   : > { %v2992_v41 = vadd.f32 %v9409_v57, %v2742_v0  ;;  %7802 = vmatmul.msk.bf16.gmra.mxu3 %vm3040_vm4, %v9566_v30 }
 0x3f1   : > { %7834 = vmatmul.msk.bf16.gmra.mxu0 %vm3040_vm4, %v3665_v20 }
 0x3f2   : > { %v3024_v63 = vmax.f32 %v2992_v41, 0.0  ;;  %v3643_v41 = vld [vmem:[#allocation3 + $0xb2] sm:$0xff] }
 0x3f3   : > { %v3093_v45 = vld [vmem:[#allocation3 + $0xda] sm:$0x1]  ;;  %v2440_v37 = vpop.f32.mrf.mxu3 }
 0x3f4   : > { %3112 = vst.msk [vmem:[#allocation3 + $0xd8] sm:$0x1] %vm3102_vm5, %v3093_v45  ;;  %v2493_v24 = vadd.f32 %v2440_v37, %v9182_v1  ;;  %v9619_v0 = vpop.f32.mrf.mxu0 }
 0x3f5   : > { %3058 = vst.msk [vmem:[#allocation3 + $0xe1] sm:$0xff] %vm3040_vm4, %v3024_v63  ;;  %v9580_v57 = vpop.f32.mrf.mxu1  ;;  %v3401_v63 = vld [vmem:[#allocation3 + $0x51] sm:$0xff] }
 0x3f6   : > { %v2743_v7 = vadd.f32 %v9416_v10, %v2493_v24 }
 0x3f8   : > { %v2993_v17 = vadd.f32 %v9423_v38, %v2743_v7  ;;  %7779 = vmatmul.msk.bf16.gmra.mxu2 %vm3040_vm4, %v9530_v12  ;;  %7864 = vmatmul.msk.bf16.gmra.mxu1 %vm3040_vm4, %v9585_v33 }
 0x3fa   : > { %v3025_v44 = vmax.f32 %v2993_v17, 0.0 }
 0x3fb   : > { %v2442_v1 = vpop.f32.mrf.mxu3  ;;  %v3878_v5 = vld [vmem:[#allocation3 + $0xd8] sm:$0xff] }
 0x3fc   : > { %v3130_v35 = vld [vmem:[#allocation3 + $0xe7] sm:$0x1]  ;;  %3059 = vst.msk [vmem:[#allocation3 + $0xf1] sm:$0xff] %vm3040_vm4, %v3025_v44  ;;  %v2494_v10 = vadd.f32 %v2442_v1, %v9190_v61 }
 0x3fd   : > { %3148 = vst.msk [vmem:[#allocation3 + $0xe9] sm:$0x1] %vm3102_vm5, %v3130_v35  ;;  %v9593_v12 = vpop.f32.mrf.mxu1  ;;  %v3879_v32 = vld [vmem:[#allocation3 + $0xe0] sm:$0xff] }
 0x3fe   : > { %v2744_v38 = vadd.f32 %v9433_v31, %v2494_v10  ;;  %v9615_v18 = vpack.c.bf16 %v3879_v32, %v3878_v5 }
 0x400   : > { %v2994_v50 = vadd.f32 %v9437_v42, %v2744_v38  ;;  %7803 = vmatmul.msk.bf16.gmra.mxu3 %vm3040_vm4, %v11811_v6  ;;  %v8077_v42 = vld [vmem:[%s11679_s5 + $0x40] sm:$0xff] }
 0x401   : > { %7835 = vmatmul.msk.bf16.gmra.mxu0 %vm3040_vm4, %v3666_v52  ;;  %4216 = vmatpush.bf16.msrb.mxu2 %v8077_v42  ;;  %v3645_v6 = vld [vmem:[#allocation3 + $0xca] sm:$0xff] }
 0x402   : > { %v3026_v61 = vmax.f32 %v2994_v50, 0.0 }
 0x403   : > { %v3094_v40 = vld [vmem:[#allocation3 + $0xf2] sm:$0x1]  ;;  %v2445_v3 = vpop.f32.mrf.mxu3 }
 0x404   : > { %3113 = vst.msk [vmem:[#allocation3 + $0xf0] sm:$0x1] %vm3102_vm5, %v3094_v40  ;;  %v2495_v31 = vadd.f32 %v2445_v3, %v9199_v46  ;;  %v3402_v3 = vld [vmem:[#allocation3 + $0x61] sm:$0xff] }
 0x405   : > { %3060 = vst.msk [vmem:[#allocation3 + $0xf9] sm:$0xff] %vm3040_vm4, %v3026_v61  ;;  %v9610_v58 = vpop.f32.mrf.mxu1  ;;  %v3403_v61 = vld [vmem:[#allocation3 + $0x69] sm:$0xff] }
 0x406   : > { %v2745_v60 = vadd.f32 %v9446_v43, %v2495_v31  ;;  %v9656_v5 = vpack.c.bf16 %v3403_v61, %v3402_v3 }
 0x408   : > { %v2995_v22 = vadd.f32 %v9448_v23, %v2745_v60  ;;  %7780 = vmatmul.msk.bf16.gmra.mxu2 %vm3040_vm4, %v9556_v27  ;;  %7865 = vmatmul.msk.bf16.gmra.mxu1 %vm3040_vm4, %v9615_v18  ;;  %v3642_v23 = vld [vmem:[#allocation3 + $0xaa] sm:$0xff] }
 0x409   : > { %v3400_v27 = vld [vmem:[#allocation3 + $0x49] sm:$0xff]  ;;  %v3667_v24 = vpack.c.bf16 %v3643_v41, %v3642_v23 }
 0x40a   : > { %v3027_v46 = vmax.f32 %v2995_v22, 0.0  ;;  %v9625_v53 = vpack.c.bf16 %v3401_v63, %v3400_v27 }
 0x40b   : > { %v2447_v20 = vpop.f32.mrf.mxu3  ;;  %v3880_v48 = vld [vmem:[#allocation3 + $0xf0] sm:$0xff] }
 0x40c   : > { %v3131_v43 = vld [vmem:[#allocation3 + $0xff] sm:$0x1]  ;;  %3061 = vst.msk [vmem:[#allocation3 + $0x109] sm:$0xff] %vm3040_vm4, %v3027_v46  ;;  %v2496_v45 = vadd.f32 %v2447_v20, %v9207_v29 }
 0x40d   : > { %3149 = vst.msk [vmem:[#allocation3 + $0x101] sm:$0x1] %vm3102_vm5, %v3131_v43  ;;  %v9627_v4 = vpop.f32.mrf.mxu1  ;;  %v3881_v35 = vld [vmem:[#allocation3 + $0xf8] sm:$0xff] }
 0x40e   : > { %v2746_v37 = vadd.f32 %v9466_v54, %v2496_v45  ;;  %v9635_v54 = vpop.f32.mrf.mxu0  ;;  %v9644_v38 = vpack.c.bf16 %v3881_v35, %v3880_v48 }
 0x410   : > { %v2996_v7 = vadd.f32 %v9461_v51, %v2746_v37  ;;  %7804 = vmatmul.msk.bf16.gmra.mxu3 %vm3040_vm4, %v9625_v53 }
 0x411   : > { %7836 = vmatmul.msk.bf16.gmra.mxu0 %vm3040_vm4, %v3667_v24 }
 0x412   : > { %v3028_v17 = vmax.f32 %v2996_v7, 0.0  ;;  %v3647_v7 = vld [vmem:[#allocation3 + $0xe2] sm:$0xff] }
 0x413   : > { %v3095_v29 = vld [vmem:[#allocation3 + $0x10a] sm:$0x1]  ;;  %v2450_v44 = vpop.f32.mrf.mxu3 }
 0x414   : > { %3114 = vst.msk [vmem:[#allocation3 + $0x108] sm:$0x1] %vm3102_vm5, %v3095_v29  ;;  %v2497_v1 = vadd.f32 %v2450_v44, %v9216_v26  ;;  %v3404_v44 = vld [vmem:[#allocation3 + $0x79] sm:$0xff] }
 0x415   : > { %3062 = vst.msk [vmem:[#allocation3 + $0x111] sm:$0xff] %vm3040_vm4, %v3028_v17  ;;  %v9639_v10 = vpop.f32.mrf.mxu1  ;;  %v3405_v17 = vld [vmem:[#allocation3 + $0x81] sm:$0xff] }
 0x416   : > { %v2747_v51 = vadd.f32 %v9481_v15, %v2497_v1  ;;  %v9689_v35 = vpack.c.bf16 %v3405_v17, %v3404_v44  ;;  %v11814_v17 = vld [vmem:[#allocation57_spill] sm:$0xff] }
 0x418   : > { %v2997_v49 = vadd.f32 %v9472_v8, %v2747_v51  ;;  %7781 = vmatmul.msk.bf16.gmra.mxu2 %vm3040_vm4, %v9585_v33  ;;  %7866 = vmatmul.msk.bf16.gmra.mxu1 %vm3040_vm4, %v9644_v38  ;;  %v3644_v33 = vld [vmem:[#allocation3 + $0xc2] sm:$0xff] }
 0x419   : > { %v3668_v42 = vpack.c.bf16 %v3645_v6, %v3644_v33 }
 0x41a   : > { %v3029_v52 = vmax.f32 %v2997_v49, 0.0 }
 0x41b   : > { %v9648_v26 = vpop.f32.mrf.mxu2  ;;  %v2452_v50 = vpop.f32.mrf.mxu3  ;;  %v3882_v63 = vld [vmem:[#allocation3 + $0x108] sm:$0xff] }
 0x41c   : > { %v3132_v40 = vld [vmem:[#allocation3 + $0x117] sm:$0x1]  ;;  %3063 = vst.msk [vmem:[#allocation3 + $0x121] sm:$0xff] %vm3040_vm4, %v3029_v52  ;;  %v2498_v15 = vadd.f32 %v2452_v50, %v9224_v59 }
 0x41d   : > { %3150 = vst.msk [vmem:[#allocation3 + $0x119] sm:$0x1] %vm3102_vm5, %v3132_v40  ;;  %v9658_v32 = vpop.f32.mrf.mxu1 }
 0x41e   : > { %v9653_v8 = vpop.f32.mrf.mxu0  ;;  %v2748_v31 = vadd.f32 %v9497_v34, %v2498_v15 }
 0x420   : > { %v2998_v60 = vadd.f32 %v9490_v19, %v2748_v31  ;;  %7805 = vmatmul.msk.bf16.gmra.mxu3 %vm3040_vm4, %v9656_v5  ;;  %v3883_v19 = vld [vmem:[#allocation3 + $0x110] sm:$0xff] }
 0x421   : > { %7837 = vmatmul.msk.bf16.gmra.mxu0 %vm3040_vm4, %v3668_v42  ;;  %v9677_v27 = vpack.c.bf16 %v3883_v19, %v3882_v63  ;;  %v3406_v63 = vld [vmem:[#allocation3 + $0x91] sm:$0xff] }
 0x422   : > { %v3030_v59 = vmax.f32 %v2998_v60, 0.0 }
 0x423   : > { %v3096_v22 = vld [vmem:[#allocation3 + $0x122] sm:$0x1]  ;;  %v9664_v46 = vpop.f32.mrf.mxu2  ;;  %v2455_v20 = vpop.f32.mrf.mxu3 }
 0x424   : > { %3115 = vst.msk [vmem:[#allocation3 + $0x120] sm:$0x1] %vm3102_vm5, %v3096_v22  ;;  %v2499_v34 = vadd.f32 %v2455_v20, %v9233_v47  ;;  %v3407_v22 = vld [vmem:[#allocation3 + $0x99] sm:$0xff] }
 0x425   : > { %3064 = vst.msk [vmem:[#allocation3 + $0x129] sm:$0xff] %vm3040_vm4, %v3030_v59  ;;  %v9672_v45 = vpop.f32.mrf.mxu1  ;;  %v3649_v59 = vld [vmem:[#allocation3 + $0xfa] sm:$0xff] }
 0x426   : > { %v9669_v41 = vpop.f32.mrf.mxu0  ;;  %v2749_v43 = vadd.f32 %v9514_v21, %v2499_v34 }
 0x428   : > { %v2999_v23 = vadd.f32 %v9501_v2, %v2749_v43  ;;  %7782 = vmatmul.msk.bf16.gmra.mxu2 %vm3040_vm4, %v9615_v18  ;;  %7867 = vmatmul.msk.bf16.gmra.mxu1 %vm3040_vm4, %v9677_v27  ;;  %v3646_v18 = vld [vmem:[#allocation3 + $0xda] sm:$0xff] }
 0x429   : > { %v3669_v48 = vpack.c.bf16 %v3647_v7, %v3646_v18  ;;  %v11813_v7 = vld [vmem:[#allocation22_spill] sm:$0xff] }
 0x42a   : > { %v3031_v37 = vmax.f32 %v2999_v23, 0.0  ;;  %v9722_v23 = vpack.c.bf16 %v3407_v22, %v3406_v63  ;;  %v3651_v22 = vld [vmem:[#allocation3 + $0x112] sm:$0xff] }
 0x42b   : > { %v9681_v47 = vpop.f32.mrf.mxu2  ;;  %v2457_v24 = vpop.f32.mrf.mxu3  ;;  %v3884_v40 = vld [vmem:[#allocation3 + $0x120] sm:$0xff] }
 0x42c   : > { %v3133_v29 = vld [vmem:[#allocation3 + $0x12f] sm:$0x1]  ;;  %3065 = vst.msk [vmem:[#allocation3 + $0x139] sm:$0xff] %vm3040_vm4, %v3031_v37  ;;  %v2500_v21 = vadd.f32 %v2457_v24, %v9243_v13 }
 0x42d   : > { %3151 = vst.msk [vmem:[#allocation3 + $0x131] sm:$0x1] %vm3102_vm5, %v3133_v29  ;;  %v9691_v51 = vpop.f32.mrf.mxu1  ;;  %v1754_v29 = vadd.f32 %v11814_v17, %v11813_v7 }
 0x42e   : > { %v9686_v2 = vpop.f32.mrf.mxu0  ;;  %v2750_v1 = vadd.f32 %v9532_v16, %v2500_v21 }
 0x430   : > { %v3000_v49 = vadd.f32 %v9516_v39, %v2750_v1  ;;  %7806 = vmatmul.msk.bf16.gmra.mxu3 %vm3040_vm4, %v9689_v35  ;;  %v3885_v39 = vld [vmem:[#allocation3 + $0x128] sm:$0xff] }
 0x431   : > { %7838 = vmatmul.msk.bf16.gmra.mxu0 %vm3040_vm4, %v3669_v48  ;;  %v9710_v31 = vpack.c.bf16 %v3885_v39, %v3884_v40  ;;  %v11815_v1 = vld [vmem:[#allocation14_spill] sm:$0xff] }
 0x432   : > { %v3032_v13 = vmax.f32 %v3000_v49, 0.0 }
 0x433   : > { %v3097_v52 = vld [vmem:[#allocation3 + $0x13a] sm:$0x1]  ;;  %v9697_v50 = vpop.f32.mrf.mxu2  ;;  %v2460_v6 = vpop.f32.mrf.mxu3 }
 0x434   : > { %3116 = vst.msk [vmem:[#allocation3 + $0x138] sm:$0x1] %vm3102_vm5, %v3097_v52  ;;  %v2501_v16 = vadd.f32 %v2460_v6, %v9254_v28  ;;  %v11816_v6 = vld [vmem:[#allocation66_spill] sm:$0xff] }
 0x435   : > { %3066 = vst.msk [vmem:[#allocation3 + $0x141] sm:$0xff] %vm3040_vm4, %v3032_v13  ;;  %v9705_v33 = vpop.f32.mrf.mxu1 }
 0x436   : > { %v9702_v61 = vpop.f32.mrf.mxu0  ;;  %v2751_v15 = vadd.f32 %v9545_v62, %v2501_v16  ;;  %v11812_v62 = vld [vmem:[#allocation20_spill] sm:$0xff]  ;;  %v2004_v16 = vadd.f32 %v11816_v6, %v1754_v29 }
 0x438   : > { %v3001_v3 = vadd.f32 %v9525_v11, %v2751_v15  ;;  %7783 = vmatmul.msk.bf16.gmra.mxu2 %vm3040_vm4, %v9644_v38  ;;  %7868 = vmatmul.msk.bf16.gmra.mxu1 %vm3040_vm4, %v9710_v31  ;;  %v3648_v38 = vld [vmem:[#allocation3 + $0xf2] sm:$0xff] }
 0x439   : > { %v3670_v43 = vpack.c.bf16 %v3649_v59, %v3648_v38  ;;  %v3408_v38 = vld [vmem:[#allocation3 + $0xa9] sm:$0xff] }
 0x43a   : > { %v3033_v42 = vmax.f32 %v3001_v3, 0.0 }
 0x43b   : > { %v9714_v28 = vpop.f32.mrf.mxu2  ;;  %v2462_v60 = vpop.f32.mrf.mxu3  ;;  %v3886_v49 = vld [vmem:[#allocation3 + $0x138] sm:$0xff] }
 0x43c   : > { %v3134_v20 = vld [vmem:[#allocation3 + $0x147] sm:$0x1]  ;;  %3067 = vst.msk [vmem:[#allocation3 + $0x151] sm:$0xff] %vm3040_vm4, %v3033_v42  ;;  %v2502_v34 = vadd.f32 %v2462_v60, %v11812_v62  ;;  %v11817_v42 = vld [vmem:[#allocation15_spill] sm:$0xff] }
 0x43d   : > { %3152 = vst.msk [vmem:[#allocation3 + $0x149] sm:$0x1] %vm3102_vm5, %v3134_v20  ;;  %v9724_v37 = vpop.f32.mrf.mxu1  ;;  %v3887_v13 = vld [vmem:[#allocation3 + $0x140] sm:$0xff]  ;;  %v2254_v60 = vadd.f32 %v11817_v42, %v2004_v16  ;;  %v3409_v20 = vld [vmem:[#allocation3 + $0xb1] sm:$0xff] }
 0x43e   : > { %v9719_v11 = vpop.f32.mrf.mxu0  ;;  %v2752_v19 = vadd.f32 %v9562_v56, %v2502_v34  ;;  %v9746_v15 = vpack.c.bf16 %v3887_v13, %v3886_v49  ;;  %v3650_v34 = vld [vmem:[#allocation3 + $0x10a] sm:$0xff] }
 0x440   : > { %v3002_v24 = vadd.f32 %v9540_v25, %v2752_v19  ;;  %7807 = vmatmul.msk.bf16.gmra.mxu3 %vm3040_vm4, %v9722_v23  ;;  %v3671_v19 = vpack.c.bf16 %v3651_v22, %v3650_v34  ;;  %v3652_v34 = vld [vmem:[#allocation3 + $0x122] sm:$0xff] }
 0x441   : > { %7839 = vmatmul.msk.bf16.gmra.mxu0 %vm3040_vm4, %v3670_v43  ;;  %v9758_v43 = vpack.c.bf16 %v3409_v20, %v3408_v38  ;;  %v3410_v20 = vld [vmem:[#allocation3 + $0xc1] sm:$0xff] }
 0x442   : > { %v3034_v21 = vmax.f32 %v3002_v24, 0.0  ;;  %v9799_v38 = vld [vmem:[%s11680_s6] ss:$0 sm:$0xff] }
 0x443   : > { %v3098_v18 = vld [vmem:[#allocation3 + $0x152] sm:$0x1]  ;;  %v9732_v44 = vpop.f32.mrf.mxu2  ;;  %v2465_v56 = vpop.f32.mrf.mxu3 }
 0x444   : > { %3117 = vst.msk [vmem:[#allocation3 + $0x150] sm:$0x1] %vm3102_vm5, %v3098_v18  ;;  %v2503_v48 = vadd.f32 %v2465_v56, %v11815_v1 }
 0x445   : > { %3068 = vst.msk [vmem:[#allocation3 + $0x159] sm:$0xff] %vm3040_vm4, %v3034_v21  ;;  %v9741_v40 = vpop.f32.mrf.mxu1 }
 0x446   : > { %v9737_v25 = vpop.f32.mrf.mxu0  ;;  %v2753_v52 = vadd.f32 %v9578_v36, %v2503_v48 }
 0x448   : > { %v3003_v39 = vadd.f32 %v9551_v55, %v2753_v52  ;;  %7784 = vmatmul.msk.bf16.gmra.mxu2 %vm3040_vm4, %v9677_v27  ;;  %7869 = vmatmul.msk.bf16.gmra.mxu1 %vm3040_vm4, %v9746_v15 }
 0x44a   : > { %v3035_v3 = vmax.f32 %v3003_v39, 0.0 }
 0x44b   : > { %v9751_v59 = vpop.f32.mrf.mxu2  ;;  %v2467_v36 = vpop.f32.mrf.mxu3  ;;  %v3888_v48 = vld [vmem:[#allocation3 + $0x150] sm:$0xff] }
 0x44c   : > { %v3135_v62 = vld [vmem:[#allocation3 + $0x15f] sm:$0x1]  ;;  %3069 = vst.msk [vmem:[#allocation3 + $0x169] sm:$0xff] %vm3040_vm4, %v3035_v3  ;;  %v2504_v55 = vadd.f32 %v2467_v36, %v2254_v60  ;;  %v3653_v60 = vld [vmem:[#allocation3 + $0x12a] sm:$0xff] }
 0x44d   : > { %3153 = vst.msk [vmem:[#allocation3 + $0x161] sm:$0x1] %vm3102_vm5, %v3135_v62  ;;  %v9760_v24 = vpop.f32.mrf.mxu1  ;;  %v3889_v49 = vld [vmem:[#allocation3 + $0x158] sm:$0xff]  ;;  %v3411_v36 = vld [vmem:[#allocation3 + $0xc9] sm:$0xff] }
 0x44e   : > { %v9755_v27 = vpop.f32.mrf.mxu0  ;;  %v2754_v63 = vadd.f32 %v9601_v14, %v2504_v55  ;;  %11818 = vst [vmem:[#allocation27_spill] sm:$0xff] %v9760_v24  ;;  %v11819_v14 = vld [vmem:[#allocation24_spill] sm:$0xff]  ;;  %v9783_v16 = vpack.c.bf16 %v3889_v49, %v3888_v48 }
 0x450   : > { %v3004_v7 = vadd.f32 %v9568_v9, %v2754_v63  ;;  %7808 = vmatmul.msk.bf16.gmra.mxu3 %vm3040_vm4, %v9758_v43 }
 0x451   : > { %7840 = vmatmul.msk.bf16.gmra.mxu0 %vm3040_vm4, %v3671_v19  ;;  %v3672_v19 = vpack.c.bf16 %v3653_v60, %v3652_v34  ;;  %v8083_v60 = vld [vmem:[%s11679_s5 + $0x70] sm:$0xff] }
 0x452   : > { %v3036_v17 = vmax.f32 %v3004_v7, 0.0  ;;  %v9804_v7 = vpack.c.bf16 %v3411_v36, %v3410_v20  ;;  %v3655_v20 = vld [vmem:[#allocation3 + $0x142] sm:$0xff] }
 0x453   : > { %v9766_v29 = vld [vmem:[#allocation3 + $0x169] sm:$0xff]  ;;  %v9768_v18 = vpop.f32.mrf.mxu2  ;;  %v2470_v56 = vpop.f32.mrf.mxu3 }
 0x454   : > { %v3099_v21 = vld [vmem:[#allocation3 + $0x16a] sm:$0x1]  ;;  %3082 = vst.msk [vmem:[#allocation3 + $0x199] sm:$0xff] %vm3040_vm4, %v9766_v29  ;;  %v2505_v1 = vadd.f32 %v2470_v56, %v11819_v14  ;;  %v3362_v56 = vadd.f32 %v9799_v38, %v9648_v26 }
 0x455   : > { %3118 = vst.msk [vmem:[#allocation3 + $0x168] sm:$0x1] %vm3102_vm5, %v3099_v21  ;;  %v9779_v6 = vpop.f32.mrf.mxu1 }
 0x456   : > { %v9774_v9 = vpop.f32.mrf.mxu0  ;;  %3070 = vst.msk [vmem:[#allocation3 + $0x171] sm:$0xff] %vm3040_vm4, %v3036_v17  ;;  %v2755_v13 = vadd.f32 %v9619_v0, %v2505_v1  ;;  %v8084_v1 = vld [vmem:[%s11679_s5 + $0x78] sm:$0xff] }
 0x457   : > { %11820 = vst [vmem:[#allocation17_spill] sm:$0xff] %v9779_v6  ;;  %4917 = vmatpush.bf16.msra.mxu1 %v8084_v1  ;;  %v8080_v1 = vld [vmem:[%s11679_s5 + $0x58] sm:$0xff] }
 0x458   : > { %v3005_v52 = vadd.f32 %v9580_v57, %v2755_v13  ;;  %7785 = vmatmul.msk.bf16.gmra.mxu2 %vm3040_vm4, %v9710_v31  ;;  %7870 = vmatmul.msk.bf16.gmra.mxu1 %vm3040_vm4, %v9783_v16  ;;  %v11821_v57 = vld [vmem:[#allocation16_spill] sm:$0xff] }
 0x459   : > { %4449 = vmatpush.bf16.msra.mxu3 %v8080_v1 }
 0x45a   : > { %v3037_v39 = vmax.f32 %v3005_v52, 0.0 }
 0x45b   : > { %v9787_v3 = vpop.f32.mrf.mxu2  ;;  %v2472_v42 = vpop.f32.mrf.mxu3  ;;  %v3101_v22 = vld [vmem:[#allocation3 + $0x19a] sm:$0x1]  ;;  %4918 = vmatpush.bf16.msra.mxu1 %v8083_v60 }
 0x45c   : > { %3071 = vst.msk [vmem:[#allocation3 + $0x181] sm:$0xff] %vm3040_vm4, %v3037_v39  ;;  %v2506_v0 = vadd.f32 %v2472_v42, %v11821_v57  ;;  %v3890_v26 = vld [vmem:[#allocation3 + $0x168] sm:$0xff] }
 0x45d   : > { %v9791_v62 = vld [vmem:[#allocation3 + $0x171] sm:$0xff]  ;;  %3120 = vst.msk [vmem:[#allocation3 + $0x198] sm:$0x1] %vm3102_vm5, %v3101_v22  ;;  %v3363_v22 = vadd.f32 %v9799_v38, %v9664_v46 }
 0x45e   : > { %v3136_v31 = vld [vmem:[#allocation3 + $0x177] sm:$0x1]  ;;  %v9793_v55 = vpop.f32.mrf.mxu0  ;;  %3083 = vst.msk [vmem:[#allocation3 + $0x1a1] sm:$0xff] %vm3040_vm4, %v9791_v62  ;;  %v2756_v63 = vadd.f32 %v9635_v54, %v2506_v0  ;;  %v9815_v54 = vpop.f32.mrf.mxu1 }
 0x45f   : > { %3154 = vst.msk [vmem:[#allocation3 + $0x179] sm:$0x1] %vm3102_vm5, %v3136_v31  ;;  %v3891_v39 = vld [vmem:[#allocation3 + $0x170] sm:$0xff]  ;;  %v3413_v31 = vld [vmem:[#allocation3 + $0xe1] sm:$0xff] }
 0x460   : > { %v3006_v21 = vadd.f32 %v9593_v12, %v2756_v63  ;;  %7809 = vmatmul.msk.bf16.gmra.mxu3 %vm3040_vm4, %v9804_v7  ;;  %11822 = vst [vmem:[#allocation32_spill] sm:$0xff] %v9815_v54  ;;  %v3908_v36 = vpack.c.bf16 %v3891_v39, %v3890_v26 }
 0x461   : > { %7841 = vmatmul.msk.bf16.gmra.mxu0 %vm3040_vm4, %v3672_v19 }
 0x462   : > { %v3038_v14 = vmax.f32 %v3006_v21, 0.0  ;;  %v3412_v21 = vld [vmem:[#allocation3 + $0xd9] sm:$0xff] }
 0x463   : > { %v3100_v48 = vld [vmem:[#allocation3 + $0x182] sm:$0x1]  ;;  %v9820_v49 = vpop.f32.mrf.mxu2  ;;  %v3516_v13 = vpop.f32.mrf.mxu3  ;;  %v9846_v46 = vpack.c.bf16 %v3413_v31, %v3412_v21  ;;  %v8082_v31 = vld [vmem:[%s11679_s5 + $0x68] sm:$0xff] }
 0x464   : > { %3119 = vst.msk [vmem:[#allocation3 + $0x180] sm:$0x1] %vm3102_vm5, %v3100_v48  ;;  %v9823_v12 = vadd.f32 %v3516_v13, %v3362_v56  ;;  %v3364_v48 = vadd.f32 %v9799_v38, %v9681_v47  ;;  %v8086_v47 = vld [vmem:[%s11679_s5 + $0x88] sm:$0xff]  ;;  %4683 = vmatpush.bf16.msra.mxu0 %v8082_v31 }
 0x465   : > { %3072 = vst.msk [vmem:[#allocation3 + $0x189] sm:$0xff] %vm3040_vm4, %v3038_v14  ;;  %v3138_v42 = vld [vmem:[#allocation3 + $0x1a7] sm:$0x1]  ;;  %5151 = vmatpush.bf16.msra.mxu2 %v8086_v47 }
 0x466   : > { %v9826_v52 = vpop.f32.mrf.mxu0  ;;  %3156 = vst.msk [vmem:[#allocation3 + $0x1a9] sm:$0x1] %vm3102_vm5, %v3138_v42  ;;  %v9839_v63 = vpop.f32.mrf.mxu1 }
 0x467   : > { %11823 = vst [vmem:[#allocation18_spill] sm:$0xff] %v9839_v63 }
 0x468   : > { %7786 = vmatmul.msk.bf16.gmra.mxu2 %vm3040_vm4, %v9746_v15  ;;  %7871 = vmatmul.msk.bf16.gmra.mxu1 %vm3040_vm4, %v3908_v36  ;;  %v3654_v15 = vld [vmem:[#allocation3 + $0x13a] sm:$0xff] }
 0x469   : > { %v3673_v14 = vpack.c.bf16 %v3655_v20, %v3654_v15 }
 0x46b   : > { %v9837_v57 = vpop.f32.mrf.mxu2  ;;  %v3518_v0 = vpop.f32.mrf.mxu3  ;;  %v3892_v42 = vld [vmem:[#allocation3 + $0x180] sm:$0xff] }
 0x46c   : > { %v3137_v34 = vld [vmem:[#allocation3 + $0x18f] sm:$0x1]  ;;  %v9841_v19 = vadd.f32 %v3518_v0, %v3363_v22 }
 0x46d   : > { %3155 = vst.msk [vmem:[#allocation3 + $0x191] sm:$0x1] %vm3102_vm5, %v3137_v34  ;;  %v3893_v60 = vld [vmem:[#allocation3 + $0x188] sm:$0xff]  ;;  %v3365_v34 = vadd.f32 %v9799_v38, %v9697_v50  ;;  %vm7219_vm5 = vcmask 917312  }
 0x46e   : > { %v9844_v56 = vpop.f32.mrf.mxu0  ;;  %v9860_v22 = vpop.f32.mrf.mxu1  ;;  %v3909_v20 = vpack.c.bf16 %v3893_v60, %v3892_v42  ;;  %v3414_v42 = vld [vmem:[#allocation3 + $0xf1] sm:$0xff] }
 0x46f   : > { %11824 = vst [vmem:[#allocation36_spill] sm:$0xff] %v9844_v56 }
 0x470   : > { %7810 = vmatmul.msk.bf16.gmra.mxu3 %vm3040_vm4, %v9846_v46  ;;  %11825 = vst [vmem:[#allocation26_spill] sm:$0xff] %v9860_v22  ;;  %v3417_v22 = vld [vmem:[#allocation3 + $0x111] sm:$0xff] }
 0x471   : > { %7842 = vmatmul.msk.bf16.gmra.mxu0 %vm3040_vm4, %v3673_v14  ;;  %v3657_v14 = vld [vmem:[#allocation3 + $0x15a] sm:$0xff] }
 0x473   : > { %v9856_v13 = vpop.f32.mrf.mxu2  ;;  %v3521_v26 = vpop.f32.mrf.mxu3 }
 0x474   : > { %v9858_v39 = vadd.f32 %v3521_v26, %v3364_v48  ;;  %v8081_v48 = vld [vmem:[%s11679_s5 + $0x60] sm:$0xff]  ;;  %v3656_v26 = vld [vmem:[#allocation3 + $0x152] sm:$0xff] }
 0x475   : > { %v3674_v60 = vpack.c.bf16 %v3657_v14, %v3656_v26  ;;  %4684 = vmatpush.bf16.msra.mxu0 %v8081_v48  ;;  %v4799_v14 = vld [vmem:[#allocation3 + $0x39] sm:$0xff]  ;;  %v3367_v26 = vadd.f32 %v9799_v38, %v9732_v44  ;;  %v3368_v44 = vadd.f32 %v9799_v38, %v9751_v59 }
 0x476   : > { %v9862_v0 = vpop.f32.mrf.mxu0  ;;  %v9884_v50 = vpop.f32.mrf.mxu1 }
 0x477   : > { %11826 = vst [vmem:[#allocation41_spill] sm:$0xff] %v9862_v0 }
 0x478   : > { %7787 = vmatmul.msk.bf16.gmra.mxu2 %vm3040_vm4, %v9783_v16  ;;  %7872 = vmatmul.msk.bf16.gmra.mxu1 %vm3040_vm4, %v3909_v20  ;;  %v3415_v16 = vld [vmem:[#allocation3 + $0xf9] sm:$0xff]  ;;  %11827 = vst [vmem:[#allocation30_spill] sm:$0xff] %v9884_v50  ;;  %v3366_v20 = vadd.f32 %v9799_v38, %v9714_v28 }
 0x479   : > { %v9882_v17 = vpack.c.bf16 %v3415_v16, %v3414_v42  ;;  %v4798_v16 = vld [vmem:[#allocation3 + $0x31] sm:$0xff] }
 0x47a   : > { %v4830_v48 = vpack.c.bf16 %v4799_v14, %v4798_v16  ;;  %v3659_v50 = vld [vmem:[#allocation3 + $0x172] sm:$0xff] }
 0x47b   : > { %v9875_v15 = vpop.f32.mrf.mxu2  ;;  %v3523_v21 = vpop.f32.mrf.mxu3 }
 0x47c   : > { %v9877_v1 = vadd.f32 %v3523_v21, %v3365_v34 }
 0x47e   : > { %v9891_v47 = vpop.f32.mrf.mxu0  ;;  %v9900_v42 = vpop.f32.mrf.mxu1 }
 0x47f   : > { %11828 = vst [vmem:[#allocation44_spill] sm:$0xff] %v9891_v47  ;;  %v3416_v47 = vld [vmem:[#allocation3 + $0x109] sm:$0xff] }
 0x480   : > { %7811 = vmatmul.msk.bf16.gmra.mxu3 %vm3040_vm4, %v9882_v17  ;;  %11829 = vst [vmem:[#allocation33_spill] sm:$0xff] %v9900_v42  ;;  %v9909_v14 = vpack.c.bf16 %v3417_v22, %v3416_v47  ;;  %v3369_v22 = vadd.f32 %v9799_v38, %v9768_v18  ;;  %v4564_v47 = vld [vmem:[#allocation3 + $0x30] sm:$0xff]  ;;  %v3370_v18 = vadd.f32 %v9799_v38, %v9787_v3 }
 0x481   : > { %7843 = vmatmul.msk.bf16.gmra.mxu0 %vm3040_vm4, %v3674_v60 }
 0x483   : > { %v9893_v31 = vpop.f32.mrf.mxu2  ;;  %v3526_v34 = vpop.f32.mrf.mxu3 }
 0x484   : > { %v9895_v21 = vadd.f32 %v3526_v34, %v3366_v20  ;;  %v3658_v34 = vld [vmem:[#allocation3 + $0x16a] sm:$0xff] }
 0x486   : > { %v9905_v63 = vpop.f32.mrf.mxu0  ;;  %v9918_v54 = vpop.f32.mrf.mxu1 }
 0x487   : > { %11830 = vst [vmem:[#allocation47_spill] sm:$0xff] %v9905_v63 }
 0x488   : > { %7788 = vmatmul.msk.bf16.gmra.mxu2 %vm3040_vm4, %v3908_v36  ;;  %7969 = vmatmul.msk.bf16.vlgmr.msra.gmra.mxu1 %vm3040_vm4, %v4830_v48  ;;  %v3675_v36 = vpack.c.bf16 %v3659_v50, %v3658_v34  ;;  %11831 = vst [vmem:[#allocation37_spill] sm:$0xff] %v9918_v54  ;;  %v4565_v34 = vld [vmem:[#allocation3 + $0x38] sm:$0xff] }
 0x48b   : > { %v9903_v28 = vpop.f32.mrf.mxu2  ;;  %v3528_v60 = vpop.f32.mrf.mxu3 }
 0x48c   : > { %v9907_v20 = vadd.f32 %v3528_v60, %v3367_v26 }
 0x48e   : > { %v9922_v60 = vpop.f32.mrf.mxu0 }
 0x48f   : > { %11832 = vst [vmem:[#allocation50_spill] sm:$0xff] %v9922_v60  ;;  %v4596_v60 = vpack.c.bf16 %v4565_v34, %v4564_v47  ;;  %v3371_v47 = vadd.f32 %v9799_v38, %v9820_v49  ;;  %v3372_v49 = vadd.f32 %v9799_v38, %v9837_v57 }
 0x490   : > { %7812 = vmatmul.msk.bf16.gmra.mxu3 %vm3040_vm4, %v9909_v14 }
 0x491   : > { %7844 = vmatmul.msk.bf16.gmra.mxu0 %vm3040_vm4, %v3675_v36  ;;  %v3419_v36 = vld [vmem:[#allocation3 + $0x129] sm:$0xff] }
 0x493   : > { %v9916_v16 = vpop.f32.mrf.mxu2  ;;  %v3531_v42 = vpop.f32.mrf.mxu3 }
 0x494   : > { %v9920_v26 = vadd.f32 %v3531_v42, %v3368_v44  ;;  %v3418_v42 = vld [vmem:[#allocation3 + $0x121] sm:$0xff]  ;;  %v9934_v44 = vpop.f32.mrf.mxu1 }
 0x495   : > { %11833 = vst [vmem:[#allocation40_spill] sm:$0xff] %v9934_v44  ;;  %v9936_v63 = vpack.c.bf16 %v3419_v36, %v3418_v42  ;;  %v4566_v36 = vld [vmem:[#allocation3 + $0x48] sm:$0xff]  ;;  %v4567_v42 = vld [vmem:[#allocation3 + $0x50] sm:$0xff] }
 0x496   : > { %v3421_v44 = vld [vmem:[#allocation3 + $0x141] sm:$0xff] }
 0x498   : > { %7885 = vmatmul.msk.bf16.vlgmr.msrb.gmra.mxu2 %vm3040_vm4, %v9566_v30  ;;  %7970 = vmatmul.msk.bf16.gmra.mxu1 %vm3040_vm4, %v9625_v53  ;;  %v9938_v30 = vpop.f32.mrf.mxu0 }
 0x499   : > { %11834 = vst [vmem:[#allocation54_spill] sm:$0xff] %v9938_v30 }
 0x49b   : > { %v9930_v50 = vpop.f32.mrf.mxu2  ;;  %v3533_v59 = vpop.f32.mrf.mxu3 }
 0x49c   : > { %v9932_v54 = vadd.f32 %v3533_v59, %v3369_v22  ;;  %v9949_v6 = vpop.f32.mrf.mxu1 }
 0x49d   : > { %11835 = vst [vmem:[#allocation43_spill] sm:$0xff] %v9949_v6  ;;  %v4597_v6 = vpack.c.bf16 %v4567_v42, %v4566_v36  ;;  %v4569_v36 = vld [vmem:[#allocation3 + $0x68] sm:$0xff]  ;;  %v3423_v42 = vld [vmem:[#allocation3 + $0x159] sm:$0xff] }
 0x4a0   : > { %7813 = vmatmul.msk.bf16.gmra.mxu3 %vm3040_vm4, %v9936_v63  ;;  %v9954_v34 = vpop.f32.mrf.mxu0 }
 0x4a1   : > { %7941 = vmatmul.msk.bf16.vlgmr.msra.gmra.mxu0 %vm3040_vm4, %v4596_v60  ;;  %11836 = vst [vmem:[#allocation46_spill] sm:$0xff] %v9954_v34 }
 0x4a3   : > { %v9945_v0 = vpop.f32.mrf.mxu2  ;;  %v3536_v22 = vpop.f32.mrf.mxu3 }
 0x4a4   : > { %v9947_v59 = vadd.f32 %v3536_v22, %v3370_v18  ;;  %v3420_v22 = vld [vmem:[#allocation3 + $0x139] sm:$0xff] }
 0x4a5   : > { %v9962_v30 = vpack.c.bf16 %v3421_v44, %v3420_v22 }
 0x4a8   : > { %7886 = vmatmul.msk.bf16.gmra.mxu2 %vm3040_vm4, %v4830_v48  ;;  %7971 = vmatmul.msk.bf16.gmra.mxu1 %vm3040_vm4, %v9656_v5  ;;  %v9969_v48 = vpop.f32.mrf.mxu1  ;;  %v9973_v24 = vpop.f32.mrf.mxu0 }
 0x4a9   : > { %11837 = vst [vmem:[#allocation51_spill] sm:$0xff] %v9969_v48 }
 0x4aa   : > { %11838 = vst [vmem:[#allocation6_spill] sm:$0xff] %v9973_v24 }
 0x4ab   : > { %v9958_v60 = vpop.f32.mrf.mxu2  ;;  %v3538_v3 = vpop.f32.mrf.mxu3 }
 0x4ac   : > { %v9960_v18 = vadd.f32 %v3538_v3, %v3371_v47  ;;  %v4568_v3 = vld [vmem:[#allocation3 + $0x60] sm:$0xff] }
 0x4b0   : > { %7814 = vmatmul.msk.bf16.gmra.mxu3 %vm3040_vm4, %v9962_v30  ;;  %v9985_v22 = vpop.f32.mrf.mxu1 }
 0x4b1   : > { %7942 = vmatmul.msk.bf16.gmra.mxu0 %vm3040_vm4, %v4597_v6  ;;  %v3373_v6 = vadd.f32 %v9799_v38, %v9856_v13  ;;  %11839 = vst [vmem:[#allocation48_spill] sm:$0xff] %v9985_v22  ;;  %v8079_v13 = vld [vmem:[%s11679_s5 + $0x50] sm:$0xff] }
 0x4b2   : > { %4450 = vmatpush.bf16.msra.mxu3 %v8079_v13  ;;  %v4571_v13 = vld [vmem:[#allocation3 + $0x80] sm:$0xff] }
 0x4b3   : > { %v9971_v34 = vpop.f32.mrf.mxu2  ;;  %v3541_v56 = vpop.f32.mrf.mxu3 }
 0x4b4   : > { %v9975_v47 = vadd.f32 %v3541_v56, %v3372_v49  ;;  %v3422_v56 = vld [vmem:[#allocation3 + $0x151] sm:$0xff]  ;;  %v9989_v49 = vpop.f32.mrf.mxu0 }
 0x4b5   : > { %11841 = vst [vmem:[#allocation19_spill] sm:$0xff] %v9989_v49  ;;  %v9991_v24 = vpack.c.bf16 %v3423_v42, %v3422_v56  ;;  %v3375_v42 = vadd.f32 %v9799_v38, %v9893_v31  ;;  %v3376_v31 = vadd.f32 %v9799_v38, %v9903_v28  ;;  %v4572_v28 = vld [vmem:[#allocation3 + $0x90] sm:$0xff] }
 0x4b8   : > { %7887 = vmatmul.msk.bf16.gmra.mxu2 %vm3040_vm4, %v9625_v53  ;;  %7972 = vmatmul.msk.bf16.gmra.mxu1 %vm3040_vm4, %v9689_v35  ;;  %v4598_v53 = vpack.c.bf16 %v4569_v36, %v4568_v3  ;;  %v10005_v3 = vpop.f32.mrf.mxu1 }
 0x4b9   : > { %11843 = vst [vmem:[#allocation7_spill] sm:$0xff] %v10005_v3 }
 0x4bb   : > { %v9983_v44 = vpop.f32.mrf.mxu2  ;;  %v3543_v57 = vpop.f32.mrf.mxu3 }
 0x4bc   : > { %v9987_v48 = vadd.f32 %v3543_v57, %v3373_v6  ;;  %v3374_v6 = vadd.f32 %v9799_v38, %v9875_v15  ;;  %v10007_v36 = vpop.f32.mrf.mxu0 }
 0x4bd   : > { %11844 = vst [vmem:[#allocation29_spill] sm:$0xff] %v10007_v36 }
 0x4be   : > { %11840 = vst [vmem:[#allocation61_spill] sm:$0xff] %v9987_v48 }
 0x4c0   : > { %7815 = vmatmul.msk.bf16.gmra.mxu3 %vm3040_vm4, %v9991_v24  ;;  %v10019_v3 = vpop.f32.mrf.mxu1 }
 0x4c1   : > { %7943 = vmatmul.msk.bf16.gmra.mxu0 %vm3040_vm4, %v4598_v53  ;;  %v4570_v53 = vld [vmem:[#allocation3 + $0x78] sm:$0xff]  ;;  %11846 = vst [vmem:[#allocation21_spill] sm:$0xff] %v10019_v3 }
 0x4c3   : > { %v10001_v57 = vpop.f32.mrf.mxu2  ;;  %v3546_v22 = vpop.f32.mrf.mxu3 }
 0x4c4   : > { %v10003_v49 = vadd.f32 %v3546_v22, %v3374_v6  ;;  %v4599_v6 = vpack.c.bf16 %v4571_v13, %v4570_v53  ;;  %v10028_v36 = vpop.f32.mrf.mxu0  ;;  %v4573_v13 = vld [vmem:[#allocation3 + $0x98] sm:$0xff] }
 0x4c5   : > { %11848 = vst [vmem:[#allocation56_spill] sm:$0xff] %v10028_v36 }
 0x4c6   : > { %11842 = vst [vmem:[#allocation53_spill] sm:$0xff] %v10003_v49 }
 0x4c8   : > { %7888 = vmatmul.msk.bf16.gmra.mxu2 %vm3040_vm4, %v9656_v5  ;;  %7973 = vmatmul.msk.bf16.gmra.mxu1 %vm3040_vm4, %v9722_v23  ;;  %v11847_v5 = vpack.c.bf16 %v9791_v62, %v9766_v29  ;;  %v10038_v53 = vpop.f32.mrf.mxu1 }
 0x4c9   : > { %11850 = vst [vmem:[#allocation58_spill] sm:$0xff] %v10038_v53 }
 0x4cb   : > { %v10015_v56 = vpop.f32.mrf.mxu2  ;;  %v3548_v15 = vpop.f32.mrf.mxu3 }
 0x4cc   : > { %v10017_v22 = vadd.f32 %v3548_v15, %v3375_v42  ;;  %v3377_v15 = vadd.f32 %v9799_v38, %v9916_v16  ;;  %v3378_v16 = vadd.f32 %v9799_v38, %v9930_v50 }
 0x4ce   : > { %11845 = vst [vmem:[#allocation64_spill] sm:$0xff] %v10017_v22 }
 0x4d0   : > { %7816 = vmatmul.msk.bf16.gmra.mxu3 %vm3040_vm4, %v11847_v5  ;;  %v10044_v5 = vpop.f32.mrf.mxu0 }
 0x4d1   : > { %7944 = vmatmul.msk.bf16.gmra.mxu0 %vm3040_vm4, %v4599_v6  ;;  %v4331_v6 = vld [vmem:[#allocation3 + $0x22] sm:$0xff]  ;;  %11851 = vst [vmem:[#allocation34_spill] sm:$0xff] %v10044_v5 }
 0x4d3   : > { %v10030_v49 = vpop.f32.mrf.mxu2  ;;  %v3551_v48 = vpop.f32.mrf.mxu3 }
 0x4d4   : > { %v10032_v42 = vadd.f32 %v3551_v48, %v3376_v31  ;;  %v4330_v31 = vld [vmem:[#allocation3 + $0x1a] sm:$0xff] }
 0x4d5   : > { %v4362_v3 = vpack.c.bf16 %v4331_v6, %v4330_v31 }
 0x4d6   : > { %11849 = vst [vmem:[#allocation8_spill] sm:$0xff] %v10032_v42  ;;  %v10054_v42 = vpop.f32.mrf.mxu1 }
 0x4d7   : > { %11852 = vst [vmem:[#allocation23_spill] sm:$0xff] %v10054_v42 }
 0x4d8   : > { %7889 = vmatmul.msk.bf16.gmra.mxu2 %vm3040_vm4, %v9689_v35  ;;  %7974 = vmatmul.msk.bf16.gmra.mxu1 %vm3040_vm4, %v9758_v43  ;;  %v4600_v35 = vpack.c.bf16 %v4573_v13, %v4572_v28  ;;  %v10058_v5 = vpop.f32.mrf.mxu0  ;;  %v4575_v28 = vld [vmem:[#allocation3 + $0xb0] sm:$0xff]  ;;  %v4333_v13 = vld [vmem:[#allocation3 + $0x3a] sm:$0xff] }
 0x4d9   : > { %11853 = vst [vmem:[#allocation59_spill] sm:$0xff] %v10058_v5 }
 0x4db   : > { %v10042_v29 = vpop.f32.mrf.mxu2  ;;  %v3553_v62 = vpop.f32.mrf.mxu3 }
 0x4dc   : > { %v10046_v48 = vadd.f32 %v3553_v62, %v3377_v15  ;;  %v3379_v15 = vadd.f32 %v9799_v38, %v9945_v0  ;;  %v4574_v62 = vld [vmem:[#allocation3 + $0xa8] sm:$0xff]  ;;  %v3380_v0 = vadd.f32 %v9799_v38, %v9958_v60 }
 0x4de   : > { %v10070_v31 = vpop.f32.mrf.mxu1 }
 0x4df   : > { %11855 = vst [vmem:[#allocation38_spill] sm:$0xff] %v10070_v31 }
 0x4e0   : > { %7913 = vmatmul.msk.bf16.vlgmr.msra.gmra.mxu3 %vm3040_vm4, %v4362_v3 }
 0x4e1   : > { %7945 = vmatmul.msk.bf16.gmra.mxu0 %vm3040_vm4, %v4600_v35  ;;  %v4601_v35 = vpack.c.bf16 %v4575_v28, %v4574_v62  ;;  %v8085_v62 = vld [vmem:[%s11679_s5 + $0x80] sm:$0xff]  ;;  %v3381_v28 = vadd.f32 %v9799_v38, %v9971_v34  ;;  %v3382_v34 = vadd.f32 %v9799_v38, %v9983_v44 }
 0x4e2   : > { %5152 = vmatpush.bf16.msra.mxu2 %v8085_v62 }
 0x4e3   : > { %v10052_v53 = vpop.f32.mrf.mxu2  ;;  %v3556_v36 = vpop.f32.mrf.mxu3 }
 0x4e4   : > { %v10056_v22 = vadd.f32 %v3556_v36, %v3378_v16  ;;  %v4332_v36 = vld [vmem:[#allocation3 + $0x32] sm:$0xff] }
 0x4e5   : > { %v10072_v16 = vpack.c.bf16 %v4333_v13, %v4332_v36 }
 0x4e6   : > { %v10085_v5 = vpop.f32.mrf.mxu1 }
 0x4e7   : > { %11858 = vst [vmem:[#allocation10_spill] sm:$0xff] %v10085_v5  ;;  %v4334_v5 = vld [vmem:[#allocation3 + $0x4a] sm:$0xff] }
 0x4e8   : > { %7890 = vmatmul.msk.bf16.gmra.mxu2 %vm3040_vm4, %v9722_v23  ;;  %7975 = vmatmul.msk.bf16.gmra.mxu1 %vm3040_vm4, %v9804_v7  ;;  %v10074_v23 = vpop.f32.mrf.mxu0 }
 0x4e9   : > { %11856 = vst [vmem:[#allocation25_spill] sm:$0xff] %v10074_v23 }
 0x4eb   : > { %v10066_v3 = vpop.f32.mrf.mxu2  ;;  %v3558_v50 = vpop.f32.mrf.mxu3 }
 0x4ec   : > { %v10068_v6 = vadd.f32 %v3558_v50, %v3379_v15 }
 0x4ee   : > { %11854 = vst [vmem:[#allocation9_spill] sm:$0xff] %v10068_v6  ;;  %v10109_v62 = vpop.f32.mrf.mxu1 }
 0x4ef   : > { %11861 = vst [vmem:[#allocation62_spill] sm:$0xff] %v10109_v62 }
 0x4f0   : > { %7914 = vmatmul.msk.bf16.gmra.mxu3 %vm3040_vm4, %v10072_v16  ;;  %v10094_v13 = vpop.f32.mrf.mxu0 }
 0x4f1   : > { %7946 = vmatmul.msk.bf16.gmra.mxu0 %vm3040_vm4, %v4601_v35  ;;  %11859 = vst [vmem:[#allocation42_spill] sm:$0xff] %v10094_v13  ;;  %v4576_v35 = vld [vmem:[#allocation3 + $0xc0] sm:$0xff] }
 0x4f3   : > { %v10081_v42 = vpop.f32.mrf.mxu2  ;;  %v3561_v15 = vpop.f32.mrf.mxu3 }
 0x4f4   : > { %v10083_v50 = vadd.f32 %v3561_v15, %v3380_v0  ;;  %v4577_v0 = vld [vmem:[#allocation3 + $0xc8] sm:$0xff]  ;;  %v4335_v15 = vld [vmem:[#allocation3 + $0x52] sm:$0xff] }
 0x4f5   : > { %v4602_v31 = vpack.c.bf16 %v4577_v0, %v4576_v35  ;;  %v10102_v23 = vpack.c.bf16 %v4335_v15, %v4334_v5  ;;  %v3383_v5 = vadd.f32 %v9799_v38, %v10001_v57  ;;  %v4579_v35 = vld [vmem:[#allocation3 + $0xe0] sm:$0xff]  ;;  %v4337_v0 = vld [vmem:[#allocation3 + $0x6a] sm:$0xff]  ;;  %v3384_v57 = vadd.f32 %v9799_v38, %v10015_v56 }
 0x4f6   : > { %11857 = vst [vmem:[#allocation60_spill] sm:$0xff] %v10083_v50  ;;  %v10125_v15 = vpop.f32.mrf.mxu1 }
 0x4f7   : > { %11864 = vst [vmem:[#allocation31_spill] sm:$0xff] %v10125_v15 }
 0x4f8   : > { %7891 = vmatmul.msk.bf16.gmra.mxu2 %vm3040_vm4, %v9758_v43  ;;  %7976 = vmatmul.msk.bf16.gmra.mxu1 %vm3040_vm4, %v9846_v46  ;;  %v10113_v6 = vpop.f32.mrf.mxu0 }
 0x4f9   : > { %11862 = vst [vmem:[#allocation11_spill] sm:$0xff] %v10113_v6 }
 0x4fb   : > { %v10098_v60 = vpop.f32.mrf.mxu2  ;;  %v3563_v36 = vpop.f32.mrf.mxu3 }
 0x4fc   : > { %v10100_v43 = vadd.f32 %v3563_v36, %v3381_v28  ;;  %v4578_v36 = vld [vmem:[#allocation3 + $0xd8] sm:$0xff] }
 0x4fe   : > { %11860 = vst [vmem:[#allocation28_spill] sm:$0xff] %v10100_v43 }
 0x500   : > { %7915 = vmatmul.msk.bf16.gmra.mxu3 %vm3040_vm4, %v10102_v23 }
 0x501   : > { %7947 = vmatmul.msk.bf16.gmra.mxu0 %vm3040_vm4, %v4602_v31 }
 0x503   : > { %v10111_v13 = vpop.f32.mrf.mxu2  ;;  %v3566_v50 = vpop.f32.mrf.mxu3 }
 0x504   : > { %v10115_v28 = vadd.f32 %v3566_v50, %v3382_v34  ;;  %v4336_v50 = vld [vmem:[#allocation3 + $0x62] sm:$0xff]  ;;  %v10129_v34 = vpop.f32.mrf.mxu0 }
 0x505   : > { %11865 = vst [vmem:[#allocation63_spill] sm:$0xff] %v10129_v34  ;;  %v10131_v6 = vpack.c.bf16 %v4337_v0, %v4336_v50  ;;  %v4580_v50 = vld [vmem:[#allocation3 + $0xf0] sm:$0xff] }
 0x506   : > { %11863 = vst [vmem:[#allocation45_spill] sm:$0xff] %v10115_v28 }
 0x508   : > { %7892 = vmatmul.msk.bf16.gmra.mxu2 %vm3040_vm4, %v9804_v7  ;;  %7977 = vmatmul.msk.bf16.gmra.mxu1 %vm3040_vm4, %v9882_v17  ;;  %v4603_v7 = vpack.c.bf16 %v4579_v35, %v4578_v36  ;;  %v3385_v35 = vadd.f32 %v9799_v38, %v10030_v49 }
 0x50b   : > { %v10123_v31 = vpop.f32.mrf.mxu2  ;;  %v3568_v44 = vpop.f32.mrf.mxu3 }
 0x50c   : > { %v10127_v62 = vadd.f32 %v3568_v44, %v3383_v5  ;;  %v3830_v5 = vadd.f32 %v9653_v8, %v9823_v12  ;;  %v10144_v44 = vpop.f32.mrf.mxu1  ;;  %v10146_v36 = vpop.f32.mrf.mxu0  ;;  %v4339_v8 = vld [vmem:[#allocation3 + $0x82] sm:$0xff] }
 0x50d   : > { %11866 = vst [vmem:[#allocation12_spill] sm:$0xff] %v10144_v44  ;;  %v4338_v44 = vld [vmem:[#allocation3 + $0x7a] sm:$0xff] }
 0x50e   : > { %11867 = vst [vmem:[#allocation49_spill] sm:$0xff] %v10146_v36  ;;  %v4064_v56 = vadd.f32 %v9610_v58, %v3830_v5  ;;  %v10161_v49 = vpack.c.bf16 %v4339_v8, %v4338_v44  ;;  %v3386_v58 = vadd.f32 %v9799_v38, %v10042_v29  ;;  %v3832_v44 = vadd.f32 %v9686_v2, %v9858_v39  ;;  %v4583_v8 = vld [vmem:[#allocation3 + $0x110] sm:$0xff] }
 0x50f   : > { %v4340_v39 = vld [vmem:[#allocation3 + $0x92] sm:$0xff] }
 0x510   : > { %7916 = vmatmul.msk.bf16.gmra.mxu3 %vm3040_vm4, %v10131_v6 }
 0x511   : > { %7948 = vmatmul.msk.bf16.gmra.mxu0 %vm3040_vm4, %v4603_v7  ;;  %v4581_v7 = vld [vmem:[#allocation3 + $0xf8] sm:$0xff] }
 0x512   : > { %v4604_v36 = vpack.c.bf16 %v4581_v7, %v4580_v50  ;;  %v4582_v7 = vld [vmem:[#allocation3 + $0x108] sm:$0xff] }
 0x513   : > { %v10138_v28 = vpop.f32.mrf.mxu2  ;;  %v3571_v43 = vpop.f32.mrf.mxu3 }
 0x514   : > { %v10140_v15 = vadd.f32 %v3571_v43, %v3384_v57  ;;  %v10163_v34 = vpop.f32.mrf.mxu1  ;;  %v10170_v5 = vpop.f32.mrf.mxu0 }
 0x518   : > { %7893 = vmatmul.msk.bf16.gmra.mxu2 %vm3040_vm4, %v9846_v46  ;;  %7978 = vmatmul.msk.bf16.gmra.mxu1 %vm3040_vm4, %v9909_v14  ;;  %v3831_v46 = vadd.f32 %v9669_v41, %v9841_v19 }
 0x51b   : > { %v4218_v43 = vpop.f32.mrf.mxu2  ;;  %v3573_v0 = vpop.f32.mrf.mxu3 }
 0x51c   : > { %v10155_v12 = vadd.f32 %v4218_v43, %v4064_v56  ;;  %v10157_v57 = vadd.f32 %v3573_v0, %v3385_v35  ;;  %v4065_v35 = vadd.f32 %v9627_v4, %v3831_v46  ;;  %v10183_v29 = vpop.f32.mrf.mxu1  ;;  %v4066_v4 = vadd.f32 %v9639_v10, %v3832_v44  ;;  %v4341_v46 = vld [vmem:[#allocation3 + $0x9a] sm:$0xff] }
 0x51d   : > { %v3388_v10 = vadd.f32 %v9799_v38, %v10066_v3  ;;  %v3389_v3 = vadd.f32 %v9799_v38, %v10081_v42 }
 0x520   : > { %7917 = vmatmul.msk.bf16.gmra.mxu3 %vm3040_vm4, %v10161_v49 }
 0x521   : > { %7949 = vmatmul.msk.bf16.gmra.mxu0 %vm3040_vm4, %v4604_v36  ;;  %v3387_v36 = vadd.f32 %v9799_v38, %v10052_v53  ;;  %v3833_v53 = vadd.f32 %v9702_v61, %v9877_v1  ;;  %v3834_v1 = vadd.f32 %v9719_v11, %v9895_v21  ;;  %v4342_v21 = vld [vmem:[#allocation3 + $0xaa] sm:$0xff] }
 0x523   : > { %v4220_v56 = vpop.f32.mrf.mxu2  ;;  %v3576_v43 = vpop.f32.mrf.mxu3 }
 0x524   : > { %v10173_v41 = vadd.f32 %v4220_v56, %v4065_v35  ;;  %v10175_v19 = vadd.f32 %v3576_v43, %v3386_v58  ;;  %v10188_v58 = vpop.f32.mrf.mxu0  ;;  %v4605_v35 = vpack.c.bf16 %v4583_v8, %v4582_v7  ;;  %v10196_v56 = vpack.c.bf16 %v4341_v46, %v4340_v39  ;;  %v4584_v46 = vld [vmem:[#allocation3 + $0x120] sm:$0xff]  ;;  %v4585_v39 = vld [vmem:[#allocation3 + $0x128] sm:$0xff] }
 0x525   : > { %v4067_v43 = vadd.f32 %v9658_v32, %v3833_v53  ;;  %v4068_v32 = vadd.f32 %v9672_v45, %v3834_v1  ;;  %v4343_v53 = vld [vmem:[#allocation3 + $0xb2] sm:$0xff]  ;;  %v4606_v42 = vpack.c.bf16 %v4585_v39, %v4584_v46  ;;  %v3390_v45 = vadd.f32 %v9799_v38, %v10098_v60 }
 0x528   : > { %7894 = vmatmul.msk.bf16.gmra.mxu2 %vm3040_vm4, %v9882_v17  ;;  %7979 = vmatmul.msk.bf16.gmra.mxu1 %vm3040_vm4, %v9936_v63 }
 0x52b   : > { %v4223_v0 = vpop.f32.mrf.mxu2  ;;  %v3578_v50 = vpop.f32.mrf.mxu3 }
 0x52c   : > { %v10190_v2 = vadd.f32 %v4223_v0, %v4066_v4  ;;  %v10192_v17 = vadd.f32 %v3578_v50, %v3387_v36  ;;  %v10204_v4 = vpop.f32.mrf.mxu1  ;;  %v10212_v50 = vpop.f32.mrf.mxu0 }
 0x530   : > { %7918 = vmatmul.msk.bf16.gmra.mxu3 %vm3040_vm4, %v10196_v56 }
 0x531   : > { %7950 = vmatmul.msk.bf16.gmra.mxu0 %vm3040_vm4, %v4605_v35 }
 0x533   : > { %v4225_v44 = vpop.f32.mrf.mxu2  ;;  %v3581_v36 = vpop.f32.mrf.mxu3 }
 0x534   : > { %v10206_v0 = vadd.f32 %v4225_v44, %v4067_v43  ;;  %v10208_v61 = vadd.f32 %v3581_v36, %v3388_v10  ;;  %v10227_v10 = vpop.f32.mrf.mxu1  ;;  %v10229_v43 = vpack.c.bf16 %v4343_v53, %v4342_v21  ;;  %v10231_v44 = vpop.f32.mrf.mxu0  ;;  %v4586_v53 = vld [vmem:[#allocation3 + $0x138] sm:$0xff]  ;;  %v4587_v21 = vld [vmem:[#allocation3 + $0x140] sm:$0xff] }
 0x538   : > { %7895 = vmatmul.msk.bf16.gmra.mxu2 %vm3040_vm4, %v9909_v14  ;;  %7980 = vmatmul.msk.bf16.gmra.mxu1 %vm3040_vm4, %v9962_v30  ;;  %v3835_v14 = vadd.f32 %v9737_v25, %v9907_v20 }
 0x53a   : > { %v4069_v36 = vadd.f32 %v9691_v51, %v3835_v14 }
 0x53b   : > { %v4228_v7 = vpop.f32.mrf.mxu2  ;;  %v3583_v8 = vpop.f32.mrf.mxu3 }
 0x53c   : > { %v10221_v35 = vadd.f32 %v4228_v7, %v4068_v32  ;;  %v10223_v11 = vadd.f32 %v3583_v8, %v3389_v3  ;;  %v3836_v32 = vadd.f32 %v9755_v27, %v9920_v26  ;;  %v10245_v7 = vpop.f32.mrf.mxu1  ;;  %v3391_v8 = vadd.f32 %v9799_v38, %v10111_v13  ;;  %v10251_v60 = vpop.f32.mrf.mxu0  ;;  %v4345_v27 = vld [vmem:[#allocation3 + $0xca] sm:$0xff] }
 0x53d   : > { %v3837_v13 = vadd.f32 %v9774_v9, %v9932_v54 }
 0x53e   : > { %v4070_v51 = vadd.f32 %v9705_v33, %v3836_v32  ;;  %v3392_v33 = vadd.f32 %v9799_v38, %v10123_v31 }
 0x540   : > { %7919 = vmatmul.msk.bf16.gmra.mxu3 %vm3040_vm4, %v10229_v43 }
 0x541   : > { %7951 = vmatmul.msk.bf16.gmra.mxu0 %vm3040_vm4, %v4606_v42  ;;  %v4607_v42 = vpack.c.bf16 %v4587_v21, %v4586_v53 }
 0x543   : > { %v4230_v1 = vpop.f32.mrf.mxu2  ;;  %v3586_v3 = vpop.f32.mrf.mxu3 }
 0x544   : > { %v10239_v25 = vadd.f32 %v4230_v1, %v4069_v36  ;;  %v10241_v20 = vadd.f32 %v3586_v3, %v3390_v45  ;;  %v10269_v36 = vpop.f32.mrf.mxu1  ;;  %v4071_v1 = vadd.f32 %v9724_v37, %v3837_v13  ;;  %v3393_v37 = vadd.f32 %v9799_v38, %v10138_v28  ;;  %v4589_v13 = vld [vmem:[#allocation3 + $0x158] sm:$0xff] }
 0x548   : > { %7896 = vmatmul.msk.bf16.gmra.mxu2 %vm3040_vm4, %v9936_v63  ;;  %7981 = vmatmul.msk.bf16.gmra.mxu1 %vm3040_vm4, %v9991_v24  ;;  %v4344_v63 = vld [vmem:[#allocation3 + $0xc2] sm:$0xff] }
 0x549   : > { %v10262_v45 = vpack.c.bf16 %v4345_v27, %v4344_v63  ;;  %v4588_v63 = vld [vmem:[#allocation3 + $0x150] sm:$0xff] }
 0x54a   : > { %v4608_v28 = vpack.c.bf16 %v4589_v13, %v4588_v63 }
 0x54b   : > { %v4233_v46 = vpop.f32.mrf.mxu2  ;;  %v3588_v39 = vpop.f32.mrf.mxu3 }
 0x54c   : > { %v10256_v26 = vadd.f32 %v4233_v46, %v4070_v51  ;;  %v10258_v14 = vadd.f32 %v3588_v39, %v3391_v8  ;;  %v10272_v8 = vpop.f32.mrf.mxu0  ;;  %v4825_v51 = vld [vmem:[#allocation3 + $0x171] sm:$0xff]  ;;  %v3838_v46 = vadd.f32 %v9793_v55, %v9947_v59  ;;  %v4824_v39 = vld [vmem:[#allocation3 + $0x169] sm:$0xff] }
 0x54d   : > { %v4843_v31 = vpack.c.bf16 %v4825_v51, %v4824_v39 }
 0x54e   : > { %v4072_v53 = vadd.f32 %v9741_v40, %v3838_v46  ;;  %v11870_v40 = vld [vmem:[#allocation27_spill] sm:$0xff] }
 0x550   : > { %7920 = vmatmul.msk.bf16.gmra.mxu3 %vm3040_vm4, %v10262_v45 }
 0x551   : > { %7952 = vmatmul.msk.bf16.gmra.mxu0 %vm3040_vm4, %v4607_v42  ;;  %v4347_v42 = vld [vmem:[#allocation3 + $0xe2] sm:$0xff] }
 0x553   : > { %v4235_v3 = vpop.f32.mrf.mxu2  ;;  %v3591_v32 = vpop.f32.mrf.mxu3 }
 0x554   : > { %v10274_v9 = vadd.f32 %v4235_v3, %v4071_v1  ;;  %v10276_v54 = vadd.f32 %v3591_v32, %v3392_v33  ;;  %v10286_v33 = vpop.f32.mrf.mxu1  ;;  %v3839_v1 = vadd.f32 %v9826_v52, %v9960_v18  ;;  %v10294_v38 = vpop.f32.mrf.mxu0  ;;  %v4827_v52 = vld [vmem:[#allocation3 + $0x189] sm:$0xff]  ;;  %v11872_v18 = vld [vmem:[#allocation36_spill] sm:$0xff] }
 0x555   : > { %11868 = vst [vmem:[#allocation35_spill] sm:$0xff] %v10286_v33 }
 0x556   : > { %v4073_v32 = vadd.f32 %v11870_v40, %v3839_v1  ;;  %v4591_v40 = vld [vmem:[#allocation3 + $0x170] sm:$0xff] }
 0x558   : > { %7897 = vmatmul.msk.bf16.gmra.mxu2 %vm3040_vm4, %v9962_v30  ;;  %7982 = vmatmul.msk.bf16.gmra.mxu1 %vm3040_vm4, %v4843_v31  ;;  %v4346_v30 = vld [vmem:[#allocation3 + $0xda] sm:$0xff] }
 0x559   : > { %v10296_v3 = vpack.c.bf16 %v4347_v42, %v4346_v30  ;;  %v11874_v42 = vld [vmem:[#allocation17_spill] sm:$0xff] }
 0x55b   : > { %v4238_v21 = vpop.f32.mrf.mxu2  ;;  %v3593_v27 = vpop.f32.mrf.mxu3 }
 0x55c   : > { %v10288_v55 = vadd.f32 %v4238_v21, %v4072_v53  ;;  %v10290_v59 = vadd.f32 %v3593_v27, %v3393_v37  ;;  %v3840_v53 = vadd.f32 %v11872_v18, %v9975_v47  ;;  %v10309_v21 = vpop.f32.mrf.mxu1  ;;  %v4826_v27 = vld [vmem:[#allocation3 + $0x181] sm:$0xff]  ;;  %v10311_v63 = vpop.f32.mrf.mxu0  ;;  %v11876_v18 = vld [vmem:[#allocation61_spill] sm:$0xff] }
 0x55d   : > { %11873 = vst [vmem:[#allocation52_spill] sm:$0xff] %v10309_v21  ;;  %v4844_v13 = vpack.c.bf16 %v4827_v52, %v4826_v27 }
 0x55e   : > { %11869 = vst [vmem:[#allocation65_spill] sm:$0xff] %v10288_v55  ;;  %v4074_v30 = vadd.f32 %v11874_v42, %v3840_v53  ;;  %v11879_v42 = vld [vmem:[#allocation32_spill] sm:$0xff] }
 0x560   : > { %7921 = vmatmul.msk.bf16.gmra.mxu3 %vm3040_vm4, %v10296_v3 }
 0x561   : > { %7953 = vmatmul.msk.bf16.gmra.mxu0 %vm3040_vm4, %v4608_v28  ;;  %v4590_v28 = vld [vmem:[#allocation3 + $0x168] sm:$0xff] }
 0x563   : > { %v4240_v51 = vpop.f32.mrf.mxu2  ;;  %v4452_v46 = vpop.f32.mrf.mxu3 }
 0x564   : > { %v10302_v39 = vadd.f32 %v4240_v51, %v4073_v32  ;;  %v10305_v37 = vadd.f32 %v4452_v46, %v10155_v12  ;;  %v4349_v32 = vld [vmem:[#allocation3 + $0xfa] sm:$0xff]  ;;  %v4348_v46 = vld [vmem:[#allocation3 + $0xf2] sm:$0xff]  ;;  %v10326_v27 = vpop.f32.mrf.mxu1  ;;  %v10331_v53 = vpop.f32.mrf.mxu0 }
 0x565   : > { %v10324_v52 = vpack.c.bf16 %v4349_v32, %v4348_v46  ;;  %11878 = vst [vmem:[#allocation55_spill] sm:$0xff] %v10326_v27  ;;  %v11882_v32 = vld [vmem:[#allocation44_spill] sm:$0xff] }
 0x566   : > { %11871 = vst [vmem:[#allocation13_spill] sm:$0xff] %v10302_v39  ;;  %v11877_v39 = vld [vmem:[#allocation41_spill] sm:$0xff] }
 0x567   : > { %v3841_v21 = vadd.f32 %v11877_v39, %v11876_v18  ;;  %v4828_v18 = vld [vmem:[#allocation3 + $0x199] sm:$0xff] }
 0x568   : > { %7898 = vmatmul.msk.bf16.gmra.mxu2 %vm3040_vm4, %v9991_v24  ;;  %7983 = vmatmul.msk.bf16.gmra.mxu1 %vm3040_vm4, %v4844_v13  ;;  %v4609_v24 = vpack.c.bf16 %v4591_v40, %v4590_v28  ;;  %v4829_v28 = vld [vmem:[#allocation3 + $0x1a1] sm:$0xff]  ;;  %v11881_v40 = vld [vmem:[#allocation53_spill] sm:$0xff] }
 0x569   : > { %v3842_v46 = vadd.f32 %v11882_v32, %v11881_v40  ;;  %v11888_v32 = vld [vmem:[#allocation47_spill] sm:$0xff] }
 0x56b   : > { %v4243_v1 = vpop.f32.mrf.mxu2  ;;  %v4454_v12 = vpop.f32.mrf.mxu3 }
 0x56c   : > { %v10317_v51 = vadd.f32 %v4243_v1, %v4074_v30  ;;  %v10320_v47 = vadd.f32 %v4454_v12, %v10173_v41  ;;  %v4075_v30 = vadd.f32 %v11879_v42, %v3841_v21  ;;  %v11884_v21 = vld [vmem:[#allocation18_spill] sm:$0xff] }
 0x56d   : > { %v4076_v42 = vadd.f32 %v11884_v21, %v3842_v46  ;;  %v11889_v46 = vld [vmem:[#allocation26_spill] sm:$0xff] }
 0x56e   : > { %11875 = vst [vmem:[#allocation39_spill] sm:$0xff] %v10317_v51  ;;  %v10342_v51 = vpop.f32.mrf.mxu1 }
 0x56f   : > { %11883 = vst [vmem:[#allocation22_spill] sm:$0xff] %v10342_v51 }
 0x570   : > { %7922 = vmatmul.msk.bf16.gmra.mxu3 %vm3040_vm4, %v10324_v52 }
 0x571   : > { %7954 = vmatmul.msk.bf16.gmra.mxu0 %vm3040_vm4, %v4609_v24  ;;  %v4845_v24 = vpack.c.bf16 %v4829_v28, %v4828_v18  ;;  %v11887_v28 = vld [vmem:[#allocation64_spill] sm:$0xff] }
 0x572   : > { %v3843_v18 = vadd.f32 %v11888_v32, %v11887_v28  ;;  %v4594_v32 = vld [vmem:[#allocation3 + $0x198] sm:$0xff] }
 0x573   : > { %v4245_v41 = vpop.f32.mrf.mxu2  ;;  %v4457_v1 = vpop.f32.mrf.mxu3 }
 0x574   : > { %v10334_v12 = vadd.f32 %v4245_v41, %v4075_v30  ;;  %v10337_v39 = vadd.f32 %v4457_v1, %v10190_v2  ;;  %v4592_v41 = vld [vmem:[#allocation3 + $0x180] sm:$0xff]  ;;  %v4351_v2 = vld [vmem:[#allocation3 + $0x112] sm:$0xff]  ;;  %v10346_v1 = vpop.f32.mrf.mxu0  ;;  %v4077_v21 = vadd.f32 %v11889_v46, %v3843_v18  ;;  %v4353_v46 = vld [vmem:[#allocation3 + $0x12a] sm:$0xff] }
 0x575   : > { %11885 = vst [vmem:[#allocation57_spill] sm:$0xff] %v10346_v1  ;;  %v4595_v18 = vld [vmem:[#allocation3 + $0x1a0] sm:$0xff] }
 0x576   : > { %11880 = vst [vmem:[#allocation20_spill] sm:$0xff] %v10334_v12  ;;  %v4593_v12 = vld [vmem:[#allocation3 + $0x188] sm:$0xff] }
 0x577   : > { %v4610_v51 = vpack.c.bf16 %v4593_v12, %v4592_v41 }
 0x578   : > { %7899 = vmatmul.msk.bf16.gmra.mxu2 %vm3040_vm4, %v4843_v31  ;;  %7984 = vmatmul.msk.bf16.gmra.mxu1 %vm3040_vm4, %v4845_v24  ;;  %v4350_v31 = vld [vmem:[#allocation3 + $0x10a] sm:$0xff] }
 0x579   : > { %v10355_v24 = vpack.c.bf16 %v4351_v2, %v4350_v31 }
 0x57b   : > { %v4248_v27 = vpop.f32.mrf.mxu2  ;;  %v4459_v30 = vpop.f32.mrf.mxu3 }
 0x57c   : > { %v10348_v55 = vadd.f32 %v4248_v27, %v4076_v42  ;;  %v10351_v40 = vadd.f32 %v4459_v30, %v10206_v0  ;;  %v11891_v30 = vld [vmem:[#allocation8_spill] sm:$0xff]  ;;  %v10368_v12 = vpop.f32.mrf.mxu0 }
 0x57e   : > { %11886 = vst [vmem:[#allocation14_spill] sm:$0xff] %v10348_v55  ;;  %v11892_v55 = vld [vmem:[#allocation50_spill] sm:$0xff] }
 0x57f   : > { %v3844_v28 = vadd.f32 %v11892_v55, %v11891_v30 }
 0x580   : > { %7923 = vmatmul.msk.bf16.gmra.mxu3 %vm3040_vm4, %v10355_v24 }
 0x581   : > { %7955 = vmatmul.msk.bf16.gmra.mxu0 %vm3040_vm4, %v4610_v51  ;;  %v11893_v51 = vld [vmem:[#allocation30_spill] sm:$0xff] }
 0x582   : > { %v4078_v41 = vadd.f32 %v11893_v51, %v3844_v28  ;;  %v11896_v28 = vld [vmem:[#allocation33_spill] sm:$0xff] }
 0x583   : > { %v4250_v1 = vpop.f32.mrf.mxu2  ;;  %v4462_v27 = vpop.f32.mrf.mxu3 }
 0x584   : > { %v10361_v42 = vadd.f32 %v4250_v1, %v4077_v21  ;;  %v10364_v0 = vadd.f32 %v4462_v27, %v10221_v35  ;;  %v4352_v35 = vld [vmem:[#allocation3 + $0x122] sm:$0xff]  ;;  %v4611_v27 = vpack.c.bf16 %v4595_v18, %v4594_v32  ;;  %v11899_v18 = vld [vmem:[#allocation37_spill] sm:$0xff] }
 0x585   : > { %v11895_v21 = vld [vmem:[#allocation54_spill] sm:$0xff]  ;;  %v10379_v30 = vpack.c.bf16 %v4353_v46, %v4352_v35 }
 0x586   : > { %11890 = vst [vmem:[#allocation66_spill] sm:$0xff] %v10361_v42  ;;  %v3845_v55 = vadd.f32 %v11895_v21, %v10046_v48  ;;  %v11898_v48 = vld [vmem:[#allocation46_spill] sm:$0xff] }
 0x587   : > { %v3846_v32 = vadd.f32 %v11898_v48, %v10056_v22  ;;  %v11903_v22 = vld [vmem:[#allocation40_spill] sm:$0xff] }
 0x588   : > { %7900 = vmatmul.msk.bf16.gmra.mxu2 %vm3040_vm4, %v4844_v13  ;;  %v10381_v13 = vpop.f32.mrf.mxu0  ;;  %v4079_v51 = vadd.f32 %v11896_v28, %v3845_v55  ;;  %v4354_v28 = vld [vmem:[#allocation3 + $0x13a] sm:$0xff] }
 0x589   : > { %v4080_v46 = vadd.f32 %v11899_v18, %v3846_v32  ;;  %v11904_v18 = vld [vmem:[#allocation60_spill] sm:$0xff] }
 0x58b   : > { %v4253_v2 = vpop.f32.mrf.mxu2  ;;  %v4464_v31 = vpop.f32.mrf.mxu3 }
 0x58c   : > { %v10372_v33 = vadd.f32 %v4253_v2, %v4078_v41  ;;  %v10375_v1 = vadd.f32 %v4464_v31, %v10239_v25 }
 0x58e   : > { %11894 = vst [vmem:[#allocation15_spill] sm:$0xff] %v10372_v33 }
 0x590   : > { %7924 = vmatmul.msk.bf16.gmra.mxu3 %vm3040_vm4, %v10379_v30 }
 0x591   : > { %7956 = vmatmul.msk.bf16.gmra.mxu0 %vm3040_vm4, %v4611_v27  ;;  %v4355_v27 = vld [vmem:[#allocation3 + $0x142] sm:$0xff] }
 0x593   : > { %v4255_v41 = vpop.f32.mrf.mxu2  ;;  %v4467_v2 = vpop.f32.mrf.mxu3 }
 0x594   : > { %v10387_v25 = vadd.f32 %v4255_v41, %v4079_v51  ;;  %v10390_v31 = vadd.f32 %v4467_v2, %v10256_v26  ;;  %v11901_v51 = vld [vmem:[#allocation9_spill] sm:$0xff]  ;;  %v11902_v26 = vld [vmem:[#allocation6_spill] sm:$0xff]  ;;  %v10404_v2 = vpack.c.bf16 %v4355_v27, %v4354_v28 }
 0x595   : > { %v3847_v41 = vadd.f32 %v11902_v26, %v11901_v51  ;;  %v4357_v51 = vld [vmem:[#allocation3 + $0x15a] sm:$0xff]  ;;  %v4356_v28 = vld [vmem:[#allocation3 + $0x152] sm:$0xff] }
 0x596   : > { %11897 = vst [vmem:[#allocation24_spill] sm:$0xff] %v10387_v25  ;;  %v11908_v26 = vld [vmem:[#allocation28_spill] sm:$0xff]  ;;  %v11909_v25 = vld [vmem:[#allocation29_spill] sm:$0xff] }
 0x597   : > { %v3849_v42 = vadd.f32 %v11909_v25, %v11908_v26  ;;  %v4359_v25 = vld [vmem:[#allocation3 + $0x172] sm:$0xff]  ;;  %v11914_v26 = vld [vmem:[#allocation34_spill] sm:$0xff] }
 0x598   : > { %7997 = vmatmul.msk.bf16.vlgmr.msra.gmra.mxu2 %vm3040_vm4, %v10072_v16  ;;  %v4081_v16 = vadd.f32 %v11903_v22, %v3847_v41  ;;  %v10420_v41 = vpack.c.bf16 %v4357_v51, %v4356_v28  ;;  %v11910_v22 = vld [vmem:[#allocation51_spill] sm:$0xff] }
 0x599   : > { %v4358_v28 = vld [vmem:[#allocation3 + $0x16a] sm:$0xff] }
 0x59b   : > { %v4258_v35 = vpop.f32.mrf.mxu2  ;;  %v4469_v21 = vpop.f32.mrf.mxu3 }
 0x59c   : > { %v10397_v33 = vadd.f32 %v4258_v35, %v4080_v46  ;;  %v10400_v55 = vadd.f32 %v4469_v21, %v10274_v9  ;;  %v11905_v46 = vld [vmem:[#allocation19_spill] sm:$0xff] }
 0x59d   : > { %v3848_v35 = vadd.f32 %v11905_v46, %v11904_v18  ;;  %v11906_v9 = vld [vmem:[#allocation43_spill] sm:$0xff]  ;;  %v11912_v46 = vld [vmem:[#allocation56_spill] sm:$0xff] }
 0x59e   : > { %11900 = vst [vmem:[#allocation16_spill] sm:$0xff] %v10397_v33 }
 0x59f   : > { %v4082_v21 = vadd.f32 %v11906_v9, %v3848_v35 }
 0x5a0   : > { %7925 = vmatmul.msk.bf16.gmra.mxu3 %vm3040_vm4, %v10404_v2 }
 0x5a3   : > { %v4260_v48 = vpop.f32.mrf.mxu2 }
 0x5a4   : > { %v10409_v32 = vadd.f32 %v4260_v48, %v4081_v16  ;;  %v4083_v16 = vadd.f32 %v11910_v22, %v3849_v42  ;;  %v10436_v42 = vpack.c.bf16 %v4359_v25, %v4358_v28  ;;  %v11915_v22 = vld [vmem:[#allocation7_spill] sm:$0xff]  ;;  %v11918_v28 = vld [vmem:[#allocation25_spill] sm:$0xff] }
 0x5a5   : > { %v4360_v25 = vld [vmem:[#allocation3 + $0x182] sm:$0xff] }
 0x5a8   : > { %7998 = vmatmul.msk.bf16.gmra.mxu2 %vm3040_vm4, %v10102_v23  ;;  %v11911_v23 = vld [vmem:[#allocation45_spill] sm:$0xff] }
 0x5a9   : > { %v3850_v35 = vadd.f32 %v11912_v46, %v11911_v23 }
 0x5ab   : > { %v4263_v33 = vpop.f32.mrf.mxu2 }
 0x5ac   : > { %v10416_v27 = vadd.f32 %v4263_v33, %v4082_v21  ;;  %v11913_v33 = vld [vmem:[#allocation48_spill] sm:$0xff] }
 0x5ad   : > { %v4084_v9 = vadd.f32 %v11913_v33, %v3850_v35  ;;  %v11917_v35 = vld [vmem:[#allocation21_spill] sm:$0xff] }
 0x5ae   : > { %11907 = vst [vmem:[#allocation27_spill] sm:$0xff] %v10416_v27  ;;  %v3851_v27 = vadd.f32 %v11914_v26, %v10127_v62  ;;  %v4361_v62 = vld [vmem:[#allocation3 + $0x18a] sm:$0xff]  ;;  %v3853_v26 = vadd.f32 %v11918_v28, %v10157_v57 }
 0x5b0   : > { %7926 = vmatmul.msk.bf16.gmra.mxu3 %vm3040_vm4, %v10420_v41 }
 0x5b3   : > { %v4265_v48 = vpop.f32.mrf.mxu2 }
 0x5b4   : > { %v10425_v18 = vadd.f32 %v4265_v48, %v4083_v16  ;;  %v4085_v16 = vadd.f32 %v11915_v22, %v3851_v27  ;;  %v10452_v27 = vpack.c.bf16 %v4361_v62, %v4360_v25  ;;  %v11919_v22 = vld [vmem:[#allocation58_spill] sm:$0xff] }
 0x5b5   : > { %v11925_v25 = vld [vmem:[#allocation38_spill] sm:$0xff] }
 0x5b8   : > { %7999 = vmatmul.msk.bf16.gmra.mxu2 %vm3040_vm4, %v10131_v6  ;;  %v11916_v6 = vld [vmem:[#allocation59_spill] sm:$0xff] }
 0x5b9   : > { %v3852_v46 = vadd.f32 %v11916_v6, %v10140_v15  ;;  %v4087_v15 = vadd.f32 %v11919_v22, %v3853_v26 }
 0x5bb   : > { %v4268_v21 = vpop.f32.mrf.mxu2  ;;  %v4086_v33 = vadd.f32 %v11917_v35, %v3852_v46  ;;  %v11922_v46 = vld [vmem:[#allocation23_spill] sm:$0xff] }
 0x5bc   : > { %v10432_v51 = vadd.f32 %v4268_v21, %v4084_v9 }
 0x5c0   : > { %7927 = vmatmul.msk.bf16.gmra.mxu3 %vm3040_vm4, %v10436_v42 }
 0x5c3   : > { %v4270_v48 = vpop.f32.mrf.mxu2 }
 0x5c4   : > { %v10441_v23 = vadd.f32 %v4270_v48, %v4085_v16 }
 0x5c8   : > { %8000 = vmatmul.msk.bf16.gmra.mxu2 %vm3040_vm4, %v10161_v49  ;;  %v11921_v49 = vld [vmem:[#allocation42_spill] sm:$0xff] }
 0x5c9   : > { %v3854_v6 = vadd.f32 %v11921_v49, %v10175_v19  ;;  %v11928_v19 = vld [vmem:[#allocation10_spill] sm:$0xff] }
 0x5cb   : > { %v4273_v9 = vpop.f32.mrf.mxu2  ;;  %v4088_v35 = vadd.f32 %v11922_v46, %v3854_v6  ;;  %v11930_v46 = vld [vmem:[#allocation49_spill] sm:$0xff] }
 0x5cc   : > { %v10448_v21 = vadd.f32 %v4273_v9, %v4086_v33  ;;  %v11924_v9 = vld [vmem:[#allocation11_spill] sm:$0xff] }
 0x5cd   : > { %v3855_v62 = vadd.f32 %v11924_v9, %v10192_v17  ;;  %v11931_v17 = vld [vmem:[#allocation62_spill] sm:$0xff] }
 0x5cf   : > { %v4089_v28 = vadd.f32 %v11925_v25, %v3855_v62  ;;  %v3858_v25 = vadd.f32 %v10170_v5, %v10241_v20 }
 0x5d0   : > { %7928 = vmatmul.msk.bf16.gmra.mxu3 %vm3040_vm4, %v10452_v27 }
 0x5d3   : > { %v4275_v16 = vpop.f32.mrf.mxu2 }
 0x5d4   : > { %v10457_v48 = vadd.f32 %v4275_v16, %v4087_v15  ;;  %v11927_v15 = vld [vmem:[#allocation63_spill] sm:$0xff] }
 0x5d5   : > { %v3856_v16 = vadd.f32 %v11927_v15, %v10208_v61  ;;  %v11933_v61 = vld [vmem:[#allocation31_spill] sm:$0xff]  ;;  %v3859_v15 = vadd.f32 %v10188_v58, %v10258_v14 }
 0x5d6   : > { %11920 = vst [vmem:[#allocation36_spill] sm:$0xff] %v10457_v48 }
 0x5d8   : > { %8001 = vmatmul.msk.bf16.gmra.mxu2 %vm3040_vm4, %v10196_v56  ;;  %v4090_v56 = vadd.f32 %v11928_v19, %v3856_v16 }
 0x5db   : > { %v4278_v33 = vpop.f32.mrf.mxu2 }
 0x5dc   : > { %v10464_v57 = vadd.f32 %v4278_v33, %v4088_v35  ;;  %v3857_v35 = vadd.f32 %v11930_v46, %v10223_v11  ;;  %v11935_v11 = vld [vmem:[#allocation12_spill] sm:$0xff]  ;;  %v3861_v46 = vadd.f32 %v10231_v44, %v10290_v59 }
 0x5dd   : > { %v4093_v16 = vadd.f32 %v11935_v11, %v3859_v15 }
 0x5de   : > { %11923 = vst [vmem:[#allocation17_spill] sm:$0xff] %v10464_v57  ;;  %v4091_v33 = vadd.f32 %v11931_v17, %v3857_v35  ;;  %v4095_v58 = vadd.f32 %v10183_v29, %v3861_v46  ;;  %v4766_v17 = vadd.f32 %v10251_v60, %v10305_v37  ;;  %v4768_v60 = vadd.f32 %v10294_v38, %v10337_v39  ;;  %v4472_v38 = vpop.f32.mrf.mxu3  ;;  %v11940_v46 = vld [vmem:[#allocation57_spill] sm:$0xff] }
 0x5e3   : > { %v4280_v26 = vpop.f32.mrf.mxu2 }
 0x5e4   : > { %v10469_v22 = vadd.f32 %v4280_v26, %v4089_v28 }
 0x5e6   : > { %11926 = vst [vmem:[#allocation61_spill] sm:$0xff] %v10469_v22 }
 0x5e8   : > { %8002 = vmatmul.msk.bf16.gmra.mxu2 %vm3040_vm4, %v10229_v43  ;;  %v4092_v43 = vadd.f32 %v11933_v61, %v3858_v25 }
 0x5eb   : > { %v4283_v49 = vpop.f32.mrf.mxu2 }
 0x5ec   : > { %v10476_v6 = vadd.f32 %v4283_v49, %v4090_v56  ;;  %v3860_v49 = vadd.f32 %v10212_v50, %v10276_v54  ;;  %v5000_v50 = vadd.f32 %v10204_v4, %v4766_v17  ;;  %v5002_v4 = vadd.f32 %v10245_v7, %v4768_v60 }
 0x5ee   : > { %11929 = vst [vmem:[#allocation41_spill] sm:$0xff] %v10476_v6  ;;  %v4094_v5 = vadd.f32 %v10163_v34, %v3860_v49 }
 0x5f3   : > { %v4285_v9 = vpop.f32.mrf.mxu2 }
 0x5f4   : > { %v10481_v62 = vadd.f32 %v4285_v9, %v4091_v33 }
 0x5f6   : > { %11932 = vst [vmem:[#allocation32_spill] sm:$0xff] %v10481_v62 }
 0x5f8   : > { %8003 = vmatmul.msk.bf16.gmra.mxu2 %vm3040_vm4, %v10262_v45 }
 0x5fb   : > { %v4288_v28 = vpop.f32.mrf.mxu2 }
 0x5fc   : > { %v10488_v26 = vadd.f32 %v4288_v28, %v4092_v43  ;;  %v4770_v43 = vadd.f32 %v10331_v53, %v10364_v0  ;;  %v4706_v28 = vpop.f32.mrf.mxu0  ;;  %v11939_v53 = vld [vmem:[#allocation35_spill] sm:$0xff] }
 0x5fe   : > { %11934 = vst [vmem:[#allocation53_spill] sm:$0xff] %v10488_v26 }
 0x603   : > { %v4290_v19 = vpop.f32.mrf.mxu2 }
 0x604   : > { %v10493_v56 = vadd.f32 %v4290_v19, %v4093_v16  ;;  %v4474_v16 = vpop.f32.mrf.mxu3 }
 0x606   : > { %11936 = vst [vmem:[#allocation44_spill] sm:$0xff] %v10493_v56 }
 0x608   : > { %8004 = vmatmul.msk.bf16.gmra.mxu2 %vm3040_vm4, %v10296_v3  ;;  %v4767_v3 = vadd.f32 %v10272_v8, %v10320_v47 }
 0x60a   : > { %v5001_v29 = vadd.f32 %v10227_v10, %v4767_v3  ;;  %v4769_v10 = vadd.f32 %v10311_v63, %v10351_v40  ;;  %v4940_v63 = vpop.f32.mrf.mxu1  ;;  %v5004_v40 = vadd.f32 %v11939_v53, %v4770_v43 }
 0x60b   : > { %v4293_v20 = vpop.f32.mrf.mxu2 }
 0x60c   : > { %v10500_v45 = vadd.f32 %v4293_v20, %v4094_v5  ;;  %v5003_v39 = vadd.f32 %v10269_v36, %v4769_v10  ;;  %v10540_v36 = vld [vmem:[%s11681_s7] sm:$0xff]  ;;  %v10587_v53 = vpop.f32.mrf.mxu3 }
 0x60d   : > { %v10545_v0 = vperm.slane %v10540_v36, 0  ;;  %v10550_v5 = vperm.slane %v10540_v36, 1 }
 0x60e   : > { %11937 = vst [vmem:[#allocation18_spill] sm:$0xff] %v10500_v45 }
 0x613   : > { %v4295_v14 = vpop.f32.mrf.mxu2 }
 0x614   : > { %v10505_v35 = vadd.f32 %v4295_v14, %v4095_v58  ;;  %v4771_v58 = vadd.f32 %v11940_v46, %v10375_v1  ;;  %v11943_v46 = vld [vmem:[#allocation55_spill] sm:$0xff] }
 0x616   : > { %11938 = vst [vmem:[#allocation64_spill] sm:$0xff] %v10505_v35 }
 0x618   : > { %8005 = vmatmul.msk.bf16.gmra.mxu2 %vm3040_vm4, %v10324_v52 }
 0x61b   : > { %v5154_v34 = vpop.f32.mrf.mxu2 }
 0x61c   : > { %v5234_v54 = vadd.f32 %v5154_v34, %v5000_v50  ;;  %v11941_v34 = vld [vmem:[#allocation65_spill] sm:$0xff] }
 0x61e   : > { %v5266_v44 = vmax.f32 %v5234_v54, 0.0  ;;  %v4540_v54 = vadd.f32 %v4472_v38, %v11941_v34 }
 0x620   : > { %5300 = vst.msk [vmem:[#allocation4 + $0x19] sm:$0xff] %vm5299_vm6, %v5266_v44 }
 0x623   : > { %v5156_v59 = vpop.f32.mrf.mxu2 }
 0x624   : > { %v5235_v33 = vadd.f32 %v5156_v59, %v5001_v29  ;;  %v10560_v29 = vperm.slane %v10540_v36, 2  ;;  %v10562_v59 = vpop.f32.mrf.mxu0 }
 0x626   : > { %v5267_v37 = vmax.f32 %v5235_v33, 0.0 }
 0x627   : > { %v5344_v52 = vld [vmem:[#allocation4 + $0x1a] sm:$0x1] }
 0x628   : > { %5363 = vst.msk [vmem:[#allocation4 + $0x18] sm:$0x1] %vm5361_vm7, %v5344_v52  ;;  %8006 = vmatmul.msk.bf16.gmra.mxu2 %vm3040_vm4, %v10355_v24  ;;  %v5517_v20 = vld [vmem:[#allocation4 + $0x19] sm:$0xff] }
 0x629   : > { %5301 = vst.msk [vmem:[#allocation4 + $0x21] sm:$0xff] %vm5299_vm6, %v5267_v37  ;;  %v5550_v3 = vmul.f32 %v10550_v5, %v5517_v20  ;;  %v11942_v37 = vld [vmem:[#allocation52_spill] sm:$0xff] }
 0x62a   : > { %v5005_v52 = vadd.f32 %v11942_v37, %v4771_v58  ;;  %v10612_v37 = vperm.slane %v10540_v36, 7 }
 0x62b   : > { %v5159_v8 = vpop.f32.mrf.mxu2 }
 0x62c   : > { %v5236_v47 = vadd.f32 %v5159_v8, %v5002_v4  ;;  %v10573_v8 = vperm.slane %v10540_v36, 3 }
 0x62e   : > { %v5268_v9 = vmax.f32 %v5236_v47, 0.0 }
 0x62f   : > { %v10547_v49 = vld [vmem:[#allocation4 + $0x18] sm:$0xff] }
 0x630   : > { %v5381_v25 = vld [vmem:[#allocation4 + $0x27] sm:$0x1]  ;;  %5302 = vst.msk [vmem:[#allocation4 + $0x31] sm:$0xff] %vm5299_vm6, %v5268_v9  ;;  %v5453_v17 = vmul.f32 %v10545_v0, %v10547_v49  ;;  %v5614_v44 = vld [vmem:[#allocation4 + $0x1a] sm:$0xff]  ;;  %v4772_v9 = vadd.f32 %v10368_v12, %v10390_v31 }
 0x631   : > { %5399 = vst.msk [vmem:[#allocation4 + $0x29] sm:$0x1] %vm5361_vm7, %v5381_v25  ;;  %v5421_v47 = vld [vmem:[#allocation4 + $0x20] sm:$0xff]  ;;  %v4773_v25 = vadd.f32 %v10381_v13, %v10400_v55  ;;  %v5647_v43 = vmul.f32 %v10560_v29, %v5614_v44 }
 0x632   : > { %v5582_v4 = vadd.f32 %v5550_v3, %v5453_v17  ;;  %v5518_v10 = vld [vmem:[#allocation4 + $0x21] sm:$0xff]  ;;  %v5454_v12 = vmul.f32 %v10545_v0, %v5421_v47  ;;  %v5006_v58 = vadd.f32 %v11943_v46, %v4772_v9 }
 0x633   : > { %v5161_v61 = vpop.f32.mrf.mxu2  ;;  %v5551_v13 = vmul.f32 %v10550_v5, %v5518_v10 }
 0x634   : > { %v5237_v24 = vadd.f32 %v5161_v61, %v5003_v39  ;;  %v10580_v39 = vpop.f32.mrf.mxu1  ;;  %v4774_v61 = vadd.f32 %v4706_v28, %v4540_v54  ;;  %v5679_v55 = vadd.f32 %v5647_v43, %v5582_v4  ;;  %v11945_v54 = vld [vmem:[#allocation13_spill] sm:$0xff] }
 0x635   : > { %v10606_v3 = vadd.f32 %v4474_v16, %v11945_v54 }
 0x636   : > { %v5269_v7 = vmax.f32 %v5237_v24, 0.0 }
 0x637   : > { %v10530_v15 = vld [vmem:[#allocation4 + $0x31] sm:$0xff] }
 0x638   : > { %v5345_v11 = vld [vmem:[#allocation4 + $0x32] sm:$0x1]  ;;  %5335 = vst.msk [vmem:[#allocation4 + $0x1] sm:$0xff] %vm5299_vm6, %v10530_v15  ;;  %8007 = vmatmul.msk.bf16.gmra.mxu2 %vm3040_vm4, %v10379_v30 }
 0x639   : > { %5364 = vst.msk [vmem:[#allocation4 + $0x30] sm:$0x1] %vm5361_vm7, %v5345_v11  ;;  %v10585_v11 = vld [vmem:[#allocation4 + $0x22] sm:$0xff] }
 0x63a   : > { %5303 = vst.msk [vmem:[#allocation4 + $0x39] sm:$0xff] %vm5299_vm6, %v5269_v7  ;;  %v5648_v34 = vmul.f32 %v10560_v29, %v10585_v11 }
 0x63b   : > { %v5164_v19 = vpop.f32.mrf.mxu2 }
 0x63c   : > { %v5238_v30 = vadd.f32 %v5164_v19, %v5004_v40  ;;  %v10592_v40 = vperm.slane %v10540_v36, 4 }
 0x63e   : > { %v5270_v14 = vmax.f32 %v5238_v30, 0.0 }
 0x63f   : > { %v5343_v50 = vld [vmem:[#allocation4 + $0x2] sm:$0x1] }
 0x640   : > { %5304 = vst.msk [vmem:[#allocation4 + $0x49] sm:$0xff] %vm5299_vm6, %v5270_v14  ;;  %v10566_v60 = vld [vmem:[#allocation4 + $0x30] sm:$0xff]  ;;  %v5515_v28 = vld [vmem:[#allocation4 + $0x1] sm:$0xff] }
 0x641   : > { %v10564_v33 = vld [vmem:[#allocation4 + $0x39] sm:$0xff]  ;;  %5362 = vst.msk [vmem:[#allocation4] sm:$0x1] %vm5361_vm7, %v5343_v50  ;;  %v5744_v7 = vmul.f32 %v10573_v8, %v10566_v60  ;;  %v11944_v14 = vld [vmem:[#allocation22_spill] sm:$0xff]  ;;  %v10601_v50 = vperm.slane %v10540_v36, 5 }
 0x642   : > { %v5382_v1 = vld [vmem:[#allocation4 + $0x3f] sm:$0x1]  ;;  %5336 = vst.msk [vmem:[#allocation4 + $0x9] sm:$0xff] %vm5299_vm6, %v10564_v33  ;;  %v10598_v17 = vadd.f32 %v11944_v14, %v4773_v25  ;;  %v5548_v25 = vmul.f32 %v10550_v5, %v5515_v28 }
 0x643   : > { %5400 = vst.msk [vmem:[#allocation4 + $0x41] sm:$0x1] %vm5361_vm7, %v5382_v1  ;;  %v5166_v38 = vpop.f32.mrf.mxu2  ;;  %v10594_v19 = vld [vmem:[#allocation4 + $0x38] sm:$0xff]  ;;  %v5776_v1 = vadd.f32 %v5744_v7, %v5679_v55  ;;  %v10624_v7 = vperm.slane %v10540_v36, 6 }
 0x644   : > { %v5239_v24 = vadd.f32 %v5166_v38, %v5005_v52  ;;  %v10614_v52 = vadd.f32 %v4940_v63, %v4774_v61  ;;  %v5583_v38 = vadd.f32 %v5551_v13, %v5454_v12  ;;  %v5742_v63 = vmul.f32 %v10573_v8, %v10547_v49  ;;  %v10632_v13 = vld [vmem:[#allocation4 + $0x32] sm:$0xff] }
 0x645   : > { %v5839_v61 = vmul.f32 %v10592_v40, %v5517_v20  ;;  %v5743_v20 = vmul.f32 %v10573_v8, %v5421_v47 }
 0x646   : > { %v5271_v31 = vmax.f32 %v5239_v24, 0.0  ;;  %v5745_v24 = vmul.f32 %v10573_v8, %v10594_v19  ;;  %v5680_v46 = vadd.f32 %v5648_v34, %v5583_v38  ;;  %v10646_v34 = vpop.f32.mrf.mxu1  ;;  %v10654_v38 = vpop.f32.mrf.mxu3 }
 0x647   : > { %v5346_v30 = vld [vmem:[#allocation4 + $0x4a] sm:$0x1] }
 0x648   : > { %5365 = vst.msk [vmem:[#allocation4 + $0x48] sm:$0x1] %vm5361_vm7, %v5346_v30  ;;  %8008 = vmatmul.msk.bf16.gmra.mxu2 %vm3040_vm4, %v10404_v2  ;;  %v5418_v4 = vld [vmem:[#allocation4] sm:$0xff]  ;;  %v5841_v2 = vmul.f32 %v10592_v40, %v10530_v15  ;;  %v5936_v30 = vmul.f32 %v10601_v50, %v5614_v44  ;;  %v5777_v45 = vadd.f32 %v5745_v24, %v5680_v46 }
 0x649   : > { %5305 = vst.msk [vmem:[#allocation4 + $0x51] sm:$0xff] %vm5299_vm6, %v5271_v31  ;;  %v5451_v9 = vmul.f32 %v10545_v0, %v5418_v4  ;;  %v5612_v16 = vld [vmem:[#allocation4 + $0x2] sm:$0xff]  ;;  %v5380_v43 = vld [vmem:[#allocation4 + $0xf] sm:$0x1]  ;;  %v10630_v31 = vpop.f32.mrf.mxu0  ;;  %v5552_v44 = vmul.f32 %v10550_v5, %v10530_v15 }
 0x64a   : > { %5398 = vst.msk [vmem:[#allocation4 + $0x11] sm:$0x1] %vm5361_vm7, %v5380_v43  ;;  %v5645_v28 = vmul.f32 %v10560_v29, %v5612_v16  ;;  %v5419_v36 = vld [vmem:[#allocation4 + $0x8] sm:$0xff]  ;;  %v5873_v4 = vadd.f32 %v5841_v2, %v5776_v1  ;;  %v10636_v49 = vld [vmem:[#allocation4 + $0x3a] sm:$0xff]  ;;  %v5455_v43 = vmul.f32 %v10566_v60, %v10545_v0  ;;  %v6033_v2 = vmul.f32 %v10624_v7, %v10566_v60 }
 0x64b   : > { %v5169_v12 = vpop.f32.mrf.mxu2  ;;  %v5580_v55 = vadd.f32 %v5548_v25, %v5451_v9  ;;  %v5516_v14 = vld [vmem:[#allocation4 + $0x9] sm:$0xff]  ;;  %v10642_v9 = vmul.f32 %v10592_v40, %v5518_v10  ;;  %v5452_v47 = vmul.f32 %v10545_v0, %v5419_v36 }
 0x64c   : > { %v5240_v54 = vadd.f32 %v5169_v12, %v5006_v58  ;;  %v5938_v58 = vmul.f32 %v10601_v50, %v10632_v13  ;;  %v10650_v1 = vld [vmem:[#allocation4 + $0x49] sm:$0xff]  ;;  %v5549_v16 = vmul.f32 %v10550_v5, %v5516_v14  ;;  %v5842_v12 = vmul.f32 %v10592_v40, %v10564_v33 }
 0x64d   : > { %v5677_v35 = vadd.f32 %v5645_v28, %v5580_v55  ;;  %v5939_v55 = vmul.f32 %v10601_v50, %v10636_v49  ;;  %v6132_v60 = vmul.f32 %v10612_v37, %v10650_v1 }
 0x64e   : > { %v5272_v25 = vmax.f32 %v5240_v54, 0.0  ;;  %v5970_v46 = vadd.f32 %v5938_v58, %v5873_v4  ;;  %v5584_v54 = vadd.f32 %v5552_v44, %v5455_v43  ;;  %v5874_v26 = vadd.f32 %v5842_v12, %v5777_v45  ;;  %v10681_v43 = vld [vmem:[%s11681_s7 + $0x8] ss:$0 sm:$0xff] }
 0x64f   : > { %v10656_v24 = vld [vmem:[#allocation4 + $0x48] sm:$0xff]  ;;  %v5774_v10 = vadd.f32 %v5742_v63, %v5677_v35  ;;  %v5649_v35 = vmul.f32 %v10632_v13, %v10560_v29  ;;  %v5456_v4 = vmul.f32 %v10594_v19, %v10545_v0 }
 0x650   : > { %v5383_v28 = vld [vmem:[#allocation4 + $0x57] sm:$0x1]  ;;  %5306 = vst.msk [vmem:[#allocation4 + $0x61] sm:$0xff] %vm5299_vm6, %v5272_v25  ;;  %v6035_v36 = vmul.f32 %v10624_v7, %v10656_v24  ;;  %v10674_v63 = vld [vmem:[#allocation4 + $0x4a] sm:$0xff]  ;;  %v5746_v45 = vmul.f32 %v10656_v24, %v10573_v8 }
 0x651   : > { %v10667_v14 = vld [vmem:[#allocation4 + $0x50] sm:$0xff]  ;;  %5401 = vst.msk [vmem:[#allocation4 + $0x59] sm:$0x1] %vm5361_vm7, %v5383_v28  ;;  %v5871_v56 = vadd.f32 %v5839_v61, %v5774_v10  ;;  %v5581_v28 = vadd.f32 %v5549_v16, %v5452_v47  ;;  %v5971_v61 = vadd.f32 %v5939_v55, %v5874_v26  ;;  %v5553_v10 = vmul.f32 %v10550_v5, %v10564_v33  ;;  %v10693_v48 = vpop.f32.mrf.mxu0 }
 0x652   : > { %v5613_v25 = vld [vmem:[#allocation4 + $0xa] sm:$0xff]  ;;  %v6067_v58 = vadd.f32 %v6035_v36, %v5970_v46  ;;  %v6036_v44 = vmul.f32 %v10624_v7, %v10667_v14  ;;  %v6229_v36 = vmul.f32 %v10681_v43, %v10674_v63  ;;  %v5681_v16 = vadd.f32 %v5649_v35, %v5584_v54  ;;  %v10716_v54 = vpop.f32.mrf.mxu3 }
 0x653   : > { %v5646_v62 = vmul.f32 %v10560_v29, %v5613_v25  ;;  %v5171_v6 = vpop.f32.mrf.mxu2  ;;  %v5968_v22 = vadd.f32 %v5936_v30, %v5871_v56  ;;  %v6130_v56 = vmul.f32 %v10612_v37, %v10530_v15  ;;  %v10697_v26 = vld [vmem:[#allocation4 + $0x51] sm:$0xff]  ;;  %v5937_v30 = vmul.f32 %v10601_v50, %v10585_v11  ;;  %v10705_v15 = vpop.f32.mrf.mxu1 }
 0x654   : > { %v5241_v12 = vadd.f32 %v5171_v6, %v10598_v17  ;;  %v6164_v46 = vadd.f32 %v6132_v60, %v6067_v58  ;;  %v6068_v6 = vadd.f32 %v6036_v44, %v5971_v61 }
 0x655   : > { %v5678_v57 = vadd.f32 %v5646_v62, %v5581_v28  ;;  %v6065_v47 = vadd.f32 %v6033_v2, %v5968_v22  ;;  %v6227_v62 = vmul.f32 %v10681_v43, %v10632_v13  ;;  %v5585_v28 = vadd.f32 %v5553_v10, %v5456_v4 }
 0x656   : > { %v5273_v55 = vmax.f32 %v5241_v12, 0.0  ;;  %v6261_v25 = vadd.f32 %v6229_v36, %v6164_v46  ;;  %v5650_v22 = vmul.f32 %v10636_v49, %v10560_v29  ;;  %v5778_v2 = vadd.f32 %v5746_v45, %v5681_v16 }
 0x657   : > { %v5775_v17 = vadd.f32 %v5743_v20, %v5678_v57  ;;  %v5347_v60 = vld [vmem:[#allocation4 + $0x62] sm:$0x1]  ;;  %v6162_v58 = vadd.f32 %v6130_v56, %v6065_v47  ;;  %v6133_v57 = vmul.f32 %v10612_v37, %v10697_v26  ;;  %v6034_v10 = vmul.f32 %v10624_v7, %v10594_v19 }
 0x658   : > { %5366 = vst.msk [vmem:[#allocation4 + $0x60] sm:$0x1] %vm5361_vm7, %v5347_v60  ;;  %8009 = vmatmul.msk.bf16.gmra.mxu2 %vm3040_vm4, %v10420_v41  ;;  %v6297_v11 = vsel %vm5299_vm6, %v6261_v25, 0.0  ;;  %v10713_v20 = vld [vmem:[#allocation4 + $0x52] sm:$0xff]  ;;  %v5747_v41 = vmul.f32 %v10667_v14, %v10573_v8  ;;  %v6131_v46 = vmul.f32 %v10612_v37, %v10564_v33  ;;  %v5682_v36 = vadd.f32 %v5650_v22, %v5585_v28 }
 0x659   : > { %v5872_v13 = vadd.f32 %v10642_v9, %v5775_v17  ;;  %5307 = vst.msk [vmem:[#allocation4 + $0x69] sm:$0xff] %vm5299_vm6, %v5273_v55  ;;  %6298 = vadd.xlane.f32.xlu1 %v6297_v11  ;;  %v6259_v35 = vadd.f32 %v6227_v62, %v6162_v58  ;;  %v6230_v4 = vmul.f32 %v10681_v43, %v10713_v20  ;;  %v10743_v62 = vld [vmem:[#allocation4 + $0x61] sm:$0xff] }
 0x65a   : > { %v6165_v44 = vadd.f32 %v6133_v57, %v6068_v6  ;;  %v5843_v9 = vmul.f32 %v10650_v1, %v10592_v40  ;;  %v6228_v19 = vmul.f32 %v10681_v43, %v10636_v49  ;;  %v5779_v25 = vadd.f32 %v5747_v41, %v5682_v36 }
 0x65b   : > { %v5969_v61 = vadd.f32 %v5937_v30, %v5872_v13  ;;  %v5174_v45 = vpop.f32.mrf.mxu2  ;;  %v6291_v12 = vsel %vm5299_vm6, %v6259_v35, 0.0  ;;  %v4775_v30 = vadd.f32 %v10562_v59, %v10606_v3  ;;  %v5940_v60 = vmul.f32 %v10674_v63, %v10601_v50 }
 0x65c   : > { %v5242_v47 = vadd.f32 %v5174_v45, %v10614_v52  ;;  %6292 = vadd.xlane.f32.xlu0 %v6291_v12  ;;  %v6262_v56 = vadd.f32 %v6230_v4, %v6165_v44  ;;  %v5875_v55 = vadd.f32 %v5843_v9, %v5778_v2  ;;  %v5457_v33 = vmul.f32 %v10656_v24, %v10545_v0  ;;  %v10739_v52 = vpop.f32.mrf.mxu0  ;;  %v11946_v2 = vld [vmem:[#allocation39_spill] sm:$0xff]  ;;  %v10763_v44 = vpop.f32.mrf.mxu1 }
 0x65d   : > { %v6066_v16 = vadd.f32 %v6034_v10, %v5969_v61  ;;  %v5844_v59 = vmul.f32 %v10697_v26, %v10592_v40  ;;  %v5941_v3 = vmul.f32 %v10713_v20, %v10601_v50  ;;  %v5554_v49 = vmul.f32 %v10650_v1, %v10550_v5  ;;  %v10769_v12 = vpop.f32.mrf.mxu3 }
 0x65e   : > { %v5274_v6 = vmax.f32 %v5242_v47, 0.0  ;;  %v6300_v24 = vsel %vm5299_vm6, %v6262_v56, 0.0  ;;  %v5972_v11 = vadd.f32 %v5940_v60, %v5875_v55  ;;  %v4542_v35 = vadd.f32 %v10587_v53, %v11946_v2 }
 0x65f   : > { %v6163_v17 = vadd.f32 %v6131_v46, %v6066_v16  ;;  %v10741_v58 = vld [vmem:[#allocation4 + $0x60] sm:$0xff]  ;;  %v5009_v1 = vadd.f32 %v10580_v39, %v4775_v30  ;;  %v5876_v41 = vadd.f32 %v5844_v59, %v5779_v25  ;;  %v6134_v10 = vmul.f32 %v10612_v37, %v10743_v62 }
 0x660   : > { %v5384_v28 = vld [vmem:[#allocation4 + $0x6f] sm:$0x1]  ;;  %5308 = vst.msk [vmem:[#allocation4 + $0x79] sm:$0xff] %vm5299_vm6, %v5274_v6  ;;  %v6037_v57 = vmul.f32 %v10624_v7, %v10741_v58  ;;  %v10761_v4 = vld [vmem:[#allocation4 + $0x62] sm:$0xff]  ;;  %v5586_v45 = vadd.f32 %v5554_v49, %v5457_v33  ;;  %v5651_v39 = vmul.f32 %v10674_v63, %v10560_v29  ;;  %v5748_v55 = vmul.f32 %v10741_v58, %v10573_v8 }
 0x661   : > { %v6260_v22 = vadd.f32 %v6228_v19, %v6163_v17  ;;  %v10755_v13 = vld [vmem:[#allocation4 + $0x68] sm:$0xff]  ;;  %5402 = vst.msk [vmem:[#allocation4 + $0x71] sm:$0x1] %vm5361_vm7, %v5384_v28  ;;  %6301 = vadd.xlane.f32.xlu1 %v6300_v24  ;;  %v5973_v36 = vadd.f32 %v5941_v3, %v5876_v41  ;;  %v6231_v16 = vmul.f32 %v10681_v43, %v10761_v4 }
 0x662   : > { %v6069_v61 = vadd.f32 %v6037_v57, %v5972_v11  ;;  %v6038_v9 = vmul.f32 %v10624_v7, %v10755_v13  ;;  %v4776_v30 = vadd.f32 %v10630_v31, %v4542_v35  ;;  %v10779_v19 = vld [vmem:[#allocation4 + $0x69] sm:$0xff]  ;;  %v5458_v25 = vmul.f32 %v10667_v14, %v10545_v0  ;;  %v11947_v49 = vld [vmem:[#allocation20_spill] sm:$0xff] }
 0x663   : > { %v5176_v53 = vpop.f32.mrf.mxu2  ;;  %v6294_v46 = vsel %vm5299_vm6, %v6260_v22, 0.0  ;;  %v5555_v6 = vmul.f32 %v10697_v26, %v10550_v5  ;;  %v5683_v33 = vadd.f32 %v5651_v39, %v5586_v45  ;;  %v5652_v3 = vmul.f32 %v10713_v20, %v10560_v29 }
 0x664   : > { %v5243_v47 = vadd.f32 %v5176_v53, %v5009_v1  ;;  %6295 = vadd.xlane.f32.xlu0 %v6294_v46  ;;  %v6166_v56 = vadd.f32 %v6134_v10, %v6069_v61  ;;  %v6070_v60 = vadd.f32 %v6038_v9, %v5973_v36  ;;  %v4543_v28 = vadd.f32 %v10654_v38, %v11947_v49  ;;  %v10797_v22 = vpop.f32.mrf.mxu0  ;;  %v10807_v41 = vpop.f32.mrf.mxu1 }
 0x665   : > { %v6135_v14 = vmul.f32 %v10612_v37, %v10779_v19  ;;  %v5780_v24 = vadd.f32 %v5748_v55, %v5683_v33  ;;  %v5587_v20 = vadd.f32 %v5555_v6, %v5458_v25  ;;  %v5010_v11 = vadd.f32 %v10646_v34, %v4776_v30  ;;  %v10810_v53 = vpop.f32.mrf.mxu3 }
 0x666   : > { %v5275_v63 = vmax.f32 %v5243_v47, 0.0  ;;  %v6263_v17 = vadd.f32 %v6231_v16, %v6166_v56  ;;  %v5845_v2 = vmul.f32 %v10743_v62, %v10592_v40  ;;  %v4777_v45 = vadd.f32 %v10693_v48, %v4543_v28 }
 0x667   : > { %v5348_v59 = vld [vmem:[#allocation4 + $0x7a] sm:$0x1]  ;;  %v6167_v57 = vadd.f32 %v6135_v14, %v6070_v60  ;;  %v5684_v1 = vadd.f32 %v5652_v3, %v5587_v20  ;;  %v5942_v34 = vmul.f32 %v10761_v4, %v10601_v50  ;;  %v5459_v39 = vmul.f32 %v10741_v58, %v10545_v0  ;;  %v11948_v3 = vld [vmem:[#allocation14_spill] sm:$0xff] }
 0x668   : > { %5367 = vst.msk [vmem:[#allocation4 + $0x78] sm:$0x1] %vm5361_vm7, %v5348_v59  ;;  %8010 = vmatmul.msk.bf16.gmra.mxu2 %vm3040_vm4, %v10436_v42  ;;  %v6303_v31 = vsel %vm5299_vm6, %v6263_v17, 0.0  ;;  %v10795_v26 = vld [vmem:[#allocation4 + $0x6a] sm:$0xff]  ;;  %v5749_v42 = vmul.f32 %v10755_v13, %v10573_v8  ;;  %v5877_v9 = vadd.f32 %v5845_v2, %v5780_v24  ;;  %v10818_v56 = vld [vmem:[#allocation4 + $0x79] sm:$0xff]  ;;  %v5846_v16 = vmul.f32 %v10779_v19, %v10592_v40 }
 0x669   : > { %5309 = vst.msk [vmem:[#allocation4 + $0x81] sm:$0xff] %vm5299_vm6, %v5275_v63  ;;  %6304 = vadd.xlane.f32.xlu2 %v6303_v31  ;;  %v6232_v38 = vmul.f32 %v10681_v43, %v10795_v26  ;;  %v5943_v48 = vmul.f32 %v10795_v26, %v10601_v50  ;;  %v5556_v63 = vmul.f32 %v10743_v62, %v10550_v5 }
 0x66a   : > { %v5781_v46 = vadd.f32 %v5749_v42, %v5684_v1  ;;  %v5974_v25 = vadd.f32 %v5942_v34, %v5877_v9  ;;  %v5011_v17 = vadd.f32 %v10705_v15, %v4777_v45  ;;  %v4544_v49 = vadd.f32 %v10716_v54, %v11948_v3  ;;  %v11949_v34 = vld [vmem:[#allocation66_spill] sm:$0xff] }
 0x66b   : > { %v5179_v35 = vpop.f32.mrf.mxu2  ;;  %v6264_v10 = vadd.f32 %v6232_v38, %v6167_v57  ;;  %v6136_v31 = vmul.f32 %v10612_v37, %v10818_v56  ;;  %v5588_v14 = vadd.f32 %v5556_v63, %v5459_v39  ;;  %v5653_v15 = vmul.f32 %v10761_v4, %v10560_v29 }
 0x66c   : > { %v5244_v61 = vadd.f32 %v5179_v35, %v5010_v11  ;;  %v5878_v33 = vadd.f32 %v5846_v16, %v5781_v46  ;;  %v10842_v62 = vpop.f32.mrf.mxu0  ;;  %v5460_v20 = vmul.f32 %v10755_v13, %v10545_v0  ;;  %v5557_v42 = vmul.f32 %v10779_v19, %v10550_v5 }
 0x66d   : > { %v6306_v30 = vsel %vm5299_vm6, %v6264_v10, 0.0  ;;  %v4778_v4 = vadd.f32 %v10739_v52, %v4544_v49  ;;  %v5685_v9 = vadd.f32 %v5653_v15, %v5588_v14  ;;  %v10859_v45 = vpop.f32.mrf.mxu3  ;;  %v4545_v39 = vadd.f32 %v10769_v12, %v11949_v34 }
 0x66e   : > { %v5276_v36 = vmax.f32 %v5244_v61, 0.0  ;;  %v5975_v38 = vadd.f32 %v5943_v48, %v5878_v33  ;;  %v10856_v61 = vpop.f32.mrf.mxu1 }
 0x66f   : > { %v10816_v47 = vld [vmem:[#allocation4 + $0x78] sm:$0xff]  ;;  %v4779_v49 = vadd.f32 %v10797_v22, %v4545_v39 }
 0x670   : > { %v5385_v55 = vld [vmem:[#allocation4 + $0x87] sm:$0x1]  ;;  %5310 = vst.msk [vmem:[#allocation4 + $0x91] sm:$0xff] %vm5299_vm6, %v5276_v36  ;;  %v6039_v6 = vmul.f32 %v10624_v7, %v10816_v47  ;;  %v10834_v60 = vld [vmem:[#allocation4 + $0x7a] sm:$0xff]  ;;  %v5750_v35 = vmul.f32 %v10816_v47, %v10573_v8  ;;  %v5654_v36 = vmul.f32 %v10795_v26, %v10560_v29 }
 0x671   : > { %v10828_v58 = vld [vmem:[#allocation4 + $0x80] sm:$0xff]  ;;  %5403 = vst.msk [vmem:[#allocation4 + $0x89] sm:$0x1] %vm5361_vm7, %v5385_v55  ;;  %6307 = vadd.xlane.f32.xlu2 %v6306_v30  ;;  %v6233_v57 = vmul.f32 %v10681_v43, %v10834_v60  ;;  %v5589_v55 = vadd.f32 %v5557_v42, %v5460_v20 }
 0x672   : > { %v6040_v59 = vmul.f32 %v10624_v7, %v10828_v58  ;;  %v6071_v28 = vadd.f32 %v6039_v6, %v5974_v25  ;;  %v10852_v2 = vld [vmem:[#allocation4 + $0x81] sm:$0xff]  ;;  %v5782_v48 = vadd.f32 %v5750_v35, %v5685_v9  ;;  %v5751_v12 = vmul.f32 %v10828_v58, %v10573_v8 }
 0x673   : > { %v5181_v24 = vpop.f32.mrf.mxu2  ;;  %v6137_v46 = vmul.f32 %v10612_v37, %v10852_v2  ;;  %v5012_v25 = vadd.f32 %v10763_v44, %v4778_v4  ;;  %v5944_v44 = vmul.f32 %v10834_v60, %v10601_v50  ;;  %v5848_v20 = vmul.f32 %v10852_v2, %v10592_v40 }
 0x674   : > { %v5245_v11 = vadd.f32 %v5181_v24, %v5011_v17  ;;  %v6168_v54 = vadd.f32 %v6136_v31, %v6071_v28  ;;  %v6072_v1 = vadd.f32 %v6040_v59, %v5975_v38  ;;  %v5686_v17 = vadd.f32 %v5654_v36, %v5589_v55  ;;  %v10881_v3 = vpop.f32.mrf.mxu0  ;;  %v5063_v36 = vld [vmem:[#allocation3 + $0x1a2] sm:$0xff] }
 0x675   : > { %v5461_v24 = vmul.f32 %v10816_v47, %v10545_v0  ;;  %v5558_v35 = vmul.f32 %v10818_v56, %v10550_v5  ;;  %v5013_v4 = vadd.f32 %v10807_v41, %v4779_v49  ;;  %v5655_v41 = vmul.f32 %v10834_v60, %v10560_v29 }
 0x676   : > { %v5277_v10 = vmax.f32 %v5245_v11, 0.0  ;;  %v6265_v13 = vadd.f32 %v6233_v57, %v6168_v54  ;;  %v6169_v30 = vadd.f32 %v6137_v46, %v6072_v1  ;;  %v5783_v31 = vadd.f32 %v5751_v12, %v5686_v17  ;;  %v10897_v42 = vpop.f32.mrf.mxu1  ;;  %v10906_v1 = vpop.f32.mrf.mxu3  ;;  %v5062_v12 = vld [vmem:[#allocation3 + $0x19a] sm:$0xff] }
 0x677   : > { %v5349_v19 = vld [vmem:[#allocation4 + $0x92] sm:$0x1]  ;;  %v5590_v39 = vadd.f32 %v5558_v35, %v5461_v24  ;;  %v5462_v55 = vmul.f32 %v10828_v58, %v10545_v0 }
 0x678   : > { %5368 = vst.msk [vmem:[#allocation4 + $0x90] sm:$0x1] %vm5361_vm7, %v5349_v19  ;;  %8011 = vmatmul.msk.bf16.gmra.mxu2 %vm3040_vm4, %v10452_v27  ;;  %v6309_v52 = vsel %vm5299_vm6, %v6265_v13, 0.0  ;;  %v10871_v16 = vld [vmem:[#allocation4 + $0x82] sm:$0xff]  ;;  %v5847_v27 = vmul.f32 %v10818_v56, %v10592_v40  ;;  %v10891_v15 = vld [vmem:[#allocation4 + $0x91] sm:$0xff]  ;;  %v5880_v13 = vadd.f32 %v5848_v20, %v5783_v31  ;;  %v11950_v19 = vld [vmem:[#allocation15_spill] sm:$0xff] }
 0x679   : > { %5311 = vst.msk [vmem:[#allocation4 + $0x99] sm:$0xff] %vm5299_vm6, %v5277_v10  ;;  %6310 = vadd.xlane.f32.xlu0 %v6309_v52  ;;  %v6234_v26 = vmul.f32 %v10681_v43, %v10871_v16  ;;  %v5945_v22 = vmul.f32 %v10871_v16, %v10601_v50  ;;  %v4546_v46 = vadd.f32 %v10810_v53, %v11950_v19 }
 0x67a   : > { %v5879_v59 = vadd.f32 %v5847_v27, %v5782_v48  ;;  %v6138_v56 = vmul.f32 %v10612_v37, %v10891_v15  ;;  %v5656_v31 = vmul.f32 %v10871_v16, %v10560_v29  ;;  %v5849_v35 = vmul.f32 %v10891_v15, %v10592_v40 }
 0x67b   : > { %v5184_v6 = vpop.f32.mrf.mxu2  ;;  %v6266_v63 = vadd.f32 %v6234_v26, %v6169_v30  ;;  %v5977_v48 = vadd.f32 %v5945_v22, %v5880_v13  ;;  %v5559_v30 = vmul.f32 %v10852_v2, %v10550_v5  ;;  %v4780_v60 = vadd.f32 %v10842_v62, %v4546_v46 }
 0x67c   : > { %v5246_v33 = vadd.f32 %v5184_v6, %v5012_v25  ;;  %v5976_v54 = vadd.f32 %v5944_v44, %v5879_v59  ;;  %v5687_v59 = vadd.f32 %v5655_v41, %v5590_v39  ;;  %v10931_v49 = vpop.f32.mrf.mxu0 }
 0x67d   : > { %v6312_v28 = vsel %vm5299_vm6, %v6266_v63, 0.0  ;;  %v5079_v63 = vpack.c.bf16 %v5063_v36, %v5062_v12  ;;  %v5591_v22 = vadd.f32 %v5559_v30, %v5462_v55 }
 0x67e   : > { %v5278_v14 = vmax.f32 %v5246_v33, 0.0  ;;  %6313 = vadd.xlane.f32.xlu1 %v6312_v28 }
 0x67f   : > { %v10889_v38 = vld [vmem:[#allocation4 + $0x90] sm:$0xff]  ;;  %v5688_v19 = vadd.f32 %v5656_v31, %v5591_v22 }
 0x680   : > { %v5386_v11 = vld [vmem:[#allocation4 + $0x9f] sm:$0x1]  ;;  %5312 = vst.msk [vmem:[#allocation4 + $0xa9] sm:$0xff] %vm5299_vm6, %v5278_v14  ;;  %v6041_v57 = vmul.f32 %v10624_v7, %v10889_v38  ;;  %v10910_v10 = vld [vmem:[#allocation4 + $0x92] sm:$0xff]  ;;  %v5752_v6 = vmul.f32 %v10889_v38, %v10573_v8  ;;  %v11951_v14 = vld [vmem:[#allocation24_spill] sm:$0xff] }
 0x681   : > { %v10902_v47 = vld [vmem:[#allocation4 + $0x98] sm:$0xff]  ;;  %5404 = vst.msk [vmem:[#allocation4 + $0xa1] sm:$0x1] %vm5361_vm7, %v5386_v11  ;;  %v6235_v25 = vmul.f32 %v10681_v43, %v10910_v10  ;;  %v4547_v44 = vadd.f32 %v10859_v45, %v11951_v14 }
 0x682   : > { %v6042_v9 = vmul.f32 %v10624_v7, %v10902_v47  ;;  %v6073_v34 = vadd.f32 %v6041_v57, %v5976_v54  ;;  %v10926_v27 = vld [vmem:[#allocation4 + $0x99] sm:$0xff]  ;;  %v5784_v20 = vadd.f32 %v5752_v6, %v5687_v59  ;;  %v5753_v45 = vmul.f32 %v10902_v47, %v10573_v8  ;;  %v10949_v54 = vpop.f32.mrf.mxu1 }
 0x683   : > { %v5186_v52 = vpop.f32.mrf.mxu2  ;;  %v6139_v28 = vmul.f32 %v10612_v37, %v10926_v27  ;;  %v5014_v57 = vadd.f32 %v10856_v61, %v4780_v60  ;;  %v5463_v61 = vmul.f32 %v10889_v38, %v10545_v0  ;;  %v5850_v30 = vmul.f32 %v10926_v27, %v10592_v40 }
 0x684   : > { %v5247_v26 = vadd.f32 %v5186_v52, %v5013_v4  ;;  %v6170_v53 = vadd.f32 %v6138_v56, %v6073_v34  ;;  %v6074_v17 = vadd.f32 %v6042_v9, %v5977_v48  ;;  %v4494_v4 = vpop.f32.mrf.mxu3  ;;  %v5881_v36 = vadd.f32 %v5849_v35, %v5784_v20  ;;  %v4728_v6 = vpop.f32.mrf.mxu0 }
 0x685   : > { %v4781_v34 = vadd.f32 %v10881_v3, %v4547_v44  ;;  %v5785_v39 = vadd.f32 %v5753_v45, %v5688_v19  ;;  %v5946_v48 = vmul.f32 %v10910_v10, %v10601_v50  ;;  %v5560_v38 = vmul.f32 %v10891_v15, %v10550_v5 }
 0x686   : > { %v5279_v33 = vmax.f32 %v5247_v26, 0.0  ;;  %v6267_v58 = vadd.f32 %v6235_v25, %v6170_v53  ;;  %v6171_v11 = vadd.f32 %v6139_v28, %v6074_v17  ;;  %v5657_v44 = vmul.f32 %v10910_v10, %v10560_v29 }
 0x687   : > { %v5350_v2 = vld [vmem:[#allocation4 + $0xaa] sm:$0x1]  ;;  %v5978_v12 = vadd.f32 %v5946_v48, %v5881_v36  ;;  %v5882_v60 = vadd.f32 %v5850_v30, %v5785_v39  ;;  %v5592_v31 = vadd.f32 %v5560_v38, %v5463_v61  ;;  %v4549_v36 = vadd.f32 %v4494_v4, %v10409_v32 }
 0x688   : > { %5369 = vst.msk [vmem:[#allocation4 + $0xa8] sm:$0x1] %vm5361_vm7, %v5350_v2  ;;  %8012 = vmatmul.msk.bf16.gmra.mxu2 %vm3040_vm4, %v5079_v63  ;;  %v6315_v62 = vsel %vm5299_vm6, %v6267_v58, 0.0  ;;  %v10942_v24 = vld [vmem:[#allocation4 + $0x9a] sm:$0xff]  ;;  %v10962_v55 = vld [vmem:[#allocation4 + $0xa9] sm:$0xff]  ;;  %v5015_v63 = vadd.f32 %v10897_v42, %v4781_v34  ;;  %v5464_v42 = vmul.f32 %v10902_v47, %v10545_v0  ;;  %vm7215_vm4 = vcmask 851712  }
 0x689   : > { %5313 = vst.msk [vmem:[#allocation4 + $0xb1] sm:$0xff] %vm5299_vm6, %v5279_v33  ;;  %6316 = vadd.xlane.f32.xlu2 %v6315_v62  ;;  %v6236_v16 = vmul.f32 %v10681_v43, %v10942_v24  ;;  %v5947_v3 = vmul.f32 %v10942_v24, %v10601_v50  ;;  %v11952_v58 = vld [vmem:[#allocation16_spill] sm:$0xff]  ;;  %v6140_v28 = vmul.f32 %v10612_v37, %v10962_v55 }
 0x68a   : > { %v4548_v59 = vadd.f32 %v10906_v1, %v11952_v58  ;;  %v5561_v62 = vmul.f32 %v10926_v27, %v10550_v5  ;;  %v4962_v20 = vpop.f32.mrf.mxu1  ;;  %v5689_v47 = vadd.f32 %v5657_v44, %v5592_v31  ;;  %v5851_v32 = vmul.f32 %v10962_v55, %v10592_v40 }
 0x68b   : > { %v5189_v13 = vpop.f32.mrf.mxu2  ;;  %v6268_v9 = vadd.f32 %v6236_v16, %v6171_v11  ;;  %v5979_v14 = vadd.f32 %v5947_v3, %v5882_v60  ;;  %v4783_v38 = vadd.f32 %v4728_v6, %v4549_v36 }
 0x68c   : > { %v5248_v46 = vadd.f32 %v5189_v13, %v5014_v57  ;;  %v4497_v57 = vpop.f32.mrf.mxu3  ;;  %v4782_v10 = vadd.f32 %v10931_v49, %v4548_v59  ;;  %v4731_v4 = vpop.f32.mrf.mxu0 }
 0x68d   : > { %v6318_v56 = vsel %vm5299_vm6, %v6268_v9, 0.0 }
 0x68e   : > { %v5280_v52 = vmax.f32 %v5248_v46, 0.0  ;;  %6319 = vadd.xlane.f32.xlu0 %v6318_v56  ;;  %v5658_v46 = vmul.f32 %v10942_v24, %v10560_v29  ;;  %v5016_v24 = vadd.f32 %v10949_v54, %v4782_v10 }
 0x68f   : > { %v10960_v41 = vld [vmem:[#allocation4 + $0xa8] sm:$0xff] }
 0x690   : > { %v5387_v26 = vld [vmem:[#allocation4 + $0xb7] sm:$0x1]  ;;  %5314 = vst.msk [vmem:[#allocation4 + $0xc1] sm:$0xff] %vm5299_vm6, %v5280_v52  ;;  %v6043_v53 = vmul.f32 %v10624_v7, %v10960_v41  ;;  %v10977_v17 = vld [vmem:[#allocation4 + $0xaa] sm:$0xff]  ;;  %v5754_v45 = vmul.f32 %v10960_v41, %v10573_v8  ;;  %v5593_v52 = vadd.f32 %v5561_v62, %v5464_v42  ;;  %v5465_v54 = vmul.f32 %v10960_v41, %v10545_v0 }
 0x691   : > { %v10971_v25 = vld [vmem:[#allocation4 + $0xb0] sm:$0xff]  ;;  %5405 = vst.msk [vmem:[#allocation4 + $0xb9] sm:$0x1] %vm5361_vm7, %v5387_v26  ;;  %v6237_v1 = vmul.f32 %v10681_v43, %v10977_v17  ;;  %v5948_v59 = vmul.f32 %v10977_v17, %v10601_v50  ;;  %v5562_v41 = vmul.f32 %v10962_v55, %v10550_v5  ;;  %v5659_v55 = vmul.f32 %v10977_v17, %v10560_v29 }
 0x692   : > { %v6044_v33 = vmul.f32 %v10624_v7, %v10971_v25  ;;  %v6075_v2 = vadd.f32 %v6043_v53, %v5978_v12  ;;  %v6108_v16 = vld [vmem:[#allocation4 + $0xb1] sm:$0xff]  ;;  %v5786_v39 = vadd.f32 %v5754_v45, %v5689_v47  ;;  %v5755_v61 = vmul.f32 %v10971_v25, %v10573_v8 }
 0x693   : > { %v5191_v15 = vpop.f32.mrf.mxu2  ;;  %v6141_v27 = vmul.f32 %v10612_v37, %v6108_v16  ;;  %v5690_v26 = vadd.f32 %v5658_v46, %v5593_v52  ;;  %v5594_v47 = vadd.f32 %v5562_v41, %v5465_v54  ;;  %v5563_v46 = vmul.f32 %v6108_v16, %v10550_v5 }
 0x694   : > { %v5249_v22 = vadd.f32 %v5191_v15, %v5015_v63  ;;  %v6172_v11 = vadd.f32 %v6140_v28, %v6075_v2  ;;  %v6076_v35 = vadd.f32 %v6044_v33, %v5979_v14  ;;  %v5883_v53 = vadd.f32 %v5851_v32, %v5786_v39  ;;  %v4965_v33 = vpop.f32.mrf.mxu1  ;;  %v4499_v2 = vpop.f32.mrf.mxu3 }
 0x695   : > { %v5787_v60 = vadd.f32 %v5755_v61, %v5690_v26  ;;  %v5852_v15 = vmul.f32 %v6108_v16, %v10592_v40  ;;  %v5691_v32 = vadd.f32 %v5659_v55, %v5594_v47  ;;  %v4551_v26 = vadd.f32 %v4499_v2, %v10425_v18 }
 0x696   : > { %v5281_v13 = vmax.f32 %v5249_v22, 0.0  ;;  %v6269_v9 = vadd.f32 %v6237_v1, %v6172_v11  ;;  %v6173_v49 = vadd.f32 %v6141_v27, %v6076_v35  ;;  %v5980_v44 = vadd.f32 %v5948_v59, %v5883_v53  ;;  %v11953_v35 = vld [vmem:[#allocation27_spill] sm:$0xff] }
 0x697   : > { %v5351_v19 = vld [vmem:[#allocation4 + $0xc2] sm:$0x1]  ;;  %v5017_v22 = vadd.f32 %v4962_v20, %v4783_v38  ;;  %v5884_v1 = vadd.f32 %v5852_v15, %v5787_v60  ;;  %v4550_v10 = vadd.f32 %v4497_v57, %v11953_v35  ;;  %v5466_v20 = vmul.f32 %v10971_v25, %v10545_v0 }
 0x698   : > { %5370 = vst.msk [vmem:[#allocation4 + $0xc0] sm:$0x1] %vm5361_vm7, %v5351_v19  ;;  %v6321_v34 = vsel %vm5299_vm6, %v6269_v9, 0.0  ;;  %v6205_v56 = vld [vmem:[#allocation4 + $0xb2] sm:$0xff]  ;;  %v11016_v31 = vld [vmem:[#allocation4 + $0xc1] sm:$0xff] }
 0x699   : > { %5315 = vst.msk [vmem:[#allocation4 + $0xc9] sm:$0xff] %vm5299_vm6, %v5281_v13  ;;  %6322 = vadd.xlane.f32.xlu1 %v6321_v34  ;;  %v6238_v48 = vmul.f32 %v10681_v43, %v6205_v56  ;;  %v5949_v6 = vmul.f32 %v6205_v56, %v10601_v50  ;;  %v6142_v9 = vmul.f32 %v10612_v37, %v11016_v31 }
 0x69a   : > { %v4784_v61 = vadd.f32 %v4731_v4, %v4550_v10  ;;  %v5660_v16 = vmul.f32 %v6205_v56, %v10560_v29  ;;  %v5853_v18 = vmul.f32 %v11016_v31, %v10592_v40 }
 0x69b   : > { %v5194_v30 = vpop.f32.mrf.mxu2  ;;  %v6270_v3 = vadd.f32 %v6238_v48, %v6173_v49  ;;  %v5981_v27 = vadd.f32 %v5949_v6, %v5884_v1  ;;  %v4733_v49 = vpop.f32.mrf.mxu0 }
 0x69c   : > { %v5250_v12 = vadd.f32 %v5194_v30, %v5016_v24  ;;  %v4502_v4 = vpop.f32.mrf.mxu3  ;;  %v5018_v59 = vadd.f32 %v4965_v33, %v4784_v61 }
 0x69d   : > { %v6324_v63 = vsel %vm5299_vm6, %v6270_v3, 0.0  ;;  %v4967_v3 = vpop.f32.mrf.mxu1 }
 0x69e   : > { %v5282_v58 = vmax.f32 %v5250_v12, 0.0  ;;  %6325 = vadd.xlane.f32.xlu2 %v6324_v63  ;;  %v5595_v63 = vadd.f32 %v5563_v46, %v5466_v20 }
 0x69f   : > { %v11014_v28 = vld [vmem:[#allocation4 + $0xc0] sm:$0xff] }
 0x6a0   : > { %v5388_v14 = vld [vmem:[#allocation4 + $0xcf] sm:$0x1]  ;;  %5316 = vst.msk [vmem:[#allocation4 + $0xd9] sm:$0xff] %vm5299_vm6, %v5282_v58  ;;  %v6045_v42 = vmul.f32 %v10624_v7, %v11014_v28  ;;  %v11028_v11 = vld [vmem:[#allocation4 + $0xc2] sm:$0xff]  ;;  %v5756_v52 = vmul.f32 %v11014_v28, %v10573_v8  ;;  %v5692_v15 = vadd.f32 %v5660_v16, %v5595_v63  ;;  %v5467_v33 = vmul.f32 %v11014_v28, %v10545_v0 }
 0x6a1   : > { %v11023_v62 = vld [vmem:[#allocation4 + $0xc8] sm:$0xff]  ;;  %5406 = vst.msk [vmem:[#allocation4 + $0xd1] sm:$0x1] %vm5361_vm7, %v5388_v14  ;;  %v6239_v57 = vmul.f32 %v10681_v43, %v11028_v11  ;;  %v5950_v1 = vmul.f32 %v11028_v11, %v10601_v50  ;;  %v5564_v28 = vmul.f32 %v11016_v31, %v10550_v5 }
 0x6a2   : > { %v6046_v45 = vmul.f32 %v10624_v7, %v11023_v62  ;;  %v6077_v13 = vadd.f32 %v6045_v42, %v5980_v44  ;;  %v11042_v39 = vld [vmem:[#allocation4 + $0xc9] sm:$0xff]  ;;  %v5788_v38 = vadd.f32 %v5756_v52, %v5691_v32  ;;  %v5757_v56 = vmul.f32 %v11023_v62, %v10573_v8 }
 0x6a3   : > { %v5196_v19 = vpop.f32.mrf.mxu2  ;;  %v6143_v25 = vmul.f32 %v10612_v37, %v11042_v39  ;;  %v4785_v44 = vadd.f32 %v4733_v49, %v4551_v26  ;;  %v4552_v52 = vadd.f32 %v4502_v4, %v10432_v51  ;;  %v5596_v61 = vadd.f32 %v5564_v28, %v5467_v33 }
 0x6a4   : > { %v5251_v36 = vadd.f32 %v5196_v19, %v5017_v22  ;;  %v6174_v34 = vadd.f32 %v6142_v9, %v6077_v13  ;;  %v6078_v48 = vadd.f32 %v6046_v45, %v5981_v27  ;;  %v5885_v14 = vadd.f32 %v5853_v18, %v5788_v38  ;;  %v4736_v45 = vpop.f32.mrf.mxu0 }
 0x6a5   : > { %v5789_v41 = vadd.f32 %v5757_v56, %v5692_v15  ;;  %v5854_v13 = vmul.f32 %v11042_v39, %v10592_v40  ;;  %v5019_v20 = vadd.f32 %v4967_v3, %v4785_v44  ;;  %v5661_v32 = vmul.f32 %v11028_v11, %v10560_v29 }
 0x6a6   : > { %v5283_v24 = vmax.f32 %v5251_v36, 0.0  ;;  %v6271_v17 = vadd.f32 %v6239_v57, %v6174_v34  ;;  %v6175_v60 = vadd.f32 %v6143_v25, %v6078_v48  ;;  %v5982_v19 = vadd.f32 %v5950_v1, %v5885_v14  ;;  %v4970_v57 = vpop.f32.mrf.mxu1 }
 0x6a7   : > { %v5352_v30 = vld [vmem:[#allocation4 + $0xda] sm:$0x1]  ;;  %v5886_v36 = vadd.f32 %v5854_v13, %v5789_v41  ;;  %v5565_v25 = vmul.f32 %v11042_v39, %v10550_v5  ;;  %v4786_v63 = vadd.f32 %v4736_v45, %v4552_v52 }
 0x6a8   : > { %5371 = vst.msk [vmem:[#allocation4 + $0xd8] sm:$0x1] %vm5361_vm7, %v5352_v30  ;;  %v6327_v12 = vsel %vm5299_vm6, %v6271_v17, 0.0  ;;  %v6207_v53 = vld [vmem:[#allocation4 + $0xca] sm:$0xff]  ;;  %v11065_v10 = vld [vmem:[#allocation4 + $0xd9] sm:$0xff]  ;;  %v5468_v30 = vmul.f32 %v11023_v62, %v10545_v0 }
 0x6a9   : > { %5317 = vst.msk [vmem:[#allocation4 + $0xe1] sm:$0xff] %vm5299_vm6, %v5283_v24  ;;  %6328 = vadd.xlane.f32.xlu0 %v6327_v12  ;;  %v6240_v58 = vmul.f32 %v10681_v43, %v6207_v53  ;;  %v5951_v9 = vmul.f32 %v6207_v53, %v10601_v50  ;;  %v6144_v48 = vmul.f32 %v10612_v37, %v11065_v10  ;;  %v4504_v24 = vpop.f32.mrf.mxu3 }
 0x6aa   : > { %v5662_v39 = vmul.f32 %v6207_v53, %v10560_v29  ;;  %v4553_v56 = vadd.f32 %v4504_v24, %v10441_v23  ;;  %v5020_v23 = vadd.f32 %v4970_v57, %v4786_v63  ;;  %v5855_v44 = vmul.f32 %v11065_v10, %v10592_v40 }
 0x6ab   : > { %v5199_v54 = vpop.f32.mrf.mxu2  ;;  %v6272_v2 = vadd.f32 %v6240_v58, %v6175_v60  ;;  %v5983_v31 = vadd.f32 %v5951_v9, %v5886_v36  ;;  %v5693_v60 = vadd.f32 %v5661_v32, %v5596_v61 }
 0x6ac   : > { %v5252_v6 = vadd.f32 %v5199_v54, %v5018_v59  ;;  %v4738_v15 = vpop.f32.mrf.mxu0 }
 0x6ad   : > { %v6330_v42 = vsel %vm5299_vm6, %v6272_v2, 0.0  ;;  %v5597_v2 = vadd.f32 %v5565_v25, %v5468_v30  ;;  %v4787_v13 = vadd.f32 %v4738_v15, %v4553_v56 }
 0x6ae   : > { %v5284_v22 = vmax.f32 %v5252_v6, 0.0  ;;  %6331 = vadd.xlane.f32.xlu1 %v6330_v42  ;;  %v4972_v45 = vpop.f32.mrf.mxu1 }
 0x6af   : > { %v11063_v35 = vld [vmem:[#allocation4 + $0xd8] sm:$0xff] }
 0x6b0   : > { %v5389_v47 = vld [vmem:[#allocation4 + $0xe7] sm:$0x1]  ;;  %5318 = vst.msk [vmem:[#allocation4 + $0xf1] sm:$0xff] %vm5299_vm6, %v5284_v22  ;;  %v6047_v27 = vmul.f32 %v10624_v7, %v11063_v35  ;;  %v11078_v46 = vld [vmem:[#allocation4 + $0xda] sm:$0xff]  ;;  %v5758_v12 = vmul.f32 %v11063_v35, %v10573_v8  ;;  %v5694_v22 = vadd.f32 %v5662_v39, %v5597_v2 }
 0x6b1   : > { %v11073_v55 = vld [vmem:[#allocation4 + $0xe0] sm:$0xff]  ;;  %5407 = vst.msk [vmem:[#allocation4 + $0xe9] sm:$0x1] %vm5361_vm7, %v5389_v47  ;;  %v6241_v51 = vmul.f32 %v10681_v43, %v11078_v46  ;;  %v4507_v9 = vpop.f32.mrf.mxu3  ;;  %v5952_v28 = vmul.f32 %v11078_v46, %v10601_v50 }
 0x6b2   : > { %v6048_v34 = vmul.f32 %v10624_v7, %v11073_v55  ;;  %v6079_v49 = vadd.f32 %v6047_v27, %v5982_v19  ;;  %v11093_v26 = vld [vmem:[#allocation4 + $0xe1] sm:$0xff]  ;;  %v5790_v54 = vadd.f32 %v5758_v12, %v5693_v60  ;;  %v5759_v53 = vmul.f32 %v11073_v55, %v10573_v8 }
 0x6b3   : > { %v5201_v17 = vpop.f32.mrf.mxu2  ;;  %v6145_v62 = vmul.f32 %v10612_v37, %v11093_v26  ;;  %v5856_v57 = vmul.f32 %v11093_v26, %v10592_v40  ;;  %v4554_v25 = vadd.f32 %v4507_v9, %v10448_v21 }
 0x6b4   : > { %v5253_v16 = vadd.f32 %v5201_v17, %v5019_v20  ;;  %v6176_v3 = vadd.f32 %v6144_v48, %v6079_v49  ;;  %v6080_v38 = vadd.f32 %v6048_v34, %v5983_v31  ;;  %v5887_v33 = vadd.f32 %v5855_v44, %v5790_v54  ;;  %v4741_v12 = vpop.f32.mrf.mxu0 }
 0x6b5   : > { %v5791_v19 = vadd.f32 %v5759_v53, %v5694_v22  ;;  %v5469_v20 = vmul.f32 %v11063_v35, %v10545_v0  ;;  %v5566_v35 = vmul.f32 %v11065_v10, %v10550_v5  ;;  %v5021_v17 = vadd.f32 %v4972_v45, %v4787_v13 }
 0x6b6   : > { %v5285_v4 = vmax.f32 %v5253_v16, 0.0  ;;  %v6273_v11 = vadd.f32 %v6241_v51, %v6176_v3  ;;  %v6177_v6 = vadd.f32 %v6145_v62, %v6080_v38  ;;  %v5984_v48 = vadd.f32 %v5952_v28, %v5887_v33  ;;  %v4975_v2 = vpop.f32.mrf.mxu1 }
 0x6b7   : > { %v5353_v58 = vld [vmem:[#allocation4 + $0xf2] sm:$0x1]  ;;  %v5888_v32 = vadd.f32 %v5856_v57, %v5791_v19  ;;  %v5598_v51 = vadd.f32 %v5566_v35, %v5469_v20  ;;  %v5663_v10 = vmul.f32 %v11078_v46, %v10560_v29  ;;  %v4788_v39 = vadd.f32 %v4741_v12, %v4554_v25 }
 0x6b8   : > { %5372 = vst.msk [vmem:[#allocation4 + $0xf0] sm:$0x1] %vm5361_vm7, %v5353_v58  ;;  %v6333_v59 = vsel %vm5299_vm6, %v6273_v11, 0.0  ;;  %v11103_v18 = vld [vmem:[#allocation4 + $0xe2] sm:$0xff]  ;;  %v11119_v34 = vld [vmem:[#allocation4 + $0xf1] sm:$0xff]  ;;  %v5567_v22 = vmul.f32 %v11093_v26, %v10550_v5 }
 0x6b9   : > { %5319 = vst.msk [vmem:[#allocation4 + $0xf9] sm:$0xff] %vm5299_vm6, %v5285_v4  ;;  %6334 = vadd.xlane.f32.xlu2 %v6333_v59  ;;  %v6242_v14 = vmul.f32 %v10681_v43, %v11103_v18  ;;  %v5953_v52 = vmul.f32 %v11103_v18, %v10601_v50  ;;  %v6146_v3 = vmul.f32 %v10612_v37, %v11119_v34  ;;  %v4509_v15 = vpop.f32.mrf.mxu3 }
 0x6ba   : > { %v5695_v54 = vadd.f32 %v5663_v10, %v5598_v51  ;;  %v5022_v45 = vadd.f32 %v4975_v2, %v4788_v39 }
 0x6bb   : > { %v5204_v42 = vpop.f32.mrf.mxu2  ;;  %v6274_v41 = vadd.f32 %v6242_v14, %v6177_v6  ;;  %v5985_v63 = vadd.f32 %v5953_v52, %v5888_v32 }
 0x6bc   : > { %v5254_v1 = vadd.f32 %v5204_v42, %v5020_v23  ;;  %v5470_v23 = vmul.f32 %v11073_v55, %v10545_v0  ;;  %v11160_v42 = vld [vmem:[%s11681_s7 + $0x8] ss:$0 sm:$0xff]  ;;  %v5857_v55 = vmul.f32 %v11119_v34, %v10592_v40  ;;  %v4743_v28 = vpop.f32.mrf.mxu0 }
 0x6bd   : > { %v6336_v47 = vsel %vm5299_vm6, %v6274_v41, 0.0 }
 0x6be   : > { %v5286_v27 = vmax.f32 %v5254_v1, 0.0  ;;  %6337 = vadd.xlane.f32.xlu0 %v6336_v47  ;;  %v11954_v1 = vld [vmem:[#allocation36_spill] sm:$0xff]  ;;  %v5664_v47 = vmul.f32 %v11103_v18, %v10560_v29  ;;  %v5599_v57 = vadd.f32 %v5567_v22, %v5470_v23  ;;  %v4977_v51 = vpop.f32.mrf.mxu1 }
 0x6bf   : > { %v11117_v36 = vld [vmem:[#allocation4 + $0xf0] sm:$0xff]  ;;  %v4555_v33 = vadd.f32 %v4509_v15, %v11954_v1 }
 0x6c0   : > { %v5390_v49 = vld [vmem:[#allocation4 + $0xff] sm:$0x1]  ;;  %5320 = vst.msk [vmem:[#allocation4 + $0x109] sm:$0xff] %vm5299_vm6, %v5286_v27  ;;  %v6049_v61 = vmul.f32 %v10624_v7, %v11117_v36  ;;  %v11133_v31 = vld [vmem:[#allocation4 + $0xf2] sm:$0xff]  ;;  %v5760_v21 = vmul.f32 %v11117_v36, %v10573_v8  ;;  %v5696_v32 = vadd.f32 %v5664_v47, %v5599_v57 }
 0x6c1   : > { %v11128_v24 = vld [vmem:[#allocation4 + $0xf8] sm:$0xff]  ;;  %5408 = vst.msk [vmem:[#allocation4 + $0x101] sm:$0x1] %vm5361_vm7, %v5390_v49  ;;  %v6243_v60 = vmul.f32 %v10681_v43, %v11133_v31  ;;  %v4789_v52 = vadd.f32 %v4743_v28, %v4555_v33  ;;  %v4512_v12 = vpop.f32.mrf.mxu3 }
 0x6c2   : > { %v6050_v30 = vmul.f32 %v10624_v7, %v11128_v24  ;;  %v6081_v16 = vadd.f32 %v6049_v61, %v5984_v48  ;;  %v11144_v58 = vld [vmem:[#allocation4 + $0xf9] sm:$0xff]  ;;  %v5792_v53 = vadd.f32 %v5760_v21, %v5695_v54  ;;  %v5761_v26 = vmul.f32 %v11128_v24, %v10573_v8  ;;  %v11174_v48 = vld [vmem:[#allocation5] ss:$0 sm:$0xff] }
 0x6c3   : > { %v5206_v38 = vpop.f32.mrf.mxu2  ;;  %v6147_v46 = vmul.f32 %v10612_v37, %v11144_v58  ;;  %v5954_v61 = vmul.f32 %v11133_v31, %v10601_v50  ;;  %v5023_v10 = vadd.f32 %v4977_v51, %v4789_v52 }
 0x6c4   : > { %v5255_v4 = vadd.f32 %v5206_v38, %v5021_v17  ;;  %v6178_v11 = vadd.f32 %v6146_v3, %v6081_v16  ;;  %v6082_v62 = vadd.f32 %v6050_v30, %v5985_v63  ;;  %v5889_v27 = vadd.f32 %v5857_v55, %v5792_v53  ;;  %v4746_v23 = vpop.f32.mrf.mxu0 }
 0x6c5   : > { %v5793_v63 = vadd.f32 %v5761_v26, %v5696_v32 }
 0x6c6   : > { %v5287_v56 = vmax.f32 %v5255_v4, 0.0  ;;  %v6275_v59 = vadd.f32 %v6243_v60, %v6178_v11  ;;  %v6179_v44 = vadd.f32 %v6147_v46, %v6082_v62  ;;  %v5986_v16 = vadd.f32 %v5954_v61, %v5889_v27  ;;  %v4980_v27 = vpop.f32.mrf.mxu1 }
 0x6c7   : > { %v5354_v6 = vld [vmem:[#allocation4 + $0x10a] sm:$0x1]  ;;  %v5858_v62 = vmul.f32 %v11144_v58, %v10592_v40 }
 0x6c8   : > { %5373 = vst.msk [vmem:[#allocation4 + $0x108] sm:$0x1] %vm5361_vm7, %v5354_v6  ;;  %v6339_v43 = vsel %vm5299_vm6, %v6275_v59, 0.0  ;;  %v11152_v14 = vld [vmem:[#allocation4 + $0xfa] sm:$0xff]  ;;  %v11180_v18 = vld [vmem:[#allocation4 + $0x109] sm:$0xff] }
 0x6c9   : > { %5321 = vst.msk [vmem:[#allocation4 + $0x111] sm:$0xff] %vm5299_vm6, %v5287_v56  ;;  %6340 = vadd.xlane.f32.xlu1 %v6339_v43  ;;  %v6244_v41 = vmul.f32 %v11160_v42, %v11152_v14  ;;  %v6148_v11 = vmul.f32 %v10612_v37, %v11180_v18  ;;  %v5955_v39 = vmul.f32 %v11152_v14, %v10601_v50  ;;  %v11955_v56 = vld [vmem:[#allocation17_spill] sm:$0xff] }
 0x6ca   : > { %v4556_v59 = vadd.f32 %v4512_v12, %v11955_v56  ;;  %v5890_v6 = vadd.f32 %v5858_v62, %v5793_v63  ;;  %v11956_v56 = vld [vmem:[#allocation61_spill] sm:$0xff] }
 0x6cb   : > { %v5209_v13 = vpop.f32.mrf.mxu2  ;;  %v6276_v9 = vadd.f32 %v6244_v41, %v6179_v44 }
 0x6cc   : > { %v5256_v19 = vadd.f32 %v5209_v13, %v5022_v45  ;;  %v5987_v22 = vadd.f32 %v5955_v39, %v5890_v6  ;;  %v4790_v33 = vadd.f32 %v4746_v23, %v4556_v59 }
 0x6cd   : > { %v6342_v20 = vsel %vm5299_vm6, %v6276_v9, 0.0 }
 0x6ce   : > { %v5288_v49 = vmax.f32 %v5256_v19, 0.0  ;;  %6343 = vadd.xlane.f32.xlu2 %v6342_v20  ;;  %v5024_v57 = vadd.f32 %v4980_v27, %v4790_v33 }
 0x6cf   : > { %v6293_v35 = vpop.xlane.xlu0 %6292  ;;  %v11178_v17 = vld [vmem:[#allocation4 + $0x108] sm:$0xff] }
 0x6d0   : > { %v5391_v30 = vld [vmem:[#allocation4 + $0x117] sm:$0x1]  ;;  %5322 = vst.msk [vmem:[#allocation4 + $0x121] sm:$0xff] %vm5299_vm6, %v5288_v49  ;;  %v6391_v25 = vadd.f32 %v11174_v48, %v6293_v35  ;;  %v6051_v3 = vmul.f32 %v10624_v7, %v11178_v17  ;;  %v11187_v38 = vld [vmem:[#allocation4 + $0x10a] sm:$0xff] }
 0x6d1   : > { %5409 = vst.msk [vmem:[#allocation4 + $0x119] sm:$0x1] %vm5361_vm7, %v5391_v30  ;;  %v11191_v60 = vld [vmem:[#allocation4 + $0x110] sm:$0xff]  ;;  %v6245_v15 = vmul.f32 %v11160_v42, %v11187_v38 }
 0x6d2   : > { %8114 = vtanh.f32 %v6391_v25  ;;  %v6083_v4 = vadd.f32 %v6051_v3, %v5986_v16  ;;  %v6052_v46 = vmul.f32 %v10624_v7, %v11191_v60  ;;  %v11205_v13 = vld [vmem:[#allocation4 + $0x111] sm:$0xff]  ;;  %v4514_v25 = vpop.f32.mrf.mxu3 }
 0x6d3   : > { %v5211_v21 = vpop.f32.mrf.mxu2  ;;  %v6149_v20 = vmul.f32 %v10612_v37, %v11205_v13  ;;  %v4557_v59 = vadd.f32 %v4514_v25, %v11956_v56  ;;  %v5665_v25 = vmul.f32 %v11133_v31, %v10560_v29 }
 0x6d4   : > { %v5257_v54 = vadd.f32 %v5211_v21, %v5023_v10  ;;  %v6180_v2 = vadd.f32 %v6148_v11, %v6083_v4  ;;  %v6084_v47 = vadd.f32 %v6052_v46, %v5987_v22  ;;  %v6299_v11 = vpop.xlane.xlu1 %6298 }
 0x6d5   : > { %v6393_v6 = vadd.f32 %v11174_v48, %v6299_v11 }
 0x6d6   : > { %v5289_v43 = vmax.f32 %v5257_v54, 0.0  ;;  %v6277_v53 = vadd.f32 %v6245_v15, %v6180_v2  ;;  %v6181_v32 = vadd.f32 %v6149_v20, %v6084_v47  ;;  %v5472_v54 = vmul.f32 %v11128_v24, %v10545_v0  ;;  %v4748_v15 = vpop.f32.mrf.mxu0 }
 0x6d7   : > { %v5355_v44 = vld [vmem:[#allocation4 + $0x122] sm:$0x1]  ;;  %v6296_v41 = vpop.xlane.xlu0 %6295  ;;  %v5569_v2 = vmul.f32 %v11144_v58, %v10550_v5  ;;  %v5763_v24 = vmul.f32 %v11191_v60, %v10573_v8 }
 0x6d8   : > { %v8115_v1 = vpop.eup %8114  ;;  %5374 = vst.msk [vmem:[#allocation4 + $0x120] sm:$0x1] %vm5361_vm7, %v5355_v44  ;;  %v6392_v45 = vadd.f32 %v11174_v48, %v6296_v41  ;;  %v6345_v55 = vsel %vm5299_vm6, %v6277_v53, 0.0  ;;  %v11208_v19 = vld [vmem:[#allocation4 + $0x112] sm:$0xff]  ;;  %v4791_v53 = vadd.f32 %v4748_v15, %v4557_v59  ;;  %v4982_v41 = vpop.f32.mrf.mxu1 }
 0x6d9   : > { %v6455_v9 = vmul.f32 0.5, %v8115_v1  ;;  %5323 = vst.msk [vmem:[#allocation4 + $0x129] sm:$0xff] %vm5299_vm6, %v5289_v43  ;;  %6346 = vadd.xlane.f32.xlu0 %v6345_v55  ;;  %v6246_v52 = vmul.f32 %v11160_v42, %v11208_v19  ;;  %v5666_v43 = vmul.f32 %v11152_v14, %v10560_v29  ;;  %v5601_v44 = vadd.f32 %v5569_v2, %v5472_v54 }
 0x6da   : > { %8116 = vtanh.f32 %v6392_v45  ;;  %v4517_v23 = vpop.f32.mrf.mxu3  ;;  %v11957_v45 = vld [vmem:[#allocation41_spill] sm:$0xff]  ;;  %v5025_v27 = vadd.f32 %v4982_v41, %v4791_v53  ;;  %v5860_v14 = vmul.f32 %v11205_v13, %v10592_v40 }
 0x6db   : > { %v6487_v28 = vadd.f32 0.5, %v6455_v9  ;;  %v5214_v26 = vpop.f32.mrf.mxu2  ;;  %v6278_v51 = vadd.f32 %v6246_v52, %v6181_v32  ;;  %8118 = vtanh.f32 %v6393_v6  ;;  %v5698_v33 = vadd.f32 %v5666_v43, %v5601_v44 }
 0x6dc   : > { %v5258_v3 = vadd.f32 %v5214_v26, %v5024_v57  ;;  %v4558_v55 = vadd.f32 %v4517_v23, %v11957_v45  ;;  %v5471_v57 = vmul.f32 %v11117_v36, %v10545_v0  ;;  %v5568_v26 = vmul.f32 %v11119_v34, %v10550_v5 }
 0x6dd   : > { %v6551_v49 = vrot.slane %v6487_v28, 1  ;;  %v6552_v61 = vrot.slane %v6487_v28, 2  ;;  %v6553_v35 = vrot.slane %v6487_v28, 3  ;;  %6775 = vst [vmem:[#allocation1] ss:$9 sm:$0xff] %v6487_v28  ;;  %v6554_v30 = vrot.slane %v6487_v28, 4 }
 0x6de   : > { %v6555_v16 = vrot.slane %v6487_v28, 5  ;;  %v6556_v12 = vrot.slane %v6487_v28, 6  ;;  %v6557_v63 = vrot.slane %v6487_v28, 7  ;;  %v6348_v10 = vsel %vm5299_vm6, %v6278_v51, 0.0  ;;  %v4751_v36 = vpop.f32.mrf.mxu0 }
 0x6df   : > { %6777 = vst [vmem:[#allocation1 + $0x1] ss:$9 sm:$0xff] %v6551_v49  ;;  %6349 = vadd.xlane.f32.xlu1 %v6348_v10  ;;  %v5290_v39 = vmax.f32 %v5258_v3, 0.0  ;;  %v5795_v20 = vadd.f32 %v5763_v24, %v5698_v33  ;;  %v5957_v32 = vmul.f32 %v11208_v19, %v10601_v50  ;;  %v4792_v51 = vadd.f32 %v4751_v36, %v4558_v55 }
 0x6e0   : > { %6779 = vst [vmem:[#allocation1 + $0x2] ss:$9 sm:$0xff] %v6552_v61  ;;  %v8117_v4 = vpop.eup %8116  ;;  %v5392_v21 = vld [vmem:[#allocation4 + $0x12f] sm:$0x1] }
 0x6e1   : > { %6781 = vst [vmem:[#allocation1 + $0x3] ss:$9 sm:$0xff] %v6553_v35  ;;  %v6456_v62 = vmul.f32 0.5, %v8117_v4  ;;  %v8190_v35 = vmov 0   ;;  %v11238_v34 = vld [vmem:[#allocation4 + $0x128] sm:$0xff] }
 0x6e2   : > { %6783 = vst [vmem:[#allocation1 + $0x4] ss:$9 sm:$0xff] %v6554_v30  ;;  %8106 = vset.pattern.permute.xlu2 %v8190_v35  ;;  %8108 = vset.pattern.permute.xlu1 %v8190_v35  ;;  %v5600_v30 = vadd.f32 %v5568_v26, %v5471_v57  ;;  %v6054_v10 = vmul.f32 %v10624_v7, %v11238_v34  ;;  %v11243_v59 = vld [vmem:[#allocation4 + $0x129] sm:$0xff]  ;;  %v4519_v33 = vpop.f32.mrf.mxu3  ;;  %v6305_v57 = vpop.xlane.xlu2 %6304 }
 0x6e3   : > { %6785 = vst [vmem:[#allocation1 + $0x5] ss:$9 sm:$0xff] %v6555_v16  ;;  %v6488_v46 = vadd.f32 0.5, %v6456_v62  ;;  %v5216_v1 = vpop.f32.mrf.mxu2  ;;  %v8119_v16 = vpop.eup %8118  ;;  %8107 = vset.pattern.permute.xlu0 %v8190_v35  ;;  %v6151_v43 = vmul.f32 %v10612_v37, %v11243_v59  ;;  %v5762_v35 = vmul.f32 %v11178_v17, %v10573_v8 }
 0x6e4   : > { %6787 = vst [vmem:[#allocation1 + $0x6] ss:$9 sm:$0xff] %v6556_v12  ;;  %v5259_v61 = vadd.f32 %v5216_v1, %v5025_v27  ;;  %v6302_v12 = vpop.xlane.xlu1 %6301  ;;  %v5697_v4 = vadd.f32 %v5665_v25, %v5600_v30  ;;  %v6457_v31 = vmul.f32 0.5, %v8119_v16  ;;  %v6395_v30 = vadd.f32 %v11174_v48, %v6305_v57 }
 0x6e5   : > { %6789 = vst [vmem:[#allocation1 + $0x7] ss:$9 sm:$0xff] %v6557_v63  ;;  %v6558_v58 = vrot.slane %v6488_v46, 1  ;;  %v6559_v22 = vrot.slane %v6488_v46, 2  ;;  %v6560_v47 = vrot.slane %v6488_v46, 3  ;;  %v6561_v28 = vrot.slane %v6488_v46, 4 }
 0x6e6   : > { %5410 = vst.msk [vmem:[#allocation4 + $0x131] sm:$0x1] %vm5361_vm7, %v5392_v21  ;;  %v6562_v52 = vrot.slane %v6488_v46, 5  ;;  %v6563_v49 = vrot.slane %v6488_v46, 6  ;;  %v6564_v3 = vrot.slane %v6488_v46, 7  ;;  %v5892_v63 = vadd.f32 %v5860_v14, %v5795_v20 }
 0x6e7   : > { %5324 = vst.msk [vmem:[#allocation4 + $0x139] sm:$0xff] %vm5299_vm6, %v5290_v39  ;;  %v5291_v21 = vmax.f32 %v5259_v61, 0.0  ;;  %v4985_v39 = vpop.f32.mrf.mxu1  ;;  %v6394_v56 = vadd.f32 %v11174_v48, %v6302_v12  ;;  %v6489_v6 = vadd.f32 0.5, %v6457_v31  ;;  %v5474_v25 = vmul.f32 %v11191_v60, %v10545_v0  ;;  %v11959_v31 = vld [vmem:[#allocation53_spill] sm:$0xff] }
 0x6e8   : > { %v5989_v62 = vadd.f32 %v5957_v32, %v5892_v63  ;;  %v5026_v54 = vadd.f32 %v4985_v39, %v4792_v51  ;;  %v4753_v32 = vpop.f32.mrf.mxu0  ;;  %v5571_v16 = vmul.f32 %v11205_v13, %v10550_v5  ;;  %v5794_v51 = vadd.f32 %v5762_v35, %v5697_v4 }
 0x6e9   : > { %5325 = vst.msk [vmem:[#allocation4 + $0x141] sm:$0xff] %vm5299_vm6, %v5291_v21  ;;  %8120 = vtanh.f32 %v6394_v56  ;;  %v6565_v41 = vrot.slane %v6489_v6, 1  ;;  %v6566_v1 = vrot.slane %v6489_v6, 2  ;;  %v6567_v45 = vrot.slane %v6489_v6, 3 }
 0x6ea   : > { %v6086_v15 = vadd.f32 %v6054_v10, %v5989_v62  ;;  %v6569_v27 = vrot.slane %v6489_v6, 5  ;;  %v6570_v14 = vrot.slane %v6489_v6, 6  ;;  %v4522_v63 = vpop.f32.mrf.mxu3  ;;  %v5603_v10 = vadd.f32 %v5571_v16, %v5474_v25 }
 0x6eb   : > { %v5219_v2 = vpop.f32.mrf.mxu2  ;;  %8122 = vtanh.f32 %v6395_v30  ;;  %v4560_v62 = vadd.f32 %v4522_v63, %v11959_v31  ;;  %v5765_v31 = vmul.f32 %v11238_v34, %v10573_v8 }
 0x6ec   : > { %v6790_v9 = vld [vmem:[#allocation1] sm:$0xff]  ;;  %v6183_v44 = vadd.f32 %v6151_v43, %v6086_v15  ;;  %v5668_v43 = vmul.f32 %v11208_v19, %v10560_v29  ;;  %v6308_v19 = vpop.xlane.xlu2 %6307 }
 0x6ed   : > { %6791 = vst [vmem:[#allocation1] ss:$9 sm:$0xff] %v6488_v46  ;;  %7071 = vperm.xlu2 %8106, %v6790_v9   ;;  %v5260_v46 = vadd.f32 %v5219_v2, %v5026_v54  ;;  %v11249_v53 = vld [vmem:[#allocation4 + $0x12a] sm:$0xff] }
 0x6ee   : > { %6792 = vst [vmem:[#allocation1 + $0x1] ss:$9 sm:$0xff] %v6558_v58  ;;  %v5356_v11 = vld [vmem:[#allocation4 + $0x13a] sm:$0x1]  ;;  %v6248_v24 = vmul.f32 %v11160_v42, %v11249_v53 }
 0x6ef   : > { %6793 = vst [vmem:[#allocation1 + $0x2] ss:$9 sm:$0xff] %v6559_v22  ;;  %v5292_v23 = vmax.f32 %v5260_v46, 0.0  ;;  %v8121_v9 = vpop.eup %8120  ;;  %v4987_v12 = vpop.f32.mrf.mxu1  ;;  %v11272_v46 = vld [vmem:[#allocation4 + $0x120] sm:$0xff] }
 0x6f0   : > { %6794 = vst [vmem:[#allocation1 + $0x3] ss:$9 sm:$0xff] %v6560_v47  ;;  %v6280_v22 = vadd.f32 %v6248_v24, %v6183_v44  ;;  %v6568_v47 = vrot.slane %v6489_v6, 4  ;;  %v6458_v20 = vmul.f32 0.5, %v8121_v9  ;;  %v5393_v26 = vld [vmem:[#allocation4 + $0x147] sm:$0x1]  ;;  %v6053_v24 = vmul.f32 %v10624_v7, %v11272_v46 }
 0x6f1   : > { %6795 = vst [vmem:[#allocation1 + $0x4] ss:$9 sm:$0xff] %v6561_v28  ;;  %v6571_v28 = vrot.slane %v6489_v6, 7 }
 0x6f2   : > { %6796 = vst [vmem:[#allocation1 + $0x5] ss:$9 sm:$0xff] %v6562_v52  ;;  %v6354_v55 = vsel %vm5299_vm6, %v6280_v22, 0.0  ;;  %v11958_v52 = vld [vmem:[#allocation32_spill] sm:$0xff]  ;;  %v6490_v36 = vadd.f32 0.5, %v6458_v20  ;;  %v8123_v22 = vpop.eup %8122 }
 0x6f3   : > { %6797 = vst [vmem:[#allocation1 + $0x6] ss:$9 sm:$0xff] %v6563_v49  ;;  %6355 = vadd.xlane.f32.xlu0 %v6354_v55  ;;  %v4559_v49 = vadd.f32 %v4519_v33, %v11958_v52  ;;  %v5221_v2 = vpop.f32.mrf.mxu2  ;;  %v5700_v55 = vadd.f32 %v5668_v43, %v5603_v10  ;;  %v6459_v57 = vmul.f32 0.5, %v8123_v22  ;;  %v5862_v22 = vmul.f32 %v11243_v59, %v10592_v40 }
 0x6f4   : > { %6798 = vst [vmem:[#allocation1 + $0x7] ss:$9 sm:$0xff] %v6564_v3  ;;  %v6572_v21 = vrot.slane %v6490_v36, 1  ;;  %v6573_v39 = vrot.slane %v6490_v36, 2  ;;  %v6574_v13 = vrot.slane %v6490_v36, 3  ;;  %v6575_v15 = vrot.slane %v6490_v36, 4 }
 0x6f5   : > { %5375 = vst.msk [vmem:[#allocation4 + $0x138] sm:$0x1] %vm5361_vm7, %v5356_v11  ;;  %v4793_v3 = vadd.f32 %v4753_v32, %v4559_v49  ;;  %v5859_v11 = vmul.f32 %v11180_v18, %v10592_v40  ;;  %v6576_v44 = vrot.slane %v6490_v36, 5  ;;  %v6577_v33 = vrot.slane %v6490_v36, 6 }
 0x6f6   : > { %5326 = vst.msk [vmem:[#allocation4 + $0x151] sm:$0xff] %vm5299_vm6, %v5292_v23  ;;  %v4756_v23 = vpop.f32.mrf.mxu0  ;;  %v6578_v9 = vrot.slane %v6490_v36, 7  ;;  %v6491_v25 = vadd.f32 0.5, %v6459_v57  ;;  %v5764_v57 = vmul.f32 %v11272_v46, %v10573_v8 }
 0x6f7   : > { %5411 = vst.msk [vmem:[#allocation4 + $0x149] sm:$0x1] %vm5361_vm7, %v5393_v26  ;;  %v5027_v56 = vadd.f32 %v4987_v12, %v4793_v3  ;;  %v5891_v54 = vadd.f32 %v5859_v11, %v5794_v51  ;;  %v4990_v20 = vpop.f32.mrf.mxu1  ;;  %v4524_v12 = vpop.f32.mrf.mxu3 }
 0x6f8   : > { %v6580_v51 = vrot.slane %v6491_v25, 2  ;;  %v6581_v63 = vrot.slane %v6491_v25, 3  ;;  %v6582_v10 = vrot.slane %v6491_v25, 4 }
 0x6f9   : > { %v5261_v4 = vadd.f32 %v5221_v2, %v5027_v56 }
 0x6fb   : > { %v11253_v58 = vld [vmem:[#allocation1] sm:$0xff]  ;;  %v5224_v35 = vpop.f32.mrf.mxu2 }
 0x6fc   : > { %6800 = vst [vmem:[#allocation1] ss:$9 sm:$0xff] %v6489_v6  ;;  %v5956_v6 = vmul.f32 %v11187_v38, %v10601_v50 }
 0x6fd   : > { %6801 = vst [vmem:[#allocation1 + $0x1] ss:$9 sm:$0xff] %v6565_v41  ;;  %v5357_v61 = vld [vmem:[#allocation4 + $0x152] sm:$0x1]  ;;  %v11278_v41 = vld [vmem:[#allocation4 + $0x121] sm:$0xff] }
 0x6fe   : > { %6802 = vst [vmem:[#allocation1 + $0x2] ss:$9 sm:$0xff] %v6566_v1  ;;  %v4794_v1 = vadd.f32 %v4756_v23, %v4560_v62  ;;  %v6584_v62 = vrot.slane %v6491_v25, 6  ;;  %v5797_v23 = vadd.f32 %v5765_v31, %v5700_v55 }
 0x6ff   : > { %6803 = vst [vmem:[#allocation1 + $0x3] ss:$9 sm:$0xff] %v6567_v45  ;;  %v5988_v45 = vadd.f32 %v5956_v6, %v5891_v54  ;;  %v11960_v54 = vld [vmem:[#allocation44_spill] sm:$0xff]  ;;  %v4758_v6 = vpop.f32.mrf.mxu0 }
 0x700   : > { %6804 = vst [vmem:[#allocation1 + $0x4] ss:$9 sm:$0xff] %v6568_v47  ;;  %v5293_v47 = vmax.f32 %v5261_v4, 0.0  ;;  %v5028_v26 = vadd.f32 %v4990_v20, %v4794_v1  ;;  %v5473_v4 = vmul.f32 %v11178_v17, %v10545_v0  ;;  %v5959_v17 = vmul.f32 %v11249_v53, %v10601_v50  ;;  %v11310_v1 = vld [vmem:[#allocation4 + $0x140] sm:$0xff] }
 0x701   : > { %6805 = vst [vmem:[#allocation1 + $0x5] ss:$9 sm:$0xff] %v6569_v27  ;;  %v11280_v27 = vld [vmem:[#allocation4 + $0x122] sm:$0xff]  ;;  %v5667_v20 = vmul.f32 %v11187_v38, %v10560_v29 }
 0x702   : > { %6806 = vst [vmem:[#allocation1 + $0x6] ss:$9 sm:$0xff] %v6570_v14  ;;  %v6085_v14 = vadd.f32 %v6053_v24, %v5988_v45  ;;  %v6247_v49 = vmul.f32 %v11160_v42, %v11280_v27  ;;  %v5262_v32 = vadd.f32 %v5224_v35, %v5028_v26  ;;  %v5570_v24 = vmul.f32 %v11180_v18, %v10550_v5 }
 0x703   : > { %6807 = vst [vmem:[#allocation1 + $0x7] ss:$9 sm:$0xff] %v6571_v28  ;;  %v6150_v28 = vmul.f32 %v10612_v37, %v11278_v41  ;;  %v6056_v18 = vmul.f32 %v10624_v7, %v11310_v1 }
 0x704   : > { %5376 = vst.msk [vmem:[#allocation4 + $0x150] sm:$0x1] %vm5361_vm7, %v5357_v61  ;;  %v6396_v61 = vadd.f32 %v11174_v48, %v6308_v19  ;;  %v5294_v16 = vmax.f32 %v5262_v32, 0.0  ;;  %v5602_v55 = vadd.f32 %v5570_v24, %v5473_v4  ;;  %v5894_v19 = vadd.f32 %v5862_v22, %v5797_v23 }
 0x705   : > { %v6182_v52 = vadd.f32 %v6150_v28, %v6085_v14  ;;  %5327 = vst.msk [vmem:[#allocation4 + $0x159] sm:$0xff] %vm5299_vm6, %v5293_v47  ;;  %v4527_v47 = vpop.f32.mrf.mxu3  ;;  %v5476_v14 = vmul.f32 %v11238_v34, %v10545_v0  ;;  %v5573_v28 = vmul.f32 %v11243_v59, %v10550_v5  ;;  %v5226_v59 = vpop.f32.mrf.mxu2 }
 0x706   : > { %8124 = vtanh.f32 %v6396_v61  ;;  %5328 = vst.msk [vmem:[#allocation4 + $0x169] sm:$0xff] %vm5299_vm6, %v5294_v16  ;;  %v5991_v26 = vadd.f32 %v5959_v17, %v5894_v19  ;;  %v5699_v34 = vadd.f32 %v5667_v20, %v5602_v55  ;;  %v5958_v17 = vmul.f32 %v11280_v27, %v10601_v50 }
 0x707   : > { %7074 = vperm.xlu0 %8107, %v11253_v58   ;;  %v6279_v30 = vadd.f32 %v6247_v49, %v6182_v52  ;;  %v6579_v58 = vrot.slane %v6491_v25, 1  ;;  %v5605_v52 = vadd.f32 %v5573_v28, %v5476_v14  ;;  %v11961_v49 = vld [vmem:[#allocation18_spill] sm:$0xff]  ;;  %v5475_v19 = vmul.f32 %v11272_v46, %v10545_v0 }
 0x708   : > { %v4562_v61 = vadd.f32 %v4527_v47, %v11961_v49  ;;  %v11347_v47 = vld [vmem:[#allocation4 + $0x139] sm:$0xff] }
 0x70a   : > { %v6808_v60 = vld [vmem:[#allocation1] sm:$0xff] }
 0x70b   : > { %6810 = vst [vmem:[#allocation1 + $0x1] ss:$9 sm:$0xff] %v6572_v21  ;;  %7077 = vperm.xlu1 %8108, %v6808_v60   ;;  %v6583_v21 = vrot.slane %v6491_v25, 5  ;;  %v6311_v60 = vpop.xlane.xlu0 %6310 }
 0x70c   : > { %6811 = vst [vmem:[#allocation1 + $0x2] ss:$9 sm:$0xff] %v6573_v39  ;;  %v8125_v11 = vpop.eup %8124  ;;  %v6585_v39 = vrot.slane %v6491_v25, 7  ;;  %v5394_v56 = vld [vmem:[#allocation4 + $0x15f] sm:$0x1] }
 0x70d   : > { %6812 = vst [vmem:[#allocation1 + $0x3] ss:$9 sm:$0xff] %v6574_v13  ;;  %v4561_v13 = vadd.f32 %v4524_v12, %v11960_v54  ;;  %v6460_v2 = vmul.f32 0.5, %v8125_v11  ;;  %v5358_v43 = vld [vmem:[#allocation4 + $0x16a] sm:$0x1]  ;;  %v4761_v12 = vpop.f32.mrf.mxu0  ;;  %v11330_v11 = vld [vmem:[#allocation4 + $0x142] sm:$0xff]  ;;  %v5229_v55 = vpop.f32.mrf.mxu2 }
 0x70e   : > { %6813 = vst [vmem:[#allocation1 + $0x4] ss:$9 sm:$0xff] %v6575_v15  ;;  %v11296_v15 = vld [vmem:[#allocation4 + $0x169] sm:$0xff] }
 0x70f   : > { %6814 = vst [vmem:[#allocation1 + $0x5] ss:$9 sm:$0xff] %v6576_v44  ;;  %v6397_v44 = vadd.f32 %v11174_v48, %v6311_v60  ;;  %v6492_v45 = vadd.f32 0.5, %v6460_v2  ;;  %v6250_v60 = vmul.f32 %v11160_v42, %v11330_v11 }
 0x710   : > { %6815 = vst [vmem:[#allocation1 + $0x6] ss:$9 sm:$0xff] %v6577_v33  ;;  %v4795_v33 = vadd.f32 %v4758_v6, %v4561_v13 }
 0x711   : > { %6816 = vst [vmem:[#allocation1 + $0x7] ss:$9 sm:$0xff] %v6578_v9  ;;  %v4992_v9 = vpop.f32.mrf.mxu1  ;;  %8126 = vtanh.f32 %v6397_v44  ;;  %v6586_v32 = vrot.slane %v6492_v45, 1  ;;  %v6587_v16 = vrot.slane %v6492_v45, 2  ;;  %v6591_v54 = vrot.slane %v6492_v45, 6 }
 0x712   : > { %6809 = vst [vmem:[#allocation1] ss:$9 sm:$0xff] %v6490_v36  ;;  %v6351_v36 = vsel %vm5299_vm6, %v6279_v30, 0.0  ;;  %v5029_v30 = vadd.f32 %v4992_v9, %v4795_v33  ;;  %v6592_v6 = vrot.slane %v6492_v45, 7 }
 0x713   : > { %5412 = vst.msk [vmem:[#allocation4 + $0x161] sm:$0x1] %vm5361_vm7, %v5394_v56  ;;  %v5861_v56 = vmul.f32 %v11278_v41, %v10592_v40 }
 0x714   : > { %5341 = vst.msk [vmem:[#allocation4 + $0x199] sm:$0xff] %vm5299_vm6, %v11296_v15  ;;  %v5263_v38 = vadd.f32 %v5226_v59, %v5029_v30  ;;  %v5669_v59 = vmul.f32 %v11280_v27, %v10560_v29  ;;  %v5767_v27 = vmul.f32 %v11310_v1, %v10573_v8 }
 0x715   : > { %5377 = vst.msk [vmem:[#allocation4 + $0x168] sm:$0x1] %vm5361_vm7, %v5358_v43  ;;  %v6314_v43 = vpop.xlane.xlu1 %6313 }
 0x716   : > { %6352 = vadd.xlane.f32.xlu2 %v6351_v36  ;;  %v6088_v36 = vadd.f32 %v6056_v18, %v5991_v26  ;;  %v5295_v13 = vmax.f32 %v5263_v38, 0.0  ;;  %v6398_v33 = vadd.f32 %v11174_v48, %v6314_v43  ;;  %v5572_v26 = vmul.f32 %v11278_v41, %v10550_v5 }
 0x717   : > { %v8127_v31 = vpop.eup %8126 }
 0x718   : > { %v6461_v44 = vmul.f32 0.5, %v8127_v31  ;;  %5329 = vst.msk [vmem:[#allocation4 + $0x171] sm:$0xff] %vm5299_vm6, %v5295_v13  ;;  %8128 = vtanh.f32 %v6398_v33  ;;  %v5863_v13 = vmul.f32 %v11347_v47, %v10592_v40 }
 0x719   : > { %v11291_v3 = vld [vmem:[#allocation1] sm:$0xff]  ;;  %v4995_v23 = vpop.f32.mrf.mxu1 }
 0x71a   : > { %6818 = vst [vmem:[#allocation1] ss:$9 sm:$0xff] %v6491_v25  ;;  %v11326_v25 = vld [vmem:[#allocation4 + $0x141] sm:$0xff]  ;;  %v6493_v20 = vadd.f32 0.5, %v6461_v44 }
 0x71b   : > { %6819 = vst [vmem:[#allocation1 + $0x1] ss:$9 sm:$0xff] %v6579_v58  ;;  %v6588_v58 = vrot.slane %v6492_v45, 3  ;;  %v5864_v33 = vmul.f32 %v11326_v25, %v10592_v40 }
 0x71c   : > { %6820 = vst [vmem:[#allocation1 + $0x2] ss:$9 sm:$0xff] %v6580_v51  ;;  %v5796_v51 = vadd.f32 %v5764_v57, %v5699_v34  ;;  %v11353_v57 = vld [vmem:[#allocation4 + $0x13a] sm:$0xff]  ;;  %v6595_v38 = vrot.slane %v6493_v20, 3  ;;  %v6597_v31 = vrot.slane %v6493_v20, 5 }
 0x71d   : > { %6821 = vst [vmem:[#allocation1 + $0x3] ss:$9 sm:$0xff] %v6581_v63  ;;  %v6589_v63 = vrot.slane %v6492_v45, 4  ;;  %v6249_v30 = vmul.f32 %v11160_v42, %v11353_v57 }
 0x71e   : > { %6822 = vst [vmem:[#allocation1 + $0x4] ss:$9 sm:$0xff] %v6582_v10  ;;  %v6153_v10 = vmul.f32 %v10612_v37, %v11326_v25 }
 0x71f   : > { %6823 = vst [vmem:[#allocation1 + $0x5] ss:$9 sm:$0xff] %v6583_v21  ;;  %v5670_v21 = vmul.f32 %v11249_v53, %v10560_v29  ;;  %v5893_v53 = vadd.f32 %v5861_v56, %v5796_v51  ;;  %v6317_v56 = vpop.xlane.xlu2 %6316 }
 0x720   : > { %6824 = vst [vmem:[#allocation1 + $0x6] ss:$9 sm:$0xff] %v6584_v62  ;;  %v4796_v62 = vadd.f32 %v4761_v12, %v4562_v61  ;;  %v6185_v2 = vadd.f32 %v6153_v10, %v6088_v36  ;;  %v6152_v61 = vmul.f32 %v10612_v37, %v11347_v47  ;;  %v6594_v36 = vrot.slane %v6493_v20, 2  ;;  %v8129_v10 = vpop.eup %8128 }
 0x721   : > { %6825 = vst [vmem:[#allocation1 + $0x7] ss:$9 sm:$0xff] %v6585_v39  ;;  %v6590_v39 = vrot.slane %v6492_v45, 5  ;;  %v11338_v4 = vadd.f32 %v5670_v21, %v5605_v52  ;;  %v5990_v14 = vadd.f32 %v5958_v17, %v5893_v53  ;;  %v6596_v12 = vrot.slane %v6493_v20, 4  ;;  %v4529_v21 = vpop.f32.mrf.mxu3  ;;  %v5395_v53 = vld [vmem:[#allocation4 + $0x177] sm:$0x1]  ;;  %v4763_v17 = vpop.f32.mrf.mxu0 }
 0x722   : > { %v6282_v24 = vadd.f32 %v6250_v60, %v6185_v2  ;;  %v5030_v22 = vadd.f32 %v4995_v23, %v4796_v62  ;;  %v6599_v60 = vrot.slane %v6493_v20, 7  ;;  %v11962_v2 = vld [vmem:[#allocation64_spill] sm:$0xff]  ;;  %v6462_v43 = vmul.f32 0.5, %v8129_v10  ;;  %5413 = vst.msk [vmem:[#allocation4 + $0x179] sm:$0x1] %vm5361_vm7, %v5395_v53 }
 0x723   : > { %v5799_v44 = vadd.f32 %v5767_v27, %v11338_v4  ;;  %v5960_v4 = vmul.f32 %v11353_v57, %v10601_v50 }
 0x724   : > { %v6360_v9 = vsel %vm5299_vm6, %v6282_v24, 0.0  ;;  %v5264_v18 = vadd.f32 %v5229_v55, %v5030_v22  ;;  %v6399_v22 = vadd.f32 %v11174_v48, %v6317_v56  ;;  %v5961_v55 = vmul.f32 %v11330_v11, %v10601_v50 }
 0x725   : > { %6361 = vadd.xlane.f32.xlu2 %v6360_v9  ;;  %v11385_v9 = vld [vmem:[#allocation4 + $0x158] sm:$0xff] }
 0x726   : > { %v5296_v52 = vmax.f32 %v5264_v18, 0.0  ;;  %v6494_v18 = vadd.f32 0.5, %v6462_v43  ;;  %8130 = vtanh.f32 %v6399_v22 }
 0x728   : > { %v11324_v35 = vld [vmem:[#allocation1] sm:$0xff]  ;;  %5330 = vst.msk [vmem:[#allocation4 + $0x181] sm:$0xff] %vm5299_vm6, %v5296_v52  ;;  %v6603_v27 = vrot.slane %v6494_v18, 4 }
 0x729   : > { %6827 = vst [vmem:[#allocation1] ss:$9 sm:$0xff] %v6492_v45  ;;  %v11345_v45 = vld [vmem:[#allocation4 + $0x138] sm:$0xff] }
 0x72a   : > { %6828 = vst [vmem:[#allocation1 + $0x1] ss:$9 sm:$0xff] %v6586_v32  ;;  %v6055_v28 = vmul.f32 %v10624_v7, %v11345_v45  ;;  %v5604_v32 = vadd.f32 %v5572_v26, %v5475_v19  ;;  %v5766_v41 = vmul.f32 %v11345_v45, %v10573_v8  ;;  %v6058_v26 = vmul.f32 %v10624_v7, %v11385_v9 }
 0x72b   : > { %6829 = vst [vmem:[#allocation1 + $0x2] ss:$9 sm:$0xff] %v6587_v16  ;;  %v6593_v16 = vrot.slane %v6493_v20, 1 }
 0x72c   : > { %6830 = vst [vmem:[#allocation1 + $0x3] ss:$9 sm:$0xff] %v6588_v58  ;;  %v6087_v49 = vadd.f32 %v6055_v28, %v5990_v14  ;;  %v5701_v51 = vadd.f32 %v5669_v59, %v5604_v32  ;;  %v11390_v14 = vld [vmem:[#allocation4 + $0x150] sm:$0xff]  ;;  %v4997_v32 = vpop.f32.mrf.mxu1  ;;  %v8131_v56 = vpop.eup %8130 }
 0x72d   : > { %6831 = vst [vmem:[#allocation1 + $0x4] ss:$9 sm:$0xff] %v6589_v63  ;;  %v11392_v28 = vld [vmem:[#allocation4 + $0x151] sm:$0xff]  ;;  %v6463_v22 = vmul.f32 0.5, %v8131_v56 }
 0x72e   : > { %6832 = vst [vmem:[#allocation1 + $0x5] ss:$9 sm:$0xff] %v6590_v39  ;;  %v6184_v46 = vadd.f32 %v6152_v61, %v6087_v49  ;;  %v5798_v62 = vadd.f32 %v5766_v41, %v5701_v51  ;;  %v6598_v39 = vrot.slane %v6493_v20, 6  ;;  %v6057_v49 = vmul.f32 %v10624_v7, %v11390_v14  ;;  %v11398_v61 = vld [vmem:[#allocation4 + $0x152] sm:$0xff]  ;;  %v5231_v51 = vpop.f32.mrf.mxu2 }
 0x72f   : > { %6833 = vst [vmem:[#allocation1 + $0x6] ss:$9 sm:$0xff] %v6591_v54  ;;  %v11371_v54 = vld [vmem:[#allocation4 + $0x171] sm:$0xff]  ;;  %v5359_v23 = vld [vmem:[#allocation4 + $0x182] sm:$0x1]  ;;  %v6600_v41 = vrot.slane %v6494_v18, 1  ;;  %v6251_v10 = vmul.f32 %v11160_v42, %v11398_v61 }
 0x730   : > { %6834 = vst [vmem:[#allocation1 + $0x7] ss:$9 sm:$0xff] %v6592_v6  ;;  %v6281_v58 = vadd.f32 %v6249_v30, %v6184_v46  ;;  %v4563_v6 = vadd.f32 %v4529_v21, %v11962_v2  ;;  %v5895_v24 = vadd.f32 %v5863_v13, %v5798_v62  ;;  %v6602_v21 = vrot.slane %v6494_v18, 3 }
 0x731   : > { %5342 = vst.msk [vmem:[#allocation4 + $0x1a1] sm:$0xff] %vm5299_vm6, %v11371_v54  ;;  %v6604_v13 = vrot.slane %v6494_v18, 5 }
 0x732   : > { %v6357_v63 = vsel %vm5299_vm6, %v6281_v58, 0.0  ;;  %v4797_v19 = vadd.f32 %v4763_v17, %v4563_v6  ;;  %5378 = vst.msk [vmem:[#allocation4 + $0x180] sm:$0x1] %vm5361_vm7, %v5359_v23  ;;  %v5992_v52 = vadd.f32 %v5960_v4, %v5895_v24  ;;  %v11402_v58 = vld [vmem:[#allocation4 + $0x159] sm:$0xff]  ;;  %v6605_v6 = vrot.slane %v6494_v18, 6  ;;  %v6320_v24 = vpop.xlane.xlu0 %6319 }
 0x733   : > { %v6155_v62 = vmul.f32 %v10612_v37, %v11402_v58 }
 0x734   : > { %v6089_v30 = vadd.f32 %v6057_v49, %v5992_v52  ;;  %v5672_v52 = vmul.f32 %v11330_v11, %v10560_v29  ;;  %v5477_v11 = vmul.f32 %v11345_v45, %v10545_v0  ;;  %v5671_v45 = vmul.f32 %v11353_v57, %v10560_v29 }
 0x735   : > { %6358 = vadd.xlane.f32.xlu1 %v6357_v63  ;;  %v6157_v57 = vmul.f32 %v10612_v37, %v11371_v54 }
 0x737   : > { %v11362_v34 = vld [vmem:[#allocation1] sm:$0xff] }
 0x738   : > { %6836 = vst [vmem:[#allocation1] ss:$9 sm:$0xff] %v6493_v20  ;;  %v5896_v20 = vadd.f32 %v5864_v33, %v5799_v44  ;;  %v6606_v44 = vrot.slane %v6494_v18, 7  ;;  %v6400_v33 = vadd.f32 %v11174_v48, %v6320_v24 }
 0x739   : > { %6837 = vst [vmem:[#allocation1 + $0x1] ss:$9 sm:$0xff] %v6593_v16  ;;  %v6154_v16 = vmul.f32 %v10612_v37, %v11392_v28 }
 0x73a   : > { %6838 = vst [vmem:[#allocation1 + $0x2] ss:$9 sm:$0xff] %v6594_v36  ;;  %v5993_v46 = vadd.f32 %v5961_v55, %v5896_v20  ;;  %v5031_v36 = vadd.f32 %v4997_v32, %v4797_v19  ;;  %8132 = vtanh.f32 %v6400_v33  ;;  %v5478_v19 = vmul.f32 %v11310_v1, %v10545_v0 }
 0x73b   : > { %6839 = vst [vmem:[#allocation1 + $0x3] ss:$9 sm:$0xff] %v6595_v38  ;;  %v6601_v38 = vrot.slane %v6494_v18, 2  ;;  %v6186_v63 = vadd.f32 %v6154_v16, %v6089_v30  ;;  %v5769_v30 = vmul.f32 %v11385_v9, %v10573_v8  ;;  %v6323_v16 = vpop.xlane.xlu1 %6322 }
 0x73c   : > { %6840 = vst [vmem:[#allocation1 + $0x4] ss:$9 sm:$0xff] %v6596_v12  ;;  %v6090_v12 = vadd.f32 %v6058_v26, %v5993_v46 }
 0x73d   : > { %6841 = vst [vmem:[#allocation1 + $0x5] ss:$9 sm:$0xff] %v6597_v31  ;;  %v5265_v31 = vadd.f32 %v5231_v51, %v5031_v36  ;;  %7080 = vperm.xlu2 %8106, %v11291_v3   ;;  %v6495_v3 = vadd.f32 0.5, %v6463_v22  ;;  %v11453_v22 = vld [vmem:[%s11681_s7 + $0x8] ss:$0 sm:$0xff] }
 0x73e   : > { %6842 = vst [vmem:[#allocation1 + $0x6] ss:$9 sm:$0xff] %v6598_v39  ;;  %v11408_v39 = vld [vmem:[#allocation4 + $0x15a] sm:$0xff]  ;;  %v6187_v53 = vadd.f32 %v6155_v62, %v6090_v12  ;;  %v6401_v12 = vadd.f32 %v11174_v48, %v6323_v16 }
 0x73f   : > { %6843 = vst [vmem:[#allocation1 + $0x7] ss:$9 sm:$0xff] %v6599_v60  ;;  %v6283_v60 = vadd.f32 %v6251_v10, %v6186_v63  ;;  %v6252_v2 = vmul.f32 %v11160_v42, %v11408_v39  ;;  %v5297_v43 = vmax.f32 %v5265_v31, 0.0  ;;  %v6607_v4 = vrot.slane %v6495_v3, 1 }
 0x740   : > { %v6608_v20 = vrot.slane %v6495_v3, 2  ;;  %v6609_v26 = vrot.slane %v6495_v3, 3  ;;  %v6610_v49 = vrot.slane %v6495_v3, 4  ;;  %v6611_v32 = vrot.slane %v6495_v3, 5 }
 0x741   : > { %v6363_v23 = vsel %vm5299_vm6, %v6283_v60, 0.0  ;;  %v6284_v17 = vadd.f32 %v6252_v2, %v6187_v53  ;;  %5331 = vst.msk [vmem:[#allocation4 + $0x189] sm:$0xff] %vm5299_vm6, %v5297_v43  ;;  %v6612_v1 = vrot.slane %v6495_v3, 6  ;;  %v5574_v63 = vmul.f32 %v11347_v47, %v10550_v5 }
 0x742   : > { %6364 = vadd.xlane.f32.xlu0 %v6363_v23  ;;  %v5963_v10 = vmul.f32 %v11408_v39, %v10601_v50  ;;  %8134 = vtanh.f32 %v6401_v12  ;;  %v11448_v23 = vld [vmem:[#allocation4 + $0x172] sm:$0xff] }
 0x743   : > { %v6366_v42 = vsel %vm5299_vm6, %v6284_v17, 0.0  ;;  %v6254_v17 = vmul.f32 %v11453_v22, %v11448_v23 }
 0x744   : > { %6367 = vadd.xlane.f32.xlu1 %v6366_v42 }
 0x745   : > { %7083 = vperm.xlu2 %8106, %v11324_v35   ;;  %v8133_v35 = vpop.eup %8132 }
 0x746   : > { %v6844_v59 = vld [vmem:[#allocation1] sm:$0xff] }
 0x747   : > { %6845 = vst [vmem:[#allocation1] ss:$9 sm:$0xff] %v6494_v18  ;;  %v5575_v18 = vmul.f32 %v11326_v25, %v10550_v5  ;;  %v6613_v25 = vrot.slane %v6495_v3, 7 }
 0x748   : > { %6846 = vst [vmem:[#allocation1 + $0x1] ss:$9 sm:$0xff] %v6600_v41  ;;  %v5396_v41 = vld [vmem:[#allocation4 + $0x18f] sm:$0x1] }
 0x749   : > { %6847 = vst [vmem:[#allocation1 + $0x2] ss:$9 sm:$0xff] %v6601_v38  ;;  %v5607_v46 = vadd.f32 %v5575_v18, %v5478_v19  ;;  %v6464_v38 = vmul.f32 0.5, %v8133_v35  ;;  %v5576_v35 = vmul.f32 %v11392_v28, %v10550_v5 }
 0x74a   : > { %6848 = vst [vmem:[#allocation1 + $0x3] ss:$9 sm:$0xff] %v6602_v21  ;;  %v11438_v21 = vld [vmem:[#allocation4 + $0x170] sm:$0xff] }
 0x74b   : > { %6849 = vst [vmem:[#allocation1 + $0x4] ss:$9 sm:$0xff] %v6603_v27  ;;  %v5704_v36 = vadd.f32 %v5672_v52, %v5607_v46  ;;  %v6496_v31 = vadd.f32 0.5, %v6464_v38  ;;  %v5606_v27 = vadd.f32 %v5574_v63, %v5477_v11  ;;  %v6060_v48 = vmul.f32 %v10624_v7, %v11438_v21 }
 0x74c   : > { %6850 = vst [vmem:[#allocation1 + $0x5] ss:$9 sm:$0xff] %v6604_v13  ;;  %v5673_v46 = vmul.f32 %v11398_v61, %v10560_v29 }
 0x74d   : > { %6851 = vst [vmem:[#allocation1 + $0x6] ss:$9 sm:$0xff] %v6605_v6  ;;  %7089 = vperm.xlu2 %8106, %v6844_v59   ;;  %v5801_v51 = vadd.f32 %v5769_v30, %v5704_v36  ;;  %v5866_v59 = vmul.f32 %v11402_v58, %v10592_v40  ;;  %v5703_v60 = vadd.f32 %v5671_v45, %v5606_v27  ;;  %v6614_v13 = vrot.slane %v6496_v31, 1  ;;  %v6026_v27 = vld [vmem:[#allocation4 + $0x168] sm:$0xff]  ;;  %v5360_v45 = vld [vmem:[#allocation4 + $0x19a] sm:$0x1] }
 0x74e   : > { %6852 = vst [vmem:[#allocation1 + $0x7] ss:$9 sm:$0xff] %v6606_v44  ;;  %v6615_v2 = vrot.slane %v6496_v31, 2  ;;  %v6616_v43 = vrot.slane %v6496_v31, 3  ;;  %v6617_v53 = vrot.slane %v6496_v31, 4  ;;  %v8135_v44 = vpop.eup %8134  ;;  %v6618_v24 = vrot.slane %v6496_v31, 5 }
 0x74f   : > { %5414 = vst.msk [vmem:[#allocation4 + $0x191] sm:$0x1] %vm5361_vm7, %v5396_v41  ;;  %v5898_v62 = vadd.f32 %v5866_v59, %v5801_v51  ;;  %v6619_v33 = vrot.slane %v6496_v31, 6  ;;  %v6465_v19 = vmul.f32 0.5, %v8135_v44 }
 0x750   : > { %5379 = vst.msk [vmem:[#allocation4 + $0x198] sm:$0x1] %vm5361_vm7, %v5360_v45 }
 0x751   : > { %v5995_v47 = vadd.f32 %v5963_v10, %v5898_v62 }
 0x753   : > { %v6092_v6 = vadd.f32 %v6060_v48, %v5995_v47  ;;  %v5962_v48 = vmul.f32 %v11398_v61, %v10601_v50  ;;  %v5770_v61 = vmul.f32 %v6026_v27, %v10573_v8 }
 0x755   : > { %v11418_v55 = vld [vmem:[#allocation1] sm:$0xff]  ;;  %v6189_v42 = vadd.f32 %v6157_v57, %v6092_v6  ;;  %v5577_v6 = vmul.f32 %v11402_v58, %v10550_v5  ;;  %v5674_v57 = vmul.f32 %v11408_v39, %v10560_v29 }
 0x756   : > { %6854 = vst [vmem:[#allocation1] ss:$9 sm:$0xff] %v6495_v3  ;;  %v6620_v3 = vrot.slane %v6496_v31, 7 }
 0x757   : > { %6855 = vst [vmem:[#allocation1 + $0x1] ss:$9 sm:$0xff] %v6607_v4  ;;  %v6326_v4 = vpop.xlane.xlu2 %6325  ;;  %v6286_v18 = vadd.f32 %v6254_v17, %v6189_v42  ;;  %v5545_v42 = vld [vmem:[#allocation4 + $0x169] sm:$0xff] }
 0x758   : > { %6856 = vst [vmem:[#allocation1 + $0x2] ss:$9 sm:$0xff] %v6608_v20  ;;  %v11458_v20 = vld [vmem:[#allocation5] ss:$0 sm:$0xff] }
 0x759   : > { %6857 = vst [vmem:[#allocation1 + $0x3] ss:$9 sm:$0xff] %v6609_v26  ;;  %v6402_v26 = vadd.f32 %v11458_v20, %v6326_v4  ;;  %v6372_v52 = vsel %vm5299_vm6, %v6286_v18, 0.0 }
 0x75a   : > { %6858 = vst [vmem:[#allocation1 + $0x4] ss:$9 sm:$0xff] %v6610_v49  ;;  %v5479_v49 = vmul.f32 %v11390_v14, %v10545_v0  ;;  %6373 = vadd.xlane.f32.xlu0 %v6372_v52 }
 0x75b   : > { %6859 = vst [vmem:[#allocation1 + $0x5] ss:$9 sm:$0xff] %v6611_v32  ;;  %8136 = vtanh.f32 %v6402_v26  ;;  %v5546_v26 = vld [vmem:[#allocation4 + $0x171] sm:$0xff] }
 0x75c   : > { %6860 = vst [vmem:[#allocation1 + $0x6] ss:$9 sm:$0xff] %v6612_v1  ;;  %v5608_v32 = vadd.f32 %v5576_v35, %v5479_v49  ;;  %v5768_v1 = vmul.f32 %v11390_v14, %v10573_v8  ;;  %v6329_v14 = vpop.xlane.xlu0 %6328  ;;  %v5867_v35 = vmul.f32 %v10592_v40, %v5545_v42 }
 0x75d   : > { %6861 = vst [vmem:[#allocation1 + $0x7] ss:$9 sm:$0xff] %v6613_v25  ;;  %7086 = vperm.xlu1 %8108, %v11362_v34   ;;  %v6497_v34 = vadd.f32 0.5, %v6465_v19  ;;  %v6403_v62 = vadd.f32 %v11458_v20, %v6329_v14  ;;  %v6029_v14 = vld [vmem:[#allocation4 + $0x188] sm:$0xff] }
 0x75e   : > { %v5705_v30 = vadd.f32 %v5673_v46, %v5608_v32  ;;  %v5800_v11 = vadd.f32 %v5768_v1, %v5703_v60  ;;  %v6332_v1 = vpop.xlane.xlu1 %6331 }
 0x75f   : > { %v6621_v16 = vrot.slane %v6497_v34, 1  ;;  %v6622_v41 = vrot.slane %v6497_v34, 2  ;;  %v6623_v36 = vrot.slane %v6497_v34, 3  ;;  %v6624_v38 = vrot.slane %v6497_v34, 4 }
 0x760   : > { %v6625_v12 = vrot.slane %v6497_v34, 5  ;;  %v6626_v63 = vrot.slane %v6497_v34, 6  ;;  %v6627_v59 = vrot.slane %v6497_v34, 7  ;;  %8138 = vtanh.f32 %v6403_v62 }
 0x761   : > { %v8137_v51 = vpop.eup %8136  ;;  %v5802_v39 = vadd.f32 %v5770_v61, %v5705_v30  ;;  %v5397_v30 = vld [vmem:[#allocation4 + $0x1a7] sm:$0x1] }
 0x762   : > { %v6466_v10 = vmul.f32 0.5, %v8137_v51  ;;  %v5481_v51 = vmul.f32 %v6026_v27, %v10545_v0  ;;  %5415 = vst.msk [vmem:[#allocation4 + $0x1a9] sm:$0x1] %vm5361_vm7, %v5397_v30  ;;  %v5933_v61 = vld [vmem:[#allocation4 + $0x182] sm:$0xff]  ;;  %vm7227_vm7 = vcmask 1048512  }
 0x764   : > { %v11444_v56 = vld [vmem:[#allocation1] sm:$0xff]  ;;  %v6498_v60 = vadd.f32 0.5, %v6466_v10  ;;  %v5578_v10 = vmul.f32 %v10550_v5, %v5545_v42 }
 0x765   : > { %6863 = vst [vmem:[#allocation1] ss:$9 sm:$0xff] %v6496_v31  ;;  %7092 = vperm.xlu1 %8108, %v11418_v55   ;;  %v5865_v55 = vmul.f32 %v11392_v28, %v10592_v40  ;;  %v6059_v28 = vmul.f32 %v10624_v7, %v6026_v27 }
 0x766   : > { %6864 = vst [vmem:[#allocation1 + $0x1] ss:$9 sm:$0xff] %v6614_v13  ;;  %v11480_v13 = vld [vmem:[#allocation4 + $0x16a] sm:$0xff]  ;;  %v6629_v58 = vrot.slane %v6498_v60, 2  ;;  %v6631_v19 = vrot.slane %v6498_v60, 4  ;;  %v6632_v52 = vrot.slane %v6498_v60, 5 }
 0x767   : > { %6865 = vst [vmem:[#allocation1 + $0x2] ss:$9 sm:$0xff] %v6615_v2  ;;  %v5897_v31 = vadd.f32 %v5865_v55, %v5800_v11  ;;  %v5480_v2 = vmul.f32 %v11385_v9, %v10545_v0  ;;  %v6253_v9 = vmul.f32 %v11453_v22, %v11480_v13  ;;  %v6634_v46 = vrot.slane %v6498_v60, 7 }
 0x768   : > { %6866 = vst [vmem:[#allocation1 + $0x3] ss:$9 sm:$0xff] %v6616_v43  ;;  %v5868_v11 = vmul.f32 %v10592_v40, %v11371_v54  ;;  %v5676_v55 = vmul.f32 %v11448_v23, %v10560_v29 }
 0x769   : > { %6867 = vst [vmem:[#allocation1 + $0x4] ss:$9 sm:$0xff] %v6617_v53  ;;  %v5994_v47 = vadd.f32 %v5962_v48, %v5897_v31  ;;  %v6156_v53 = vmul.f32 %v10612_v37, %v11296_v15  ;;  %v5771_v15 = vmul.f32 %v11438_v21, %v10573_v8  ;;  %v5739_v31 = vld [vmem:[#allocation4 + $0x180] sm:$0xff]  ;;  %v5610_v48 = vadd.f32 %v5578_v10, %v5481_v51 }
 0x76a   : > { %6868 = vst [vmem:[#allocation1 + $0x5] ss:$9 sm:$0xff] %v6618_v24  ;;  %v6628_v24 = vrot.slane %v6498_v60, 1  ;;  %v6061_v27 = vmul.f32 %v10624_v7, %v5739_v31 }
 0x76b   : > { %6869 = vst [vmem:[#allocation1 + $0x6] ss:$9 sm:$0xff] %v6619_v33  ;;  %v6091_v43 = vadd.f32 %v6059_v28, %v5994_v47  ;;  %v5609_v33 = vadd.f32 %v5577_v6, %v5480_v2  ;;  %v6126_v6 = vld [vmem:[#allocation4 + $0x189] sm:$0xff] }
 0x76c   : > { %6870 = vst [vmem:[#allocation1 + $0x7] ss:$9 sm:$0xff] %v6620_v3  ;;  %v6630_v3 = vrot.slane %v6498_v60, 3 }
 0x76d   : > { %v6188_v17 = vadd.f32 %v6156_v53, %v6091_v43  ;;  %v5706_v18 = vadd.f32 %v5674_v57, %v5609_v33  ;;  %v5772_v43 = vmul.f32 %v10573_v8, %v5739_v31 }
 0x76e   : > { %7095 = vperm.xlu0 %8107, %v11444_v56   ;;  %v8139_v56 = vpop.eup %8138 }
 0x76f   : > { %v6285_v4 = vadd.f32 %v6253_v9, %v6188_v17  ;;  %v5803_v32 = vadd.f32 %v5771_v15, %v5706_v18  ;;  %v6159_v15 = vmul.f32 %v10612_v37, %v6126_v6 }
 0x771   : > { %v6369_v49 = vsel %vm5299_vm6, %v6285_v4, 0.0 }
 0x773   : > { %v11471_v25 = vld [vmem:[#allocation1] sm:$0xff] }
 0x774   : > { %6872 = vst [vmem:[#allocation1] ss:$9 sm:$0xff] %v6497_v34  ;;  %v6633_v34 = vrot.slane %v6498_v60, 6 }
 0x775   : > { %6873 = vst [vmem:[#allocation1 + $0x1] ss:$9 sm:$0xff] %v6621_v16  ;;  %v5899_v16 = vadd.f32 %v5867_v35, %v5802_v39  ;;  %v6255_v39 = vmul.f32 %v11453_v22, %v5933_v61 }
 0x776   : > { %6874 = vst [vmem:[#allocation1 + $0x2] ss:$9 sm:$0xff] %v6622_v41  ;;  %6370 = vadd.xlane.f32.xlu2 %v6369_v49  ;;  %v5482_v41 = vmul.f32 %v11438_v21, %v10545_v0  ;;  %v6404_v21 = vadd.f32 %v11458_v20, %v6332_v1  ;;  %v6062_v0 = vmul.f32 %v10624_v7, %v6029_v14 }
 0x777   : > { %6875 = vst [vmem:[#allocation1 + $0x3] ss:$9 sm:$0xff] %v6623_v36  ;;  %v5579_v36 = vmul.f32 %v10550_v5, %v5546_v26  ;;  %v5675_v5 = vmul.f32 %v11480_v13, %v10560_v29 }
 0x778   : > { %6876 = vst [vmem:[#allocation1 + $0x4] ss:$9 sm:$0xff] %v6624_v38  ;;  %v6467_v38 = vmul.f32 0.5, %v8139_v56  ;;  %8140 = vtanh.f32 %v6404_v21 }
 0x779   : > { %6877 = vst [vmem:[#allocation1 + $0x5] ss:$9 sm:$0xff] %v6625_v12  ;;  %v5965_v12 = vmul.f32 %v11448_v23, %v10601_v50  ;;  %v5611_v45 = vadd.f32 %v5579_v36, %v5482_v41  ;;  %v5773_v23 = vmul.f32 %v6029_v14, %v10573_v8  ;;  %v6223_v8 = vld [vmem:[#allocation4 + $0x18a] sm:$0xff]  ;;  %v6335_v41 = vpop.xlane.xlu2 %6334 }
 0x77a   : > { %6878 = vst [vmem:[#allocation1 + $0x6] ss:$9 sm:$0xff] %v6626_v63  ;;  %v5964_v63 = vmul.f32 %v11480_v13, %v10601_v50  ;;  %v6499_v62 = vadd.f32 0.5, %v6467_v38  ;;  %v6256_v18 = vmul.f32 %v11453_v22, %v6223_v8  ;;  %v5967_v56 = vmul.f32 %v6223_v8, %v10601_v50 }
 0x77b   : > { %6879 = vst [vmem:[#allocation1 + $0x7] ss:$9 sm:$0xff] %v6627_v59  ;;  %v5900_v59 = vadd.f32 %v5868_v11, %v5803_v32  ;;  %v5708_v2 = vadd.f32 %v5676_v55, %v5611_v45  ;;  %v6128_v11 = vld [vmem:[#allocation4 + $0x1a1] sm:$0xff]  ;;  %v6405_v21 = vadd.f32 %v11458_v20, %v6335_v41 }
 0x77c   : > { %v5996_v54 = vadd.f32 %v5964_v63, %v5899_v16  ;;  %v6635_v9 = vrot.slane %v6499_v62, 1  ;;  %v6636_v33 = vrot.slane %v6499_v62, 2  ;;  %v6637_v4 = vrot.slane %v6499_v62, 3  ;;  %v6225_v55 = vld [vmem:[#allocation4 + $0x1a2] sm:$0xff] }
 0x77d   : > { %v5997_v47 = vadd.f32 %v5965_v12, %v5900_v59  ;;  %v6638_v29 = vrot.slane %v6499_v62, 4  ;;  %v6639_v35 = vrot.slane %v6499_v62, 5  ;;  %v6640_v32 = vrot.slane %v6499_v62, 6  ;;  %v6030_v59 = vld [vmem:[#allocation4 + $0x198] sm:$0xff] }
 0x77e   : > { %v6093_v28 = vadd.f32 %v6061_v27, %v5996_v54  ;;  %v8141_v49 = vpop.eup %8140  ;;  %v6641_v30 = vrot.slane %v6499_v62, 7  ;;  %v6161_v10 = vmul.f32 %v10612_v37, %v6128_v11  ;;  %v6258_v27 = vmul.f32 %v11453_v22, %v6225_v55 }
 0x77f   : > { %v6094_v53 = vadd.f32 %v6062_v0, %v5997_v47  ;;  %v6468_v51 = vmul.f32 0.5, %v8141_v49  ;;  %v6063_v45 = vmul.f32 %v10624_v7, %v6030_v59  ;;  %8142 = vtanh.f32 %v6405_v21 }
 0x781   : > { %v6500_v0 = vadd.f32 0.5, %v6468_v51 }
 0x782   : > { %v11491_v44 = vld [vmem:[#allocation1] sm:$0xff] }
 0x783   : > { %6881 = vst [vmem:[#allocation1] ss:$9 sm:$0xff] %v6498_v60  ;;  %v5836_v60 = vld [vmem:[#allocation4 + $0x181] sm:$0xff]  ;;  %v6643_v47 = vrot.slane %v6500_v0, 2 }
 0x784   : > { %6882 = vst [vmem:[#allocation1 + $0x1] ss:$9 sm:$0xff] %v6628_v24  ;;  %v6158_v57 = vmul.f32 %v10612_v37, %v5836_v60  ;;  %v5805_v24 = vadd.f32 %v5773_v23, %v5708_v2  ;;  %v6642_v23 = vrot.slane %v6500_v0, 1  ;;  %v6644_v2 = vrot.slane %v6500_v0, 3 }
 0x785   : > { %6883 = vst [vmem:[#allocation1 + $0x2] ss:$9 sm:$0xff] %v6629_v58  ;;  %v5707_v58 = vadd.f32 %v5675_v5, %v5610_v48 }
 0x786   : > { %6884 = vst [vmem:[#allocation1 + $0x3] ss:$9 sm:$0xff] %v6630_v3  ;;  %v6190_v42 = vadd.f32 %v6158_v57, %v6093_v28  ;;  %v5870_v3 = vmul.f32 %v6126_v6, %v10592_v40  ;;  %v6224_v6 = vld [vmem:[#allocation4 + $0x19a] sm:$0xff]  ;;  %v6647_v57 = vrot.slane %v6500_v0, 6 }
 0x787   : > { %6885 = vst [vmem:[#allocation1 + $0x4] ss:$9 sm:$0xff] %v6631_v19  ;;  %v5804_v13 = vadd.f32 %v5772_v43, %v5707_v58  ;;  %v6191_v19 = vadd.f32 %v6159_v15, %v6094_v53  ;;  %v6645_v43 = vrot.slane %v6500_v0, 4  ;;  %v6338_v58 = vpop.xlane.xlu0 %6337 }
 0x788   : > { %6886 = vst [vmem:[#allocation1 + $0x5] ss:$9 sm:$0xff] %v6632_v52  ;;  %v5902_v26 = vadd.f32 %v5870_v3, %v5805_v24  ;;  %v6031_v52 = vld [vmem:[#allocation4 + $0x1a0] sm:$0xff]  ;;  %v6287_v1 = vadd.f32 %v6255_v39, %v6190_v42  ;;  %v6257_v24 = vmul.f32 %v11453_v22, %v6224_v6  ;;  %v6406_v15 = vadd.f32 %v11458_v20, %v6338_v58 }
 0x789   : > { %6887 = vst [vmem:[#allocation1 + $0x6] ss:$9 sm:$0xff] %v6633_v34  ;;  %v5869_v34 = vmul.f32 %v10592_v40, %v5836_v60  ;;  %v6064_v38 = vmul.f32 %v10624_v7, %v6031_v52  ;;  %v5966_v40 = vmul.f32 %v10601_v50, %v5933_v61  ;;  %v8143_v7 = vpop.eup %8142  ;;  %v6646_v61 = vrot.slane %v6500_v0, 5 }
 0x78a   : > { %6888 = vst [vmem:[#allocation1 + $0x7] ss:$9 sm:$0xff] %v6634_v46  ;;  %v6288_v46 = vadd.f32 %v6256_v18, %v6191_v19  ;;  %v5999_v16 = vadd.f32 %v5967_v56, %v5902_v26  ;;  %v6375_v14 = vsel %vm5299_vm6, %v6287_v1, 0.0  ;;  %8144 = vtanh.f32 %v6406_v15  ;;  %v6341_v56 = vpop.xlane.xlu1 %6340 }
 0x78b   : > { %v5901_v36 = vadd.f32 %v5869_v34, %v5804_v13  ;;  %v6407_v49 = vadd.f32 %v11458_v20, %v6341_v56 }
 0x78c   : > { %v6378_v12 = vsel %vm5299_vm6, %v6288_v46, 0.0  ;;  %v6096_v63 = vadd.f32 %v6064_v38, %v5999_v16  ;;  %v6344_v38 = vpop.xlane.xlu2 %6343 }
 0x78d   : > { %6379 = vadd.xlane.f32.xlu2 %v6378_v12  ;;  %v5998_v31 = vadd.f32 %v5966_v40, %v5901_v36  ;;  %8146 = vtanh.f32 %v6407_v49  ;;  %v6408_v11 = vadd.f32 %v11458_v20, %v6344_v38 }
 0x78e   : > { %v6193_v54 = vadd.f32 %v6161_v10, %v6096_v63 }
 0x78f   : > { %6376 = vadd.xlane.f32.xlu1 %v6375_v14  ;;  %v6095_v48 = vadd.f32 %v6063_v45, %v5998_v31  ;;  %8148 = vtanh.f32 %v6408_v11  ;;  %v6347_v55 = vpop.xlane.xlu0 %6346  ;;  %v7166_v45 = vlaneseq }
 0x790   : > { %v6290_v50 = vadd.f32 %v6258_v27, %v6193_v54  ;;  %v8145_v39 = vpop.eup %8144  ;;  %v6409_v54 = vadd.f32 %v11458_v20, %v6347_v55 }
 0x791   : > { %v11522_v17 = vld [vmem:[#allocation1] sm:$0xff]  ;;  %v6470_v52 = vmul.f32 0.5, %v8145_v39 }
 0x792   : > { %6890 = vst [vmem:[#allocation1] ss:$9 sm:$0xff] %v6499_v62  ;;  %v6127_v62 = vld [vmem:[#allocation4 + $0x199] sm:$0xff]  ;;  %v6384_v5 = vsel %vm5299_vm6, %v6290_v50, 0.0  ;;  %v6350_v27 = vpop.xlane.xlu1 %6349  ;;  %8150 = vtanh.f32 %v6409_v54 }
 0x793   : > { %6891 = vst [vmem:[#allocation1 + $0x1] ss:$9 sm:$0xff] %v6635_v9  ;;  %v6160_v28 = vmul.f32 %v10612_v37, %v6127_v62  ;;  %v6648_v9 = vrot.slane %v6500_v0, 7  ;;  %v6469_v37 = vmul.f32 0.5, %v8143_v7  ;;  %v8147_v16 = vpop.eup %8146 }
 0x794   : > { %6892 = vst [vmem:[#allocation1 + $0x2] ss:$9 sm:$0xff] %v6636_v33 }
 0x795   : > { %6893 = vst [vmem:[#allocation1 + $0x3] ss:$9 sm:$0xff] %v6637_v4  ;;  %v6192_v53 = vadd.f32 %v6160_v28, %v6095_v48  ;;  %v6501_v42 = vadd.f32 0.5, %v6469_v37  ;;  %v8149_v59 = vpop.eup %8148  ;;  %v11552_v48 = vand.u32 127, %v7166_v45  ;;  %v7072_v28 = vpop.permute.xlu2 %7071 }
 0x796   : > { %6894 = vst [vmem:[#allocation1 + $0x4] ss:$9 sm:$0xff] %v6638_v29 }
 0x797   : > { %6895 = vst [vmem:[#allocation1 + $0x5] ss:$9 sm:$0xff] %v6639_v35  ;;  %6385 = vadd.xlane.f32.xlu1 %v6384_v5  ;;  %v6289_v33 = vadd.f32 %v6257_v24, %v6192_v53  ;;  %v6649_v29 = vrot.slane %v6501_v42, 1  ;;  %v6650_v8 = vrot.slane %v6501_v42, 2  ;;  %v6651_v13 = vrot.slane %v6501_v42, 3  ;;  %v11549_v62 = vpop.xlane.xlu0 %6355 }
 0x798   : > { %6896 = vst [vmem:[#allocation1 + $0x6] ss:$9 sm:$0xff] %v6640_v32  ;;  %v6652_v22 = vrot.slane %v6501_v42, 4  ;;  %v6653_v19 = vrot.slane %v6501_v42, 5  ;;  %v6654_v18 = vrot.slane %v6501_v42, 6  ;;  %v6655_v26 = vrot.slane %v6501_v42, 7 }
 0x799   : > { %6897 = vst [vmem:[#allocation1 + $0x7] ss:$9 sm:$0xff] %v6641_v30  ;;  %v6381_v3 = vsel %vm5299_vm6, %v6289_v33, 0.0  ;;  %v6502_v35 = vadd.f32 0.5, %v6470_v52  ;;  %v7168_v24 = vperm.slane %v7072_v28, %v11552_v48  ;;  %v11570_v38 = vadd.s32 4294967272, %v11552_v48 }
 0x79a   : > { %6382 = vadd.xlane.f32.xlu0 %v6381_v3  ;;  %v7078_v5 = vpop.permute.xlu1 %7077  ;;  %v6412_v55 = vadd.f32 %v11458_v20, %v11549_v62  ;;  %vm7223_vm6 = vcmask 982912  }
 0x79b   : > { %v6656_v34 = vrot.slane %v6502_v35, 1  ;;  %v6657_v32 = vrot.slane %v6502_v35, 2  ;;  %v6658_v46 = vrot.slane %v6502_v35, 3  ;;  %v6659_v1 = vrot.slane %v6502_v35, 4 }
 0x79c   : > { %v6660_v30 = vrot.slane %v6502_v35, 5  ;;  %v6661_v41 = vrot.slane %v6502_v35, 6  ;;  %v6662_v36 = vrot.slane %v6502_v35, 7 }
 0x79d   : > { %v6353_v39 = vpop.xlane.xlu2 %6352 }
 0x79f   : > { %v7075_v7 = vpop.permute.xlu0 %7074 }
 0x7a0   : > { %v6898_v60 = vld [vmem:[#allocation1] sm:$0xff] }
 0x7a1   : > { %6899 = vst [vmem:[#allocation1] ss:$9 sm:$0xff] %v6500_v0  ;;  %v6472_v0 = vmul.f32 0.5, %v8149_v59 }
 0x7a2   : > { %6900 = vst [vmem:[#allocation1 + $0x1] ss:$9 sm:$0xff] %v6642_v23 }
 0x7a3   : > { %6901 = vst [vmem:[#allocation1 + $0x2] ss:$9 sm:$0xff] %v6643_v47  ;;  %v6504_v50 = vadd.f32 0.5, %v6472_v0 }
 0x7a4   : > { %6902 = vst [vmem:[#allocation1 + $0x3] ss:$9 sm:$0xff] %v6644_v2  ;;  %v11555_v2 = vadd.s32 4294967280, %v11552_v48 }
 0x7a5   : > { %6903 = vst [vmem:[#allocation1 + $0x4] ss:$9 sm:$0xff] %v6645_v43  ;;  %7098 = vperm.xlu2 %8106, %v11471_v25   ;;  %v6670_v23 = vrot.slane %v6504_v50, 1  ;;  %v6671_v47 = vrot.slane %v6504_v50, 2  ;;  %v6672_v6 = vrot.slane %v6504_v50, 3  ;;  %v11558_v43 = vadd.s32 4294967288, %v11552_v48 }
 0x7a6   : > { %6904 = vst [vmem:[#allocation1 + $0x5] ss:$9 sm:$0xff] %v6646_v61  ;;  %v6673_v53 = vrot.slane %v6504_v50, 4  ;;  %v8151_v61 = vpop.eup %8150  ;;  %v6675_v58 = vrot.slane %v6504_v50, 6  ;;  %v7174_v37 = vperm.slane %v7078_v5, %v11555_v2  ;;  %v6676_v33 = vrot.slane %v6504_v50, 7 }
 0x7a7   : > { %6905 = vst [vmem:[#allocation1 + $0x6] ss:$9 sm:$0xff] %v6647_v57  ;;  %v6674_v57 = vrot.slane %v6504_v50, 5 }
 0x7a8   : > { %6906 = vst [vmem:[#allocation1 + $0x7] ss:$9 sm:$0xff] %v6648_v9  ;;  %v7170_v9 = vperm.slane %v7075_v7, %v11558_v43  ;;  %v6359_v62 = vpop.xlane.xlu1 %6358 }
 0x7a9   : > { %v6413_v5 = vadd.f32 %v11458_v20, %v6359_v62 }
 0x7aa   : > { %v7172_v15 = vsel %vm7171_vm8, %v7170_v9, %v7168_v24 }
 0x7ab   : > { %v7176_v3 = vsel %vm7175_vm9, %v7174_v37, %v7172_v15 }
 0x7ad   : > { %7107 = vperm.xlu2 %8106, %v6898_v60  }
 0x7ae   : > { %7104 = vperm.xlu0 %8107, %v11522_v17  }
 0x7af   : > { %v6907_v4 = vld [vmem:[#allocation1] sm:$0xff] }
 0x7b0   : > { %6908 = vst [vmem:[#allocation1] ss:$9 sm:$0xff] %v6501_v42  ;;  %7101 = vperm.xlu1 %8108, %v11491_v44   ;;  %v6471_v44 = vmul.f32 0.5, %v8147_v16  ;;  %v6473_v42 = vmul.f32 0.5, %v8151_v61 }
 0x7b1   : > { %6909 = vst [vmem:[#allocation1 + $0x1] ss:$9 sm:$0xff] %v6649_v29 }
 0x7b2   : > { %6910 = vst [vmem:[#allocation1 + $0x2] ss:$9 sm:$0xff] %v6650_v8  ;;  %v6503_v51 = vadd.f32 0.5, %v6471_v44  ;;  %v6505_v29 = vadd.f32 0.5, %v6473_v42 }
 0x7b3   : > { %6911 = vst [vmem:[#allocation1 + $0x3] ss:$9 sm:$0xff] %v6651_v13 }
 0x7b4   : > { %6912 = vst [vmem:[#allocation1 + $0x4] ss:$9 sm:$0xff] %v6652_v22  ;;  %v6663_v12 = vrot.slane %v6503_v51, 1  ;;  %v6664_v40 = vrot.slane %v6503_v51, 2  ;;  %v6665_v63 = vrot.slane %v6503_v51, 3  ;;  %v6666_v21 = vrot.slane %v6503_v51, 4 }
 0x7b5   : > { %6913 = vst [vmem:[#allocation1 + $0x5] ss:$9 sm:$0xff] %v6653_v19  ;;  %v6667_v14 = vrot.slane %v6503_v51, 5  ;;  %v6668_v10 = vrot.slane %v6503_v51, 6  ;;  %v6669_v31 = vrot.slane %v6503_v51, 7  ;;  %v6677_v13 = vrot.slane %v6505_v29, 1 }
 0x7b6   : > { %6914 = vst [vmem:[#allocation1 + $0x6] ss:$9 sm:$0xff] %v6654_v18  ;;  %v6678_v22 = vrot.slane %v6505_v29, 2  ;;  %v6679_v19 = vrot.slane %v6505_v29, 3  ;;  %v6680_v18 = vrot.slane %v6505_v29, 4  ;;  %v6681_v56 = vrot.slane %v6505_v29, 5 }
 0x7b7   : > { %6915 = vst [vmem:[#allocation1 + $0x7] ss:$9 sm:$0xff] %v6655_v26  ;;  %v6682_v52 = vrot.slane %v6505_v29, 6  ;;  %v6683_v49 = vrot.slane %v6505_v29, 7 }
 0x7b8   : > { %7110 = vperm.xlu1 %8108, %v6907_v4   ;;  %v6410_v4 = vadd.f32 %v11458_v20, %v6350_v27 }
 0x7ba   : > { %8152 = vtanh.f32 %v6410_v4 }
 0x7be   : > { %v6916_v25 = vld [vmem:[#allocation1] sm:$0xff] }
 0x7bf   : > { %6917 = vst [vmem:[#allocation1] ss:$9 sm:$0xff] %v6502_v35  ;;  %7113 = vperm.xlu0 %8107, %v6916_v25   ;;  %v6411_v25 = vadd.f32 %v11458_v20, %v6353_v39 }
 0x7c0   : > { %6918 = vst [vmem:[#allocation1 + $0x1] ss:$9 sm:$0xff] %v6656_v34  ;;  %v8153_v26 = vpop.eup %8152 }
 0x7c1   : > { %6919 = vst [vmem:[#allocation1 + $0x2] ss:$9 sm:$0xff] %v6657_v32  ;;  %v6474_v35 = vmul.f32 0.5, %v8153_v26  ;;  %8154 = vtanh.f32 %v6411_v25  ;;  %v11567_v32 = vpop.xlane.xlu2 %6361  ;;  %v6365_v26 = vpop.xlane.xlu0 %6364 }
 0x7c2   : > { %6920 = vst [vmem:[#allocation1 + $0x3] ss:$9 sm:$0xff] %v6658_v46  ;;  %8156 = vtanh.f32 %v6412_v55  ;;  %v6414_v4 = vadd.f32 %v11458_v20, %v11567_v32 }
 0x7c3   : > { %6921 = vst [vmem:[#allocation1 + $0x4] ss:$9 sm:$0xff] %v6659_v1  ;;  %v6506_v34 = vadd.f32 0.5, %v6474_v35  ;;  %8158 = vtanh.f32 %v6413_v5  ;;  %v6368_v35 = vpop.xlane.xlu1 %6367 }
 0x7c4   : > { %6922 = vst [vmem:[#allocation1 + $0x5] ss:$9 sm:$0xff] %v6660_v30  ;;  %8160 = vtanh.f32 %v6414_v4 }
 0x7c5   : > { %6923 = vst [vmem:[#allocation1 + $0x6] ss:$9 sm:$0xff] %v6661_v41  ;;  %v6684_v1 = vrot.slane %v6506_v34, 1  ;;  %v6685_v16 = vrot.slane %v6506_v34, 2  ;;  %v6686_v41 = vrot.slane %v6506_v34, 3  ;;  %v6688_v44 = vrot.slane %v6506_v34, 5 }
 0x7c6   : > { %6924 = vst [vmem:[#allocation1 + $0x7] ss:$9 sm:$0xff] %v6662_v36  ;;  %v6687_v36 = vrot.slane %v6506_v34, 4 }
 0x7c7   : > { %v8155_v30 = vpop.eup %8154 }
 0x7c9   : > { %v7081_v11 = vpop.permute.xlu2 %7080 }
 0x7cd   : > { %v6925_v17 = vld [vmem:[#allocation1] sm:$0xff] }
 0x7ce   : > { %6926 = vst [vmem:[#allocation1] ss:$9 sm:$0xff] %v6503_v51  ;;  %7116 = vperm.xlu2 %8106, %v6925_v17   ;;  %v6689_v51 = vrot.slane %v6506_v34, 6  ;;  %v6475_v17 = vmul.f32 0.5, %v8155_v30 }
 0x7cf   : > { %6927 = vst [vmem:[#allocation1 + $0x1] ss:$9 sm:$0xff] %v6663_v12  ;;  %v7178_v12 = vperm.slane %v7081_v11, %v11570_v38  ;;  %v7087_v30 = vpop.permute.xlu1 %7086 }
 0x7d0   : > { %6928 = vst [vmem:[#allocation1 + $0x2] ss:$9 sm:$0xff] %v6664_v40  ;;  %v6690_v40 = vrot.slane %v6506_v34, 7 }
 0x7d1   : > { %6929 = vst [vmem:[#allocation1 + $0x3] ss:$9 sm:$0xff] %v6665_v63  ;;  %v7180_v63 = vsel %vm7179_vm10, %v7178_v12, %v7176_v3 }
 0x7d2   : > { %6930 = vst [vmem:[#allocation1 + $0x4] ss:$9 sm:$0xff] %v6666_v21  ;;  %v6507_v21 = vadd.f32 0.5, %v6475_v17 }
 0x7d3   : > { %6931 = vst [vmem:[#allocation1 + $0x5] ss:$9 sm:$0xff] %v6667_v14 }
 0x7d4   : > { %6932 = vst [vmem:[#allocation1 + $0x6] ss:$9 sm:$0xff] %v6668_v10  ;;  %v6691_v59 = vrot.slane %v6507_v21, 1  ;;  %v6692_v14 = vrot.slane %v6507_v21, 2  ;;  %v6694_v0 = vrot.slane %v6507_v21, 4  ;;  %v6695_v54 = vrot.slane %v6507_v21, 5 }
 0x7d5   : > { %6933 = vst [vmem:[#allocation1 + $0x7] ss:$9 sm:$0xff] %v6669_v31  ;;  %v6693_v31 = vrot.slane %v6507_v21, 3  ;;  %v6696_v27 = vrot.slane %v6507_v21, 6 }
 0x7dc   : > { %v6934_v60 = vld [vmem:[#allocation1] sm:$0xff] }
 0x7dd   : > { %6935 = vst [vmem:[#allocation1] ss:$9 sm:$0xff] %v6504_v50  ;;  %7119 = vperm.xlu1 %8108, %v6934_v60   ;;  %v11577_v50 = vadd.s32 4294967264, %v11552_v48  ;;  %v8157_v60 = vpop.eup %8156 }
 0x7de   : > { %6936 = vst [vmem:[#allocation1 + $0x1] ss:$9 sm:$0xff] %v6670_v23  ;;  %v6697_v23 = vrot.slane %v6507_v21, 7  ;;  %v8159_v9 = vpop.eup %8158 }
 0x7df   : > { %6937 = vst [vmem:[#allocation1 + $0x2] ss:$9 sm:$0xff] %v6671_v47  ;;  %v7084_v47 = vpop.permute.xlu2 %7083  ;;  %v6477_v42 = vmul.f32 0.5, %v8159_v9 }
 0x7e0   : > { %6938 = vst [vmem:[#allocation1 + $0x3] ss:$9 sm:$0xff] %v6672_v6  ;;  %v7182_v28 = vperm.slane %v7084_v47, %v11577_v50  ;;  %v6476_v6 = vmul.f32 0.5, %v8157_v60  ;;  %v6416_v47 = vadd.f32 %v11458_v20, %v6368_v35 }
 0x7e1   : > { %6939 = vst [vmem:[#allocation1 + $0x4] ss:$9 sm:$0xff] %v6673_v53 }
 0x7e2   : > { %6940 = vst [vmem:[#allocation1 + $0x5] ss:$9 sm:$0xff] %v6674_v57  ;;  %v11582_v53 = vsel %vm7183_vm11, %v7182_v28, %v7180_v63  ;;  %v6508_v7 = vadd.f32 0.5, %v6476_v6 }
 0x7e3   : > { %6941 = vst [vmem:[#allocation1 + $0x6] ss:$9 sm:$0xff] %v6675_v58 }
 0x7e4   : > { %6942 = vst [vmem:[#allocation1 + $0x7] ss:$9 sm:$0xff] %v6676_v33  ;;  %v6698_v61 = vrot.slane %v6508_v7, 1  ;;  %v6699_v24 = vrot.slane %v6508_v7, 2  ;;  %v6700_v58 = vrot.slane %v6508_v7, 3  ;;  %v6701_v37 = vrot.slane %v6508_v7, 4 }
 0x7e5   : > { %v6702_v33 = vrot.slane %v6508_v7, 5  ;;  %v6703_v15 = vrot.slane %v6508_v7, 6  ;;  %v6704_v3 = vrot.slane %v6508_v7, 7 }
 0x7eb   : > { %v6943_v8 = vld [vmem:[#allocation1] sm:$0xff] }
 0x7ec   : > { %6944 = vst [vmem:[#allocation1] ss:$9 sm:$0xff] %v6505_v29  ;;  %7122 = vperm.xlu0 %8107, %v6943_v8   ;;  %v6509_v29 = vadd.f32 0.5, %v6477_v42 }
 0x7ed   : > { %6945 = vst [vmem:[#allocation1 + $0x1] ss:$9 sm:$0xff] %v6677_v13 }
 0x7ee   : > { %6946 = vst [vmem:[#allocation1 + $0x2] ss:$9 sm:$0xff] %v6678_v22  ;;  %v6705_v8 = vrot.slane %v6509_v29, 1  ;;  %v6706_v13 = vrot.slane %v6509_v29, 2  ;;  %v6707_v39 = vrot.slane %v6509_v29, 3 }
 0x7ef   : > { %6947 = vst [vmem:[#allocation1 + $0x3] ss:$9 sm:$0xff] %v6679_v19  ;;  %v6708_v19 = vrot.slane %v6509_v29, 4 }
 0x7f0   : > { %6948 = vst [vmem:[#allocation1 + $0x4] ss:$9 sm:$0xff] %v6680_v18  ;;  %v6709_v18 = vrot.slane %v6509_v29, 5 }
 0x7f1   : > { %6949 = vst [vmem:[#allocation1 + $0x5] ss:$9 sm:$0xff] %v6681_v56  ;;  %v6710_v56 = vrot.slane %v6509_v29, 6 }
 0x7f2   : > { %6950 = vst [vmem:[#allocation1 + $0x6] ss:$9 sm:$0xff] %v6682_v52  ;;  %v8161_v52 = vpop.eup %8160 }
 0x7f3   : > { %6951 = vst [vmem:[#allocation1 + $0x7] ss:$9 sm:$0xff] %v6683_v49  ;;  %v6711_v49 = vrot.slane %v6509_v29, 7  ;;  %v6478_v25 = vmul.f32 0.5, %v8161_v52 }
 0x7f5   : > { %v6510_v32 = vadd.f32 0.5, %v6478_v25 }
 0x7f7   : > { %v6713_v11 = vrot.slane %v6510_v32, 2  ;;  %v6714_v17 = vrot.slane %v6510_v32, 3 }
 0x7fa   : > { %v6952_v46 = vld [vmem:[#allocation1] sm:$0xff] }
 0x7fb   : > { %6953 = vst [vmem:[#allocation1] ss:$9 sm:$0xff] %v6506_v34  ;;  %7125 = vperm.xlu2 %8106, %v6952_v46   ;;  %v6415_v34 = vadd.f32 %v11458_v20, %v6365_v26  ;;  %v11587_v46 = vpop.xlane.xlu0 %6373 }
 0x7fc   : > { %6954 = vst [vmem:[#allocation1 + $0x1] ss:$9 sm:$0xff] %v6684_v1  ;;  %v11590_v1 = vadd.s32 4294967256, %v11552_v48 }
 0x7fd   : > { %6955 = vst [vmem:[#allocation1 + $0x2] ss:$9 sm:$0xff] %v6685_v16  ;;  %8162 = vtanh.f32 %v6415_v34  ;;  %v11593_v16 = vadd.s32 4294967248, %v11552_v48 }
 0x7fe   : > { %6956 = vst [vmem:[#allocation1 + $0x3] ss:$9 sm:$0xff] %v6686_v41  ;;  %v7090_v41 = vpop.permute.xlu2 %7089  ;;  %8164 = vtanh.f32 %v6416_v47 }
 0x7ff   : > { %6957 = vst [vmem:[#allocation1 + $0x4] ss:$9 sm:$0xff] %v6687_v36  ;;  %v6712_v36 = vrot.slane %v6510_v32, 1  ;;  %v7190_v12 = vperm.slane %v7090_v41, %v11593_v16 }
 0x800   : > { %6958 = vst [vmem:[#allocation1 + $0x5] ss:$9 sm:$0xff] %v6688_v44 }
 0x801   : > { %6959 = vst [vmem:[#allocation1 + $0x6] ss:$9 sm:$0xff] %v6689_v51  ;;  %v7186_v51 = vperm.slane %v7087_v30, %v11590_v1 }
 0x802   : > { %6960 = vst [vmem:[#allocation1 + $0x7] ss:$9 sm:$0xff] %v6690_v40  ;;  %v6715_v40 = vrot.slane %v6510_v32, 4 }
 0x803   : > { %v7188_v63 = vsel %vm7187_vm12, %v7186_v51, %v11582_v53  ;;  %v8163_v55 = vpop.eup %8162 }
 0x804   : > { %v6479_v60 = vmul.f32 0.5, %v8163_v55  ;;  %v8165_v9 = vpop.eup %8164 }
 0x805   : > { %v6480_v42 = vmul.f32 0.5, %v8165_v9 }
 0x806   : > { %v6511_v5 = vadd.f32 0.5, %v6479_v60 }
 0x807   : > { %v6512_v4 = vadd.f32 0.5, %v6480_v42 }
 0x809   : > { %v6961_v10 = vld [vmem:[#allocation1] sm:$0xff]  ;;  %v6731_v26 = vrot.slane %v6512_v4, 6  ;;  %v6732_v52 = vrot.slane %v6512_v4, 7 }
 0x80a   : > { %6962 = vst [vmem:[#allocation1] ss:$9 sm:$0xff] %v6507_v21  ;;  %7128 = vperm.xlu1 %8108, %v6961_v10   ;;  %v6716_v21 = vrot.slane %v6510_v32, 5  ;;  %v6717_v10 = vrot.slane %v6510_v32, 6 }
 0x80b   : > { %6963 = vst [vmem:[#allocation1 + $0x1] ss:$9 sm:$0xff] %v6691_v59  ;;  %v11600_v59 = vadd.s32 4294967232, %v11552_v48 }
 0x80c   : > { %6964 = vst [vmem:[#allocation1 + $0x2] ss:$9 sm:$0xff] %v6692_v14  ;;  %v7192_v14 = vsel %vm7191_vm13, %v7190_v12, %v7188_v63 }
 0x80d   : > { %6965 = vst [vmem:[#allocation1 + $0x3] ss:$9 sm:$0xff] %v6693_v31  ;;  %v7096_v31 = vpop.permute.xlu0 %7095 }
 0x80e   : > { %6966 = vst [vmem:[#allocation1 + $0x4] ss:$9 sm:$0xff] %v6694_v0  ;;  %v11604_v0 = vadd.s32 4294967240, %v11552_v48  ;;  %v7198_v62 = vperm.slane %v7096_v31, %v11600_v59 }
 0x80f   : > { %6967 = vst [vmem:[#allocation1 + $0x5] ss:$9 sm:$0xff] %v6695_v54  ;;  %v6718_v54 = vrot.slane %v6510_v32, 7 }
 0x810   : > { %6968 = vst [vmem:[#allocation1 + $0x6] ss:$9 sm:$0xff] %v6696_v27  ;;  %v7093_v27 = vpop.permute.xlu1 %7092 }
 0x811   : > { %6969 = vst [vmem:[#allocation1 + $0x7] ss:$9 sm:$0xff] %v6697_v23  ;;  %v7194_v23 = vperm.slane %v7093_v27, %v11604_v0 }
 0x813   : > { %v7196_v28 = vsel %vm7195_vm14, %v7194_v23, %v7192_v14 }
 0x814   : > { %v11611_v6 = vsel %vm7199_vm15, %v7198_v62, %v7196_v28 }
 0x818   : > { %v6970_v57 = vld [vmem:[#allocation1] sm:$0xff] }
 0x819   : > { %6971 = vst [vmem:[#allocation1] ss:$9 sm:$0xff] %v6508_v7  ;;  %7131 = vperm.xlu0 %8107, %v6970_v57   ;;  %v6719_v7 = vrot.slane %v6511_v5, 1  ;;  %v6721_v57 = vrot.slane %v6511_v5, 3 }
 0x81a   : > { %6972 = vst [vmem:[#allocation1 + $0x1] ss:$9 sm:$0xff] %v6698_v61  ;;  %v6720_v61 = vrot.slane %v6511_v5, 2 }
 0x81b   : > { %6973 = vst [vmem:[#allocation1 + $0x2] ss:$9 sm:$0xff] %v6699_v24  ;;  %v6722_v24 = vrot.slane %v6511_v5, 4 }
 0x81c   : > { %6974 = vst [vmem:[#allocation1 + $0x3] ss:$9 sm:$0xff] %v6700_v58  ;;  %v6723_v58 = vrot.slane %v6511_v5, 5 }
 0x81d   : > { %6975 = vst [vmem:[#allocation1 + $0x4] ss:$9 sm:$0xff] %v6701_v37  ;;  %v6371_v37 = vpop.xlane.xlu2 %6370 }
 0x81e   : > { %6976 = vst [vmem:[#allocation1 + $0x5] ss:$9 sm:$0xff] %v6702_v33  ;;  %v6724_v33 = vrot.slane %v6511_v5, 6 }
 0x81f   : > { %6977 = vst [vmem:[#allocation1 + $0x6] ss:$9 sm:$0xff] %v6703_v15  ;;  %v6725_v15 = vrot.slane %v6511_v5, 7 }
 0x820   : > { %6978 = vst [vmem:[#allocation1 + $0x7] ss:$9 sm:$0xff] %v6704_v3  ;;  %v6417_v3 = vadd.f32 %v11458_v20, %v6371_v37  ;;  %v11614_v20 = vld [vmem:[#allocation5] ss:$0 sm:$0xff]  ;;  %v6383_v37 = vpop.xlane.xlu0 %6382 }
 0x821   : > { %v6421_v42 = vadd.f32 %v11614_v20, %v6383_v37 }
 0x822   : > { %8166 = vtanh.f32 %v6417_v3 }
 0x825   : > { %v6380_v23 = vpop.xlane.xlu2 %6379 }
 0x826   : > { %v6420_v47 = vadd.f32 %v11614_v20, %v6380_v23 }
 0x827   : > { %v6979_v22 = vld [vmem:[#allocation1] sm:$0xff] }
 0x828   : > { %6980 = vst [vmem:[#allocation1] ss:$9 sm:$0xff] %v6509_v29  ;;  %7134 = vperm.xlu2 %8106, %v6979_v22   ;;  %v6726_v29 = vrot.slane %v6512_v4, 1  ;;  %v8167_v22 = vpop.eup %8166 }
 0x829   : > { %6981 = vst [vmem:[#allocation1 + $0x1] ss:$9 sm:$0xff] %v6705_v8 }
 0x82a   : > { %6982 = vst [vmem:[#allocation1 + $0x2] ss:$9 sm:$0xff] %v6706_v13  ;;  %v6727_v13 = vrot.slane %v6512_v4, 2 }
 0x82b   : > { %6983 = vst [vmem:[#allocation1 + $0x3] ss:$9 sm:$0xff] %v6707_v39  ;;  %v6728_v39 = vrot.slane %v6512_v4, 3 }
 0x82c   : > { %6984 = vst [vmem:[#allocation1 + $0x4] ss:$9 sm:$0xff] %v6708_v19  ;;  %v6729_v19 = vrot.slane %v6512_v4, 4 }
 0x82d   : > { %6985 = vst [vmem:[#allocation1 + $0x5] ss:$9 sm:$0xff] %v6709_v18  ;;  %v6730_v18 = vrot.slane %v6512_v4, 5 }
 0x82e   : > { %6986 = vst [vmem:[#allocation1 + $0x6] ss:$9 sm:$0xff] %v6710_v56  ;;  %v6481_v56 = vmul.f32 0.5, %v8167_v22 }
 0x82f   : > { %6987 = vst [vmem:[#allocation1 + $0x7] ss:$9 sm:$0xff] %v6711_v49  ;;  %v6418_v49 = vadd.f32 %v11614_v20, %v11587_v46 }
 0x830   : > { %v6513_v35 = vadd.f32 0.5, %v6481_v56 }
 0x831   : > { %8168 = vtanh.f32 %v6418_v49 }
 0x832   : > { %v6733_v25 = vrot.slane %v6513_v35, 1  ;;  %v6734_v34 = vrot.slane %v6513_v35, 2  ;;  %v6735_v30 = vrot.slane %v6513_v35, 3  ;;  %v6736_v41 = vrot.slane %v6513_v35, 4 }
 0x833   : > { %v6739_v51 = vrot.slane %v6513_v35, 7 }
 0x836   : > { %v6988_v44 = vld [vmem:[#allocation1] sm:$0xff] }
 0x837   : > { %6989 = vst [vmem:[#allocation1] ss:$9 sm:$0xff] %v6510_v32  ;;  %7137 = vperm.xlu1 %8108, %v6988_v44   ;;  %v6738_v44 = vrot.slane %v6513_v35, 6 }
 0x838   : > { %6990 = vst [vmem:[#allocation1 + $0x1] ss:$9 sm:$0xff] %v6712_v36  ;;  %v6737_v36 = vrot.slane %v6513_v35, 5 }
 0x839   : > { %6991 = vst [vmem:[#allocation1 + $0x2] ss:$9 sm:$0xff] %v6713_v11  ;;  %v8169_v11 = vpop.eup %8168 }
 0x83a   : > { %6992 = vst [vmem:[#allocation1 + $0x3] ss:$9 sm:$0xff] %v6714_v17  ;;  %v6377_v17 = vpop.xlane.xlu1 %6376  ;;  %v6482_v46 = vmul.f32 0.5, %v8169_v11 }
 0x83b   : > { %6993 = vst [vmem:[#allocation1 + $0x4] ss:$9 sm:$0xff] %v6715_v40  ;;  %v6419_v12 = vadd.f32 %v11614_v20, %v6377_v17 }
 0x83c   : > { %6994 = vst [vmem:[#allocation1 + $0x5] ss:$9 sm:$0xff] %v6716_v21  ;;  %v6514_v40 = vadd.f32 0.5, %v6482_v46 }
 0x83d   : > { %6995 = vst [vmem:[#allocation1 + $0x6] ss:$9 sm:$0xff] %v6717_v10  ;;  %8170 = vtanh.f32 %v6419_v12 }
 0x83e   : > { %6996 = vst [vmem:[#allocation1 + $0x7] ss:$9 sm:$0xff] %v6718_v54  ;;  %v6740_v63 = vrot.slane %v6514_v40, 1  ;;  %v6741_v21 = vrot.slane %v6514_v40, 2  ;;  %v6742_v14 = vrot.slane %v6514_v40, 3  ;;  %v6743_v10 = vrot.slane %v6514_v40, 4 }
 0x83f   : > { %v6744_v54 = vrot.slane %v6514_v40, 5  ;;  %v6745_v27 = vrot.slane %v6514_v40, 6  ;;  %v6746_v60 = vrot.slane %v6514_v40, 7  ;;  %8172 = vtanh.f32 %v6420_v47 }
 0x840   : > { %8174 = vtanh.f32 %v6421_v42 }
 0x842   : > { %v6386_v56 = vpop.xlane.xlu1 %6385 }
 0x843   : > { %v8171_v31 = vpop.eup %8170  ;;  %v6422_v49 = vadd.f32 %v11614_v20, %v6386_v56 }
 0x844   : > { %v6483_v62 = vmul.f32 0.5, %v8171_v31 }
 0x845   : > { %v6997_v53 = vld [vmem:[#allocation1] sm:$0xff]  ;;  %8176 = vtanh.f32 %v6422_v49 }
 0x846   : > { %6998 = vst [vmem:[#allocation1] ss:$9 sm:$0xff] %v6511_v5  ;;  %7140 = vperm.xlu0 %8107, %v6997_v53   ;;  %v6515_v28 = vadd.f32 0.5, %v6483_v62 }
 0x847   : > { %6999 = vst [vmem:[#allocation1 + $0x1] ss:$9 sm:$0xff] %v6719_v7 }
 0x848   : > { %7000 = vst [vmem:[#allocation1 + $0x2] ss:$9 sm:$0xff] %v6720_v61  ;;  %v6747_v5 = vrot.slane %v6515_v28, 1  ;;  %v6748_v7 = vrot.slane %v6515_v28, 2  ;;  %v6749_v61 = vrot.slane %v6515_v28, 3  ;;  %v6751_v9 = vrot.slane %v6515_v28, 5 }
 0x849   : > { %7001 = vst [vmem:[#allocation1 + $0x3] ss:$9 sm:$0xff] %v6721_v57  ;;  %v6750_v57 = vrot.slane %v6515_v28, 4 }
 0x84a   : > { %7002 = vst [vmem:[#allocation1 + $0x4] ss:$9 sm:$0xff] %v6722_v24  ;;  %v8173_v24 = vpop.eup %8172 }
 0x84b   : > { %7003 = vst [vmem:[#allocation1 + $0x5] ss:$9 sm:$0xff] %v6723_v58  ;;  %v6752_v58 = vrot.slane %v6515_v28, 6 }
 0x84c   : > { %7004 = vst [vmem:[#allocation1 + $0x6] ss:$9 sm:$0xff] %v6724_v33  ;;  %v6753_v33 = vrot.slane %v6515_v28, 7 }
 0x84d   : > { %7005 = vst [vmem:[#allocation1 + $0x7] ss:$9 sm:$0xff] %v6725_v15  ;;  %v6484_v15 = vmul.f32 0.5, %v8173_v24 }
 0x84f   : > { %v6516_v3 = vadd.f32 0.5, %v6484_v15 }
 0x851   : > { %v6757_v22 = vrot.slane %v6516_v3, 4 }
 0x854   : > { %v7006_v8 = vld [vmem:[#allocation1] sm:$0xff] }
 0x855   : > { %7007 = vst [vmem:[#allocation1] ss:$9 sm:$0xff] %v6512_v4  ;;  %7143 = vperm.xlu2 %8106, %v7006_v8   ;;  %v6754_v4 = vrot.slane %v6516_v3, 1  ;;  %v6755_v8 = vrot.slane %v6516_v3, 2 }
 0x856   : > { %7008 = vst [vmem:[#allocation1 + $0x1] ss:$9 sm:$0xff] %v6726_v29 }
 0x857   : > { %7009 = vst [vmem:[#allocation1 + $0x2] ss:$9 sm:$0xff] %v6727_v13  ;;  %v6756_v13 = vrot.slane %v6516_v3, 3 }
 0x858   : > { %7010 = vst [vmem:[#allocation1 + $0x3] ss:$9 sm:$0xff] %v6728_v39  ;;  %v8175_v39 = vpop.eup %8174 }
 0x859   : > { %7011 = vst [vmem:[#allocation1 + $0x4] ss:$9 sm:$0xff] %v6729_v19  ;;  %v6758_v19 = vrot.slane %v6516_v3, 5 }
 0x85a   : > { %7012 = vst [vmem:[#allocation1 + $0x5] ss:$9 sm:$0xff] %v6730_v18  ;;  %v6759_v18 = vrot.slane %v6516_v3, 6 }
 0x85b   : > { %7013 = vst [vmem:[#allocation1 + $0x6] ss:$9 sm:$0xff] %v6731_v26  ;;  %v6760_v26 = vrot.slane %v6516_v3, 7 }
 0x85c   : > { %7014 = vst [vmem:[#allocation1 + $0x7] ss:$9 sm:$0xff] %v6732_v52  ;;  %v6485_v52 = vmul.f32 0.5, %v8175_v39 }
 0x863   : > { %v7015_v32 = vld [vmem:[#allocation1] sm:$0xff] }
 0x864   : > { %7146 = vperm.xlu1 %8108, %v7015_v32   ;;  %7016 = vst [vmem:[#allocation1] ss:$9 sm:$0xff] %v6513_v35  ;;  %v6517_v35 = vadd.f32 0.5, %v6485_v52 }
 0x865   : > { %7017 = vst [vmem:[#allocation1 + $0x1] ss:$9 sm:$0xff] %v6733_v25 }
 0x866   : > { %7018 = vst [vmem:[#allocation1 + $0x2] ss:$9 sm:$0xff] %v6734_v34  ;;  %v6761_v25 = vrot.slane %v6517_v35, 1  ;;  %v6762_v32 = vrot.slane %v6517_v35, 2  ;;  %v6766_v11 = vrot.slane %v6517_v35, 6 }
 0x867   : > { %7019 = vst [vmem:[#allocation1 + $0x3] ss:$9 sm:$0xff] %v6735_v30  ;;  %v6763_v30 = vrot.slane %v6517_v35, 3 }
 0x868   : > { %7020 = vst [vmem:[#allocation1 + $0x4] ss:$9 sm:$0xff] %v6736_v41  ;;  %v6764_v41 = vrot.slane %v6517_v35, 4 }
 0x869   : > { %7021 = vst [vmem:[#allocation1 + $0x5] ss:$9 sm:$0xff] %v6737_v36  ;;  %v8177_v36 = vpop.eup %8176 }
 0x86a   : > { %7022 = vst [vmem:[#allocation1 + $0x6] ss:$9 sm:$0xff] %v6738_v44  ;;  %v6765_v44 = vrot.slane %v6517_v35, 5  ;;  %v6486_v17 = vmul.f32 0.5, %v8177_v36  ;;  %v7217_v36 = vadd.s32 4294967192, %v11552_v48 }
 0x86b   : > { %7023 = vst [vmem:[#allocation1 + $0x7] ss:$9 sm:$0xff] %v6739_v51  ;;  %v6767_v51 = vrot.slane %v6517_v35, 7 }
 0x86c   : > { %v6518_v20 = vadd.f32 0.5, %v6486_v17 }
 0x86e   : > { %v6768_v46 = vrot.slane %v6518_v20, 1 }
 0x872   : > { %v7024_v55 = vld [vmem:[#allocation1] sm:$0xff] }
 0x873   : > { %7149 = vperm.xlu0 %8107, %v7024_v55   ;;  %7025 = vst [vmem:[#allocation1] ss:$9 sm:$0xff] %v6514_v40  ;;  %v6769_v40 = vrot.slane %v6518_v20, 2  ;;  %v6771_v55 = vrot.slane %v6518_v20, 4 }
 0x874   : > { %7026 = vst [vmem:[#allocation1 + $0x1] ss:$9 sm:$0xff] %v6740_v63  ;;  %v6770_v63 = vrot.slane %v6518_v20, 3 }
 0x875   : > { %7027 = vst [vmem:[#allocation1 + $0x2] ss:$9 sm:$0xff] %v6741_v21  ;;  %v6772_v21 = vrot.slane %v6518_v20, 5 }
 0x876   : > { %7028 = vst [vmem:[#allocation1 + $0x3] ss:$9 sm:$0xff] %v6742_v14  ;;  %v6773_v14 = vrot.slane %v6518_v20, 6 }
 0x877   : > { %7029 = vst [vmem:[#allocation1 + $0x4] ss:$9 sm:$0xff] %v6743_v10  ;;  %v6774_v10 = vrot.slane %v6518_v20, 7 }
 0x878   : > { %7030 = vst [vmem:[#allocation1 + $0x5] ss:$9 sm:$0xff] %v6744_v54  ;;  %v7099_v54 = vpop.permute.xlu2 %7098 }
 0x879   : > { %7031 = vst [vmem:[#allocation1 + $0x6] ss:$9 sm:$0xff] %v6745_v27  ;;  %v7102_v27 = vpop.permute.xlu1 %7101 }
 0x87a   : > { %7032 = vst [vmem:[#allocation1 + $0x7] ss:$9 sm:$0xff] %v6746_v60  ;;  %v7105_v60 = vpop.permute.xlu0 %7104 }
 0x880   : > { %v11622_v23 = vpop.permute.xlu2 %7107 }
 0x881   : > { %v7033_v53 = vld [vmem:[#allocation1] sm:$0xff]  ;;  %v11624_v62 = vpop.permute.xlu1 %7110 }
 0x882   : > { %7152 = vperm.xlu2 %8106, %v7033_v53   ;;  %7034 = vst [vmem:[#allocation1] ss:$9 sm:$0xff] %v6515_v28  ;;  %v11626_v47 = vpop.permute.xlu0 %7113 }
 0x883   : > { %7035 = vst [vmem:[#allocation1 + $0x1] ss:$9 sm:$0xff] %v6747_v5 }
 0x884   : > { %7036 = vst [vmem:[#allocation1 + $0x2] ss:$9 sm:$0xff] %v6748_v7 }
 0x885   : > { %7037 = vst [vmem:[#allocation1 + $0x3] ss:$9 sm:$0xff] %v6749_v61 }
 0x886   : > { %7038 = vst [vmem:[#allocation1 + $0x4] ss:$9 sm:$0xff] %v6750_v57 }
 0x887   : > { %7039 = vst [vmem:[#allocation1 + $0x5] ss:$9 sm:$0xff] %v6751_v9 }
 0x888   : > { %7040 = vst [vmem:[#allocation1 + $0x6] ss:$9 sm:$0xff] %v6752_v58  ;;  %v11628_v28 = vpop.permute.xlu2 %7116 }
 0x889   : > { %7041 = vst [vmem:[#allocation1 + $0x7] ss:$9 sm:$0xff] %v6753_v33  ;;  %v7120_v5 = vpop.permute.xlu1 %7119 }
 0x88a   : > { %v7123_v53 = vpop.permute.xlu0 %7122  ;;  %v7229_v24 = vperm.slane %v7120_v5, %v11552_v48 }
 0x88b   : > { %v7230_v9 = vperm.slane %v7123_v53, %v11558_v43 }
 0x88d   : > { %v7231_v37 = vsel %vm7171_vm8, %v7230_v9, %v7229_v24  ;;  %vm7265_vm8 = vcmp.lt.s32.totalorder %v7166_v45, 256 }
 0x890   : > { %v7042_v29 = vld [vmem:[#allocation1] sm:$0xff]  ;;  %v7126_v7 = vpop.permute.xlu2 %7125 }
 0x891   : > { %7155 = vperm.xlu1 %8108, %v7042_v29   ;;  %7043 = vst [vmem:[#allocation1] ss:$9 sm:$0xff] %v6516_v3  ;;  %v7129_v61 = vpop.permute.xlu1 %7128  ;;  %v7232_v42 = vperm.slane %v7126_v7, %v11555_v2 }
 0x892   : > { %7044 = vst [vmem:[#allocation1 + $0x1] ss:$9 sm:$0xff] %v6754_v4  ;;  %v7132_v57 = vpop.permute.xlu0 %7131  ;;  %v7234_v33 = vperm.slane %v7129_v61, %v11570_v38 }
 0x893   : > { %7045 = vst [vmem:[#allocation1 + $0x2] ss:$9 sm:$0xff] %v6755_v8  ;;  %v7233_v4 = vsel %vm7175_vm9, %v7232_v42, %v7231_v37  ;;  %v7236_v8 = vperm.slane %v7132_v57, %v11577_v50 }
 0x894   : > { %7046 = vst [vmem:[#allocation1 + $0x3] ss:$9 sm:$0xff] %v6756_v13  ;;  %v7235_v29 = vsel %vm7179_vm10, %v7234_v33, %v7233_v4 }
 0x895   : > { %7047 = vst [vmem:[#allocation1 + $0x4] ss:$9 sm:$0xff] %v6757_v22  ;;  %v7201_v22 = vadd.s32 4294967224, %v11552_v48  ;;  %v7237_v43 = vsel %vm7183_vm11, %v7236_v8, %v7235_v29 }
 0x896   : > { %7048 = vst [vmem:[#allocation1 + $0x5] ss:$9 sm:$0xff] %v6758_v19  ;;  %v7205_v19 = vadd.s32 4294967216, %v11552_v48 }
 0x897   : > { %7049 = vst [vmem:[#allocation1 + $0x6] ss:$9 sm:$0xff] %v6759_v18  ;;  %v7202_v56 = vperm.slane %v7099_v54, %v7201_v22 }
 0x898   : > { %7050 = vst [vmem:[#allocation1 + $0x7] ss:$9 sm:$0xff] %v6760_v26  ;;  %v7135_v58 = vpop.permute.xlu2 %7134  ;;  %v7206_v50 = vperm.slane %v7102_v27, %v7205_v19  ;;  %v7225_v27 = vadd.s32 4294967176, %v11552_v48 }
 0x899   : > { %v7238_v38 = vperm.slane %v7135_v58, %v11590_v1  ;;  %v7204_v1 = vsel %vm7203_vm1, %v7202_v56, %v11611_v6 }
 0x89a   : > { %v7226_v24 = vperm.slane %v11628_v28, %v7225_v27 }
 0x89b   : > { %v7239_v26 = vsel %vm7187_vm12, %v7238_v38, %v7237_v43 }
 0x89f   : > { %v7051_v34 = vld [vmem:[#allocation1] sm:$0xff] }
 0x8a0   : > { %7158 = vperm.xlu0 %8107, %v7051_v34   ;;  %7052 = vst [vmem:[#allocation1] ss:$9 sm:$0xff] %v6517_v35  ;;  %v7209_v35 = vadd.s32 4294967208, %v11552_v48 }
 0x8a1   : > { %7053 = vst [vmem:[#allocation1 + $0x1] ss:$9 sm:$0xff] %v6761_v25 }
 0x8a2   : > { %7054 = vst [vmem:[#allocation1 + $0x2] ss:$9 sm:$0xff] %v6762_v32 }
 0x8a3   : > { %7055 = vst [vmem:[#allocation1 + $0x3] ss:$9 sm:$0xff] %v6763_v30 }
 0x8a4   : > { %7056 = vst [vmem:[#allocation1 + $0x4] ss:$9 sm:$0xff] %v6764_v41  ;;  %v7208_v41 = vsel %vm7207_vm2, %v7206_v50, %v7204_v1 }
 0x8a5   : > { %7057 = vst [vmem:[#allocation1 + $0x5] ss:$9 sm:$0xff] %v6765_v44 }
 0x8a6   : > { %7058 = vst [vmem:[#allocation1 + $0x6] ss:$9 sm:$0xff] %v6766_v11  ;;  %v7210_v11 = vperm.slane %v7105_v60, %v7209_v35 }
 0x8a7   : > { %7059 = vst [vmem:[#allocation1 + $0x7] ss:$9 sm:$0xff] %v6767_v51 }
 0x8a9   : > { %v7138_v15 = vpop.permute.xlu1 %7137 }
 0x8aa   : > { %v7240_v39 = vperm.slane %v7138_v15, %v11593_v16 }
 0x8ac   : > { %v7241_v52 = vsel %vm7191_vm13, %v7240_v39, %v7239_v26 }
 0x8ae   : > { %v7060_v12 = vld [vmem:[#allocation1] sm:$0xff] }
 0x8af   : > { %7161 = vperm.xlu2 %8106, %v7060_v12   ;;  %7061 = vst [vmem:[#allocation1] ss:$9 sm:$0xff] %v6518_v20  ;;  %v7144_v13 = vpop.permute.xlu2 %7143  ;;  %v7218_v12 = vperm.slane %v11624_v62, %v7217_v36 }
 0x8b0   : > { %7062 = vst [vmem:[#allocation1 + $0x1] ss:$9 sm:$0xff] %v6768_v46  ;;  %v7244_v32 = vperm.slane %v7144_v13, %v11600_v59  ;;  %v7212_v46 = vsel %vm7211_vm3, %v7210_v11, %v7208_v41 }
 0x8b1   : > { %7063 = vst [vmem:[#allocation1 + $0x2] ss:$9 sm:$0xff] %v6769_v40 }
 0x8b2   : > { %7064 = vst [vmem:[#allocation1 + $0x3] ss:$9 sm:$0xff] %v6770_v63 }
 0x8b3   : > { %7065 = vst [vmem:[#allocation1 + $0x4] ss:$9 sm:$0xff] %v6771_v55 }
 0x8b4   : > { %7066 = vst [vmem:[#allocation1 + $0x5] ss:$9 sm:$0xff] %v6772_v21  ;;  %v7221_v21 = vadd.s32 4294967184, %v11552_v48 }
 0x8b5   : > { %7067 = vst [vmem:[#allocation1 + $0x6] ss:$9 sm:$0xff] %v6773_v14 }
 0x8b6   : > { %7068 = vst [vmem:[#allocation1 + $0x7] ss:$9 sm:$0xff] %v6774_v10  ;;  %v7222_v62 = vperm.slane %v11626_v47, %v7221_v21 }
 0x8b8   : > { %v7141_v3 = vpop.permute.xlu0 %7140 }
 0x8b9   : > { %v7242_v49 = vperm.slane %v7141_v3, %v11604_v0  ;;  %v7213_v0 = vadd.s32 4294967200, %v11552_v48 }
 0x8bb   : > { %v7243_v16 = vsel %vm7195_vm14, %v7242_v49, %v7241_v52  ;;  %v7214_v55 = vperm.slane %v11622_v23, %v7213_v0 }
 0x8bc   : > { %v7245_v51 = vsel %vm7199_vm15, %v7244_v32, %v7243_v16 }
 0x8bd   : > { %v7069_v31 = vld [vmem:[#allocation1] sm:$0xff] }
 0x8be   : > { %7164 = vperm.xlu1 %8108, %v7069_v31   ;;  %v7216_v31 = vsel %vm7215_vm4, %v7214_v55, %v7212_v46 }
 0x8bf   : > { %v7220_v60 = vsel %vm7219_vm5, %v7218_v12, %v7216_v31 }
 0x8c0   : > { %v7224_v23 = vsel %vm7223_vm6, %v7222_v62, %v7220_v60 }
 0x8c1   : > { %v7228_v58 = vsel %vm7227_vm7, %v7226_v24, %v7224_v23 }
 0x8d6   : > { %v7147_v18 = vpop.permute.xlu1 %7146 }
 0x8d7   : > { %v7246_v25 = vperm.slane %v7147_v18, %v7201_v22 }
 0x8d9   : > { %v7247_v20 = vsel %vm7203_vm1, %v7246_v25, %v7245_v51 }
 0x8dc   : > { %v7153_v34 = vpop.permute.xlu2 %7152 }
 0x8dd   : > { %v7250_v40 = vperm.slane %v7153_v34, %v7209_v35 }
 0x8e5   : > { %v7150_v2 = vpop.permute.xlu0 %7149 }
 0x8e6   : > { %v7248_v30 = vperm.slane %v7150_v2, %v7205_v19 }
 0x8e8   : > { %v7249_v6 = vsel %vm7207_vm2, %v7248_v30, %v7247_v20 }
 0x8e9   : > { %v7251_v10 = vsel %vm7211_vm3, %v7250_v40, %v7249_v6 }
 0x903   : > { %v7156_v44 = vpop.permute.xlu1 %7155 }
 0x904   : > { %v7252_v59 = vperm.slane %v7156_v44, %v7213_v0 }
 0x906   : > { %v7253_v54 = vsel %vm7215_vm4, %v7252_v59, %v7251_v10 }
 0x909   : > { %v7162_v14 = vpop.permute.xlu2 %7161 }
 0x90a   : > { %v7256_v53 = vperm.slane %v7162_v14, %v7221_v21 }
 0x912   : > { %v7159_v17 = vpop.permute.xlu0 %7158 }
 0x913   : > { %v7254_v63 = vperm.slane %v7159_v17, %v7217_v36 }
 0x915   : > { %v7255_v5 = vsel %vm7219_vm5, %v7254_v63, %v7253_v54 }
 0x916   : > { %v7257_v57 = vsel %vm7223_vm6, %v7256_v53, %v7255_v5 }
 0x930   : > { %v7165_v7 = vpop.permute.xlu1 %7164 }
 0x931   : > { %v7258_v61 = vperm.slane %v7165_v7, %v7225_v27 }
 0x933   : > { %v7259_v9 = vsel %vm7227_vm7, %v7258_v61, %v7257_v57 }
 0x934   : > { %v7260_v48 = vrot.slane %v7259_v9, 7 }
 0x936   : > { %v7261_v47 = vsel %vm511_vm0, %v7228_v58, %v7260_v48 }
 0x937   : > { %7267 = vst.msk [vmem:[%s332_s26] sm:$0x3] %vm7265_vm8, %v7261_v47 }
 0x938 PF: > { %s21_s11 = sadd.s32 1, %s8188_s11  }
 0x939   : > { %p18_p4 = scmp.ge.s32.totalorder %s21_s11, 4  }
 0x93b   :  { %20 = sbr.rel (!%p18_p4) target bundleno = 3 (0x3), region = 121 }

</bundles_post_ra>
